<compile_context>
chip_gen: v5e
topology: v5e:2x2
jax: 0.10.0
libtpu: 0.0.40
codegen_flags: <defaults>
</compile_context>

<pallas_src>
import functools

import jax
import jax.numpy as jnp
from jax.experimental import pallas as pl
from jax.experimental.pallas import tpu as pltpu


def _round_up(x, m):
    return ((x + m - 1) // m) * m


def _vmem_limit_bytes():
    """Generation-aware VMEM limit: ~3/4 of the chip's VMEM, fallback 48 MiB."""
    cap = None
    try:
        info = pltpu.get_tpu_info()
        for name in ("vmem_capacity_bytes", "vmem_bytes", "vmem_size_bytes"):
            cap = getattr(info, name, None)
            if cap:
                break
    except Exception:
        cap = None
    if not cap or cap <= 0:
        cap = 64 * 1024 * 1024          # conservative: v7x per-TensorCore VMEM
    return int(cap) * 3 // 4            # leave headroom for compiler scratch


def _pick_tt(t, b_tile, h_pad, d, num_layers, budget_bytes, tt_target):
    """Largest tt <= tt_target whose tt-scaling scratch fits in ~half the budget."""
    tt = max(1, min(tt_target, t))

    def scaling_bytes(n):
        gbuf = n * b_tile * 4 * h_pad * 4                       # f32 gates
        hbuf = (n * b_tile * h_pad * 2) if num_layers > 1 else 0  # bf16 inter-layer
        xbuf = 2 * n * b_tile * d * 2                           # double-buffered x
        return gbuf + hbuf + xbuf

    while tt > 1 and scaling_bytes(tt) > budget_bytes // 2:
        tt = max(1, tt // 2)
    return tt


def _pad_gate_cols(w, h, h_pad):
    """w: (rows, 4*h) in PyTorch gate order [i,f,g,o] -> (rows, 4*h_pad).

    Each gate keeps its own lane-aligned H_pad slot (zero padded), so in-kernel
    gate slices [k*H_pad:(k+1)*H_pad] never cross a 128-lane boundary.
    """
    r = w.shape[0]
    w4 = w.reshape(r, 4, h)
    w4 = jnp.pad(w4, ((0, 0), (0, 0), (0, h_pad - h)))
    return w4.reshape(r, 4 * h_pad)


# ---------------------------------------------------------------------------
# Fused kernel: all layers + head.
# grid = (n_btiles [parallel], n_time_blocks [arbitrary/sequential]).
# ---------------------------------------------------------------------------
def _fused_lstm_kernel(*refs, num_layers, tt, b_tile, h_pad, t_real,
                       needs_mask, unroll):
    if num_layers > 1:
        (x_ref, wih0_ref, wihr_ref, whh_ref, b_ref, wlin_ref, blin_ref,
         out_ref, h_sc, c_sc, hbuf, gbuf) = refs
    else:
        (x_ref, wih0_ref, whh_ref, b_ref, wlin_ref, blin_ref,
         out_ref, h_sc, c_sc, gbuf) = refs
        wihr_ref = None
        hbuf = None

    ti = pl.program_id(1)

    @pl.when(ti == 0)
    def _init():
        h_sc[...] = jnp.zeros_like(h_sc)
        c_sc[...] = jnp.zeros_like(c_sc)

    # Hoisted once per block (independent of layer / step-local work).
    base_t = ti * tt

    for layer in range(num_layers):
        # ---- block input projection: one big MXU matmul per block, bias
        # ---- folded in here (not in the serial recurrence).
        if layer == 0:
            xin = x_ref[...].reshape(tt * b_tile, x_ref.shape[-1])     # bf16
            w_in = wih0_ref[...]
        else:
            xin = hbuf[...].reshape(tt * b_tile, h_pad)                # bf16
            w_in = wihr_ref[layer - 1]
        gbuf[...] = (
            jnp.dot(xin, w_in, preferred_element_type=jnp.float32)
            + b_ref[layer]
        ).reshape(tt, b_tile, 4 * h_pad)

        is_inner = layer < num_layers - 1

        # ---- serial recurrence over the tt steps of this block.
        def step(s, carry):
            h, c = carry
            gh = jnp.dot(h.astype(jnp.bfloat16), whh_ref[layer],
                         preferred_element_type=jnp.float32)
            g = gbuf[s] + gh                                   # (b_tile, 4*H_pad)
            i_g = jax.nn.sigmoid(g[:, 0 * h_pad:1 * h_pad])
            f_g = jax.nn.sigmoid(g[:, 1 * h_pad:2 * h_pad])
            g_g = jnp.tanh(g[:, 2 * h_pad:3 * h_pad])
            o_g = jax.nn.sigmoid(g[:, 3 * h_pad:4 * h_pad])
            c_new = f_g * c + i_g * g_g
            h_new = o_g * jnp.tanh(c_new)
            if needs_mask:                                     # freeze padded steps
                valid = (base_t + s) < t_real
                c_new = jnp.where(valid, c_new, c)
                h_new = jnp.where(valid, h_new, h)
            if is_inner:                                       # feed next layer
                hbuf[s] = h_new.astype(jnp.bfloat16)
            return h_new, c_new

        h0 = h_sc[layer]
        c0 = c_sc[layer]
        if unroll >= tt:                       # small block: fully unrolled
            h, c = h0, c0
            for s in range(tt):
                h, c = step(s, (h, c))
        else:                                  # large block: bounded unroll
            h, c = jax.lax.fori_loop(0, tt, step, (h0, c0), unroll=unroll)
        h_sc[layer] = h
        c_sc[layer] = c

    # ---- fused head: sigmoid(h_last @ W_lin + b_lin), only on the last block.
    @pl.when(ti == pl.num_programs(1) - 1)
    def _head():
        logits = (
            jnp.dot(h_sc[num_layers - 1].astype(jnp.bfloat16), wlin_ref[...],
                    preferred_element_type=jnp.float32)
            + blin_ref[...]
        )
        out_ref[...] = jax.nn.sigmoid(logits).astype(out_ref.dtype)


# ---------------------------------------------------------------------------
# Parameter init (PyTorch layout) and packing into padded TPU layout.
# ---------------------------------------------------------------------------
def init_params(key, input_size, hidden_size, num_layers, output_size):
    """PyTorch-shaped params, uniform(-1/sqrt(H), 1/sqrt(H)) like nn.LSTM/Linear."""
    params = {"lstm": [], "linear": {}}
    k = 1.0 / float(hidden_size) ** 0.5
    for layer in range(num_layers):
        d_in = input_size if layer == 0 else hidden_size
        key, k1, k2, k3, k4 = jax.random.split(key, 5)
        params["lstm"].append({
            "w_ih": jax.random.uniform(k1, (4 * hidden_size, d_in), jnp.float32, -k, k),
            "w_hh": jax.random.uniform(k2, (4 * hidden_size, hidden_size), jnp.float32, -k, k),
            "b_ih": jax.random.uniform(k3, (4 * hidden_size,), jnp.float32, -k, k),
            "b_hh": jax.random.uniform(k4, (4 * hidden_size,), jnp.float32, -k, k),
        })
    key, k5, k6 = jax.random.split(key, 3)
    params["linear"]["w"] = jax.random.uniform(k5, (output_size, hidden_size), jnp.float32, -k, k)
    params["linear"]["b"] = jax.random.uniform(k6, (output_size,), jnp.float32, -k, k)
    return params


def _pack_params(params, hidden_size, num_layers, output_size, h_pad, o_pad):
    lstm = params["lstm"]
    # Layer 0 input projection: (D, 4*H_pad), bf16.
    wih0 = _pad_gate_cols(lstm[0]["w_ih"].T, hidden_size, h_pad).astype(jnp.bfloat16)
    # Layers >= 1 input projections (only if they exist -- no dummy operand).
    if num_layers > 1:
        wihr = jnp.stack([
            jnp.pad(_pad_gate_cols(lstm[l]["w_ih"].T, hidden_size, h_pad),
                    ((0, h_pad - hidden_size), (0, 0)))
            for l in range(1, num_layers)
        ]).astype(jnp.bfloat16)
    else:
        wihr = None
    whh = jnp.stack([
        jnp.pad(_pad_gate_cols(lstm[l]["w_hh"].T, hidden_size, h_pad),
                ((0, h_pad - hidden_size), (0, 0)))
        for l in range(num_layers)
    ]).astype(jnp.bfloat16)
    bias = jnp.stack([
        _pad_gate_cols((lstm[l]["b_ih"] + lstm[l]["b_hh"]).reshape(1, -1),
                       hidden_size, h_pad)
        for l in range(num_layers)
    ]).astype(jnp.float32)                                     # (L, 1, 4*H_pad)
    wlin = jnp.pad(params["linear"]["w"].T,
                   ((0, h_pad - hidden_size), (0, o_pad - output_size))
                   ).astype(jnp.bfloat16)                      # (H_pad, O_pad)
    blin = jnp.pad(params["linear"]["b"].reshape(1, -1),
                   ((0, 0), (0, o_pad - output_size))).astype(jnp.float32)
    return wih0, wihr, whh, bias, wlin, blin


# ---------------------------------------------------------------------------
# Forward: matches LSTM(input_size, hidden_size, num_layers, output_size).
# ---------------------------------------------------------------------------
def lstm_forward(params, x, hidden_size, num_layers, output_size, tt_target=32):
    B, T, D = x.shape
    h_pad = _round_up(hidden_size, 128)       # lane-aligned hidden dim
    o_pad = _round_up(output_size, 128)       # lane-dense head output
    b_pad = _round_up(B, 16)                  # bf16 packs 2 rows/sublane -> 16

    # Megacore: split the batch across 2 tiles (leading "parallel" grid axis)
    # when there is enough batch; harmless (single tile) otherwise.
    n_btiles = 2 if b_pad >= 32 else 1
    b_tile = b_pad // n_btiles

    vmem_budget = _vmem_limit_bytes()
    tt = _pick_tt(T, b_tile, h_pad, D, num_layers, vmem_budget, tt_target)
    t_pad = _round_up(T, tt)
    grid_t = t_pad // tt
    needs_mask = (t_pad != T)
    unroll = tt if tt <= 8 else 4

    wih0, wihr, whh, bias, wlin, blin = _pack_params(
        params, hidden_size, num_layers, output_size, h_pad, o_pad)

    # (B, T, D) -> time-major padded (t_pad, b_pad, D) bf16; transpose/pad/cast
    # fuse into one XLA op, the in-kernel flatten is free layout plumbing.
    x_tm = jnp.transpose(x, (1, 0, 2))
    x_tm = jnp.pad(x_tm, ((0, t_pad - T), (0, b_pad - B), (0, 0))).astype(jnp.bfloat16)

    kernel = functools.partial(
        _fused_lstm_kernel,
        num_layers=num_layers, tt=tt, b_tile=b_tile, h_pad=h_pad,
        t_real=T, needs_mask=needs_mask, unroll=unroll,
    )

    # Grid-invariant weights: whole-array resident in VMEM, single buffer
    # (no per-step DMA, no double-buffering).
    wspec = pl.BlockSpec(memory_space=pltpu.MemorySpace.VMEM)

    in_specs = [pl.BlockSpec((tt, b_tile, D), lambda bi, ti: (ti, bi, 0)),  # x block
                wspec]                                                       # W_ih layer 0
    operands = [x_tm, wih0]
    if num_layers > 1:
        in_specs.append(wspec)                                               # W_ih layers>=1
        operands.append(wihr)
    in_specs += [wspec, wspec, wspec, wspec]       # W_hh, biases, head W, head b
    operands += [whh, bias, wlin, blin]

    scratch = [
        pltpu.VMEM((num_layers, b_tile, h_pad), jnp.float32),   # h carry
        pltpu.VMEM((num_layers, b_tile, h_pad), jnp.float32),   # c carry
    ]
    if num_layers > 1:
        scratch.append(pltpu.VMEM((tt, b_tile, h_pad), jnp.bfloat16))  # inter-layer h
    scratch.append(pltpu.VMEM((tt, b_tile, 4 * h_pad), jnp.float32))   # block gates

    out = pl.pallas_call(
        kernel,
        out_shape=jax.ShapeDtypeStruct((b_pad, o_pad), jnp.float32),
        grid_spec=pltpu.PrefetchScalarGridSpec(
            num_scalar_prefetch=0,
            grid=(n_btiles, grid_t),
            in_specs=in_specs,
            out_specs=pl.BlockSpec((b_tile, o_pad), lambda bi, ti: (bi, 0)),
            scratch_shapes=scratch,
        ),
        compiler_params=pltpu.CompilerParams(
            # batch tiles independent (megacore), time axis is the recurrence.
            dimension_semantics=("parallel", "arbitrary"),
            vmem_limit_bytes=vmem_budget,
        ),
    )(*operands)

    return out[:B, :output_size]


# ---------------------------------------------------------------------------
# Pure-JAX reference (mirrors PyTorch nn.LSTM + Linear + sigmoid semantics).
# ---------------------------------------------------------------------------
def lstm_reference(params, x, hidden_size, num_layers):
    B, T, _ = x.shape
    seq = x.astype(jnp.float32)
    for l in range(num_layers):
        p = params["lstm"][l]
        h = jnp.zeros((B, hidden_size), jnp.float32)
        c = jnp.zeros((B, hidden_size), jnp.float32)
        outs = []
        for t in range(T):
            g = (seq[:, t, :] @ p["w_ih"].T + p["b_ih"]
                 + h @ p["w_hh"].T + p["b_hh"])
            i_g = jax.nn.sigmoid(g[:, 0 * hidden_size:1 * hidden_size])
            f_g = jax.nn.sigmoid(g[:, 1 * hidden_size:2 * hidden_size])
            g_g = jnp.tanh(g[:, 2 * hidden_size:3 * hidden_size])
            o_g = jax.nn.sigmoid(g[:, 3 * hidden_size:4 * hidden_size])
            c = f_g * c + i_g * g_g
            h = o_g * jnp.tanh(c)
            outs.append(h)
        seq = jnp.stack(outs, axis=1)
    logits = seq[:, -1, :] @ params["linear"]["w"].T + params["linear"]["b"]
    return jax.nn.sigmoid(logits)


def _check(key, input_size, hidden_size, num_layers, output_size,
           batch, seq_len, tt_target):
    kp, kx = jax.random.split(key)
    params = init_params(kp, input_size, hidden_size, num_layers, output_size)
    x = jax.random.normal(kx, (batch, seq_len, input_size), jnp.float32)
    out = lstm_forward(params, x, hidden_size, num_layers, output_size,
                       tt_target=tt_target)
    jax.block_until_ready(out)
    assert out.shape == (batch, output_size)
    ref = lstm_reference(params, x, hidden_size, num_layers)
    # Loose tolerance: kernel feeds the MXU bf16 (f32 accumulation/state).
    err = float(jnp.max(jnp.abs(out - ref)))
    assert err < 5e-2, f"max abs err {err}"
    return out


if __name__ == "__main__":
    key = jax.random.PRNGKey(0)
    k1, k2, k3 = jax.random.split(key, 3)

    # Primary small config (2 layers, single time block, fully unrolled path).
    out = _check(k1, input_size=16, hidden_size=32, num_layers=2,
                 output_size=4, batch=2, seq_len=8, tt_target=32)

    # Longer sequence -> fori_loop(unroll=4) inner-step path.
    _check(k2, input_size=16, hidden_size=32, num_layers=2,
           output_size=4, batch=2, seq_len=20, tt_target=32)

    # Single layer, multiple time blocks + padded-tail masking path.
    _check(k3, input_size=16, hidden_size=32, num_layers=1,
           output_size=4, batch=2, seq_len=20, tt_target=8)

    print("KERNEL_OK")
</pallas_src>

<mosaic_0001>
module attributes {stable_mosaic.version = 11 : i64} {
  func.func @_fused_lstm_kernel(%arg0: i32, %arg1: i32, %arg2: memref<8x16x16xbf16, #tpu.memory_space<vmem>>, %arg3: memref<16x512xbf16, #tpu.memory_space<vmem>>, %arg4: memref<1x128x512xbf16, #tpu.memory_space<vmem>>, %arg5: memref<2x128x512xbf16, #tpu.memory_space<vmem>>, %arg6: memref<2x1x512xf32, #tpu.memory_space<vmem>>, %arg7: memref<128x128xbf16, #tpu.memory_space<vmem>>, %arg8: memref<1x128xf32, #tpu.memory_space<vmem>>, %arg9: memref<16x128xf32, #tpu.memory_space<vmem>>, %arg10: memref<2x16x128xf32, #tpu.memory_space<vmem>>, %arg11: memref<2x16x128xf32, #tpu.memory_space<vmem>>, %arg12: memref<8x16x128xbf16, #tpu.memory_space<vmem>>, %arg13: memref<8x16x512xf32, #tpu.memory_space<vmem>>) attributes {dimension_semantics = [#tpu.dimension_semantics<parallel>, #tpu.dimension_semantics<arbitrary>], iteration_bounds = array<i64: 1, 1>, scalar_prefetch = 0 : i64, scratch_operands = 4 : i64, tpu.core_type = #tpu.core_type<tc>, window_params = [{transform_indices = @transform_0, window_bounds = array<i64: 8, 16, 16>}, {pipeline_mode = #tpu.pipeline_mode<synchronous>, transform_indices = @transform_1, window_bounds = array<i64: 16, 512>}, {pipeline_mode = #tpu.pipeline_mode<synchronous>, transform_indices = @transform_2, window_bounds = array<i64: 1, 128, 512>}, {pipeline_mode = #tpu.pipeline_mode<synchronous>, transform_indices = @transform_3, window_bounds = array<i64: 2, 128, 512>}, {pipeline_mode = #tpu.pipeline_mode<synchronous>, transform_indices = @transform_4, window_bounds = array<i64: 2, 1, 512>}, {pipeline_mode = #tpu.pipeline_mode<synchronous>, transform_indices = @transform_5, window_bounds = array<i64: 128, 128>}, {pipeline_mode = #tpu.pipeline_mode<synchronous>, transform_indices = @transform_6, window_bounds = array<i64: 1, 128>}, {transform_indices = @transform_7, window_bounds = array<i64: 16, 128>}]} {
    %c0_i32 = arith.constant 0 : i32
    %0 = arith.cmpi eq, %arg1, %c0_i32 : i32
    %1 = arith.extui %0 : i1 to i32
    %c0_i32_0 = arith.constant 0 : i32
    %2 = arith.cmpi ne, %1, %c0_i32_0 : i32
    scf.if %2 {
      %cst_227 = arith.constant 0.000000e+00 : f32
      %591 = vector.broadcast %cst_227 : f32 to vector<2x16x128xf32>
      %c0_228 = arith.constant 0 : index
      %c0_229 = arith.constant 0 : index
      %c0_230 = arith.constant 0 : index
      %592 = vector.load %arg10[%c0_228, %c0_229, %c0_230] : memref<2x16x128xf32, #tpu.memory_space<vmem>>, vector<2x16x128xf32>
      tpu.vector_store %arg10[%c0_228, %c0_229, %c0_230], %591 {strides = array<i32>} : memref<2x16x128xf32, #tpu.memory_space<vmem>>, vector<2x16x128xf32>,
      %cst_231 = arith.constant 0.000000e+00 : f32
      %593 = vector.broadcast %cst_231 : f32 to vector<2x16x128xf32>
      %c0_232 = arith.constant 0 : index
      %c0_233 = arith.constant 0 : index
      %c0_234 = arith.constant 0 : index
      %594 = vector.load %arg11[%c0_232, %c0_233, %c0_234] : memref<2x16x128xf32, #tpu.memory_space<vmem>>, vector<2x16x128xf32>
      tpu.vector_store %arg11[%c0_232, %c0_233, %c0_234], %593 {strides = array<i32>} : memref<2x16x128xf32, #tpu.memory_space<vmem>>, vector<2x16x128xf32>,
    } else {
    }
    %c0 = arith.constant 0 : index
    %c0_1 = arith.constant 0 : index
    %c0_2 = arith.constant 0 : index
    %3 = vector.load %arg2[%c0, %c0_1, %c0_2] : memref<8x16x16xbf16, #tpu.memory_space<vmem>>, vector<8x16x16xbf16>
    %4 = vector.shape_cast %3 : vector<8x16x16xbf16> to vector<128x16xbf16>
    %c0_3 = arith.constant 0 : index
    %c0_4 = arith.constant 0 : index
    %5 = vector.load %arg3[%c0_3, %c0_4] : memref<16x512xbf16, #tpu.memory_space<vmem>>, vector<16x512xbf16>
    %cst = arith.constant dense<0.000000e+00> : vector<128x512xf32>
    %6 = tpu.matmul %4, %5, %cst {dimension_numbers = #tpu.dot_dimension_numbers<[1], [0], [0], [1], [0, 0, 1, 1], [], []>} : vector<128x16xbf16>, vector<16x512xbf16>, vector<128x512xf32> -> vector<128x512xf32>
    %c0_5 = arith.constant 0 : index
    %c0_6 = arith.constant 0 : index
    %c0_7 = arith.constant 0 : index
    %7 = vector.load %arg6[%c0_5, %c0_6, %c0_7] : memref<2x1x512xf32, #tpu.memory_space<vmem>>, vector<1x1x512xf32>
    %8 = vector.shape_cast %7 : vector<1x1x512xf32> to vector<1x512xf32>
    %9 = vector.broadcast %8 : vector<1x512xf32> to vector<128x512xf32>
    %10 = arith.addf %6, %9 : vector<128x512xf32>
    %11 = vector.shape_cast %10 : vector<128x512xf32> to vector<8x16x512xf32>
    %c0_8 = arith.constant 0 : index
    %c0_9 = arith.constant 0 : index
    %c0_10 = arith.constant 0 : index
    %12 = vector.load %arg13[%c0_8, %c0_9, %c0_10] : memref<8x16x512xf32, #tpu.memory_space<vmem>>, vector<8x16x512xf32>
    tpu.vector_store %arg13[%c0_8, %c0_9, %c0_10], %11 {strides = array<i32>} : memref<8x16x512xf32, #tpu.memory_space<vmem>>, vector<8x16x512xf32>,
    %c0_11 = arith.constant 0 : index
    %c0_12 = arith.constant 0 : index
    %c0_13 = arith.constant 0 : index
    %13 = vector.load %arg10[%c0_11, %c0_12, %c0_13] : memref<2x16x128xf32, #tpu.memory_space<vmem>>, vector<1x16x128xf32>
    %14 = vector.shape_cast %13 : vector<1x16x128xf32> to vector<16x128xf32>
    %c0_14 = arith.constant 0 : index
    %c0_15 = arith.constant 0 : index
    %c0_16 = arith.constant 0 : index
    %15 = vector.load %arg11[%c0_14, %c0_15, %c0_16] : memref<2x16x128xf32, #tpu.memory_space<vmem>>, vector<1x16x128xf32>
    %16 = vector.shape_cast %15 : vector<1x16x128xf32> to vector<16x128xf32>
    %17 = arith.truncf %14 : vector<16x128xf32> to vector<16x128xbf16>
    %c0_17 = arith.constant 0 : index
    %c0_18 = arith.constant 0 : index
    %c0_19 = arith.constant 0 : index
    %18 = vector.load %arg5[%c0_17, %c0_18, %c0_19] : memref<2x128x512xbf16, #tpu.memory_space<vmem>>, vector<1x128x512xbf16>
    %19 = vector.shape_cast %18 : vector<1x128x512xbf16> to vector<128x512xbf16>
    %cst_20 = arith.constant dense<0.000000e+00> : vector<16x512xf32>
    %20 = tpu.matmul %17, %19, %cst_20 {dimension_numbers = #tpu.dot_dimension_numbers<[1], [0], [0], [1], [0, 0, 1, 1], [], []>} : vector<16x128xbf16>, vector<128x512xbf16>, vector<16x512xf32> -> vector<16x512xf32>
    %c0_21 = arith.constant 0 : index
    %c0_22 = arith.constant 0 : index
    %c0_23 = arith.constant 0 : index
    %21 = vector.load %arg13[%c0_21, %c0_22, %c0_23] : memref<8x16x512xf32, #tpu.memory_space<vmem>>, vector<1x16x512xf32>
    %22 = vector.shape_cast %21 : vector<1x16x512xf32> to vector<16x512xf32>
    %23 = arith.addf %22, %20 : vector<16x512xf32>
    %24 = vector.extract_strided_slice %23 {offsets = [0, 0], sizes = [16, 128], strides = [1, 1]} : vector<16x512xf32> to vector<16x128xf32>
    %25 = arith.negf %24 : vector<16x128xf32>
    %26 = math.exp %25 : vector<16x128xf32>
    %cst_24 = arith.constant 1.000000e+00 : f32
    %27 = vector.broadcast %cst_24 : f32 to vector<16x128xf32>
    %28 = arith.addf %27, %26 : vector<16x128xf32>
    %29 = arith.divf %27, %28 : vector<16x128xf32>
    %30 = vector.extract_strided_slice %23 {offsets = [0, 128], sizes = [16, 128], strides = [1, 1]} : vector<16x512xf32> to vector<16x128xf32>
    %31 = arith.negf %30 : vector<16x128xf32>
    %32 = math.exp %31 : vector<16x128xf32>
    %cst_25 = arith.constant 1.000000e+00 : f32
    %33 = vector.broadcast %cst_25 : f32 to vector<16x128xf32>
    %34 = arith.addf %33, %32 : vector<16x128xf32>
    %35 = arith.divf %33, %34 : vector<16x128xf32>
    %36 = vector.extract_strided_slice %23 {offsets = [0, 256], sizes = [16, 128], strides = [1, 1]} : vector<16x512xf32> to vector<16x128xf32>
    %37 = math.tanh %36 : vector<16x128xf32>
    %38 = vector.extract_strided_slice %23 {offsets = [0, 384], sizes = [16, 128], strides = [1, 1]} : vector<16x512xf32> to vector<16x128xf32>
    %39 = arith.negf %38 : vector<16x128xf32>
    %40 = math.exp %39 : vector<16x128xf32>
    %cst_26 = arith.constant 1.000000e+00 : f32
    %41 = vector.broadcast %cst_26 : f32 to vector<16x128xf32>
    %42 = arith.addf %41, %40 : vector<16x128xf32>
    %43 = arith.divf %41, %42 : vector<16x128xf32>
    %44 = arith.mulf %35, %16 : vector<16x128xf32>
    %45 = arith.mulf %29, %37 : vector<16x128xf32>
    %46 = arith.addf %44, %45 : vector<16x128xf32>
    %47 = math.tanh %46 : vector<16x128xf32>
    %48 = arith.mulf %43, %47 : vector<16x128xf32>
    %49 = arith.truncf %48 : vector<16x128xf32> to vector<16x128xbf16>
    %c0_27 = arith.constant 0 : index
    %c0_28 = arith.constant 0 : index
    %c0_29 = arith.constant 0 : index
    %50 = vector.load %arg12[%c0_27, %c0_28, %c0_29] : memref<8x16x128xbf16, #tpu.memory_space<vmem>>, vector<1x16x128xbf16>
    %51 = vector.shape_cast %50 : vector<1x16x128xbf16> to vector<16x128xbf16>
    %52 = vector.shape_cast %49 : vector<16x128xbf16> to vector<1x16x128xbf16>
    tpu.vector_store %arg12[%c0_27, %c0_28, %c0_29], %52 {strides = array<i32>} : memref<8x16x128xbf16, #tpu.memory_space<vmem>>, vector<1x16x128xbf16>,
    %53 = arith.truncf %48 : vector<16x128xf32> to vector<16x128xbf16>
    %c0_30 = arith.constant 0 : index
    %c0_31 = arith.constant 0 : index
    %c0_32 = arith.constant 0 : index
    %54 = vector.load %arg5[%c0_30, %c0_31, %c0_32] : memref<2x128x512xbf16, #tpu.memory_space<vmem>>, vector<1x128x512xbf16>
    %55 = vector.shape_cast %54 : vector<1x128x512xbf16> to vector<128x512xbf16>
    %cst_33 = arith.constant dense<0.000000e+00> : vector<16x512xf32>
    %56 = tpu.matmul %53, %55, %cst_33 {dimension_numbers = #tpu.dot_dimension_numbers<[1], [0], [0], [1], [0, 0, 1, 1], [], []>} : vector<16x128xbf16>, vector<128x512xbf16>, vector<16x512xf32> -> vector<16x512xf32>
    %c1 = arith.constant 1 : index
    %c0_34 = arith.constant 0 : index
    %c0_35 = arith.constant 0 : index
    %57 = vector.load %arg13[%c1, %c0_34, %c0_35] : memref<8x16x512xf32, #tpu.memory_space<vmem>>, vector<1x16x512xf32>
    %58 = vector.shape_cast %57 : vector<1x16x512xf32> to vector<16x512xf32>
    %59 = arith.addf %58, %56 : vector<16x512xf32>
    %60 = vector.extract_strided_slice %59 {offsets = [0, 0], sizes = [16, 128], strides = [1, 1]} : vector<16x512xf32> to vector<16x128xf32>
    %61 = arith.negf %60 : vector<16x128xf32>
    %62 = math.exp %61 : vector<16x128xf32>
    %cst_36 = arith.constant 1.000000e+00 : f32
    %63 = vector.broadcast %cst_36 : f32 to vector<16x128xf32>
    %64 = arith.addf %63, %62 : vector<16x128xf32>
    %65 = arith.divf %63, %64 : vector<16x128xf32>
    %66 = vector.extract_strided_slice %59 {offsets = [0, 128], sizes = [16, 128], strides = [1, 1]} : vector<16x512xf32> to vector<16x128xf32>
    %67 = arith.negf %66 : vector<16x128xf32>
    %68 = math.exp %67 : vector<16x128xf32>
    %cst_37 = arith.constant 1.000000e+00 : f32
    %69 = vector.broadcast %cst_37 : f32 to vector<16x128xf32>
    %70 = arith.addf %69, %68 : vector<16x128xf32>
    %71 = arith.divf %69, %70 : vector<16x128xf32>
    %72 = vector.extract_strided_slice %59 {offsets = [0, 256], sizes = [16, 128], strides = [1, 1]} : vector<16x512xf32> to vector<16x128xf32>
    %73 = math.tanh %72 : vector<16x128xf32>
    %74 = vector.extract_strided_slice %59 {offsets = [0, 384], sizes = [16, 128], strides = [1, 1]} : vector<16x512xf32> to vector<16x128xf32>
    %75 = arith.negf %74 : vector<16x128xf32>
    %76 = math.exp %75 : vector<16x128xf32>
    %cst_38 = arith.constant 1.000000e+00 : f32
    %77 = vector.broadcast %cst_38 : f32 to vector<16x128xf32>
    %78 = arith.addf %77, %76 : vector<16x128xf32>
    %79 = arith.divf %77, %78 : vector<16x128xf32>
    %80 = arith.mulf %71, %46 : vector<16x128xf32>
    %81 = arith.mulf %65, %73 : vector<16x128xf32>
    %82 = arith.addf %80, %81 : vector<16x128xf32>
    %83 = math.tanh %82 : vector<16x128xf32>
    %84 = arith.mulf %79, %83 : vector<16x128xf32>
    %85 = arith.truncf %84 : vector<16x128xf32> to vector<16x128xbf16>
    %c1_39 = arith.constant 1 : index
    %c0_40 = arith.constant 0 : index
    %c0_41 = arith.constant 0 : index
    %86 = vector.load %arg12[%c1_39, %c0_40, %c0_41] : memref<8x16x128xbf16, #tpu.memory_space<vmem>>, vector<1x16x128xbf16>
    %87 = vector.shape_cast %86 : vector<1x16x128xbf16> to vector<16x128xbf16>
    %88 = vector.shape_cast %85 : vector<16x128xbf16> to vector<1x16x128xbf16>
    tpu.vector_store %arg12[%c1_39, %c0_40, %c0_41], %88 {strides = array<i32>} : memref<8x16x128xbf16, #tpu.memory_space<vmem>>, vector<1x16x128xbf16>,
    %89 = arith.truncf %84 : vector<16x128xf32> to vector<16x128xbf16>
    %c0_42 = arith.constant 0 : index
    %c0_43 = arith.constant 0 : index
    %c0_44 = arith.constant 0 : index
    %90 = vector.load %arg5[%c0_42, %c0_43, %c0_44] : memref<2x128x512xbf16, #tpu.memory_space<vmem>>, vector<1x128x512xbf16>
    %91 = vector.shape_cast %90 : vector<1x128x512xbf16> to vector<128x512xbf16>
    %cst_45 = arith.constant dense<0.000000e+00> : vector<16x512xf32>
    %92 = tpu.matmul %89, %91, %cst_45 {dimension_numbers = #tpu.dot_dimension_numbers<[1], [0], [0], [1], [0, 0, 1, 1], [], []>} : vector<16x128xbf16>, vector<128x512xbf16>, vector<16x512xf32> -> vector<16x512xf32>
    %c2 = arith.constant 2 : index
    %c0_46 = arith.constant 0 : index
    %c0_47 = arith.constant 0 : index
    %93 = vector.load %arg13[%c2, %c0_46, %c0_47] : memref<8x16x512xf32, #tpu.memory_space<vmem>>, vector<1x16x512xf32>
    %94 = vector.shape_cast %93 : vector<1x16x512xf32> to vector<16x512xf32>
    %95 = arith.addf %94, %92 : vector<16x512xf32>
    %96 = vector.extract_strided_slice %95 {offsets = [0, 0], sizes = [16, 128], strides = [1, 1]} : vector<16x512xf32> to vector<16x128xf32>
    %97 = arith.negf %96 : vector<16x128xf32>
    %98 = math.exp %97 : vector<16x128xf32>
    %cst_48 = arith.constant 1.000000e+00 : f32
    %99 = vector.broadcast %cst_48 : f32 to vector<16x128xf32>
    %100 = arith.addf %99, %98 : vector<16x128xf32>
    %101 = arith.divf %99, %100 : vector<16x128xf32>
    %102 = vector.extract_strided_slice %95 {offsets = [0, 128], sizes = [16, 128], strides = [1, 1]} : vector<16x512xf32> to vector<16x128xf32>
    %103 = arith.negf %102 : vector<16x128xf32>
    %104 = math.exp %103 : vector<16x128xf32>
    %cst_49 = arith.constant 1.000000e+00 : f32
    %105 = vector.broadcast %cst_49 : f32 to vector<16x128xf32>
    %106 = arith.addf %105, %104 : vector<16x128xf32>
    %107 = arith.divf %105, %106 : vector<16x128xf32>
    %108 = vector.extract_strided_slice %95 {offsets = [0, 256], sizes = [16, 128], strides = [1, 1]} : vector<16x512xf32> to vector<16x128xf32>
    %109 = math.tanh %108 : vector<16x128xf32>
    %110 = vector.extract_strided_slice %95 {offsets = [0, 384], sizes = [16, 128], strides = [1, 1]} : vector<16x512xf32> to vector<16x128xf32>
    %111 = arith.negf %110 : vector<16x128xf32>
    %112 = math.exp %111 : vector<16x128xf32>
    %cst_50 = arith.constant 1.000000e+00 : f32
    %113 = vector.broadcast %cst_50 : f32 to vector<16x128xf32>
    %114 = arith.addf %113, %112 : vector<16x128xf32>
    %115 = arith.divf %113, %114 : vector<16x128xf32>
    %116 = arith.mulf %107, %82 : vector<16x128xf32>
    %117 = arith.mulf %101, %109 : vector<16x128xf32>
    %118 = arith.addf %116, %117 : vector<16x128xf32>
    %119 = math.tanh %118 : vector<16x128xf32>
    %120 = arith.mulf %115, %119 : vector<16x128xf32>
    %121 = arith.truncf %120 : vector<16x128xf32> to vector<16x128xbf16>
    %c2_51 = arith.constant 2 : index
    %c0_52 = arith.constant 0 : index
    %c0_53 = arith.constant 0 : index
    %122 = vector.load %arg12[%c2_51, %c0_52, %c0_53] : memref<8x16x128xbf16, #tpu.memory_space<vmem>>, vector<1x16x128xbf16>
    %123 = vector.shape_cast %122 : vector<1x16x128xbf16> to vector<16x128xbf16>
    %124 = vector.shape_cast %121 : vector<16x128xbf16> to vector<1x16x128xbf16>
    tpu.vector_store %arg12[%c2_51, %c0_52, %c0_53], %124 {strides = array<i32>} : memref<8x16x128xbf16, #tpu.memory_space<vmem>>, vector<1x16x128xbf16>,
    %125 = arith.truncf %120 : vector<16x128xf32> to vector<16x128xbf16>
    %c0_54 = arith.constant 0 : index
    %c0_55 = arith.constant 0 : index
    %c0_56 = arith.constant 0 : index
    %126 = vector.load %arg5[%c0_54, %c0_55, %c0_56] : memref<2x128x512xbf16, #tpu.memory_space<vmem>>, vector<1x128x512xbf16>
    %127 = vector.shape_cast %126 : vector<1x128x512xbf16> to vector<128x512xbf16>
    %cst_57 = arith.constant dense<0.000000e+00> : vector<16x512xf32>
    %128 = tpu.matmul %125, %127, %cst_57 {dimension_numbers = #tpu.dot_dimension_numbers<[1], [0], [0], [1], [0, 0, 1, 1], [], []>} : vector<16x128xbf16>, vector<128x512xbf16>, vector<16x512xf32> -> vector<16x512xf32>
    %c3 = arith.constant 3 : index
    %c0_58 = arith.constant 0 : index
    %c0_59 = arith.constant 0 : index
    %129 = vector.load %arg13[%c3, %c0_58, %c0_59] : memref<8x16x512xf32, #tpu.memory_space<vmem>>, vector<1x16x512xf32>
    %130 = vector.shape_cast %129 : vector<1x16x512xf32> to vector<16x512xf32>
    %131 = arith.addf %130, %128 : vector<16x512xf32>
    %132 = vector.extract_strided_slice %131 {offsets = [0, 0], sizes = [16, 128], strides = [1, 1]} : vector<16x512xf32> to vector<16x128xf32>
    %133 = arith.negf %132 : vector<16x128xf32>
    %134 = math.exp %133 : vector<16x128xf32>
    %cst_60 = arith.constant 1.000000e+00 : f32
    %135 = vector.broadcast %cst_60 : f32 to vector<16x128xf32>
    %136 = arith.addf %135, %134 : vector<16x128xf32>
    %137 = arith.divf %135, %136 : vector<16x128xf32>
    %138 = vector.extract_strided_slice %131 {offsets = [0, 128], sizes = [16, 128], strides = [1, 1]} : vector<16x512xf32> to vector<16x128xf32>
    %139 = arith.negf %138 : vector<16x128xf32>
    %140 = math.exp %139 : vector<16x128xf32>
    %cst_61 = arith.constant 1.000000e+00 : f32
    %141 = vector.broadcast %cst_61 : f32 to vector<16x128xf32>
    %142 = arith.addf %141, %140 : vector<16x128xf32>
    %143 = arith.divf %141, %142 : vector<16x128xf32>
    %144 = vector.extract_strided_slice %131 {offsets = [0, 256], sizes = [16, 128], strides = [1, 1]} : vector<16x512xf32> to vector<16x128xf32>
    %145 = math.tanh %144 : vector<16x128xf32>
    %146 = vector.extract_strided_slice %131 {offsets = [0, 384], sizes = [16, 128], strides = [1, 1]} : vector<16x512xf32> to vector<16x128xf32>
    %147 = arith.negf %146 : vector<16x128xf32>
    %148 = math.exp %147 : vector<16x128xf32>
    %cst_62 = arith.constant 1.000000e+00 : f32
    %149 = vector.broadcast %cst_62 : f32 to vector<16x128xf32>
    %150 = arith.addf %149, %148 : vector<16x128xf32>
    %151 = arith.divf %149, %150 : vector<16x128xf32>
    %152 = arith.mulf %143, %118 : vector<16x128xf32>
    %153 = arith.mulf %137, %145 : vector<16x128xf32>
    %154 = arith.addf %152, %153 : vector<16x128xf32>
    %155 = math.tanh %154 : vector<16x128xf32>
    %156 = arith.mulf %151, %155 : vector<16x128xf32>
    %157 = arith.truncf %156 : vector<16x128xf32> to vector<16x128xbf16>
    %c3_63 = arith.constant 3 : index
    %c0_64 = arith.constant 0 : index
    %c0_65 = arith.constant 0 : index
    %158 = vector.load %arg12[%c3_63, %c0_64, %c0_65] : memref<8x16x128xbf16, #tpu.memory_space<vmem>>, vector<1x16x128xbf16>
    %159 = vector.shape_cast %158 : vector<1x16x128xbf16> to vector<16x128xbf16>
    %160 = vector.shape_cast %157 : vector<16x128xbf16> to vector<1x16x128xbf16>
    tpu.vector_store %arg12[%c3_63, %c0_64, %c0_65], %160 {strides = array<i32>} : memref<8x16x128xbf16, #tpu.memory_space<vmem>>, vector<1x16x128xbf16>,
    %161 = arith.truncf %156 : vector<16x128xf32> to vector<16x128xbf16>
    %c0_66 = arith.constant 0 : index
    %c0_67 = arith.constant 0 : index
    %c0_68 = arith.constant 0 : index
    %162 = vector.load %arg5[%c0_66, %c0_67, %c0_68] : memref<2x128x512xbf16, #tpu.memory_space<vmem>>, vector<1x128x512xbf16>
    %163 = vector.shape_cast %162 : vector<1x128x512xbf16> to vector<128x512xbf16>
    %cst_69 = arith.constant dense<0.000000e+00> : vector<16x512xf32>
    %164 = tpu.matmul %161, %163, %cst_69 {dimension_numbers = #tpu.dot_dimension_numbers<[1], [0], [0], [1], [0, 0, 1, 1], [], []>} : vector<16x128xbf16>, vector<128x512xbf16>, vector<16x512xf32> -> vector<16x512xf32>
    %c4 = arith.constant 4 : index
    %c0_70 = arith.constant 0 : index
    %c0_71 = arith.constant 0 : index
    %165 = vector.load %arg13[%c4, %c0_70, %c0_71] : memref<8x16x512xf32, #tpu.memory_space<vmem>>, vector<1x16x512xf32>
    %166 = vector.shape_cast %165 : vector<1x16x512xf32> to vector<16x512xf32>
    %167 = arith.addf %166, %164 : vector<16x512xf32>
    %168 = vector.extract_strided_slice %167 {offsets = [0, 0], sizes = [16, 128], strides = [1, 1]} : vector<16x512xf32> to vector<16x128xf32>
    %169 = arith.negf %168 : vector<16x128xf32>
    %170 = math.exp %169 : vector<16x128xf32>
    %cst_72 = arith.constant 1.000000e+00 : f32
    %171 = vector.broadcast %cst_72 : f32 to vector<16x128xf32>
    %172 = arith.addf %171, %170 : vector<16x128xf32>
    %173 = arith.divf %171, %172 : vector<16x128xf32>
    %174 = vector.extract_strided_slice %167 {offsets = [0, 128], sizes = [16, 128], strides = [1, 1]} : vector<16x512xf32> to vector<16x128xf32>
    %175 = arith.negf %174 : vector<16x128xf32>
    %176 = math.exp %175 : vector<16x128xf32>
    %cst_73 = arith.constant 1.000000e+00 : f32
    %177 = vector.broadcast %cst_73 : f32 to vector<16x128xf32>
    %178 = arith.addf %177, %176 : vector<16x128xf32>
    %179 = arith.divf %177, %178 : vector<16x128xf32>
    %180 = vector.extract_strided_slice %167 {offsets = [0, 256], sizes = [16, 128], strides = [1, 1]} : vector<16x512xf32> to vector<16x128xf32>
    %181 = math.tanh %180 : vector<16x128xf32>
    %182 = vector.extract_strided_slice %167 {offsets = [0, 384], sizes = [16, 128], strides = [1, 1]} : vector<16x512xf32> to vector<16x128xf32>
    %183 = arith.negf %182 : vector<16x128xf32>
    %184 = math.exp %183 : vector<16x128xf32>
    %cst_74 = arith.constant 1.000000e+00 : f32
    %185 = vector.broadcast %cst_74 : f32 to vector<16x128xf32>
    %186 = arith.addf %185, %184 : vector<16x128xf32>
    %187 = arith.divf %185, %186 : vector<16x128xf32>
    %188 = arith.mulf %179, %154 : vector<16x128xf32>
    %189 = arith.mulf %173, %181 : vector<16x128xf32>
    %190 = arith.addf %188, %189 : vector<16x128xf32>
    %191 = math.tanh %190 : vector<16x128xf32>
    %192 = arith.mulf %187, %191 : vector<16x128xf32>
    %193 = arith.truncf %192 : vector<16x128xf32> to vector<16x128xbf16>
    %c4_75 = arith.constant 4 : index
    %c0_76 = arith.constant 0 : index
    %c0_77 = arith.constant 0 : index
    %194 = vector.load %arg12[%c4_75, %c0_76, %c0_77] : memref<8x16x128xbf16, #tpu.memory_space<vmem>>, vector<1x16x128xbf16>
    %195 = vector.shape_cast %194 : vector<1x16x128xbf16> to vector<16x128xbf16>
    %196 = vector.shape_cast %193 : vector<16x128xbf16> to vector<1x16x128xbf16>
    tpu.vector_store %arg12[%c4_75, %c0_76, %c0_77], %196 {strides = array<i32>} : memref<8x16x128xbf16, #tpu.memory_space<vmem>>, vector<1x16x128xbf16>,
    %197 = arith.truncf %192 : vector<16x128xf32> to vector<16x128xbf16>
    %c0_78 = arith.constant 0 : index
    %c0_79 = arith.constant 0 : index
    %c0_80 = arith.constant 0 : index
    %198 = vector.load %arg5[%c0_78, %c0_79, %c0_80] : memref<2x128x512xbf16, #tpu.memory_space<vmem>>, vector<1x128x512xbf16>
    %199 = vector.shape_cast %198 : vector<1x128x512xbf16> to vector<128x512xbf16>
    %cst_81 = arith.constant dense<0.000000e+00> : vector<16x512xf32>
    %200 = tpu.matmul %197, %199, %cst_81 {dimension_numbers = #tpu.dot_dimension_numbers<[1], [0], [0], [1], [0, 0, 1, 1], [], []>} : vector<16x128xbf16>, vector<128x512xbf16>, vector<16x512xf32> -> vector<16x512xf32>
    %c5 = arith.constant 5 : index
    %c0_82 = arith.constant 0 : index
    %c0_83 = arith.constant 0 : index
    %201 = vector.load %arg13[%c5, %c0_82, %c0_83] : memref<8x16x512xf32, #tpu.memory_space<vmem>>, vector<1x16x512xf32>
    %202 = vector.shape_cast %201 : vector<1x16x512xf32> to vector<16x512xf32>
    %203 = arith.addf %202, %200 : vector<16x512xf32>
    %204 = vector.extract_strided_slice %203 {offsets = [0, 0], sizes = [16, 128], strides = [1, 1]} : vector<16x512xf32> to vector<16x128xf32>
    %205 = arith.negf %204 : vector<16x128xf32>
    %206 = math.exp %205 : vector<16x128xf32>
    %cst_84 = arith.constant 1.000000e+00 : f32
    %207 = vector.broadcast %cst_84 : f32 to vector<16x128xf32>
    %208 = arith.addf %207, %206 : vector<16x128xf32>
    %209 = arith.divf %207, %208 : vector<16x128xf32>
    %210 = vector.extract_strided_slice %203 {offsets = [0, 128], sizes = [16, 128], strides = [1, 1]} : vector<16x512xf32> to vector<16x128xf32>
    %211 = arith.negf %210 : vector<16x128xf32>
    %212 = math.exp %211 : vector<16x128xf32>
    %cst_85 = arith.constant 1.000000e+00 : f32
    %213 = vector.broadcast %cst_85 : f32 to vector<16x128xf32>
    %214 = arith.addf %213, %212 : vector<16x128xf32>
    %215 = arith.divf %213, %214 : vector<16x128xf32>
    %216 = vector.extract_strided_slice %203 {offsets = [0, 256], sizes = [16, 128], strides = [1, 1]} : vector<16x512xf32> to vector<16x128xf32>
    %217 = math.tanh %216 : vector<16x128xf32>
    %218 = vector.extract_strided_slice %203 {offsets = [0, 384], sizes = [16, 128], strides = [1, 1]} : vector<16x512xf32> to vector<16x128xf32>
    %219 = arith.negf %218 : vector<16x128xf32>
    %220 = math.exp %219 : vector<16x128xf32>
    %cst_86 = arith.constant 1.000000e+00 : f32
    %221 = vector.broadcast %cst_86 : f32 to vector<16x128xf32>
    %222 = arith.addf %221, %220 : vector<16x128xf32>
    %223 = arith.divf %221, %222 : vector<16x128xf32>
    %224 = arith.mulf %215, %190 : vector<16x128xf32>
    %225 = arith.mulf %209, %217 : vector<16x128xf32>
    %226 = arith.addf %224, %225 : vector<16x128xf32>
    %227 = math.tanh %226 : vector<16x128xf32>
    %228 = arith.mulf %223, %227 : vector<16x128xf32>
    %229 = arith.truncf %228 : vector<16x128xf32> to vector<16x128xbf16>
    %c5_87 = arith.constant 5 : index
    %c0_88 = arith.constant 0 : index
    %c0_89 = arith.constant 0 : index
    %230 = vector.load %arg12[%c5_87, %c0_88, %c0_89] : memref<8x16x128xbf16, #tpu.memory_space<vmem>>, vector<1x16x128xbf16>
    %231 = vector.shape_cast %230 : vector<1x16x128xbf16> to vector<16x128xbf16>
    %232 = vector.shape_cast %229 : vector<16x128xbf16> to vector<1x16x128xbf16>
    tpu.vector_store %arg12[%c5_87, %c0_88, %c0_89], %232 {strides = array<i32>} : memref<8x16x128xbf16, #tpu.memory_space<vmem>>, vector<1x16x128xbf16>,
    %233 = arith.truncf %228 : vector<16x128xf32> to vector<16x128xbf16>
    %c0_90 = arith.constant 0 : index
    %c0_91 = arith.constant 0 : index
    %c0_92 = arith.constant 0 : index
    %234 = vector.load %arg5[%c0_90, %c0_91, %c0_92] : memref<2x128x512xbf16, #tpu.memory_space<vmem>>, vector<1x128x512xbf16>
    %235 = vector.shape_cast %234 : vector<1x128x512xbf16> to vector<128x512xbf16>
    %cst_93 = arith.constant dense<0.000000e+00> : vector<16x512xf32>
    %236 = tpu.matmul %233, %235, %cst_93 {dimension_numbers = #tpu.dot_dimension_numbers<[1], [0], [0], [1], [0, 0, 1, 1], [], []>} : vector<16x128xbf16>, vector<128x512xbf16>, vector<16x512xf32> -> vector<16x512xf32>
    %c6 = arith.constant 6 : index
    %c0_94 = arith.constant 0 : index
    %c0_95 = arith.constant 0 : index
    %237 = vector.load %arg13[%c6, %c0_94, %c0_95] : memref<8x16x512xf32, #tpu.memory_space<vmem>>, vector<1x16x512xf32>
    %238 = vector.shape_cast %237 : vector<1x16x512xf32> to vector<16x512xf32>
    %239 = arith.addf %238, %236 : vector<16x512xf32>
    %240 = vector.extract_strided_slice %239 {offsets = [0, 0], sizes = [16, 128], strides = [1, 1]} : vector<16x512xf32> to vector<16x128xf32>
    %241 = arith.negf %240 : vector<16x128xf32>
    %242 = math.exp %241 : vector<16x128xf32>
    %cst_96 = arith.constant 1.000000e+00 : f32
    %243 = vector.broadcast %cst_96 : f32 to vector<16x128xf32>
    %244 = arith.addf %243, %242 : vector<16x128xf32>
    %245 = arith.divf %243, %244 : vector<16x128xf32>
    %246 = vector.extract_strided_slice %239 {offsets = [0, 128], sizes = [16, 128], strides = [1, 1]} : vector<16x512xf32> to vector<16x128xf32>
    %247 = arith.negf %246 : vector<16x128xf32>
    %248 = math.exp %247 : vector<16x128xf32>
    %cst_97 = arith.constant 1.000000e+00 : f32
    %249 = vector.broadcast %cst_97 : f32 to vector<16x128xf32>
    %250 = arith.addf %249, %248 : vector<16x128xf32>
    %251 = arith.divf %249, %250 : vector<16x128xf32>
    %252 = vector.extract_strided_slice %239 {offsets = [0, 256], sizes = [16, 128], strides = [1, 1]} : vector<16x512xf32> to vector<16x128xf32>
    %253 = math.tanh %252 : vector<16x128xf32>
    %254 = vector.extract_strided_slice %239 {offsets = [0, 384], sizes = [16, 128], strides = [1, 1]} : vector<16x512xf32> to vector<16x128xf32>
    %255 = arith.negf %254 : vector<16x128xf32>
    %256 = math.exp %255 : vector<16x128xf32>
    %cst_98 = arith.constant 1.000000e+00 : f32
    %257 = vector.broadcast %cst_98 : f32 to vector<16x128xf32>
    %258 = arith.addf %257, %256 : vector<16x128xf32>
    %259 = arith.divf %257, %258 : vector<16x128xf32>
    %260 = arith.mulf %251, %226 : vector<16x128xf32>
    %261 = arith.mulf %245, %253 : vector<16x128xf32>
    %262 = arith.addf %260, %261 : vector<16x128xf32>
    %263 = math.tanh %262 : vector<16x128xf32>
    %264 = arith.mulf %259, %263 : vector<16x128xf32>
    %265 = arith.truncf %264 : vector<16x128xf32> to vector<16x128xbf16>
    %c6_99 = arith.constant 6 : index
    %c0_100 = arith.constant 0 : index
    %c0_101 = arith.constant 0 : index
    %266 = vector.load %arg12[%c6_99, %c0_100, %c0_101] : memref<8x16x128xbf16, #tpu.memory_space<vmem>>, vector<1x16x128xbf16>
    %267 = vector.shape_cast %266 : vector<1x16x128xbf16> to vector<16x128xbf16>
    %268 = vector.shape_cast %265 : vector<16x128xbf16> to vector<1x16x128xbf16>
    tpu.vector_store %arg12[%c6_99, %c0_100, %c0_101], %268 {strides = array<i32>} : memref<8x16x128xbf16, #tpu.memory_space<vmem>>, vector<1x16x128xbf16>,
    %269 = arith.truncf %264 : vector<16x128xf32> to vector<16x128xbf16>
    %c0_102 = arith.constant 0 : index
    %c0_103 = arith.constant 0 : index
    %c0_104 = arith.constant 0 : index
    %270 = vector.load %arg5[%c0_102, %c0_103, %c0_104] : memref<2x128x512xbf16, #tpu.memory_space<vmem>>, vector<1x128x512xbf16>
    %271 = vector.shape_cast %270 : vector<1x128x512xbf16> to vector<128x512xbf16>
    %cst_105 = arith.constant dense<0.000000e+00> : vector<16x512xf32>
    %272 = tpu.matmul %269, %271, %cst_105 {dimension_numbers = #tpu.dot_dimension_numbers<[1], [0], [0], [1], [0, 0, 1, 1], [], []>} : vector<16x128xbf16>, vector<128x512xbf16>, vector<16x512xf32> -> vector<16x512xf32>
    %c7 = arith.constant 7 : index
    %c0_106 = arith.constant 0 : index
    %c0_107 = arith.constant 0 : index
    %273 = vector.load %arg13[%c7, %c0_106, %c0_107] : memref<8x16x512xf32, #tpu.memory_space<vmem>>, vector<1x16x512xf32>
    %274 = vector.shape_cast %273 : vector<1x16x512xf32> to vector<16x512xf32>
    %275 = arith.addf %274, %272 : vector<16x512xf32>
    %276 = vector.extract_strided_slice %275 {offsets = [0, 0], sizes = [16, 128], strides = [1, 1]} : vector<16x512xf32> to vector<16x128xf32>
    %277 = arith.negf %276 : vector<16x128xf32>
    %278 = math.exp %277 : vector<16x128xf32>
    %cst_108 = arith.constant 1.000000e+00 : f32
    %279 = vector.broadcast %cst_108 : f32 to vector<16x128xf32>
    %280 = arith.addf %279, %278 : vector<16x128xf32>
    %281 = arith.divf %279, %280 : vector<16x128xf32>
    %282 = vector.extract_strided_slice %275 {offsets = [0, 128], sizes = [16, 128], strides = [1, 1]} : vector<16x512xf32> to vector<16x128xf32>
    %283 = arith.negf %282 : vector<16x128xf32>
    %284 = math.exp %283 : vector<16x128xf32>
    %cst_109 = arith.constant 1.000000e+00 : f32
    %285 = vector.broadcast %cst_109 : f32 to vector<16x128xf32>
    %286 = arith.addf %285, %284 : vector<16x128xf32>
    %287 = arith.divf %285, %286 : vector<16x128xf32>
    %288 = vector.extract_strided_slice %275 {offsets = [0, 256], sizes = [16, 128], strides = [1, 1]} : vector<16x512xf32> to vector<16x128xf32>
    %289 = math.tanh %288 : vector<16x128xf32>
    %290 = vector.extract_strided_slice %275 {offsets = [0, 384], sizes = [16, 128], strides = [1, 1]} : vector<16x512xf32> to vector<16x128xf32>
    %291 = arith.negf %290 : vector<16x128xf32>
    %292 = math.exp %291 : vector<16x128xf32>
    %cst_110 = arith.constant 1.000000e+00 : f32
    %293 = vector.broadcast %cst_110 : f32 to vector<16x128xf32>
    %294 = arith.addf %293, %292 : vector<16x128xf32>
    %295 = arith.divf %293, %294 : vector<16x128xf32>
    %296 = arith.mulf %287, %262 : vector<16x128xf32>
    %297 = arith.mulf %281, %289 : vector<16x128xf32>
    %298 = arith.addf %296, %297 : vector<16x128xf32>
    %299 = math.tanh %298 : vector<16x128xf32>
    %300 = arith.mulf %295, %299 : vector<16x128xf32>
    %301 = arith.truncf %300 : vector<16x128xf32> to vector<16x128xbf16>
    %c7_111 = arith.constant 7 : index
    %c0_112 = arith.constant 0 : index
    %c0_113 = arith.constant 0 : index
    %302 = vector.load %arg12[%c7_111, %c0_112, %c0_113] : memref<8x16x128xbf16, #tpu.memory_space<vmem>>, vector<1x16x128xbf16>
    %303 = vector.shape_cast %302 : vector<1x16x128xbf16> to vector<16x128xbf16>
    %304 = vector.shape_cast %301 : vector<16x128xbf16> to vector<1x16x128xbf16>
    tpu.vector_store %arg12[%c7_111, %c0_112, %c0_113], %304 {strides = array<i32>} : memref<8x16x128xbf16, #tpu.memory_space<vmem>>, vector<1x16x128xbf16>,
    %c0_114 = arith.constant 0 : index
    %c0_115 = arith.constant 0 : index
    %c0_116 = arith.constant 0 : index
    %305 = vector.load %arg10[%c0_114, %c0_115, %c0_116] : memref<2x16x128xf32, #tpu.memory_space<vmem>>, vector<1x16x128xf32>
    %306 = vector.shape_cast %305 : vector<1x16x128xf32> to vector<16x128xf32>
    %307 = vector.shape_cast %300 : vector<16x128xf32> to vector<1x16x128xf32>
    tpu.vector_store %arg10[%c0_114, %c0_115, %c0_116], %307 {strides = array<i32>} : memref<2x16x128xf32, #tpu.memory_space<vmem>>, vector<1x16x128xf32>,
    %c0_117 = arith.constant 0 : index
    %c0_118 = arith.constant 0 : index
    %c0_119 = arith.constant 0 : index
    %308 = vector.load %arg11[%c0_117, %c0_118, %c0_119] : memref<2x16x128xf32, #tpu.memory_space<vmem>>, vector<1x16x128xf32>
    %309 = vector.shape_cast %308 : vector<1x16x128xf32> to vector<16x128xf32>
    %310 = vector.shape_cast %298 : vector<16x128xf32> to vector<1x16x128xf32>
    tpu.vector_store %arg11[%c0_117, %c0_118, %c0_119], %310 {strides = array<i32>} : memref<2x16x128xf32, #tpu.memory_space<vmem>>, vector<1x16x128xf32>,
    %c0_120 = arith.constant 0 : index
    %c0_121 = arith.constant 0 : index
    %c0_122 = arith.constant 0 : index
    %311 = vector.load %arg12[%c0_120, %c0_121, %c0_122] : memref<8x16x128xbf16, #tpu.memory_space<vmem>>, vector<8x16x128xbf16>
    %312 = vector.shape_cast %311 : vector<8x16x128xbf16> to vector<128x128xbf16>
    %c0_123 = arith.constant 0 : index
    %c0_124 = arith.constant 0 : index
    %c0_125 = arith.constant 0 : index
    %313 = vector.load %arg4[%c0_123, %c0_124, %c0_125] : memref<1x128x512xbf16, #tpu.memory_space<vmem>>, vector<1x128x512xbf16>
    %314 = vector.shape_cast %313 : vector<1x128x512xbf16> to vector<128x512xbf16>
    %cst_126 = arith.constant dense<0.000000e+00> : vector<128x512xf32>
    %315 = tpu.matmul %312, %314, %cst_126 {dimension_numbers = #tpu.dot_dimension_numbers<[1], [0], [0], [1], [0, 0, 1, 1], [], []>} : vector<128x128xbf16>, vector<128x512xbf16>, vector<128x512xf32> -> vector<128x512xf32>
    %c1_127 = arith.constant 1 : index
    %c0_128 = arith.constant 0 : index
    %c0_129 = arith.constant 0 : index
    %316 = vector.load %arg6[%c1_127, %c0_128, %c0_129] : memref<2x1x512xf32, #tpu.memory_space<vmem>>, vector<1x1x512xf32>
    %317 = vector.shape_cast %316 : vector<1x1x512xf32> to vector<1x512xf32>
    %318 = vector.broadcast %317 : vector<1x512xf32> to vector<128x512xf32>
    %319 = arith.addf %315, %318 : vector<128x512xf32>
    %320 = vector.shape_cast %319 : vector<128x512xf32> to vector<8x16x512xf32>
    %c0_130 = arith.constant 0 : index
    %c0_131 = arith.constant 0 : index
    %c0_132 = arith.constant 0 : index
    %321 = vector.load %arg13[%c0_130, %c0_131, %c0_132] : memref<8x16x512xf32, #tpu.memory_space<vmem>>, vector<8x16x512xf32>
    tpu.vector_store %arg13[%c0_130, %c0_131, %c0_132], %320 {strides = array<i32>} : memref<8x16x512xf32, #tpu.memory_space<vmem>>, vector<8x16x512xf32>,
    %c1_133 = arith.constant 1 : index
    %c0_134 = arith.constant 0 : index
    %c0_135 = arith.constant 0 : index
    %322 = vector.load %arg10[%c1_133, %c0_134, %c0_135] : memref<2x16x128xf32, #tpu.memory_space<vmem>>, vector<1x16x128xf32>
    %323 = vector.shape_cast %322 : vector<1x16x128xf32> to vector<16x128xf32>
    %c1_136 = arith.constant 1 : index
    %c0_137 = arith.constant 0 : index
    %c0_138 = arith.constant 0 : index
    %324 = vector.load %arg11[%c1_136, %c0_137, %c0_138] : memref<2x16x128xf32, #tpu.memory_space<vmem>>, vector<1x16x128xf32>
    %325 = vector.shape_cast %324 : vector<1x16x128xf32> to vector<16x128xf32>
    %326 = arith.truncf %323 : vector<16x128xf32> to vector<16x128xbf16>
    %c1_139 = arith.constant 1 : index
    %c0_140 = arith.constant 0 : index
    %c0_141 = arith.constant 0 : index
    %327 = vector.load %arg5[%c1_139, %c0_140, %c0_141] : memref<2x128x512xbf16, #tpu.memory_space<vmem>>, vector<1x128x512xbf16>
    %328 = vector.shape_cast %327 : vector<1x128x512xbf16> to vector<128x512xbf16>
    %cst_142 = arith.constant dense<0.000000e+00> : vector<16x512xf32>
    %329 = tpu.matmul %326, %328, %cst_142 {dimension_numbers = #tpu.dot_dimension_numbers<[1], [0], [0], [1], [0, 0, 1, 1], [], []>} : vector<16x128xbf16>, vector<128x512xbf16>, vector<16x512xf32> -> vector<16x512xf32>
    %c0_143 = arith.constant 0 : index
    %c0_144 = arith.constant 0 : index
    %c0_145 = arith.constant 0 : index
    %330 = vector.load %arg13[%c0_143, %c0_144, %c0_145] : memref<8x16x512xf32, #tpu.memory_space<vmem>>, vector<1x16x512xf32>
    %331 = vector.shape_cast %330 : vector<1x16x512xf32> to vector<16x512xf32>
    %332 = arith.addf %331, %329 : vector<16x512xf32>
    %333 = vector.extract_strided_slice %332 {offsets = [0, 0], sizes = [16, 128], strides = [1, 1]} : vector<16x512xf32> to vector<16x128xf32>
    %334 = arith.negf %333 : vector<16x128xf32>
    %335 = math.exp %334 : vector<16x128xf32>
    %cst_146 = arith.constant 1.000000e+00 : f32
    %336 = vector.broadcast %cst_146 : f32 to vector<16x128xf32>
    %337 = arith.addf %336, %335 : vector<16x128xf32>
    %338 = arith.divf %336, %337 : vector<16x128xf32>
    %339 = vector.extract_strided_slice %332 {offsets = [0, 128], sizes = [16, 128], strides = [1, 1]} : vector<16x512xf32> to vector<16x128xf32>
    %340 = arith.negf %339 : vector<16x128xf32>
    %341 = math.exp %340 : vector<16x128xf32>
    %cst_147 = arith.constant 1.000000e+00 : f32
    %342 = vector.broadcast %cst_147 : f32 to vector<16x128xf32>
    %343 = arith.addf %342, %341 : vector<16x128xf32>
    %344 = arith.divf %342, %343 : vector<16x128xf32>
    %345 = vector.extract_strided_slice %332 {offsets = [0, 256], sizes = [16, 128], strides = [1, 1]} : vector<16x512xf32> to vector<16x128xf32>
    %346 = math.tanh %345 : vector<16x128xf32>
    %347 = vector.extract_strided_slice %332 {offsets = [0, 384], sizes = [16, 128], strides = [1, 1]} : vector<16x512xf32> to vector<16x128xf32>
    %348 = arith.negf %347 : vector<16x128xf32>
    %349 = math.exp %348 : vector<16x128xf32>
    %cst_148 = arith.constant 1.000000e+00 : f32
    %350 = vector.broadcast %cst_148 : f32 to vector<16x128xf32>
    %351 = arith.addf %350, %349 : vector<16x128xf32>
    %352 = arith.divf %350, %351 : vector<16x128xf32>
    %353 = arith.mulf %344, %325 : vector<16x128xf32>
    %354 = arith.mulf %338, %346 : vector<16x128xf32>
    %355 = arith.addf %353, %354 : vector<16x128xf32>
    %356 = math.tanh %355 : vector<16x128xf32>
    %357 = arith.mulf %352, %356 : vector<16x128xf32>
    %358 = arith.truncf %357 : vector<16x128xf32> to vector<16x128xbf16>
    %c1_149 = arith.constant 1 : index
    %c0_150 = arith.constant 0 : index
    %c0_151 = arith.constant 0 : index
    %359 = vector.load %arg5[%c1_149, %c0_150, %c0_151] : memref<2x128x512xbf16, #tpu.memory_space<vmem>>, vector<1x128x512xbf16>
    %360 = vector.shape_cast %359 : vector<1x128x512xbf16> to vector<128x512xbf16>
    %cst_152 = arith.constant dense<0.000000e+00> : vector<16x512xf32>
    %361 = tpu.matmul %358, %360, %cst_152 {dimension_numbers = #tpu.dot_dimension_numbers<[1], [0], [0], [1], [0, 0, 1, 1], [], []>} : vector<16x128xbf16>, vector<128x512xbf16>, vector<16x512xf32> -> vector<16x512xf32>
    %c1_153 = arith.constant 1 : index
    %c0_154 = arith.constant 0 : index
    %c0_155 = arith.constant 0 : index
    %362 = vector.load %arg13[%c1_153, %c0_154, %c0_155] : memref<8x16x512xf32, #tpu.memory_space<vmem>>, vector<1x16x512xf32>
    %363 = vector.shape_cast %362 : vector<1x16x512xf32> to vector<16x512xf32>
    %364 = arith.addf %363, %361 : vector<16x512xf32>
    %365 = vector.extract_strided_slice %364 {offsets = [0, 0], sizes = [16, 128], strides = [1, 1]} : vector<16x512xf32> to vector<16x128xf32>
    %366 = arith.negf %365 : vector<16x128xf32>
    %367 = math.exp %366 : vector<16x128xf32>
    %cst_156 = arith.constant 1.000000e+00 : f32
    %368 = vector.broadcast %cst_156 : f32 to vector<16x128xf32>
    %369 = arith.addf %368, %367 : vector<16x128xf32>
    %370 = arith.divf %368, %369 : vector<16x128xf32>
    %371 = vector.extract_strided_slice %364 {offsets = [0, 128], sizes = [16, 128], strides = [1, 1]} : vector<16x512xf32> to vector<16x128xf32>
    %372 = arith.negf %371 : vector<16x128xf32>
    %373 = math.exp %372 : vector<16x128xf32>
    %cst_157 = arith.constant 1.000000e+00 : f32
    %374 = vector.broadcast %cst_157 : f32 to vector<16x128xf32>
    %375 = arith.addf %374, %373 : vector<16x128xf32>
    %376 = arith.divf %374, %375 : vector<16x128xf32>
    %377 = vector.extract_strided_slice %364 {offsets = [0, 256], sizes = [16, 128], strides = [1, 1]} : vector<16x512xf32> to vector<16x128xf32>
    %378 = math.tanh %377 : vector<16x128xf32>
    %379 = vector.extract_strided_slice %364 {offsets = [0, 384], sizes = [16, 128], strides = [1, 1]} : vector<16x512xf32> to vector<16x128xf32>
    %380 = arith.negf %379 : vector<16x128xf32>
    %381 = math.exp %380 : vector<16x128xf32>
    %cst_158 = arith.constant 1.000000e+00 : f32
    %382 = vector.broadcast %cst_158 : f32 to vector<16x128xf32>
    %383 = arith.addf %382, %381 : vector<16x128xf32>
    %384 = arith.divf %382, %383 : vector<16x128xf32>
    %385 = arith.mulf %376, %355 : vector<16x128xf32>
    %386 = arith.mulf %370, %378 : vector<16x128xf32>
    %387 = arith.addf %385, %386 : vector<16x128xf32>
    %388 = math.tanh %387 : vector<16x128xf32>
    %389 = arith.mulf %384, %388 : vector<16x128xf32>
    %390 = arith.truncf %389 : vector<16x128xf32> to vector<16x128xbf16>
    %c1_159 = arith.constant 1 : index
    %c0_160 = arith.constant 0 : index
    %c0_161 = arith.constant 0 : index
    %391 = vector.load %arg5[%c1_159, %c0_160, %c0_161] : memref<2x128x512xbf16, #tpu.memory_space<vmem>>, vector<1x128x512xbf16>
    %392 = vector.shape_cast %391 : vector<1x128x512xbf16> to vector<128x512xbf16>
    %cst_162 = arith.constant dense<0.000000e+00> : vector<16x512xf32>
    %393 = tpu.matmul %390, %392, %cst_162 {dimension_numbers = #tpu.dot_dimension_numbers<[1], [0], [0], [1], [0, 0, 1, 1], [], []>} : vector<16x128xbf16>, vector<128x512xbf16>, vector<16x512xf32> -> vector<16x512xf32>
    %c2_163 = arith.constant 2 : index
    %c0_164 = arith.constant 0 : index
    %c0_165 = arith.constant 0 : index
    %394 = vector.load %arg13[%c2_163, %c0_164, %c0_165] : memref<8x16x512xf32, #tpu.memory_space<vmem>>, vector<1x16x512xf32>
    %395 = vector.shape_cast %394 : vector<1x16x512xf32> to vector<16x512xf32>
    %396 = arith.addf %395, %393 : vector<16x512xf32>
    %397 = vector.extract_strided_slice %396 {offsets = [0, 0], sizes = [16, 128], strides = [1, 1]} : vector<16x512xf32> to vector<16x128xf32>
    %398 = arith.negf %397 : vector<16x128xf32>
    %399 = math.exp %398 : vector<16x128xf32>
    %cst_166 = arith.constant 1.000000e+00 : f32
    %400 = vector.broadcast %cst_166 : f32 to vector<16x128xf32>
    %401 = arith.addf %400, %399 : vector<16x128xf32>
    %402 = arith.divf %400, %401 : vector<16x128xf32>
    %403 = vector.extract_strided_slice %396 {offsets = [0, 128], sizes = [16, 128], strides = [1, 1]} : vector<16x512xf32> to vector<16x128xf32>
    %404 = arith.negf %403 : vector<16x128xf32>
    %405 = math.exp %404 : vector<16x128xf32>
    %cst_167 = arith.constant 1.000000e+00 : f32
    %406 = vector.broadcast %cst_167 : f32 to vector<16x128xf32>
    %407 = arith.addf %406, %405 : vector<16x128xf32>
    %408 = arith.divf %406, %407 : vector<16x128xf32>
    %409 = vector.extract_strided_slice %396 {offsets = [0, 256], sizes = [16, 128], strides = [1, 1]} : vector<16x512xf32> to vector<16x128xf32>
    %410 = math.tanh %409 : vector<16x128xf32>
    %411 = vector.extract_strided_slice %396 {offsets = [0, 384], sizes = [16, 128], strides = [1, 1]} : vector<16x512xf32> to vector<16x128xf32>
    %412 = arith.negf %411 : vector<16x128xf32>
    %413 = math.exp %412 : vector<16x128xf32>
    %cst_168 = arith.constant 1.000000e+00 : f32
    %414 = vector.broadcast %cst_168 : f32 to vector<16x128xf32>
    %415 = arith.addf %414, %413 : vector<16x128xf32>
    %416 = arith.divf %414, %415 : vector<16x128xf32>
    %417 = arith.mulf %408, %387 : vector<16x128xf32>
    %418 = arith.mulf %402, %410 : vector<16x128xf32>
    %419 = arith.addf %417, %418 : vector<16x128xf32>
    %420 = math.tanh %419 : vector<16x128xf32>
    %421 = arith.mulf %416, %420 : vector<16x128xf32>
    %422 = arith.truncf %421 : vector<16x128xf32> to vector<16x128xbf16>
    %c1_169 = arith.constant 1 : index
    %c0_170 = arith.constant 0 : index
    %c0_171 = arith.constant 0 : index
    %423 = vector.load %arg5[%c1_169, %c0_170, %c0_171] : memref<2x128x512xbf16, #tpu.memory_space<vmem>>, vector<1x128x512xbf16>
    %424 = vector.shape_cast %423 : vector<1x128x512xbf16> to vector<128x512xbf16>
    %cst_172 = arith.constant dense<0.000000e+00> : vector<16x512xf32>
    %425 = tpu.matmul %422, %424, %cst_172 {dimension_numbers = #tpu.dot_dimension_numbers<[1], [0], [0], [1], [0, 0, 1, 1], [], []>} : vector<16x128xbf16>, vector<128x512xbf16>, vector<16x512xf32> -> vector<16x512xf32>
    %c3_173 = arith.constant 3 : index
    %c0_174 = arith.constant 0 : index
    %c0_175 = arith.constant 0 : index
    %426 = vector.load %arg13[%c3_173, %c0_174, %c0_175] : memref<8x16x512xf32, #tpu.memory_space<vmem>>, vector<1x16x512xf32>
    %427 = vector.shape_cast %426 : vector<1x16x512xf32> to vector<16x512xf32>
    %428 = arith.addf %427, %425 : vector<16x512xf32>
    %429 = vector.extract_strided_slice %428 {offsets = [0, 0], sizes = [16, 128], strides = [1, 1]} : vector<16x512xf32> to vector<16x128xf32>
    %430 = arith.negf %429 : vector<16x128xf32>
    %431 = math.exp %430 : vector<16x128xf32>
    %cst_176 = arith.constant 1.000000e+00 : f32
    %432 = vector.broadcast %cst_176 : f32 to vector<16x128xf32>
    %433 = arith.addf %432, %431 : vector<16x128xf32>
    %434 = arith.divf %432, %433 : vector<16x128xf32>
    %435 = vector.extract_strided_slice %428 {offsets = [0, 128], sizes = [16, 128], strides = [1, 1]} : vector<16x512xf32> to vector<16x128xf32>
    %436 = arith.negf %435 : vector<16x128xf32>
    %437 = math.exp %436 : vector<16x128xf32>
    %cst_177 = arith.constant 1.000000e+00 : f32
    %438 = vector.broadcast %cst_177 : f32 to vector<16x128xf32>
    %439 = arith.addf %438, %437 : vector<16x128xf32>
    %440 = arith.divf %438, %439 : vector<16x128xf32>
    %441 = vector.extract_strided_slice %428 {offsets = [0, 256], sizes = [16, 128], strides = [1, 1]} : vector<16x512xf32> to vector<16x128xf32>
    %442 = math.tanh %441 : vector<16x128xf32>
    %443 = vector.extract_strided_slice %428 {offsets = [0, 384], sizes = [16, 128], strides = [1, 1]} : vector<16x512xf32> to vector<16x128xf32>
    %444 = arith.negf %443 : vector<16x128xf32>
    %445 = math.exp %444 : vector<16x128xf32>
    %cst_178 = arith.constant 1.000000e+00 : f32
    %446 = vector.broadcast %cst_178 : f32 to vector<16x128xf32>
    %447 = arith.addf %446, %445 : vector<16x128xf32>
    %448 = arith.divf %446, %447 : vector<16x128xf32>
    %449 = arith.mulf %440, %419 : vector<16x128xf32>
    %450 = arith.mulf %434, %442 : vector<16x128xf32>
    %451 = arith.addf %449, %450 : vector<16x128xf32>
    %452 = math.tanh %451 : vector<16x128xf32>
    %453 = arith.mulf %448, %452 : vector<16x128xf32>
    %454 = arith.truncf %453 : vector<16x128xf32> to vector<16x128xbf16>
    %c1_179 = arith.constant 1 : index
    %c0_180 = arith.constant 0 : index
    %c0_181 = arith.constant 0 : index
    %455 = vector.load %arg5[%c1_179, %c0_180, %c0_181] : memref<2x128x512xbf16, #tpu.memory_space<vmem>>, vector<1x128x512xbf16>
    %456 = vector.shape_cast %455 : vector<1x128x512xbf16> to vector<128x512xbf16>
    %cst_182 = arith.constant dense<0.000000e+00> : vector<16x512xf32>
    %457 = tpu.matmul %454, %456, %cst_182 {dimension_numbers = #tpu.dot_dimension_numbers<[1], [0], [0], [1], [0, 0, 1, 1], [], []>} : vector<16x128xbf16>, vector<128x512xbf16>, vector<16x512xf32> -> vector<16x512xf32>
    %c4_183 = arith.constant 4 : index
    %c0_184 = arith.constant 0 : index
    %c0_185 = arith.constant 0 : index
    %458 = vector.load %arg13[%c4_183, %c0_184, %c0_185] : memref<8x16x512xf32, #tpu.memory_space<vmem>>, vector<1x16x512xf32>
    %459 = vector.shape_cast %458 : vector<1x16x512xf32> to vector<16x512xf32>
    %460 = arith.addf %459, %457 : vector<16x512xf32>
    %461 = vector.extract_strided_slice %460 {offsets = [0, 0], sizes = [16, 128], strides = [1, 1]} : vector<16x512xf32> to vector<16x128xf32>
    %462 = arith.negf %461 : vector<16x128xf32>
    %463 = math.exp %462 : vector<16x128xf32>
    %cst_186 = arith.constant 1.000000e+00 : f32
    %464 = vector.broadcast %cst_186 : f32 to vector<16x128xf32>
    %465 = arith.addf %464, %463 : vector<16x128xf32>
    %466 = arith.divf %464, %465 : vector<16x128xf32>
    %467 = vector.extract_strided_slice %460 {offsets = [0, 128], sizes = [16, 128], strides = [1, 1]} : vector<16x512xf32> to vector<16x128xf32>
    %468 = arith.negf %467 : vector<16x128xf32>
    %469 = math.exp %468 : vector<16x128xf32>
    %cst_187 = arith.constant 1.000000e+00 : f32
    %470 = vector.broadcast %cst_187 : f32 to vector<16x128xf32>
    %471 = arith.addf %470, %469 : vector<16x128xf32>
    %472 = arith.divf %470, %471 : vector<16x128xf32>
    %473 = vector.extract_strided_slice %460 {offsets = [0, 256], sizes = [16, 128], strides = [1, 1]} : vector<16x512xf32> to vector<16x128xf32>
    %474 = math.tanh %473 : vector<16x128xf32>
    %475 = vector.extract_strided_slice %460 {offsets = [0, 384], sizes = [16, 128], strides = [1, 1]} : vector<16x512xf32> to vector<16x128xf32>
    %476 = arith.negf %475 : vector<16x128xf32>
    %477 = math.exp %476 : vector<16x128xf32>
    %cst_188 = arith.constant 1.000000e+00 : f32
    %478 = vector.broadcast %cst_188 : f32 to vector<16x128xf32>
    %479 = arith.addf %478, %477 : vector<16x128xf32>
    %480 = arith.divf %478, %479 : vector<16x128xf32>
    %481 = arith.mulf %472, %451 : vector<16x128xf32>
    %482 = arith.mulf %466, %474 : vector<16x128xf32>
    %483 = arith.addf %481, %482 : vector<16x128xf32>
    %484 = math.tanh %483 : vector<16x128xf32>
    %485 = arith.mulf %480, %484 : vector<16x128xf32>
    %486 = arith.truncf %485 : vector<16x128xf32> to vector<16x128xbf16>
    %c1_189 = arith.constant 1 : index
    %c0_190 = arith.constant 0 : index
    %c0_191 = arith.constant 0 : index
    %487 = vector.load %arg5[%c1_189, %c0_190, %c0_191] : memref<2x128x512xbf16, #tpu.memory_space<vmem>>, vector<1x128x512xbf16>
    %488 = vector.shape_cast %487 : vector<1x128x512xbf16> to vector<128x512xbf16>
    %cst_192 = arith.constant dense<0.000000e+00> : vector<16x512xf32>
    %489 = tpu.matmul %486, %488, %cst_192 {dimension_numbers = #tpu.dot_dimension_numbers<[1], [0], [0], [1], [0, 0, 1, 1], [], []>} : vector<16x128xbf16>, vector<128x512xbf16>, vector<16x512xf32> -> vector<16x512xf32>
    %c5_193 = arith.constant 5 : index
    %c0_194 = arith.constant 0 : index
    %c0_195 = arith.constant 0 : index
    %490 = vector.load %arg13[%c5_193, %c0_194, %c0_195] : memref<8x16x512xf32, #tpu.memory_space<vmem>>, vector<1x16x512xf32>
    %491 = vector.shape_cast %490 : vector<1x16x512xf32> to vector<16x512xf32>
    %492 = arith.addf %491, %489 : vector<16x512xf32>
    %493 = vector.extract_strided_slice %492 {offsets = [0, 0], sizes = [16, 128], strides = [1, 1]} : vector<16x512xf32> to vector<16x128xf32>
    %494 = arith.negf %493 : vector<16x128xf32>
    %495 = math.exp %494 : vector<16x128xf32>
    %cst_196 = arith.constant 1.000000e+00 : f32
    %496 = vector.broadcast %cst_196 : f32 to vector<16x128xf32>
    %497 = arith.addf %496, %495 : vector<16x128xf32>
    %498 = arith.divf %496, %497 : vector<16x128xf32>
    %499 = vector.extract_strided_slice %492 {offsets = [0, 128], sizes = [16, 128], strides = [1, 1]} : vector<16x512xf32> to vector<16x128xf32>
    %500 = arith.negf %499 : vector<16x128xf32>
    %501 = math.exp %500 : vector<16x128xf32>
    %cst_197 = arith.constant 1.000000e+00 : f32
    %502 = vector.broadcast %cst_197 : f32 to vector<16x128xf32>
    %503 = arith.addf %502, %501 : vector<16x128xf32>
    %504 = arith.divf %502, %503 : vector<16x128xf32>
    %505 = vector.extract_strided_slice %492 {offsets = [0, 256], sizes = [16, 128], strides = [1, 1]} : vector<16x512xf32> to vector<16x128xf32>
    %506 = math.tanh %505 : vector<16x128xf32>
    %507 = vector.extract_strided_slice %492 {offsets = [0, 384], sizes = [16, 128], strides = [1, 1]} : vector<16x512xf32> to vector<16x128xf32>
    %508 = arith.negf %507 : vector<16x128xf32>
    %509 = math.exp %508 : vector<16x128xf32>
    %cst_198 = arith.constant 1.000000e+00 : f32
    %510 = vector.broadcast %cst_198 : f32 to vector<16x128xf32>
    %511 = arith.addf %510, %509 : vector<16x128xf32>
    %512 = arith.divf %510, %511 : vector<16x128xf32>
    %513 = arith.mulf %504, %483 : vector<16x128xf32>
    %514 = arith.mulf %498, %506 : vector<16x128xf32>
    %515 = arith.addf %513, %514 : vector<16x128xf32>
    %516 = math.tanh %515 : vector<16x128xf32>
    %517 = arith.mulf %512, %516 : vector<16x128xf32>
    %518 = arith.truncf %517 : vector<16x128xf32> to vector<16x128xbf16>
    %c1_199 = arith.constant 1 : index
    %c0_200 = arith.constant 0 : index
    %c0_201 = arith.constant 0 : index
    %519 = vector.load %arg5[%c1_199, %c0_200, %c0_201] : memref<2x128x512xbf16, #tpu.memory_space<vmem>>, vector<1x128x512xbf16>
    %520 = vector.shape_cast %519 : vector<1x128x512xbf16> to vector<128x512xbf16>
    %cst_202 = arith.constant dense<0.000000e+00> : vector<16x512xf32>
    %521 = tpu.matmul %518, %520, %cst_202 {dimension_numbers = #tpu.dot_dimension_numbers<[1], [0], [0], [1], [0, 0, 1, 1], [], []>} : vector<16x128xbf16>, vector<128x512xbf16>, vector<16x512xf32> -> vector<16x512xf32>
    %c6_203 = arith.constant 6 : index
    %c0_204 = arith.constant 0 : index
    %c0_205 = arith.constant 0 : index
    %522 = vector.load %arg13[%c6_203, %c0_204, %c0_205] : memref<8x16x512xf32, #tpu.memory_space<vmem>>, vector<1x16x512xf32>
    %523 = vector.shape_cast %522 : vector<1x16x512xf32> to vector<16x512xf32>
    %524 = arith.addf %523, %521 : vector<16x512xf32>
    %525 = vector.extract_strided_slice %524 {offsets = [0, 0], sizes = [16, 128], strides = [1, 1]} : vector<16x512xf32> to vector<16x128xf32>
    %526 = arith.negf %525 : vector<16x128xf32>
    %527 = math.exp %526 : vector<16x128xf32>
    %cst_206 = arith.constant 1.000000e+00 : f32
    %528 = vector.broadcast %cst_206 : f32 to vector<16x128xf32>
    %529 = arith.addf %528, %527 : vector<16x128xf32>
    %530 = arith.divf %528, %529 : vector<16x128xf32>
    %531 = vector.extract_strided_slice %524 {offsets = [0, 128], sizes = [16, 128], strides = [1, 1]} : vector<16x512xf32> to vector<16x128xf32>
    %532 = arith.negf %531 : vector<16x128xf32>
    %533 = math.exp %532 : vector<16x128xf32>
    %cst_207 = arith.constant 1.000000e+00 : f32
    %534 = vector.broadcast %cst_207 : f32 to vector<16x128xf32>
    %535 = arith.addf %534, %533 : vector<16x128xf32>
    %536 = arith.divf %534, %535 : vector<16x128xf32>
    %537 = vector.extract_strided_slice %524 {offsets = [0, 256], sizes = [16, 128], strides = [1, 1]} : vector<16x512xf32> to vector<16x128xf32>
    %538 = math.tanh %537 : vector<16x128xf32>
    %539 = vector.extract_strided_slice %524 {offsets = [0, 384], sizes = [16, 128], strides = [1, 1]} : vector<16x512xf32> to vector<16x128xf32>
    %540 = arith.negf %539 : vector<16x128xf32>
    %541 = math.exp %540 : vector<16x128xf32>
    %cst_208 = arith.constant 1.000000e+00 : f32
    %542 = vector.broadcast %cst_208 : f32 to vector<16x128xf32>
    %543 = arith.addf %542, %541 : vector<16x128xf32>
    %544 = arith.divf %542, %543 : vector<16x128xf32>
    %545 = arith.mulf %536, %515 : vector<16x128xf32>
    %546 = arith.mulf %530, %538 : vector<16x128xf32>
    %547 = arith.addf %545, %546 : vector<16x128xf32>
    %548 = math.tanh %547 : vector<16x128xf32>
    %549 = arith.mulf %544, %548 : vector<16x128xf32>
    %550 = arith.truncf %549 : vector<16x128xf32> to vector<16x128xbf16>
    %c1_209 = arith.constant 1 : index
    %c0_210 = arith.constant 0 : index
    %c0_211 = arith.constant 0 : index
    %551 = vector.load %arg5[%c1_209, %c0_210, %c0_211] : memref<2x128x512xbf16, #tpu.memory_space<vmem>>, vector<1x128x512xbf16>
    %552 = vector.shape_cast %551 : vector<1x128x512xbf16> to vector<128x512xbf16>
    %cst_212 = arith.constant dense<0.000000e+00> : vector<16x512xf32>
    %553 = tpu.matmul %550, %552, %cst_212 {dimension_numbers = #tpu.dot_dimension_numbers<[1], [0], [0], [1], [0, 0, 1, 1], [], []>} : vector<16x128xbf16>, vector<128x512xbf16>, vector<16x512xf32> -> vector<16x512xf32>
    %c7_213 = arith.constant 7 : index
    %c0_214 = arith.constant 0 : index
    %c0_215 = arith.constant 0 : index
    %554 = vector.load %arg13[%c7_213, %c0_214, %c0_215] : memref<8x16x512xf32, #tpu.memory_space<vmem>>, vector<1x16x512xf32>
    %555 = vector.shape_cast %554 : vector<1x16x512xf32> to vector<16x512xf32>
    %556 = arith.addf %555, %553 : vector<16x512xf32>
    %557 = vector.extract_strided_slice %556 {offsets = [0, 0], sizes = [16, 128], strides = [1, 1]} : vector<16x512xf32> to vector<16x128xf32>
    %558 = arith.negf %557 : vector<16x128xf32>
    %559 = math.exp %558 : vector<16x128xf32>
    %cst_216 = arith.constant 1.000000e+00 : f32
    %560 = vector.broadcast %cst_216 : f32 to vector<16x128xf32>
    %561 = arith.addf %560, %559 : vector<16x128xf32>
    %562 = arith.divf %560, %561 : vector<16x128xf32>
    %563 = vector.extract_strided_slice %556 {offsets = [0, 128], sizes = [16, 128], strides = [1, 1]} : vector<16x512xf32> to vector<16x128xf32>
    %564 = arith.negf %563 : vector<16x128xf32>
    %565 = math.exp %564 : vector<16x128xf32>
    %cst_217 = arith.constant 1.000000e+00 : f32
    %566 = vector.broadcast %cst_217 : f32 to vector<16x128xf32>
    %567 = arith.addf %566, %565 : vector<16x128xf32>
    %568 = arith.divf %566, %567 : vector<16x128xf32>
    %569 = vector.extract_strided_slice %556 {offsets = [0, 256], sizes = [16, 128], strides = [1, 1]} : vector<16x512xf32> to vector<16x128xf32>
    %570 = math.tanh %569 : vector<16x128xf32>
    %571 = vector.extract_strided_slice %556 {offsets = [0, 384], sizes = [16, 128], strides = [1, 1]} : vector<16x512xf32> to vector<16x128xf32>
    %572 = arith.negf %571 : vector<16x128xf32>
    %573 = math.exp %572 : vector<16x128xf32>
    %cst_218 = arith.constant 1.000000e+00 : f32
    %574 = vector.broadcast %cst_218 : f32 to vector<16x128xf32>
    %575 = arith.addf %574, %573 : vector<16x128xf32>
    %576 = arith.divf %574, %575 : vector<16x128xf32>
    %577 = arith.mulf %568, %547 : vector<16x128xf32>
    %578 = arith.mulf %562, %570 : vector<16x128xf32>
    %579 = arith.addf %577, %578 : vector<16x128xf32>
    %580 = math.tanh %579 : vector<16x128xf32>
    %581 = arith.mulf %576, %580 : vector<16x128xf32>
    %c1_219 = arith.constant 1 : index
    %c0_220 = arith.constant 0 : index
    %c0_221 = arith.constant 0 : index
    %582 = vector.load %arg10[%c1_219, %c0_220, %c0_221] : memref<2x16x128xf32, #tpu.memory_space<vmem>>, vector<1x16x128xf32>
    %583 = vector.shape_cast %582 : vector<1x16x128xf32> to vector<16x128xf32>
    %584 = vector.shape_cast %581 : vector<16x128xf32> to vector<1x16x128xf32>
    tpu.vector_store %arg10[%c1_219, %c0_220, %c0_221], %584 {strides = array<i32>} : memref<2x16x128xf32, #tpu.memory_space<vmem>>, vector<1x16x128xf32>,
    %c1_222 = arith.constant 1 : index
    %c0_223 = arith.constant 0 : index
    %c0_224 = arith.constant 0 : index
    %585 = vector.load %arg11[%c1_222, %c0_223, %c0_224] : memref<2x16x128xf32, #tpu.memory_space<vmem>>, vector<1x16x128xf32>
    %586 = vector.shape_cast %585 : vector<1x16x128xf32> to vector<16x128xf32>
    %587 = vector.shape_cast %579 : vector<16x128xf32> to vector<1x16x128xf32>
    tpu.vector_store %arg11[%c1_222, %c0_223, %c0_224], %587 {strides = array<i32>} : memref<2x16x128xf32, #tpu.memory_space<vmem>>, vector<1x16x128xf32>,
    %c0_i32_225 = arith.constant 0 : i32
    %588 = arith.cmpi eq, %arg1, %c0_i32_225 : i32
    %589 = arith.extui %588 : i1 to i32
    %c0_i32_226 = arith.constant 0 : i32
    %590 = arith.cmpi ne, %589, %c0_i32_226 : i32
    scf.if %590 {
      %c1_227 = arith.constant 1 : index
      %c0_228 = arith.constant 0 : index
      %c0_229 = arith.constant 0 : index
      %591 = vector.load %arg10[%c1_227, %c0_228, %c0_229] : memref<2x16x128xf32, #tpu.memory_space<vmem>>, vector<1x16x128xf32>
      %592 = vector.shape_cast %591 : vector<1x16x128xf32> to vector<16x128xf32>
      %593 = arith.truncf %592 : vector<16x128xf32> to vector<16x128xbf16>
      %c0_230 = arith.constant 0 : index
      %c0_231 = arith.constant 0 : index
      %594 = vector.load %arg7[%c0_230, %c0_231] : memref<128x128xbf16, #tpu.memory_space<vmem>>, vector<128x128xbf16>
      %cst_232 = arith.constant dense<0.000000e+00> : vector<16x128xf32>
      %595 = tpu.matmul %593, %594, %cst_232 {dimension_numbers = #tpu.dot_dimension_numbers<[1], [0], [0], [1], [0, 0, 1, 1], [], []>} : vector<16x128xbf16>, vector<128x128xbf16>, vector<16x128xf32> -> vector<16x128xf32>
      %c0_233 = arith.constant 0 : index
      %c0_234 = arith.constant 0 : index
      %596 = vector.load %arg8[%c0_233, %c0_234] : memref<1x128xf32, #tpu.memory_space<vmem>>, vector<1x128xf32>
      %597 = vector.broadcast %596 : vector<1x128xf32> to vector<16x128xf32>
      %598 = arith.addf %595, %597 : vector<16x128xf32>
      %599 = arith.negf %598 : vector<16x128xf32>
      %600 = math.exp %599 : vector<16x128xf32>
      %cst_235 = arith.constant 1.000000e+00 : f32
      %601 = vector.broadcast %cst_235 : f32 to vector<16x128xf32>
      %602 = arith.addf %601, %600 : vector<16x128xf32>
      %603 = arith.divf %601, %602 : vector<16x128xf32>
      %c0_236 = arith.constant 0 : index
      %c0_237 = arith.constant 0 : index
      %604 = vector.load %arg9[%c0_236, %c0_237] : memref<16x128xf32, #tpu.memory_space<vmem>>, vector<16x128xf32>
      tpu.vector_store %arg9[%c0_236, %c0_237], %603 {strides = array<i32>} : memref<16x128xf32, #tpu.memory_space<vmem>>, vector<16x128xf32>,
    } else {
    }
    return
  }
  func.func @transform_0(%arg0: i32, %arg1: i32) -> (i32, i32, i32) {
    %c0_i32 = arith.constant 0 : i32
    %c0_i32_0 = arith.constant 0 : i32
    return %arg1, %arg0, %c0_i32 : i32, i32, i32
  }
  func.func @transform_1(%arg0: i32, %arg1: i32) -> (i32, i32) {
    %c0_i32 = arith.constant 0 : i32
    %c0_i32_0 = arith.constant 0 : i32
    %c0_i32_1 = arith.constant 0 : i32
    return %c0_i32, %c0_i32_0 : i32, i32
  }
  func.func @transform_2(%arg0: i32, %arg1: i32) -> (i32, i32, i32) {
    %c0_i32 = arith.constant 0 : i32
    %c0_i32_0 = arith.constant 0 : i32
    %c0_i32_1 = arith.constant 0 : i32
    %c0_i32_2 = arith.constant 0 : i32
    return %c0_i32, %c0_i32_0, %c0_i32_1 : i32, i32, i32
  }
  func.func @transform_3(%arg0: i32, %arg1: i32) -> (i32, i32, i32) {
    %c0_i32 = arith.constant 0 : i32
    %c0_i32_0 = arith.constant 0 : i32
    %c0_i32_1 = arith.constant 0 : i32
    %c0_i32_2 = arith.constant 0 : i32
    return %c0_i32, %c0_i32_0, %c0_i32_1 : i32, i32, i32
  }
  func.func @transform_4(%arg0: i32, %arg1: i32) -> (i32, i32, i32) {
    %c0_i32 = arith.constant 0 : i32
    %c0_i32_0 = arith.constant 0 : i32
    %c0_i32_1 = arith.constant 0 : i32
    %c0_i32_2 = arith.constant 0 : i32
    return %c0_i32, %c0_i32_0, %c0_i32_1 : i32, i32, i32
  }
  func.func @transform_5(%arg0: i32, %arg1: i32) -> (i32, i32) {
    %c0_i32 = arith.constant 0 : i32
    %c0_i32_0 = arith.constant 0 : i32
    %c0_i32_1 = arith.constant 0 : i32
    return %c0_i32, %c0_i32_0 : i32, i32
  }
  func.func @transform_6(%arg0: i32, %arg1: i32) -> (i32, i32) {
    %c0_i32 = arith.constant 0 : i32
    %c0_i32_0 = arith.constant 0 : i32
    %c0_i32_1 = arith.constant 0 : i32
    return %c0_i32, %c0_i32_0 : i32, i32
  }
  func.func @transform_7(%arg0: i32, %arg1: i32) -> (i32, i32) {
    %c0_i32 = arith.constant 0 : i32
    %c0_i32_0 = arith.constant 0 : i32
    return %arg0, %c0_i32 : i32, i32
  }
}

</mosaic_0001>

<bundles_post_ra>
// kernel: tpu_custom_call.1
= control target key start
LH: loop header
LB: loop body
LE: loop exit
PB: predicated region body
PF: predicated region fallthrough
CT: control target
= control target key end

     0   :  { %12 = vsyncpa [#allocation7], 0  ;;  %s11210_s0 = inlined_call_operand.hbm [shape: bf16[8,16,16], index: 0, kind: input, shape index: {}]   ;;  %s11211_s1 = inlined_call_operand.hbm [shape: bf16[16,512], index: 1, kind: input, shape index: {}]   ;;  %s11212_s2 = inlined_call_operand.hbm [shape: bf16[1,128,512], index: 2, kind: input, shape index: {}]   ;;  %s11213_s3 = inlined_call_operand.hbm [shape: bf16[2,128,512], index: 3, kind: input, shape index: {}]   ;;  %s11214_s4 = inlined_call_operand.hbm [shape: f32[2,1,512], index: 4, kind: input, shape index: {}]   ;;  %s11215_s5 = inlined_call_operand.hbm [shape: bf16[128,128], index: 5, kind: input, shape index: {}]   ;;  %s11216_s6 = inlined_call_operand.vmem [shape: f32[1,128], index: 6, kind: input, shape index: {}]   ;;  %s11217_s7 = inlined_call_operand.hbm [shape: f32[16,128], index: 7, kind: output, shape index: {}]  }
   0x1   :  { %13 = vsyncpa [#allocation10], 0 }
   0x2   :  { %14 = vsyncpa [#allocation13], 0 }
   0x3   :  { %15 = vsyncpa [#allocation16], 0  ;;  %s34_s26 = sshll.u32 %s11211_s1, 4  ;;  %s35_s26 = int_to_ptr.hbm [resolvable:$true] %s34_s26 }
   0x4   :  { %16 = vsyncpa [#allocation8], 0  ;;  %s8822_s27 = smov [#allocation9]   ;;  %s60_s8 = sshll.u32 %s11213_s3, 4  ;;  %s61_s8 = int_to_ptr.hbm [resolvable:$true] %s60_s8 }
   0x5   :  { %s36_s28 = sshll.u32 %s8822_s27, 4  ;;  %s8823_s9 = smov 256   ;;  %s37_s28 = int_to_ptr.vmem [resolvable:$true] %s36_s28 }
   0x6   :  { %s8824_s10 = smov 16   ;;  %s8825_s11 = smov [#allocation12]  }
   0x7   :  { %42 = dma.hbm_to_vmem [thread:$0]  %s35_s26, 512, %s37_s28, [#allocation10], %s8823_s9, %s8823_s9, %s8824_s10  }
   0x8   :  { %s62_s12 = sshll.u32 %s8825_s11, 4  ;;  %s21_s15 = sshll.u32 %s11210_s0, 4  ;;  %s63_s12 = int_to_ptr.vmem [resolvable:$true] %s62_s12  ;;  %s22_s15 = int_to_ptr.hbm [resolvable:$true] %s21_s15 }
   0x9   :  { %68 = dma.hbm_to_vmem [thread:$0]  %s61_s8, 8192, %s63_s12, [#allocation13], %s8823_s9, %s8823_s9, %s8824_s10  }
   0xa   :  { %s8826_s1 = smov [#allocation6]   ;;  %s47_s3 = sshll.u32 %s11212_s2, 4  ;;  %s48_s3 = int_to_ptr.hbm [resolvable:$true] %s47_s3 }
   0xb   :  { %s23_s16 = sshll.u32 %s8826_s1, 4  ;;  %s8827_s19 = smov 64   ;;  %s24_s16 = int_to_ptr.vmem [resolvable:$true] %s23_s16 }
   0xc   :  { %s8828_s20 = smov 4   ;;  %s8829_s21 = smov [#allocation11]  }
   0xd   :  { %29 = dma.hbm_to_vmem [thread:$0]  %s22_s15, 1024, %s24_s16, [#allocation7], %s8827_s19, %s8827_s19, %s8828_s20  }
   0xe   :  { %s49_s22 = sshll.u32 %s8829_s21, 4  ;;  %s73_s0 = sshll.u32 %s11214_s4, 4  ;;  %s50_s22 = int_to_ptr.vmem [resolvable:$true] %s49_s22  ;;  %s74_s0 = int_to_ptr.hbm [resolvable:$true] %s73_s0 }
   0xf   :  { %55 = dma.hbm_to_vmem [thread:$0]  %s48_s3, 4096, %s50_s22, [#allocation10], %s8823_s9, %s8823_s9, %s8824_s10  }
  0x10   :  { %s86_s27 = sshll.u32 %s11215_s5, 4  ;;  %s8830_s28 = smov [#allocation14]   ;;  %s87_s27 = int_to_ptr.hbm [resolvable:$true] %s86_s27 }
  0x11   :  { %s75_s29 = sshll.u32 %s8830_s28, 4  ;;  %s8831_s2 = smov [#allocation15]   ;;  %s76_s29 = int_to_ptr.vmem [resolvable:$true] %s75_s29 }
  0x12   :  { %81 = dma.hbm_to_vmem [thread:$0]  %s74_s0, 128, %s76_s29, [#allocation13], %s8827_s19, %s8827_s19, %s8828_s20  }
  0x13   :  { %s88_s30 = sshll.u32 %s8831_s2, 4  ;;  %s89_s30 = int_to_ptr.vmem [resolvable:$true] %s88_s30 }
  0x14   :  { %94 = dma.hbm_to_vmem [thread:$0]  %s87_s27, 1024, %s89_s30, [#allocation16], %s8827_s19, %s8827_s19, %s8828_s20  }
  0x15   :  { %8812 = dma.done.wait [#allocation7], 1024  }
  0x16   :  { %8813 = vsyncadd [#allocation7], 4294966272 }
  0x17   :  { %8814 = dma.done.wait [#allocation10], 4608  }
  0x18   :  { %8815 = vsyncadd [#allocation10], 4294962688 }
  0x19   :  { %8816 = dma.done.wait [#allocation13], 8320  }
  0x1a   :  { %8817 = vsyncadd [#allocation13], 4294958976 }
  0x1b   :  { %8818 = dma.done.wait [#allocation16], 1024  }
  0x1c   :  { %8819 = vsyncadd [#allocation16], 4294966272  ;;  %v6232_v0 = vld [vmem:[#allocation9] sm:$0xf]  ;;  %v7730_v1 = vld [vmem:[#allocation9 + $0xc] sm:$0xf0] }
  0x1d   :  { %v6240_v2 = vld [vmem:[#allocation9 + $0x8] sm:$0xf]  ;;  %v6233_v3 = vor.u32 %v7730_v1, %v6232_v0  ;;  %v7731_v4 = vld [vmem:[#allocation9 + $0x14] sm:$0xf0]  ;;  %v7729_v5 = vld [vmem:[#allocation9 + $0xc] sm:$0xf] }
  0x1e   :  { %v6242_v6 = vld [vmem:[#allocation9 + $0x18] sm:$0xf0]  ;;  %v6241_v7 = vor.u32 %v7731_v4, %v6240_v2  ;;  %v7720_v9 = vld [vmem:[#allocation6] sm:$0xff]  ;;  %vm224_vm0 = vcmask 130048   ;;  %v6234_v12 = vld [vmem:[#allocation9 + $0x10] sm:$0xf0] }
  0x1f   :  { %v6245_v8 = vor.u32 %v7729_v5, %v6242_v6  ;;  %v8894_v10 = vld [vmem:[#allocation6 + $0x38] sm:$0xff]  ;;  %v7728_v11 = vld [vmem:[#allocation9 + $0x4] sm:$0xf]  ;;  %256 = vmatpush.bf16.msra.mxu0 %v6233_v3  ;;  %8108 = vmatpush.bf16.msra.mxu1 %v6233_v3  ;;  %v6394_v15 = vld [vmem:[#allocation12 + $0xf0] sm:$0xf0]  ;;  %s6182_s11 = sshll.u32 %s11217_s7, 4  ;;  %s6183_s11 = int_to_ptr.hbm [resolvable:$true] %s6182_s11 }
  0x20   :  { %v7760_v13 = vld [vmem:[#allocation12 + $0xe4] sm:$0xf]  ;;  %354 = vmatpush.bf16.msra.mxu2 %v6241_v7  ;;  %v6237_v14 = vor.u32 %v7728_v11, %v6234_v12  ;;  %v7761_v16 = vld [vmem:[#allocation12 + $0xec] sm:$0xf]  ;;  %v6402_v17 = vld [vmem:[#allocation12 + $0xf8] sm:$0xf0] }
  0x21   :  { %403 = vmatpush.bf16.msra.mxu3 %v6245_v8  ;;  %v6397_v18 = vor.u32 %v7760_v13, %v6394_v15  ;;  %v6405_v19 = vor.u32 %v7761_v16, %v6402_v17  ;;  %v6400_v20 = vld [vmem:[#allocation12 + $0xe8] sm:$0xf]  ;;  %v7763_v21 = vld [vmem:[#allocation12 + $0xf4] sm:$0xf0]  ;;  %v6392_v23 = vld [vmem:[#allocation12 + $0xe0] sm:$0xf] }
  0x22   :  { %6246 = vmatmul.msk.bf16.vlgmr.msra.gmra.mxu0 %vm224_vm0, %v7720_v9  ;;  %6253 = vmatmul.msk.bf16.vlgmr.msra.gmra.mxu1 %vm224_vm0, %v8894_v10  ;;  %v6401_v22 = vor.u32 %v7763_v21, %v6400_v20  ;;  %v7762_v24 = vld [vmem:[#allocation12 + $0xec] sm:$0xf0]  ;;  %v7756_v25 = vld [vmem:[#allocation12 + $0xc4] sm:$0xf]  ;;  %v6378_v27 = vld [vmem:[#allocation12 + $0xd0] sm:$0xf0] }
  0x23   :  { %305 = vmatpush.bf16.msrb.mxu1 %v6237_v14  ;;  %6262 = vmatmul.msk.bf16.vlgmr.msra.gmra.mxu2 %vm224_vm0, %v7720_v9  ;;  %v6393_v26 = vor.u32 %v7762_v24, %v6392_v23  ;;  %v7757_v28 = vld [vmem:[#allocation12 + $0xcc] sm:$0xf]  ;;  %v6386_v29 = vld [vmem:[#allocation12 + $0xd8] sm:$0xf0]  ;;  %v6381_v30 = vor.u32 %v7756_v25, %v6378_v27  ;;  %v6376_v32 = vld [vmem:[#allocation12 + $0xc0] sm:$0xf] }
  0x24   :  { %6270 = vmatmul.msk.bf16.vlgmr.msra.gmra.mxu3 %vm224_vm0, %v7720_v9  ;;  %734 = vmatpush.bf16.msrb.mxu2 %v6401_v22  ;;  %v6389_v31 = vor.u32 %v7757_v28, %v6386_v29  ;;  %v7758_v33 = vld [vmem:[#allocation12 + $0xcc] sm:$0xf0]  ;;  %v6384_v34 = vld [vmem:[#allocation12 + $0xc8] sm:$0xf]  ;;  %v7759_v36 = vld [vmem:[#allocation12 + $0xd4] sm:$0xf0] }
  0x25   :  { %748 = vmatpush.bf16.msrb.mxu3 %v6405_v19  ;;  %706 = vmatpush.bf16.msrb.mxu0 %v6393_v26  ;;  %v6377_v35 = vor.u32 %v7758_v33, %v6376_v32  ;;  %v6385_v37 = vor.u32 %v7759_v36, %v6384_v34  ;;  %v7721_v38 = vld [vmem:[#allocation6 + $0x8] sm:$0xff]  ;;  %v7752_v39 = vld [vmem:[#allocation12 + $0xa4] sm:$0xf]  ;;  %v6362_v40 = vld [vmem:[#allocation12 + $0xb0] sm:$0xf0]  ;;  %s8834_s12 = smov 128  }
  0x26   :  { %v7753_v41 = vld [vmem:[#allocation12 + $0xac] sm:$0xf]  ;;  %v6365_v42 = vor.u32 %v7752_v39, %v6362_v40  ;;  %v6370_v43 = vld [vmem:[#allocation12 + $0xb8] sm:$0xf0]  ;;  %v6360_v44 = vld [vmem:[#allocation12 + $0xa0] sm:$0xf] }
  0x27   :  { %720 = vmatpush.bf16.msra.mxu1 %v6397_v18  ;;  %v7754_v45 = vld [vmem:[#allocation12 + $0xac] sm:$0xf0]  ;;  %v6373_v46 = vor.u32 %v7753_v41, %v6370_v43  ;;  %v6368_v48 = vld [vmem:[#allocation12 + $0xa8] sm:$0xf]  ;;  %v7755_v49 = vld [vmem:[#allocation12 + $0xb4] sm:$0xf0] }
  0x28   :  { %735 = vmatpush.bf16.msrb.mxu2 %v6385_v37  ;;  %v6361_v47 = vor.u32 %v7754_v45, %v6360_v44  ;;  %v6369_v50 = vor.u32 %v7755_v49, %v6368_v48  ;;  %v7722_v51 = vld [vmem:[#allocation6 + $0x10] sm:$0xff]  ;;  %v7748_v52 = vld [vmem:[#allocation12 + $0x84] sm:$0xf]  ;;  %v7749_v54 = vld [vmem:[#allocation12 + $0x8c] sm:$0xf]  ;;  %s8835_s13 = smov 8  }
  0x29   :  { %749 = vmatpush.bf16.msrb.mxu3 %v6389_v31  ;;  %707 = vmatpush.bf16.msrb.mxu0 %v6377_v35  ;;  %v6346_v53 = vld [vmem:[#allocation12 + $0x90] sm:$0xf0]  ;;  %v6354_v56 = vld [vmem:[#allocation12 + $0x98] sm:$0xf0]  ;;  %v6344_v57 = vld [vmem:[#allocation12 + $0x80] sm:$0xf] }
  0x2a   :  { %v6349_v55 = vor.u32 %v7748_v52, %v6346_v53  ;;  %v7750_v58 = vld [vmem:[#allocation12 + $0x8c] sm:$0xf0]  ;;  %v6357_v59 = vor.u32 %v7749_v54, %v6354_v56  ;;  %v6352_v61 = vld [vmem:[#allocation12 + $0x88] sm:$0xf]  ;;  %v7751_v62 = vld [vmem:[#allocation12 + $0x94] sm:$0xf0] }
  0x2b   :  { %721 = vmatpush.bf16.msra.mxu1 %v6381_v30  ;;  %v6345_v60 = vor.u32 %v7750_v58, %v6344_v57  ;;  %v6353_v63 = vor.u32 %v7751_v62, %v6352_v61  ;;  %v7723_v0 = vld [vmem:[#allocation6 + $0x18] sm:$0xff]  ;;  %v7744_v1 = vld [vmem:[#allocation12 + $0x64] sm:$0xf]  ;;  %v6330_v2 = vld [vmem:[#allocation12 + $0x70] sm:$0xf0]  ;;  %v11218_v53 = vmov 0.0|0.0  }
  0x2c   :  { %736 = vmatpush.bf16.msrb.mxu2 %v6369_v50  ;;  %v7745_v3 = vld [vmem:[#allocation12 + $0x6c] sm:$0xf]  ;;  %v6333_v4 = vor.u32 %v7744_v1, %v6330_v2  ;;  %v6338_v5 = vld [vmem:[#allocation12 + $0x78] sm:$0xf0]  ;;  %v6328_v6 = vld [vmem:[#allocation12 + $0x60] sm:$0xf] }
  0x2d   :  { %750 = vmatpush.bf16.msrb.mxu3 %v6373_v46  ;;  %708 = vmatpush.bf16.msrb.mxu0 %v6361_v47  ;;  %v7746_v7 = vld [vmem:[#allocation12 + $0x6c] sm:$0xf0]  ;;  %v6341_v8 = vor.u32 %v7745_v3, %v6338_v5  ;;  %v6336_v11 = vld [vmem:[#allocation12 + $0x68] sm:$0xf]  ;;  %v7747_v12 = vld [vmem:[#allocation12 + $0x74] sm:$0xf0] }
  0x2e   :  { %v6337_v13 = vor.u32 %v7747_v12, %v6336_v11  ;;  %v7724_v14 = vld [vmem:[#allocation6 + $0x20] sm:$0xff]  ;;  %v6314_v16 = vld [vmem:[#allocation12 + $0x50] sm:$0xf0]  ;;  %v7742_v19 = vld [vmem:[#allocation12 + $0x4c] sm:$0xf0] }
  0x2f   :  { %722 = vmatpush.bf16.msra.mxu1 %v6365_v42  ;;  %v7740_v15 = vld [vmem:[#allocation12 + $0x44] sm:$0xf]  ;;  %v6312_v17 = vld [vmem:[#allocation12 + $0x40] sm:$0xf]  ;;  %v7741_v20 = vld [vmem:[#allocation12 + $0x4c] sm:$0xf] }
  0x30   :  { %737 = vmatpush.bf16.msrb.mxu2 %v6353_v63  ;;  %v6317_v18 = vor.u32 %v7740_v15, %v6314_v16  ;;  %v6322_v21 = vld [vmem:[#allocation12 + $0x58] sm:$0xf0]  ;;  %v6313_v22 = vor.u32 %v7742_v19, %v6312_v17  ;;  %v6296_v24 = vld [vmem:[#allocation12 + $0x20] sm:$0xf]  ;;  %v7738_v25 = vld [vmem:[#allocation12 + $0x2c] sm:$0xf0] }
  0x31   :  { %751 = vmatpush.bf16.msrb.mxu3 %v6357_v59  ;;  %709 = vmatpush.bf16.msrb.mxu0 %v6345_v60  ;;  %v6325_v23 = vor.u32 %v7741_v20, %v6322_v21  ;;  %v6320_v26 = vld [vmem:[#allocation12 + $0x48] sm:$0xf]  ;;  %v7743_v27 = vld [vmem:[#allocation12 + $0x54] sm:$0xf0]  ;;  %v6297_v28 = vor.u32 %v7738_v25, %v6296_v24  ;;  %v6280_v30 = vld [vmem:[#allocation12] sm:$0xf] }
  0x32   :  { %6247 = vmatmul.msk.bf16.gmra.mxu0 %vm224_vm0, %v7721_v38  ;;  %6254 = vmatmul.msk.bf16.vlgmr.msrb.gmra.mxu1 %vm224_vm0, %v7720_v9  ;;  %v6329_v9 = vor.u32 %v7746_v7, %v6328_v6  ;;  %v6321_v29 = vor.u32 %v7743_v27, %v6320_v26  ;;  %v7734_v31 = vld [vmem:[#allocation12 + $0xc] sm:$0xf0]  ;;  %v7725_v33 = vld [vmem:[#allocation6 + $0x28] sm:$0xff]  ;;  %v7736_v34 = vld [vmem:[#allocation12 + $0x24] sm:$0xf] }
  0x33   :  { %6263 = vmatmul.msk.bf16.gmra.mxu2 %vm224_vm0, %v7721_v38  ;;  %723 = vmatpush.bf16.msra.mxu1 %v6349_v55  ;;  %v6281_v32 = vor.u32 %v7734_v31, %v6280_v30  ;;  %v6298_v35 = vld [vmem:[#allocation12 + $0x30] sm:$0xf0]  ;;  %v7737_v36 = vld [vmem:[#allocation12 + $0x2c] sm:$0xf]  ;;  %v6304_v39 = vld [vmem:[#allocation12 + $0x28] sm:$0xf] }
  0x34   :  { %6271 = vmatmul.msk.bf16.gmra.mxu3 %vm224_vm0, %v7721_v38  ;;  %738 = vmatpush.bf16.msrb.mxu2 %v6337_v13  ;;  %v6301_v37 = vor.u32 %v7736_v34, %v6298_v35  ;;  %v7739_v40 = vld [vmem:[#allocation12 + $0x34] sm:$0xf0]  ;;  %v7726_v43 = vld [vmem:[#allocation6 + $0x30] sm:$0xff]  ;;  %v6288_v44 = vld [vmem:[#allocation12 + $0x8] sm:$0xf] }
  0x35   :  { %752 = vmatpush.bf16.msrb.mxu3 %v6341_v8  ;;  %710 = vmatpush.bf16.msrb.mxu0 %v6329_v9  ;;  %v6305_v42 = vor.u32 %v7739_v40, %v6304_v39  ;;  %v7735_v45 = vld [vmem:[#allocation12 + $0x14] sm:$0xf0]  ;;  %v7733_v46 = vld [vmem:[#allocation12 + $0xc] sm:$0xf]  ;;  %v6290_v48 = vld [vmem:[#allocation12 + $0x18] sm:$0xf0] }
  0x36   :  { %v6289_v47 = vor.u32 %v7735_v45, %v6288_v44  ;;  %v6293_v49 = vor.u32 %v7733_v46, %v6290_v48  ;;  %v7732_v50 = vld [vmem:[#allocation12 + $0x4] sm:$0xf]  ;;  %v154_v44 = vld [vmem:[#allocation14] sm:$0xf] }
  0x37   :  { %724 = vmatpush.bf16.msra.mxu1 %v6333_v4  ;;  %v9042_v45 = vperm.slane %v154_v44, 0 }
  0x38   :  { %739 = vmatpush.bf16.msrb.mxu2 %v6321_v29 }
  0x39   :  { %711 = vmatpush.bf16.msrb.mxu0 %v6313_v22  ;;  %753 = vmatpush.bf16.msrb.mxu3 %v6325_v23 }
  0x3b   :  { %725 = vmatpush.bf16.msra.mxu1 %v6317_v18 }
  0x3c   :  { %740 = vmatpush.bf16.msrb.mxu2 %v6305_v42 }
  0x3d   :  { %712 = vmatpush.bf16.msrb.mxu0 %v6297_v28 }
  0x3f   :  { %726 = vmatpush.bf16.msra.mxu1 %v6301_v37 }
  0x40   :  { %741 = vmatpush.bf16.msrb.mxu2 %v6289_v47 }
  0x41   :  { %713 = vmatpush.bf16.msrb.mxu0 %v6281_v32 }
  0x42   :  { %6248 = vmatmul.msk.bf16.gmra.mxu0 %vm224_vm0, %v7722_v51  ;;  %6255 = vmatmul.msk.bf16.gmra.mxu1 %vm224_vm0, %v7721_v38  ;;  %v6306_v38 = vld [vmem:[#allocation12 + $0x38] sm:$0xf0] }
  0x43   :  { %6264 = vmatmul.msk.bf16.gmra.mxu2 %vm224_vm0, %v7722_v51  ;;  %v6309_v41 = vor.u32 %v7737_v36, %v6306_v38 }
  0x44   :  { %6272 = vmatmul.msk.bf16.gmra.mxu3 %vm224_vm0, %v7722_v51 }
  0x45   :  { %754 = vmatpush.bf16.msrb.mxu3 %v6309_v41 }
  0x49   :  { %755 = vmatpush.bf16.msrb.mxu3 %v6293_v49 }
  0x52   :  { %6249 = vmatmul.msk.bf16.gmra.mxu0 %vm224_vm0, %v7723_v0  ;;  %6256 = vmatmul.msk.bf16.gmra.mxu1 %vm224_vm0, %v7722_v51  ;;  %v6282_v51 = vld [vmem:[#allocation12 + $0x10] sm:$0xf0] }
  0x53   :  { %6265 = vmatmul.msk.bf16.gmra.mxu2 %vm224_vm0, %v7723_v0  ;;  %v6285_v52 = vor.u32 %v7732_v50, %v6282_v51 }
  0x54   :  { %6273 = vmatmul.msk.bf16.gmra.mxu3 %vm224_vm0, %v7723_v0 }
  0x55   :  { %727 = vmatpush.bf16.msra.mxu1 %v6285_v52 }
  0x62   :  { %6250 = vmatmul.msk.bf16.gmra.mxu0 %vm224_vm0, %v7724_v14  ;;  %6257 = vmatmul.msk.bf16.gmra.mxu1 %vm224_vm0, %v7723_v0 }
  0x63   :  { %6266 = vmatmul.msk.bf16.gmra.mxu2 %vm224_vm0, %v7724_v14 }
  0x64   :  { %6274 = vmatmul.msk.bf16.gmra.mxu3 %vm224_vm0, %v7724_v14 }
  0x72   :  { %6251 = vmatmul.msk.bf16.gmra.mxu0 %vm224_vm0, %v7725_v33  ;;  %6258 = vmatmul.msk.bf16.gmra.mxu1 %vm224_vm0, %v7724_v14 }
  0x73   :  { %6267 = vmatmul.msk.bf16.gmra.mxu2 %vm224_vm0, %v7725_v33 }
  0x74   :  { %6275 = vmatmul.msk.bf16.gmra.mxu3 %vm224_vm0, %v7725_v33 }
  0x82   :  { %6252 = vmatmul.msk.bf16.gmra.mxu0 %vm224_vm0, %v7726_v43  ;;  %6259 = vmatmul.msk.bf16.gmra.mxu1 %vm224_vm0, %v7725_v33 }
  0x83   :  { %6268 = vmatmul.msk.bf16.gmra.mxu2 %vm224_vm0, %v7726_v43 }
  0x84   :  { %6276 = vmatmul.msk.bf16.gmra.mxu3 %vm224_vm0, %v7726_v43 }
  0x92   :  { %6260 = vmatmul.msk.bf16.gmra.mxu1 %vm224_vm0, %v7726_v43  ;;  %714 = vmatmul.bf16.vlgmr.msrb.gmra.mxu0 %v11218_v53 }
  0x93   :  { %6269 = vmatmul.msk.bf16.gmra.mxu2 %vm224_vm0, %v8894_v10 }
  0x94   :  { %6277 = vmatmul.msk.bf16.gmra.mxu3 %vm224_vm0, %v8894_v10 }
  0x9f   :  { %v258_v54 = vpop.f32.mrf.mxu0  ;;  %v8931_v55 = vpop.f32.mrf.mxu1 }
  0xa0   :  { %11236 = vst [vmem:[#allocation23_spill] sm:$0xff] %v8931_v55  ;;  %v259_v46 = vadd.f32 %v258_v54, %v9042_v45 }
  0xa2   :  { %6261 = vmatmul.msk.bf16.gmra.mxu1 %vm224_vm0, %v8894_v10 }
  0xa3   :  { %742 = vmatmul.bf16.vlgmr.msrb.gmra.mxu2 %v11218_v53 }
  0xa4   :  { %756 = vmatmul.bf16.vlgmr.msrb.gmra.mxu3 %v11218_v53 }
  0xa6   :  { %v8937_v56 = vpop.f32.mrf.mxu2 }
  0xa7   :  { %v8939_v57 = vpop.f32.mrf.mxu3  ;;  %v8941_v58 = vpop.f32.mrf.mxu0 }
  0xa8   :  { %v8943_v59 = vpop.f32.mrf.mxu1 }
  0xa9   :  { %11237 = vst [vmem:[#allocation24_spill] sm:$0xff] %v8943_v59 }
  0xae   :  { %v8945_v60 = vpop.f32.mrf.mxu2 }
  0xaf   :  { %v8947_v61 = vpop.f32.mrf.mxu3  ;;  %v8949_v62 = vpop.f32.mrf.mxu0 }
  0xb0   :  { %v8951_v63 = vpop.f32.mrf.mxu1 }
  0xb2   :  { %728 = vmatmul.bf16.vlgmr.msra.gmra.mxu1 %v11218_v53 }
  0xb6   :  { %v8954_v10 = vpop.f32.mrf.mxu2 }
  0xb7   :  { %v8956_v0 = vpop.f32.mrf.mxu3  ;;  %v8958_v1 = vpop.f32.mrf.mxu0 }
  0xb8   :  { %v8960_v2 = vpop.f32.mrf.mxu1 }
  0xbe   :  { %v8962_v3 = vpop.f32.mrf.mxu2 }
  0xbf   :  { %v8964_v4 = vpop.f32.mrf.mxu3  ;;  %v8966_v5 = vpop.f32.mrf.mxu0 }
  0xc0   :  { %v8968_v6 = vpop.f32.mrf.mxu1 }
  0xc6   :  { %v8970_v7 = vpop.f32.mrf.mxu2 }
  0xc7   :  { %v8972_v8 = vpop.f32.mrf.mxu3  ;;  %v8974_v9 = vpop.f32.mrf.mxu0 }
  0xc8   :  { %v8976_v11 = vpop.f32.mrf.mxu1 }
  0xce   :  { %v8978_v12 = vpop.f32.mrf.mxu2 }
  0xcf   :  { %v8980_v13 = vpop.f32.mrf.mxu3  ;;  %v8982_v14 = vpop.f32.mrf.mxu0 }
  0xd0   :  { %v8984_v15 = vpop.f32.mrf.mxu1 }
  0xd6   :  { %v8986_v16 = vpop.f32.mrf.mxu2 }
  0xd7   :  { %v8988_v17 = vpop.f32.mrf.mxu3  ;;  %v8990_v18 = vpop.f32.mrf.mxu0 }
  0xd8   :  { %v8992_v19 = vpop.f32.mrf.mxu1 }
  0xde   :  { %v8994_v20 = vpop.f32.mrf.mxu2 }
  0xdf   :  { %v8996_v21 = vpop.f32.mrf.mxu3  ;;  %v8998_v22 = vpop.f32.mrf.mxu0 }
  0xe0   :  { %v9000_v23 = vpop.f32.mrf.mxu1 }
  0xe6   :  { %v9002_v24 = vpop.f32.mrf.mxu2 }
  0xe7   :  { %11238 = vst [vmem:[#allocation25_spill] sm:$0xff] %v9002_v24  ;;  %v9004_v25 = vpop.f32.mrf.mxu3  ;;  %v9006_v26 = vpop.f32.mrf.mxu0  ;;  %v7765_v24 = vld [vmem:[#allocation12 + $0xc] sm:$0xf] }
  0xe8   :  { %v9008_v27 = vpop.f32.mrf.mxu1 }
  0xee   :  { %v9010_v28 = vpop.f32.mrf.mxu2 }
  0xef   :  { %11239 = vst [vmem:[#allocation26_spill] sm:$0xff] %v9010_v28  ;;  %v9012_v29 = vpop.f32.mrf.mxu3  ;;  %v9014_v30 = vpop.f32.mrf.mxu0  ;;  %v6510_v28 = vld [vmem:[#allocation12 + $0xc0] sm:$0xf] }
  0xf0   :  { %11240 = vst [vmem:[#allocation27_spill] sm:$0xff] %v9012_v29  ;;  %v9016_v31 = vpop.f32.mrf.mxu1 }
  0xf1   :  { %11241 = vst [vmem:[#allocation28_spill] sm:$0xff] %v9014_v30 }
  0xf6   :  { %v9018_v32 = vpop.f32.mrf.mxu2 }
  0xf7   :  { %11242 = vst [vmem:[#allocation29_spill] sm:$0xff] %v9018_v32  ;;  %v9020_v33 = vpop.f32.mrf.mxu3  ;;  %v9022_v34 = vpop.f32.mrf.mxu0 }
  0xf8   :  { %11243 = vst [vmem:[#allocation30_spill] sm:$0xff] %v9020_v33  ;;  %v9024_v35 = vpop.f32.mrf.mxu1  ;;  %v7793_v33 = vld [vmem:[#allocation12 + $0xec] sm:$0xf] }
  0xf9   :  { %11244 = vst [vmem:[#allocation31_spill] sm:$0xff] %v9022_v34 }
  0xfa   :  { %11245 = vst [vmem:[#allocation32_spill] sm:$0xff] %v9024_v35  ;;  %v6424_v35 = vld [vmem:[#allocation12 + $0x18] sm:$0xf0] }
  0xfe   :  { %v9026_v36 = vpop.f32.mrf.mxu2 }
  0xff   :  { %11246 = vst [vmem:[#allocation33_spill] sm:$0xff] %v9026_v36  ;;  %v9028_v37 = vpop.f32.mrf.mxu3  ;;  %v9030_v38 = vpop.f32.mrf.mxu0 }
 0x100   :  { %11247 = vst [vmem:[#allocation34_spill] sm:$0xff] %v9028_v37  ;;  %v9032_v39 = vpop.f32.mrf.mxu1 }
 0x101   :  { %11248 = vst [vmem:[#allocation35_spill] sm:$0xff] %v9030_v38 }
 0x102   :  { %11249 = vst [vmem:[#allocation36_spill] sm:$0xff] %v9032_v39  ;;  %v6536_v39 = vld [vmem:[#allocation12 + $0xf8] sm:$0xf0] }
 0x106   :  { %v9034_v40 = vpop.f32.mrf.mxu2 }
 0x107   :  { %11250 = vst [vmem:[#allocation37_spill] sm:$0xff] %v9034_v40  ;;  %v9036_v41 = vpop.f32.mrf.mxu3  ;;  %v9038_v42 = vpop.f32.mrf.mxu0 }
 0x108   :  { %11251 = vst [vmem:[#allocation38_spill] sm:$0xff] %v9036_v41  ;;  %v9040_v43 = vpop.f32.mrf.mxu1 }
 0x109   :  { %11252 = vst [vmem:[#allocation39_spill] sm:$0xff] %v9038_v42 }
 0x10a   :  { %11253 = vst [vmem:[#allocation40_spill] sm:$0xff] %v9040_v43  ;;  %v6528_v43 = vld [vmem:[#allocation12 + $0xf0] sm:$0xf0] }
 0x10e   :  { %v9045_v47 = vpop.f32.mrf.mxu2 }
 0x10f   :  { %11254 = vst [vmem:[#allocation41_spill] sm:$0xff] %v9045_v47  ;;  %v9047_v48 = vpop.f32.mrf.mxu3  ;;  %v715_v49 = vpop.f32.mrf.mxu0 }
 0x110   :  { %11255 = vst [vmem:[#allocation42_spill] sm:$0xff] %v9047_v48  ;;  %v9049_v50 = vpop.f32.mrf.mxu1  ;;  %v770_v51 = vadd.f32 %v715_v49, %v259_v46  ;;  %v261_v48 = vadd.f32 %v8941_v58, %v9042_v45  ;;  %v9065_v49 = vperm.slane %v154_v44, 2  ;;  %v9071_v58 = vperm.slane %v154_v44, 1 }
 0x111   :  { %11256 = vst [vmem:[#allocation43_spill] sm:$0xff] %v9049_v50 }
 0x112   :  { %v6406_v52 = vmul.f32 -1.442695, %v770_v51 }
 0x114   :  { %8124 = vpow2.f32 %v6406_v52 }
 0x116   :  { %v9051_v53 = vpop.f32.mrf.mxu2 }
 0x117   :  { %11257 = vst [vmem:[#allocation44_spill] sm:$0xff] %v9051_v53  ;;  %v9053_v59 = vpop.f32.mrf.mxu3  ;;  %v717_v47 = vpop.f32.mrf.mxu0 }
 0x118   :  { %11258 = vst [vmem:[#allocation45_spill] sm:$0xff] %v9053_v59  ;;  %v9055_v55 = vpop.f32.mrf.mxu1  ;;  %v774_v51 = vadd.f32 %v717_v47, %v261_v48  ;;  %v357_v59 = vadd.f32 %v8937_v56, %v9065_v49  ;;  %v6526_v56 = vld [vmem:[#allocation12 + $0xe0] sm:$0xf]  ;;  %v7794_v48 = vld [vmem:[#allocation12 + $0xec] sm:$0xf0] }
 0x119   :  { %11259 = vst [vmem:[#allocation46_spill] sm:$0xff] %v9055_v55 }
 0x11a   :  { %v8125_v40 = vpop.eup %8124 }
 0x11b   :  { %v784_v42 = vadd.f32 1.0, %v8125_v40  ;;  %v9069_v40 = vperm.slane %v154_v44, 3  ;;  %v6534_v44 = vld [vmem:[#allocation12 + $0xe8] sm:$0xf] }
 0x11d   :  { %8126 = vrcp.f32 %v784_v42  ;;  %v797_v38 = vand.u32 2147483648, %v784_v42  ;;  %v795_v37 = vand.u32 2147483647, %v784_v42  ;;  %v406_v47 = vadd.f32 %v8939_v57, %v9069_v40 }
 0x11e   :  { %v9057_v54 = vpop.f32.mrf.mxu2  ;;  %vm791_vm2 = vweird.f32 %v784_v42 }
 0x11f   :  { %11260 = vst [vmem:[#allocation47_spill] sm:$0xff] %v9057_v54  ;;  %v9059_v41 = vpop.f32.mrf.mxu3  ;;  %v6407_v54 = vmul.f32 -1.442695, %v774_v51  ;;  %vm796_vm4 = vcmp.eq.f32.partialorder %v795_v37, 8.507059e+37  ;;  %v7789_v37 = vld [vmem:[#allocation12 + $0xcc] sm:$0xf] }
 0x120   :  { %11261 = vst [vmem:[#allocation48_spill] sm:$0xff] %v9059_v41  ;;  %v9063_v46 = vpop.f32.mrf.mxu1 }
 0x121   :  { %11262 = vst [vmem:[#allocation49_spill] sm:$0xff] %v9063_v46 }
 0x123   :  { %v8127_v52 = vpop.eup %8126 }
 0x124   :  { %v787_v53 = vmul.f32 %v8127_v52, %v784_v42  ;;  %vm792_vm1 = vweird.f32 %v8127_v52  ;;  %v6539_v42 = vor.u32 %v7793_v33, %v6536_v39 }
 0x125   :  { %vm793_vm3 = vmor %vm791_vm2, %vm792_vm1 }
 0x126   :  { %v788_v55 = vsub.f32 1.0, %v787_v53  ;;  %v743_v50 = vpop.f32.mrf.mxu2  ;;  %v7792_v53 = vld [vmem:[#allocation12 + $0xe4] sm:$0xf]  ;;  %1148 = vmatpush.bf16.msra.mxu3 %v6539_v42 }
 0x127   :  { %v772_v41 = vadd.f32 %v743_v50, %v357_v59  ;;  %v757_v36 = vpop.f32.mrf.mxu3  ;;  %v798_v59 = vor.u32 1.1754944e-38, %v797_v38  ;;  %v6527_v50 = vor.u32 %v7794_v48, %v6526_v56  ;;  %v6531_v34 = vor.u32 %v7792_v53, %v6528_v43  ;;  %v7788_v56 = vld [vmem:[#allocation12 + $0xc4] sm:$0xf]  ;;  %v6512_v48 = vld [vmem:[#allocation12 + $0xd0] sm:$0xf0] }
 0x128   :  { %v789_v46 = vmul.f32 %v8127_v52, %v788_v55  ;;  %v9073_v32 = vpop.f32.mrf.mxu1  ;;  %v7795_v55 = vld [vmem:[#allocation12 + $0xf4] sm:$0xf0]  ;;  %v773_v30 = vadd.f32 %v757_v36, %v406_v47  ;;  %v408_v38 = vadd.f32 %v8947_v61, %v9069_v40  ;;  %v308_v53 = vadd.f32 %v8951_v63, %v9071_v58  ;;  %v6494_v63 = vld [vmem:[#allocation12 + $0xa0] sm:$0xf] }
 0x129   :  { %11263 = vst [vmem:[#allocation50_spill] sm:$0xff] %v9073_v32  ;;  %8128 = vtanh.f32 %v772_v41  ;;  %1106 = vmatpush.bf16.msra.mxu0 %v6527_v50  ;;  %1120 = vmatpush.bf16.msrb.mxu1 %v6531_v34  ;;  %v6535_v41 = vor.u32 %v7795_v55, %v6534_v44  ;;  %v6515_v36 = vor.u32 %v7788_v56, %v6512_v48  ;;  %v7791_v34 = vld [vmem:[#allocation12 + $0xd4] sm:$0xf0]  ;;  %v7786_v55 = vld [vmem:[#allocation12 + $0xac] sm:$0xf0] }
 0x12a   :  { %8130 = vpow2.f32 %v6407_v54  ;;  %v790_v51 = vadd.f32 %v8127_v52, %v789_v46  ;;  %v7790_v54 = vld [vmem:[#allocation12 + $0xcc] sm:$0xf0]  ;;  %v6410_v47 = vmul.f32 -1.442695, %v773_v30  ;;  %v6495_v42 = vor.u32 %v7786_v55, %v6494_v63  ;;  %v6502_v56 = vld [vmem:[#allocation12 + $0xa8] sm:$0xf] }
 0x12b   :  { %v6511_v46 = vor.u32 %v7790_v54, %v6510_v28  ;;  %1134 = vmatpush.bf16.msra.mxu2 %v6535_v41  ;;  %v7784_v41 = vld [vmem:[#allocation12 + $0xa4] sm:$0xf]  ;;  %v6496_v54 = vld [vmem:[#allocation12 + $0xb0] sm:$0xf0]  ;;  %v6462_v63 = vld [vmem:[#allocation12 + $0x60] sm:$0xf] }
 0x12c   :  { %v794_v32 = vsel %vm793_vm3, %v8127_v52, %v790_v51  ;;  %v6499_v30 = vor.u32 %v7784_v41, %v6496_v54  ;;  %8132 = vpow2.f32 %v6410_v47  ;;  %v7778_v55 = vld [vmem:[#allocation12 + $0x6c] sm:$0xf0] }
 0x12d   :  { %v799_v57 = vsel %vm796_vm4, %v798_v59, %v794_v32  ;;  %v6518_v32 = vld [vmem:[#allocation12 + $0xc8] sm:$0xf]  ;;  %1107 = vmatpush.bf16.msra.mxu0 %v6511_v46  ;;  %v6520_v59 = vld [vmem:[#allocation12 + $0xd8] sm:$0xf0]  ;;  %1121 = vmatpush.bf16.msrb.mxu1 %v6515_v36  ;;  %v7782_v36 = vld [vmem:[#allocation12 + $0x8c] sm:$0xf0]  ;;  %v6463_v54 = vor.u32 %v7778_v55, %v6462_v63 }
 0x12e   :  { %v6519_v28 = vor.u32 %v7791_v34, %v6518_v32  ;;  %v6523_v44 = vor.u32 %v7789_v37, %v6520_v59  ;;  %v7780_v37 = vld [vmem:[#allocation12 + $0x84] sm:$0xf]  ;;  %v7783_v59 = vld [vmem:[#allocation12 + $0x94] sm:$0xf0] }
 0x12f   :  { %v8129_v43 = vpop.eup %8128  ;;  %v759_v52 = vpop.f32.mrf.mxu3 }
 0x130   :  { %v8131_v33 = vpop.eup %8130  ;;  %v9081_v39 = vmul.f32 %v8129_v43, %v799_v57  ;;  %v777_v51 = vadd.f32 %v759_v52, %v408_v38  ;;  %v729_v61 = vpop.f32.mrf.mxu1  ;;  %1135 = vmatpush.bf16.msra.mxu2 %v6519_v28  ;;  %1149 = vmatpush.bf16.msra.mxu3 %v6523_v44  ;;  %v7787_v57 = vld [vmem:[#allocation12 + $0xb4] sm:$0xf0]  ;;  %v7785_v43 = vld [vmem:[#allocation12 + $0xac] sm:$0xf]  ;;  %v6478_v52 = vld [vmem:[#allocation12 + $0x80] sm:$0xf]  ;;  %v310_v28 = vadd.f32 %v8960_v2, %v9071_v58 }
 0x131   :  { %v771_v50 = vadd.f32 %v729_v61, %v308_v53  ;;  %v9083_v48 = vadd.f32 1.0, %v8131_v33  ;;  %1108 = vmatpush.bf16.msra.mxu0 %v6495_v42  ;;  %v6503_v46 = vor.u32 %v7787_v57, %v6502_v56  ;;  %v6504_v53 = vld [vmem:[#allocation12 + $0xb8] sm:$0xf0]  ;;  %1122 = vmatpush.bf16.msrb.mxu1 %v6499_v30  ;;  %v6479_v34 = vor.u32 %v7782_v36, %v6478_v52  ;;  %v6480_v33 = vld [vmem:[#allocation12 + $0x90] sm:$0xf0] }
 0x132   :  { %v6411_v38 = vmul.f32 -1.442695, %v777_v51  ;;  %v6507_v32 = vor.u32 %v7785_v43, %v6504_v53  ;;  %v6486_v61 = vld [vmem:[#allocation12 + $0x88] sm:$0xf]  ;;  %v6483_v51 = vor.u32 %v7780_v37, %v6480_v33  ;;  %v7776_v56 = vld [vmem:[#allocation12 + $0x64] sm:$0xf]  ;;  %v8133_v52 = vpop.eup %8132 }
 0x133   :  { %v6408_v29 = vmul.f32 -1.442695, %v771_v50  ;;  %v7781_v50 = vld [vmem:[#allocation12 + $0x8c] sm:$0xf]  ;;  %v6487_v44 = vor.u32 %v7783_v59, %v6486_v61  ;;  %v6464_v2 = vld [vmem:[#allocation12 + $0x70] sm:$0xf0]  ;;  %vm806_vm7 = vweird.f32 %v9083_v48 }
 0x134   :  { %1136 = vmatpush.bf16.msra.mxu2 %v6503_v46  ;;  %1150 = vmatpush.bf16.msra.mxu3 %v6507_v32  ;;  %v6470_v30 = vld [vmem:[#allocation12 + $0x68] sm:$0xf]  ;;  %v6467_v57 = vor.u32 %v7776_v56, %v6464_v2  ;;  %v7779_v46 = vld [vmem:[#allocation12 + $0x74] sm:$0xf0]  ;;  %v7777_v43 = vld [vmem:[#allocation12 + $0x6c] sm:$0xf] }
 0x135   :  { %8134 = vpow2.f32 %v6408_v29  ;;  %1109 = vmatpush.bf16.msra.mxu0 %v6479_v34  ;;  %v6488_v29 = vld [vmem:[#allocation12 + $0x98] sm:$0xf0]  ;;  %1123 = vmatpush.bf16.msrb.mxu1 %v6483_v51  ;;  %v6471_v36 = vor.u32 %v7779_v46, %v6470_v30  ;;  %v6446_v32 = vld [vmem:[#allocation12 + $0x40] sm:$0xf]  ;;  %v7774_v33 = vld [vmem:[#allocation12 + $0x4c] sm:$0xf0] }
 0x136   :  { %8136 = vrcp.f32 %v9083_v48  ;;  %v6491_v42 = vor.u32 %v7781_v50, %v6488_v29  ;;  %v6472_v53 = vld [vmem:[#allocation12 + $0x78] sm:$0xf0]  ;;  %v7772_v61 = vld [vmem:[#allocation12 + $0x44] sm:$0xf]  ;;  %v6454_v50 = vld [vmem:[#allocation12 + $0x48] sm:$0xf] }
 0x137   :  { %8138 = vpow2.f32 %v6411_v38  ;;  %v6475_v37 = vor.u32 %v7777_v43, %v6472_v53  ;;  %v9092_v63 = vadd.f32 1.0, %v8133_v52  ;;  %v7770_v30 = vld [vmem:[#allocation12 + $0x2c] sm:$0xf0]  ;;  %v6432_v46 = vld [vmem:[#allocation12 + $0x30] sm:$0xf0] }
 0x138   :  { %v731_v47 = vpop.f32.mrf.mxu1  ;;  %1137 = vmatpush.bf16.msra.mxu2 %v6487_v44  ;;  %1151 = vmatpush.bf16.msra.mxu3 %v6491_v42  ;;  %v6447_v44 = vor.u32 %v7774_v33, %v6446_v32  ;;  %v6456_v42 = vld [vmem:[#allocation12 + $0x58] sm:$0xf0]  ;;  %v6438_v32 = vld [vmem:[#allocation12 + $0x28] sm:$0xf]  ;;  %v6414_v33 = vld [vmem:[#allocation12] sm:$0xf] }
 0x139   :  { %v775_v41 = vadd.f32 %v731_v47, %v310_v28  ;;  %1110 = vmatpush.bf16.msra.mxu0 %v6463_v54  ;;  %v6448_v28 = vld [vmem:[#allocation12 + $0x50] sm:$0xf0]  ;;  %1124 = vmatpush.bf16.msrb.mxu1 %v6467_v57  ;;  %v7775_v47 = vld [vmem:[#allocation12 + $0x54] sm:$0xf0]  ;;  %v6430_v54 = vld [vmem:[#allocation12 + $0x20] sm:$0xf]  ;;  %vm869_vm2 = vweird.f32 %v9092_v63 }
 0x13a   :  { %v6451_v55 = vor.u32 %v7772_v61, %v6448_v28  ;;  %v6455_v56 = vor.u32 %v7775_v47, %v6454_v50  ;;  %v7768_v57 = vld [vmem:[#allocation12 + $0x24] sm:$0xf]  ;;  %v6431_v52 = vor.u32 %v7770_v30, %v6430_v54  ;;  %v7766_v28 = vld [vmem:[#allocation12 + $0xc] sm:$0xf0]  ;;  %v6416_v47 = vld [vmem:[#allocation12 + $0x10] sm:$0xf0] }
 0x13b   :  { %v6409_v38 = vmul.f32 -1.442695, %v775_v41  ;;  %v8135_v34 = vpop.eup %8134  ;;  %v7773_v41 = vld [vmem:[#allocation12 + $0x4c] sm:$0xf]  ;;  %v7764_v50 = vld [vmem:[#allocation12 + $0x4] sm:$0xf] }
 0x13c   :  { %v9088_v51 = vpop.eup %8136  ;;  %v9090_v59 = vadd.f32 1.0, %v8135_v34  ;;  %1138 = vmatpush.bf16.msra.mxu2 %v6471_v36  ;;  %1152 = vmatpush.bf16.msra.mxu3 %v6475_v37  ;;  %v6459_v2 = vor.u32 %v7773_v41, %v6456_v42  ;;  %v7771_v34 = vld [vmem:[#allocation12 + $0x34] sm:$0xf0]  ;;  %v7769_v36 = vld [vmem:[#allocation12 + $0x2c] sm:$0xf]  ;;  %v6415_v41 = vor.u32 %v7766_v28, %v6414_v33 }
 0x13d   :  { %v8139_v29 = vpop.eup %8138  ;;  %8140 = vpow2.f32 %v6409_v38  ;;  %1111 = vmatpush.bf16.msra.mxu0 %v6447_v44  ;;  %v802_v43 = vmul.f32 %v9088_v51, %v9083_v48  ;;  %1125 = vmatpush.bf16.msrb.mxu1 %v6451_v55  ;;  %v6435_v38 = vor.u32 %v7768_v57, %v6432_v46  ;;  %v6440_v37 = vld [vmem:[#allocation12 + $0x38] sm:$0xf0]  ;;  %v6439_v61 = vor.u32 %v7771_v34, %v6438_v32  ;;  %v6422_v55 = vld [vmem:[#allocation12 + $0x8] sm:$0xf]  ;;  %v7767_v42 = vld [vmem:[#allocation12 + $0x14] sm:$0xf0]  ;;  %v745_v32 = vpop.f32.mrf.mxu2 }
 0x13e   :  { %8142 = vrcp.f32 %v9090_v59  ;;  %v9097_v53 = vadd.f32 1.0, %v8139_v29  ;;  %v6443_v29 = vor.u32 %v7769_v36, %v6440_v37  ;;  %v6419_v46 = vor.u32 %v7764_v50, %v6416_v47 }
 0x13f   :  { %8144 = vrcp.f32 %v9092_v63  ;;  %v803_v30 = vsub.f32 1.0, %v802_v43  ;;  %v6427_v43 = vor.u32 %v7765_v24, %v6424_v35  ;;  %v835_v37 = vand.u32 2147483648, %v9090_v59 }
 0x140   :  { %1139 = vmatpush.bf16.msra.mxu2 %v6455_v56  ;;  %1153 = vmatpush.bf16.msra.mxu3 %v6459_v2  ;;  %8146 = vrcp.f32 %v9097_v53  ;;  %v6423_v2 = vor.u32 %v7767_v42, %v6422_v55  ;;  %vm829_vm6 = vweird.f32 %v9090_v59  ;;  %vm807_vm8 = vweird.f32 %v9088_v51 }
 0x141   :  { %1112 = vmatpush.bf16.msra.mxu0 %v6431_v52  ;;  %1126 = vmatpush.bf16.msrb.mxu1 %v6435_v38  ;;  %v359_v38 = vadd.f32 %v8945_v60, %v9065_v49  ;;  %v804_v36 = vmul.f32 %v9088_v51, %v803_v30  ;;  %vm9124_vm11 = vmor %vm806_vm7, %vm807_vm8 }
 0x143   :  { %v8141_v44 = vpop.eup %8140  ;;  %v776_v50 = vadd.f32 %v745_v32, %v359_v38  ;;  %v805_v35 = vadd.f32 %v9088_v51, %v804_v36 }
 0x144   :  { %v8143_v54 = vpop.eup %8142  ;;  %v9100_v57 = vadd.f32 1.0, %v8141_v44  ;;  %1140 = vmatpush.bf16.msra.mxu2 %v6439_v61  ;;  %1154 = vmatpush.bf16.msra.mxu3 %v6443_v29  ;;  %v833_v61 = vand.u32 2147483647, %v9090_v59  ;;  %v836_v44 = vor.u32 1.1754944e-38, %v835_v37  ;;  %v812_v29 = vand.u32 2147483648, %v9083_v48 }
 0x145   :  { %v825_v56 = vmul.f32 %v8143_v54, %v9090_v59  ;;  %v9105_v52 = vpop.eup %8144  ;;  %1113 = vmatpush.bf16.msra.mxu0 %v6415_v41  ;;  %1127 = vmatpush.bf16.msrb.mxu1 %v6419_v46  ;;  %vm830_vm5 = vweird.f32 %v8143_v54 }
 0x146   :  { %8148 = vrcp.f32 %v9100_v57  ;;  %v865_v28 = vmul.f32 %v9105_v52, %v9092_v63  ;;  %v9114_v47 = vpop.eup %8146  ;;  %vm831_vm9 = vmor %vm829_vm6, %vm830_vm5  ;;  %vm834_vm10 = vcmp.eq.f32.partialorder %v833_v61, 8.507059e+37  ;;  %v848_v36 = vand.u32 2147483647, %v9100_v57 }
 0x147   :  { %v826_v34 = vsub.f32 1.0, %v825_v56  ;;  %8150 = vtanh.f32 %v776_v50  ;;  %v880_v59 = vmul.f32 %v9114_v47, %v9097_v53  ;;  %v810_v56 = vand.u32 2147483647, %v9083_v48 }
 0x148   :  { %1141 = vmatpush.bf16.msra.mxu2 %v6423_v2  ;;  %1155 = vmatpush.bf16.msra.mxu3 %v6427_v43  ;;  %v866_v42 = vsub.f32 1.0, %v865_v28  ;;  %vm844_vm14 = vweird.f32 %v9100_v57  ;;  %vm849_vm0 = vcmp.eq.f32.partialorder %v848_v36, 8.507059e+37  ;;  %vm870_vm1 = vweird.f32 %v9105_v52 }
 0x149   :  { %v827_v33 = vmul.f32 %v8143_v54, %v826_v34  ;;  %v850_v34 = vand.u32 2147483648, %v9100_v57  ;;  %v881_v61 = vsub.f32 1.0, %v880_v59  ;;  %vm811_vm13 = vcmp.eq.f32.partialorder %v810_v56, 8.507059e+37  ;;  %vm871_vm3 = vmor %vm869_vm2, %vm870_vm1 }
 0x14a   :  { %v867_v37 = vmul.f32 %v9105_v52, %v866_v42  ;;  %vm885_vm4 = vweird.f32 %v9114_v47  ;;  %v890_v56 = vand.u32 2147483648, %v9097_v53  ;;  %vm884_vm5 = vweird.f32 %v9097_v53 }
 0x14b   :  { %v828_v24 = vadd.f32 %v8143_v54, %v827_v33  ;;  %v813_v33 = vor.u32 1.1754944e-38, %v812_v29  ;;  %v875_v29 = vand.u32 2147483648, %v9092_v63  ;;  %vm886_vm7 = vmor %vm884_vm5, %vm885_vm4 }
 0x14c   :  { %v8149_v60 = vpop.eup %8148 }
 0x14d   :  { %v832_v41 = vsel %vm831_vm9, %v8143_v54, %v828_v24  ;;  %v840_v55 = vmul.f32 %v8149_v60, %v9100_v57  ;;  %v809_v54 = vsel %vm9124_vm11, %v9088_v51, %v805_v35  ;;  %vm845_vm12 = vweird.f32 %v8149_v60  ;;  %v8151_v28 = vpop.eup %8150 }
 0x14e   :  { %v837_v30 = vsel %vm834_vm10, %v836_v44, %v832_v41  ;;  %v814_v50 = vsel %vm811_vm13, %v813_v33, %v809_v54  ;;  %vm846_vm15 = vmor %vm844_vm14, %vm845_vm12  ;;  %v851_v51 = vor.u32 1.1754944e-38, %v850_v34  ;;  %v868_v44 = vadd.f32 %v9105_v52, %v867_v37 }
 0x14f   :  { %v894_v2 = vmul.f32 0.0, %v837_v30  ;;  %v841_v32 = vsub.f32 1.0, %v840_v55  ;;  %v897_v41 = vmul.f32 %v8151_v28, %v814_v50  ;;  %v873_v57 = vand.u32 2147483647, %v9092_v63 }
 0x150   :  { %v872_v42 = vsel %vm871_vm3, %v9105_v52, %v868_v44  ;;  %v876_v46 = vor.u32 1.1754944e-38, %v875_v29  ;;  %v888_v63 = vand.u32 2147483647, %v9097_v53  ;;  %v891_v54 = vor.u32 1.1754944e-38, %v890_v56  ;;  %v6660_v56 = vld [vmem:[#allocation12 + $0xe0] sm:$0xf] }
 0x151   :  { %v9134_v43 = vadd.f32 %v9081_v39, %v894_v2  ;;  %v842_v38 = vmul.f32 %v8149_v60, %v841_v32  ;;  %v882_v39 = vmul.f32 %v9114_v47, %v881_v61  ;;  %vm874_vm6 = vcmp.eq.f32.partialorder %v873_v57, 8.507059e+37 }
 0x152   :  { %v877_v2 = vsel %vm874_vm6, %v876_v46, %v872_v42  ;;  %vm889_vm8 = vcmp.eq.f32.partialorder %v888_v63, 8.507059e+37  ;;  %v264_v53 = vadd.f32 %v8949_v62, %v9042_v45  ;;  %v315_v62 = vadd.f32 %v8976_v11, %v9071_v58  ;;  %v7826_v63 = vld [vmem:[#allocation12 + $0xec] sm:$0xf0] }
 0x153   :  { %v843_v48 = vadd.f32 %v8149_v60, %v842_v38  ;;  %8152 = vtanh.f32 %v9134_v43  ;;  %v883_v59 = vadd.f32 %v9114_v47, %v882_v39 }
 0x155   :  { %v847_v24 = vsel %vm846_vm15, %v8149_v60, %v843_v48  ;;  %v887_v32 = vsel %vm886_vm7, %v9114_v47, %v883_v59  ;;  %v313_v47 = vadd.f32 %v8968_v6, %v9071_v58 }
 0x156   :  { %v852_v35 = vsel %vm849_vm0, %v851_v51, %v847_v24  ;;  %v892_v38 = vsel %vm889_vm8, %v891_v54, %v887_v32  ;;  %v6662_v54 = vld [vmem:[#allocation12 + $0xf0] sm:$0xf0] }
 0x157   :  { %v895_v55 = vmul.f32 0.0, %v852_v35 }
 0x159   :  { %v9146_v60 = vadd.f32 %v897_v41, %v895_v55  ;;  %v8153_v30 = vpop.eup %8152  ;;  %v411_v41 = vadd.f32 %v8956_v0, %v9069_v40  ;;  %v266_v55 = vadd.f32 %v8958_v1, %v9042_v45  ;;  %v6668_v0 = vld [vmem:[#allocation12 + $0xe8] sm:$0xf] }
 0x15a   :  { %v902_v52 = vmul.f32 %v8153_v30, %v877_v2  ;;  %v7824_v2 = vld [vmem:[#allocation12 + $0xe4] sm:$0xf] }
 0x15b   :  { %8154 = vtanh.f32 %v9146_v60  ;;  %v6665_v1 = vor.u32 %v7824_v2, %v6662_v54  ;;  %v6628_v2 = vld [vmem:[#allocation12 + $0xa0] sm:$0xf] }
 0x15c   :  { %v904_v37 = vpack.c.bf16 %v902_v52, %v902_v52 }
 0x15d   :  { %1522 = vmatpush.bf16.msra.mxu1 %v6665_v1 }
 0x15e   :  { %v942_v48 = vunpack.c.l.b16 %v904_v37  ;;  %v7827_v37 = vld [vmem:[#allocation12 + $0xf4] sm:$0xf0] }
 0x161   :  { %v8155_v34 = vpop.eup %8154 }
 0x162   :  { %v903_v36 = vmul.f32 %v8155_v34, %v892_v38 }
 0x164   :  { %v905_v33 = vpack.c.bf16 %v903_v36, %v903_v36  ;;  %v8071_v61 = vpack.c.bf16 %v903_v36, %v902_v52  ;;  %v6661_v52 = vor.u32 %v7826_v63, %v6660_v56 }
 0x166   :  { %8072 = vst [vmem:[#allocation4 + $0x30] sm:$0xff] %v8071_v61   ;;  %v943_v28 = vunpack.c.l.b16 %v905_v33  ;;  %1508 = vmatpush.bf16.msrb.mxu0 %v6661_v52  ;;  %v6669_v61 = vor.u32 %v7827_v37, %v6668_v0  ;;  %v7816_v52 = vld [vmem:[#allocation12 + $0xa4] sm:$0xf] }
 0x168   :  { %v944_v50 = vpack.c.b16 %v943_v28, %v942_v48  ;;  %v7825_v48 = vld [vmem:[#allocation12 + $0xec] sm:$0xf]  ;;  %v6670_v28 = vld [vmem:[#allocation12 + $0xf8] sm:$0xf0]  ;;  %1536 = vmatpush.bf16.msrb.mxu2 %v6669_v61 }
 0x16a   :  { %1114 = vmatmul.bf16.vlgmr.msra.gmra.mxu0 %v944_v50  ;;  %1128 = vmatmul.bf16.vlgmr.msrb.gmra.mxu1 %v944_v50 }
 0x16b   :  { %1142 = vmatmul.bf16.vlgmr.msra.gmra.mxu2 %v944_v50  ;;  %1156 = vmatmul.bf16.vlgmr.msra.gmra.mxu3 %v944_v50 }
 0x1e7   :  { %v1115_v51 = vpop.f32.mrf.mxu0  ;;  %v1129_v24 = vpop.f32.mrf.mxu1 }
 0x1e8   :  { %v1171_v39 = vadd.f32 %v1115_v51, %v264_v53  ;;  %v1172_v35 = vadd.f32 %v1129_v24, %v313_v47  ;;  %v6673_v47 = vor.u32 %v7825_v48, %v6670_v28  ;;  %v6644_v51 = vld [vmem:[#allocation12 + $0xc0] sm:$0xf]  ;;  %v7822_v24 = vld [vmem:[#allocation12 + $0xcc] sm:$0xf0]  ;;  %v364_v28 = vadd.f32 %v8962_v3, %v9065_v49 }
 0x1ea   :  { %v6540_v44 = vmul.f32 -1.442695, %v1171_v39  ;;  %v6542_v29 = vmul.f32 -1.442695, %v1172_v35  ;;  %v413_v39 = vadd.f32 %v8964_v4, %v9069_v40  ;;  %1550 = vmatpush.bf16.msrb.mxu3 %v6673_v47 }
 0x1ec   :  { %8156 = vpow2.f32 %v6540_v44  ;;  %v7820_v44 = vld [vmem:[#allocation12 + $0xc4] sm:$0xf] }
 0x1ed   :  { %8158 = vpow2.f32 %v6542_v29  ;;  %v6646_v29 = vld [vmem:[#allocation12 + $0xd0] sm:$0xf0] }
 0x1ee   :  { %v1157_v57 = vpop.f32.mrf.mxu3  ;;  %v1143_v53 = vpop.f32.mrf.mxu2  ;;  %v6649_v4 = vor.u32 %v7820_v44, %v6646_v29 }
 0x1ef   :  { %v1174_v42 = vadd.f32 %v1157_v57, %v411_v41  ;;  %v1117_v6 = vpop.f32.mrf.mxu0  ;;  %v1131_v59 = vpop.f32.mrf.mxu1  ;;  %v6652_v41 = vld [vmem:[#allocation12 + $0xc8] sm:$0xf] }
 0x1f0   :  { %v1175_v30 = vadd.f32 %v1117_v6, %v266_v55  ;;  %v1176_v46 = vadd.f32 %v1131_v59, %v315_v62  ;;  %v7823_v55 = vld [vmem:[#allocation12 + $0xd4] sm:$0xf0]  ;;  %v362_v62 = vadd.f32 %v8954_v10, %v9065_v49  ;;  %v6645_v6 = vor.u32 %v7822_v24, %v6644_v51  ;;  %v7821_v59 = vld [vmem:[#allocation12 + $0xcc] sm:$0xf]  ;;  %v6630_v10 = vld [vmem:[#allocation12 + $0xb0] sm:$0xf0]  ;;  %1523 = vmatpush.bf16.msra.mxu1 %v6649_v4 }
 0x1f1   :  { %v6544_v32 = vmul.f32 -1.442695, %v1174_v42  ;;  %v6653_v56 = vor.u32 %v7823_v55, %v6652_v41  ;;  %v6633_v61 = vor.u32 %v7816_v52, %v6630_v10  ;;  %v6636_v41 = vld [vmem:[#allocation12 + $0xa8] sm:$0xf]  ;;  %v7819_v55 = vld [vmem:[#allocation12 + $0xb4] sm:$0xf0] }
 0x1f2   :  { %v8157_v34 = vpop.eup %8156  ;;  %v6541_v38 = vmul.f32 -1.442695, %v1175_v30  ;;  %v6543_v36 = vmul.f32 -1.442695, %v1176_v46  ;;  %v6654_v30 = vld [vmem:[#allocation12 + $0xd8] sm:$0xf0]  ;;  %v1173_v0 = vadd.f32 %v1143_v53, %v362_v62  ;;  %1509 = vmatpush.bf16.msrb.mxu0 %v6645_v6 }
 0x1f3   :  { %v8159_v33 = vpop.eup %8158  ;;  %v9166_v11 = vadd.f32 1.0, %v8157_v34  ;;  %8160 = vpow2.f32 %v6544_v32  ;;  %v6657_v63 = vor.u32 %v7821_v59, %v6654_v30  ;;  %v7818_v32 = vld [vmem:[#allocation12 + $0xac] sm:$0xf0]  ;;  %1537 = vmatpush.bf16.msrb.mxu2 %v6653_v56  ;;  %v6638_v6 = vld [vmem:[#allocation12 + $0xb8] sm:$0xf0] }
 0x1f4   :  { %v9168_v50 = vadd.f32 1.0, %v8159_v33  ;;  %8162 = vpow2.f32 %v6541_v38  ;;  %v6629_v38 = vor.u32 %v7818_v32, %v6628_v2  ;;  %1524 = vmatpush.bf16.msra.mxu1 %v6633_v61  ;;  %v7814_v2 = vld [vmem:[#allocation12 + $0x8c] sm:$0xf0]  ;;  %v7812_v10 = vld [vmem:[#allocation12 + $0x84] sm:$0xf] }
 0x1f5   :  { %8164 = vrcp.f32 %v9166_v11  ;;  %v1196_v57 = vand.u32 2147483647, %v9166_v11  ;;  %v1198_v1 = vand.u32 2147483648, %v9166_v11  ;;  %1551 = vmatpush.bf16.msrb.mxu3 %v6657_v63  ;;  %vm1192_vm10 = vweird.f32 %v9166_v11  ;;  %v6612_v63 = vld [vmem:[#allocation12 + $0x80] sm:$0xf] }
 0x1f6   :  { %8166 = vrcp.f32 %v9168_v50  ;;  %v1159_v35 = vpop.f32.mrf.mxu3  ;;  %v1236_v47 = vand.u32 2147483648, %v9168_v50  ;;  %v1145_v29 = vpop.f32.mrf.mxu2  ;;  %1510 = vmatpush.bf16.msrb.mxu0 %v6629_v38  ;;  %vm1230_vm11 = vweird.f32 %v9168_v50  ;;  %v7808_v61 = vld [vmem:[#allocation12 + $0x64] sm:$0xf] }
 0x1f7   :  { %8168 = vpow2.f32 %v6543_v36  ;;  %v1178_v42 = vadd.f32 %v1159_v35, %v413_v39  ;;  %vm9194_vm9 = vcmp.eq.f32.partialorder %v1196_v57, 8.507059e+37  ;;  %v1234_v35 = vand.u32 2147483647, %v9168_v50  ;;  %v6598_v39 = vld [vmem:[#allocation12 + $0x70] sm:$0xf0] }
 0x1f8   :  { %v1199_v57 = vor.u32 1.1754944e-38, %v1198_v1  ;;  %v1237_v4 = vor.u32 1.1754944e-38, %v1236_v47  ;;  %v1177_v56 = vadd.f32 %v1145_v29, %v364_v28  ;;  %v6614_v1 = vld [vmem:[#allocation12 + $0x90] sm:$0xf0] }
 0x1f9   :  { %v8161_v46 = vpop.eup %8160  ;;  %v6545_v33 = vmul.f32 -1.442695, %v1178_v42  ;;  %v7817_v42 = vld [vmem:[#allocation12 + $0xac] sm:$0xf]  ;;  %vm9213_vm14 = vcmp.eq.f32.partialorder %v1234_v35, 8.507059e+37 }
 0x1fa   :  { %v8163_v54 = vpop.eup %8162  ;;  %v9177_v34 = vadd.f32 1.0, %v8161_v46  ;;  %v6641_v38 = vor.u32 %v7817_v42, %v6638_v6  ;;  %v7813_v42 = vld [vmem:[#allocation12 + $0x8c] sm:$0xf] }
 0x1fb   :  { %v9179_v36 = vpop.eup %8164  ;;  %v9182_v37 = vadd.f32 1.0, %v8163_v54  ;;  %v7809_v54 = vld [vmem:[#allocation12 + $0x6c] sm:$0xf] }
 0x1fc   :  { %v9184_v48 = vpop.eup %8166  ;;  %v1188_v53 = vmul.f32 %v9179_v36, %v9166_v11  ;;  %8170 = vrcp.f32 %v9177_v34  ;;  %vm1193_vm12 = vweird.f32 %v9179_v36  ;;  %1552 = vmatpush.bf16.msrb.mxu3 %v6641_v38 }
 0x1fd   :  { %v8169_v51 = vpop.eup %8168  ;;  %v1226_v24 = vmul.f32 %v9184_v48, %v9168_v50  ;;  %8172 = vrcp.f32 %v9182_v37  ;;  %v1213_v30 = vand.u32 2147483648, %v9182_v37  ;;  %vm1231_vm13 = vweird.f32 %v9184_v48  ;;  %vm9223_vm15 = vmor %vm1192_vm10, %vm1193_vm12  ;;  %v6622_v50 = vld [vmem:[#allocation12 + $0x98] sm:$0xf0] }
 0x1fe   :  { %v1189_v3 = vsub.f32 1.0, %v1188_v53  ;;  %8174 = vtanh.f32 %v1173_v0  ;;  %v9201_v44 = vadd.f32 1.0, %v8169_v51  ;;  %v6637_v0 = vor.u32 %v7819_v55, %v6636_v41  ;;  %vm9238_vm0 = vmor %vm1230_vm11, %vm1231_vm13  ;;  %v6620_v55 = vld [vmem:[#allocation12 + $0x88] sm:$0xf] }
 0x1ff   :  { %v1227_v62 = vsub.f32 1.0, %v1226_v24  ;;  %8176 = vpow2.f32 %v6545_v33  ;;  %v9247_v29 = vor.u32 1.1754944e-38, %v1213_v30  ;;  %v6613_v41 = vor.u32 %v7814_v2, %v6612_v63  ;;  %v7810_v30 = vld [vmem:[#allocation12 + $0x6c] sm:$0xf0]  ;;  %v6588_v51 = vld [vmem:[#allocation12 + $0x48] sm:$0xf] }
 0x200   :  { %v1190_v59 = vmul.f32 %v9179_v36, %v1189_v3  ;;  %8178 = vrcp.f32 %v9201_v44  ;;  %1538 = vmatpush.bf16.msrb.mxu2 %v6637_v0  ;;  %vm1207_vm2 = vweird.f32 %v9182_v37  ;;  %vm1245_vm6 = vweird.f32 %v9201_v44 }
 0x201   :  { %v1228_v46 = vmul.f32 %v9184_v48, %v1227_v62  ;;  %v7815_v62 = vld [vmem:[#allocation12 + $0x94] sm:$0xf0]  ;;  %8180 = vtanh.f32 %v1177_v56  ;;  %1511 = vmatpush.bf16.msrb.mxu0 %v6613_v41  ;;  %v7804_v41 = vld [vmem:[#allocation12 + $0x44] sm:$0xf]  ;;  %vm1270_vm10 = vweird.f32 %v9177_v34 }
 0x202   :  { %v9210_v32 = vpop.eup %8170  ;;  %v1191_v52 = vadd.f32 %v9179_v36, %v1190_v59 }
 0x203   :  { %v9217_v33 = vpop.eup %8172  ;;  %v1229_v28 = vadd.f32 %v9184_v48, %v1228_v46  ;;  %v9230_v53 = vmul.f32 %v9210_v32, %v9177_v34  ;;  %v6617_v46 = vor.u32 %v7812_v10, %v6614_v1  ;;  %v7811_v10 = vld [vmem:[#allocation12 + $0x74] sm:$0xf0]  ;;  %v6606_v1 = vld [vmem:[#allocation12 + $0x78] sm:$0xf0] }
 0x204   :  { %v8175_v24 = vpop.eup %8174  ;;  %v1195_v35 = vsel %vm9223_vm15, %v9179_v36, %v1191_v52  ;;  %v1203_v3 = vmul.f32 %v9217_v33, %v9182_v37  ;;  %v6596_v52 = vld [vmem:[#allocation12 + $0x60] sm:$0xf]  ;;  %vm1208_vm1 = vweird.f32 %v9217_v33 }
 0x205   :  { %v8177_v6 = vpop.eup %8176  ;;  %v1200_v59 = vsel %vm9194_vm9, %v1199_v57, %v1195_v35  ;;  %v1233_v36 = vsel %vm9238_vm0, %v9184_v48, %v1229_v28  ;;  %v6604_v57 = vld [vmem:[#allocation12 + $0x68] sm:$0xf]  ;;  %v1267_v48 = vsub.f32 1.0, %v9230_v53  ;;  %1525 = vmatpush.bf16.msra.mxu1 %v6617_v46  ;;  %v6580_v28 = vld [vmem:[#allocation12 + $0x40] sm:$0xf]  ;;  %v6621_v35 = vor.u32 %v7815_v62, %v6620_v55  ;;  %vm9273_vm3 = vmor %vm1207_vm2, %vm1208_vm1 }
 0x206   :  { %v9254_v0 = vpop.eup %8178  ;;  %v1238_v63 = vsel %vm9213_vm14, %v1237_v4, %v1233_v36  ;;  %v1297_v2 = vmul.f32 %v8175_v24, %v1200_v59  ;;  %v1204_v38 = vsub.f32 1.0, %v1203_v3  ;;  %v9258_v47 = vadd.f32 1.0, %v8177_v6  ;;  %v7806_v24 = vld [vmem:[#allocation12 + $0x4c] sm:$0xf0]  ;;  %v6582_v6 = vld [vmem:[#allocation12 + $0x50] sm:$0xf0] }
 0x207   :  { %v1295_v11 = vmul.f32 %v1238_v63, %v9134_v43  ;;  %v1241_v56 = vmul.f32 %v9254_v0, %v9201_v44  ;;  %v6625_v3 = vor.u32 %v7813_v42, %v6622_v50  ;;  %v1249_v46 = vand.u32 2147483647, %v9201_v44  ;;  %1539 = vmatpush.bf16.msrb.mxu2 %v6621_v35  ;;  %v7807_v42 = vld [vmem:[#allocation12 + $0x54] sm:$0xf0]  ;;  %v7805_v50 = vld [vmem:[#allocation12 + $0x4c] sm:$0xf] }
 0x208   :  { %v1205_v4 = vmul.f32 %v9217_v33, %v1204_v38  ;;  %8182 = vrcp.f32 %v9258_v47  ;;  %v6597_v63 = vor.u32 %v7810_v30, %v6596_v52  ;;  %v6601_v38 = vor.u32 %v7808_v61, %v6598_v39  ;;  %v6564_v39 = vld [vmem:[#allocation12 + $0x20] sm:$0xf]  ;;  %v6566_v35 = vld [vmem:[#allocation12 + $0x30] sm:$0xf0]  ;;  %v7803_v36 = vld [vmem:[#allocation12 + $0x34] sm:$0xf0] }
 0x209   :  { %v9268_v43 = vadd.f32 %v1297_v2, %v1295_v11  ;;  %v1242_v53 = vsub.f32 1.0, %v1241_v56  ;;  %v8181_v2 = vpop.eup %8180  ;;  %vm1246_vm4 = vweird.f32 %v9254_v0  ;;  %1553 = vmatpush.bf16.msrb.mxu3 %v6625_v3  ;;  %v6605_v55 = vor.u32 %v7811_v10, %v6604_v57  ;;  %v6590_v56 = vld [vmem:[#allocation12 + $0x58] sm:$0xf0] }
 0x20a   :  { %v1206_v59 = vadd.f32 %v9217_v33, %v1205_v4  ;;  %v6609_v62 = vor.u32 %v7809_v54, %v6606_v1  ;;  %v11276_v52 = vand.u32 2147483647, %v9182_v37  ;;  %1512 = vmatpush.bf16.msrb.mxu0 %v6597_v63  ;;  %1526 = vmatpush.bf16.msra.mxu1 %v6601_v38  ;;  %v6581_v30 = vor.u32 %v7806_v24, %v6580_v28  ;;  %v7802_v54 = vld [vmem:[#allocation12 + $0x2c] sm:$0xf0]  ;;  %v7800_v1 = vld [vmem:[#allocation12 + $0x24] sm:$0xf]  ;;  %vm9293_vm7 = vmor %vm1245_vm6, %vm1246_vm4 }
 0x20b   :  { %v1243_v11 = vmul.f32 %v9254_v0, %v1242_v53  ;;  %v6585_v61 = vor.u32 %v7804_v41, %v6582_v6  ;;  %v1268_v53 = vmul.f32 %v9210_v32, %v1267_v48  ;;  %v11279_v28 = vand.u32 2147483648, %v9201_v44  ;;  %1540 = vmatpush.bf16.msrb.mxu2 %v6605_v55  ;;  %v7801_v63 = vld [vmem:[#allocation12 + $0x2c] sm:$0xf]  ;;  %v6574_v38 = vld [vmem:[#allocation12 + $0x38] sm:$0xf0] }
 0x20c   :  { %v1210_v4 = vsel %vm9273_vm3, %v9217_v33, %v1206_v59  ;;  %vm1212_vm5 = vcmp.eq.f32.partialorder %v11276_v52, 8.507059e+37  ;;  %vm1250_vm8 = vcmp.eq.f32.partialorder %v1249_v46, 8.507059e+37  ;;  %v6589_v24 = vor.u32 %v7807_v42, %v6588_v51  ;;  %v6572_v59 = vld [vmem:[#allocation12 + $0x28] sm:$0xf]  ;;  %v7798_v42 = vld [vmem:[#allocation12 + $0xc] sm:$0xf0] }
 0x20d   :  { %v1215_v57 = vsel %vm1212_vm5, %v9247_v29, %v1210_v4  ;;  %v1244_v10 = vadd.f32 %v9254_v0, %v1243_v11  ;;  %v1252_v48 = vor.u32 1.1754944e-38, %v11279_v28  ;;  %v6593_v3 = vor.u32 %v7805_v50, %v6590_v56  ;;  %1554 = vmatpush.bf16.msrb.mxu3 %v6609_v62  ;;  %v6548_v11 = vld [vmem:[#allocation12] sm:$0xf]  ;;  %v7796_v55 = vld [vmem:[#allocation12 + $0x4] sm:$0xf] }
 0x20e   :  { %v9289_v33 = vpop.eup %8182  ;;  %8184 = vtanh.f32 %v9268_v43  ;;  %v1298_v41 = vmul.f32 %v8181_v2, %v1215_v57  ;;  %vm1271_vm9 = vweird.f32 %v9210_v32  ;;  %1513 = vmatpush.bf16.msrb.mxu0 %v6581_v30  ;;  %1527 = vmatpush.bf16.msra.mxu1 %v6585_v61  ;;  %v6565_v51 = vor.u32 %v7802_v54, %v6564_v39  ;;  %v6550_v62 = vld [vmem:[#allocation12 + $0x10] sm:$0xf0]  ;;  %v6556_v57 = vld [vmem:[#allocation12 + $0x8] sm:$0xf]  ;;  %v7799_v54 = vld [vmem:[#allocation12 + $0x14] sm:$0xf0] }
 0x20f   :  { %v1248_v29 = vsel %vm9293_vm7, %v9254_v0, %v1244_v10  ;;  %v1281_v6 = vmul.f32 %v9289_v33, %v9258_v47  ;;  %v6569_v46 = vor.u32 %v7800_v1, %v6566_v35  ;;  %v1276_v0 = vand.u32 2147483648, %v9177_v34  ;;  %vm9313_vm11 = vmor %vm1270_vm10, %vm1271_vm9  ;;  %1541 = vmatpush.bf16.msrb.mxu2 %v6589_v24  ;;  %v6558_v1 = vld [vmem:[#allocation12 + $0x18] sm:$0xf0] }
 0x210   :  { %v1253_v44 = vsel %vm1250_vm8, %v1252_v48, %v1248_v29  ;;  %v1269_v56 = vadd.f32 %v9210_v32, %v1268_v53  ;;  %v6573_v4 = vor.u32 %v7803_v36, %v6572_v59  ;;  %v1274_v52 = vand.u32 2147483647, %v9177_v34  ;;  %v7797_v34 = vld [vmem:[#allocation12 + $0xc] sm:$0xf] }
 0x211   :  { %v1296_v2 = vmul.f32 %v1253_v44, %v9146_v60  ;;  %v1282_v50 = vsub.f32 1.0, %v1281_v6  ;;  %1555 = vmatpush.bf16.msrb.mxu3 %v6593_v3  ;;  %v6577_v39 = vor.u32 %v7801_v63, %v6574_v38  ;;  %v6549_v53 = vor.u32 %v7798_v42, %v6548_v11 }
 0x212   :  { %1514 = vmatpush.bf16.msrb.mxu0 %v6565_v51  ;;  %1528 = vmatpush.bf16.msra.mxu1 %v6569_v46  ;;  %v6553_v10 = vor.u32 %v7796_v55, %v6550_v62  ;;  %v1273_v35 = vsel %vm9313_vm11, %v9210_v32, %v1269_v56  ;;  %vm1286_vm12 = vweird.f32 %v9289_v33  ;;  %v1277_v28 = vor.u32 1.1754944e-38, %v1276_v0 }
 0x213   :  { %v9317_v61 = vadd.f32 %v1298_v41, %v1296_v2  ;;  %v1283_v60 = vmul.f32 %v9289_v33, %v1282_v50  ;;  %v1291_v48 = vand.u32 2147483648, %v9258_v47  ;;  %vm1285_vm13 = vweird.f32 %v9258_v47  ;;  %1542 = vmatpush.bf16.msrb.mxu2 %v6573_v4 }
 0x214   :  { %v8185_v37 = vpop.eup %8184  ;;  %vm1275_vm14 = vcmp.eq.f32.partialorder %v1274_v52, 8.507059e+37  ;;  %v1289_v3 = vand.u32 2147483647, %v9258_v47  ;;  %v6557_v29 = vor.u32 %v7799_v54, %v6556_v57  ;;  %v6561_v41 = vor.u32 %v7797_v34, %v6558_v1  ;;  %vm1287_vm15 = vmor %vm1285_vm13, %vm1286_vm12  ;;  %v6794_v1 = vld [vmem:[#allocation12 + $0xe0] sm:$0xf] }
 0x215   :  { %8186 = vtanh.f32 %v9317_v61  ;;  %v1284_v24 = vadd.f32 %v9289_v33, %v1283_v60  ;;  %1556 = vmatpush.bf16.msrb.mxu3 %v6577_v39  ;;  %v1278_v32 = vsel %vm1275_vm14, %v1277_v28, %v1273_v35  ;;  %v1292_v36 = vor.u32 1.1754944e-38, %v1291_v48  ;;  %v7858_v35 = vld [vmem:[#allocation12 + $0xec] sm:$0xf0] }
 0x216   :  { %1515 = vmatpush.bf16.msrb.mxu0 %v6549_v53  ;;  %1529 = vmatpush.bf16.msra.mxu1 %v6553_v10  ;;  %v1303_v59 = vmul.f32 %v8185_v37, %v1278_v32  ;;  %vm1290_vm0 = vcmp.eq.f32.partialorder %v1289_v3, 8.507059e+37  ;;  %v318_v2 = vadd.f32 %v8984_v15, %v9071_v58  ;;  %v416_v30 = vadd.f32 %v8972_v8, %v9069_v40  ;;  %v7856_v8 = vld [vmem:[#allocation12 + $0xe4] sm:$0xf] }
 0x217   :  { %v1288_v6 = vsel %vm1287_vm15, %v9289_v33, %v1284_v24  ;;  %1543 = vmatpush.bf16.msrb.mxu2 %v6557_v29  ;;  %v269_v33 = vadd.f32 %v8966_v5, %v9042_v45  ;;  %v271_v60 = vadd.f32 %v8974_v9, %v9042_v45  ;;  %v320_v5 = vadd.f32 %v8992_v19, %v9071_v58  ;;  %v6796_v29 = vld [vmem:[#allocation12 + $0xf0] sm:$0xf0] }
 0x218   :  { %v1293_v44 = vsel %vm1290_vm0, %v1292_v36, %v1288_v6  ;;  %v1305_v46 = vpack.c.bf16 %v1303_v59, %v1303_v59  ;;  %v6795_v48 = vor.u32 %v7858_v35, %v6794_v1  ;;  %v6799_v32 = vor.u32 %v7856_v8, %v6796_v29  ;;  %v6802_v6 = vld [vmem:[#allocation12 + $0xe8] sm:$0xf] }
 0x219   :  { %1557 = vmatpush.bf16.msrb.mxu3 %v6561_v41  ;;  %v418_v36 = vadd.f32 %v8980_v13, %v9069_v40 }
 0x21a   :  { %v1344_v11 = vunpack.c.l.b16 %v1305_v46  ;;  %1910 = vmatpush.bf16.msra.mxu0 %v6795_v48  ;;  %1924 = vmatpush.bf16.msrb.mxu1 %v6799_v32  ;;  %v6778_v46 = vld [vmem:[#allocation12 + $0xc0] sm:$0xf]  ;;  %v7850_v32 = vld [vmem:[#allocation12 + $0xac] sm:$0xf0] }
 0x21b   :  { %v8187_v63 = vpop.eup %8186 }
 0x21c   :  { %v1304_v51 = vmul.f32 %v8187_v63, %v1293_v44  ;;  %v7857_v44 = vld [vmem:[#allocation12 + $0xec] sm:$0xf] }
 0x21e   :  { %v1306_v47 = vpack.c.bf16 %v1304_v51, %v1304_v51  ;;  %v8076_v38 = vpack.c.bf16 %v1304_v51, %v1303_v59  ;;  %v7859_v59 = vld [vmem:[#allocation12 + $0xf4] sm:$0xf0]  ;;  %v6804_v51 = vld [vmem:[#allocation12 + $0xf8] sm:$0xf0] }
 0x220   :  { %8077 = vst [vmem:[#allocation4] sm:$0xff] %v8076_v38   ;;  %v1345_v42 = vunpack.c.l.b16 %v1306_v47  ;;  %v7854_v47 = vld [vmem:[#allocation12 + $0xcc] sm:$0xf0]  ;;  %v7852_v38 = vld [vmem:[#allocation12 + $0xc4] sm:$0xf] }
 0x222   :  { %v1346_v0 = vpack.c.b16 %v1345_v42, %v1344_v11  ;;  %v367_v11 = vadd.f32 %v8970_v7, %v9065_v49 }
 0x224   :  { %1516 = vmatmul.bf16.vlgmr.msrb.gmra.mxu0 %v1346_v0  ;;  %1530 = vmatmul.bf16.vlgmr.msra.gmra.mxu1 %v1346_v0 }
 0x225   :  { %1544 = vmatmul.bf16.vlgmr.msrb.gmra.mxu2 %v1346_v0  ;;  %1558 = vmatmul.bf16.vlgmr.msrb.gmra.mxu3 %v1346_v0 }
 0x2a1   :  { %v1517_v50 = vpop.f32.mrf.mxu0  ;;  %v1531_v55 = vpop.f32.mrf.mxu1 }
 0x2a2   :  { %v1573_v62 = vadd.f32 %v1517_v50, %v269_v33  ;;  %v1574_v56 = vadd.f32 %v1531_v55, %v318_v2  ;;  %v6803_v33 = vor.u32 %v7859_v59, %v6802_v6  ;;  %v6780_v2 = vld [vmem:[#allocation12 + $0xd0] sm:$0xf0]  ;;  %v6786_v50 = vld [vmem:[#allocation12 + $0xc8] sm:$0xf]  ;;  %v6807_v55 = vor.u32 %v7857_v44, %v6804_v51 }
 0x2a4   :  { %v6674_v4 = vmul.f32 -1.442695, %v1573_v62  ;;  %v6676_v52 = vmul.f32 -1.442695, %v1574_v56  ;;  %v6779_v62 = vor.u32 %v7854_v47, %v6778_v46  ;;  %v6783_v56 = vor.u32 %v7852_v38, %v6780_v2  ;;  %1938 = vmatpush.bf16.msra.mxu2 %v6803_v33  ;;  %1952 = vmatpush.bf16.msra.mxu3 %v6807_v55  ;;  %v7849_v55 = vld [vmem:[#allocation12 + $0xac] sm:$0xf] }
 0x2a6   :  { %8188 = vpow2.f32 %v6674_v4  ;;  %v7855_v4 = vld [vmem:[#allocation12 + $0xd4] sm:$0xf0]  ;;  %1911 = vmatpush.bf16.msra.mxu0 %v6779_v62  ;;  %1925 = vmatpush.bf16.msrb.mxu1 %v6783_v56  ;;  %v6772_v62 = vld [vmem:[#allocation12 + $0xb8] sm:$0xf0] }
 0x2a7   :  { %8190 = vpow2.f32 %v6676_v52  ;;  %v7853_v52 = vld [vmem:[#allocation12 + $0xcc] sm:$0xf] }
 0x2a8   :  { %v1559_v39 = vpop.f32.mrf.mxu3  ;;  %v1545_v41 = vpop.f32.mrf.mxu2 }
 0x2a9   :  { %v1576_v57 = vadd.f32 %v1559_v39, %v416_v30  ;;  %v1519_v15 = vpop.f32.mrf.mxu0  ;;  %v1533_v53 = vpop.f32.mrf.mxu1  ;;  %v6788_v30 = vld [vmem:[#allocation12 + $0xd8] sm:$0xf0] }
 0x2aa   :  { %v1577_v10 = vadd.f32 %v1519_v15, %v271_v60  ;;  %v1578_v54 = vadd.f32 %v1533_v53, %v320_v5  ;;  %v1575_v5 = vadd.f32 %v1545_v41, %v367_v11  ;;  %v369_v15 = vadd.f32 %v8978_v12, %v9065_v49  ;;  %v6762_v41 = vld [vmem:[#allocation12 + $0xa0] sm:$0xf]  ;;  %v6770_v11 = vld [vmem:[#allocation12 + $0xa8] sm:$0xf] }
 0x2ab   :  { %v6678_v34 = vmul.f32 -1.442695, %v1576_v57  ;;  %v6787_v57 = vor.u32 %v7855_v4, %v6786_v50  ;;  %v6763_v50 = vor.u32 %v7850_v32, %v6762_v41  ;;  %v6748_v41 = vld [vmem:[#allocation12 + $0x90] sm:$0xf0]  ;;  %v6754_v32 = vld [vmem:[#allocation12 + $0x88] sm:$0xf] }
 0x2ac   :  { %v8189_v37 = vpop.eup %8188  ;;  %v6675_v28 = vmul.f32 -1.442695, %v1577_v10  ;;  %v6677_v9 = vmul.f32 -1.442695, %v1578_v54  ;;  %v6791_v54 = vor.u32 %v7853_v52, %v6788_v30  ;;  %v7841_v30 = vld [vmem:[#allocation12 + $0x6c] sm:$0xf] }
 0x2ad   :  { %v8191_v24 = vpop.eup %8190  ;;  %v9340_v3 = vadd.f32 1.0, %v8189_v37  ;;  %8192 = vpow2.f32 %v6678_v34  ;;  %1939 = vmatpush.bf16.msra.mxu2 %v6787_v57  ;;  %1912 = vmatpush.bf16.msra.mxu0 %v6763_v50  ;;  %v6732_v50 = vld [vmem:[#allocation12 + $0x70] sm:$0xf0] }
 0x2ae   :  { %v9342_v19 = vadd.f32 1.0, %v8191_v24  ;;  %8194 = vpow2.f32 %v6675_v28  ;;  %1953 = vmatpush.bf16.msra.mxu3 %v6791_v54 }
 0x2af   :  { %8196 = vrcp.f32 %v9340_v3  ;;  %v1598_v42 = vand.u32 2147483647, %v9340_v3  ;;  %v1600_v37 = vand.u32 2147483648, %v9340_v3  ;;  %vm1594_vm2 = vweird.f32 %v9340_v3 }
 0x2b0   :  { %8198 = vrcp.f32 %v9342_v19  ;;  %v1561_v63 = vpop.f32.mrf.mxu3  ;;  %v1638_v35 = vand.u32 2147483648, %v9342_v19  ;;  %v1636_v8 = vand.u32 2147483647, %v9342_v19  ;;  %v1547_v29 = vpop.f32.mrf.mxu2  ;;  %vm1632_vm3 = vweird.f32 %v9342_v19 }
 0x2b1   :  { %8200 = vpow2.f32 %v6677_v9  ;;  %v1580_v0 = vadd.f32 %v1561_v63, %v418_v36  ;;  %vm9368_vm1 = vcmp.eq.f32.partialorder %v1598_v42, 8.507059e+37  ;;  %v7848_v36 = vld [vmem:[#allocation12 + $0xa4] sm:$0xf]  ;;  %v6764_v63 = vld [vmem:[#allocation12 + $0xb0] sm:$0xf0]  ;;  %v1601_v47 = vor.u32 1.1754944e-38, %v1600_v37 }
 0x2b2   :  { %v1579_v38 = vadd.f32 %v1547_v29, %v369_v15  ;;  %v7851_v42 = vld [vmem:[#allocation12 + $0xb4] sm:$0xf0]  ;;  %v1639_v33 = vor.u32 1.1754944e-38, %v1638_v35  ;;  %vm9399_vm7 = vcmp.eq.f32.partialorder %v1636_v8, 8.507059e+37  ;;  %v6746_v35 = vld [vmem:[#allocation12 + $0x80] sm:$0xf]  ;;  %v6775_v29 = vor.u32 %v7849_v55, %v6772_v62 }
 0x2b3   :  { %v8193_v13 = vpop.eup %8192  ;;  %v6679_v10 = vmul.f32 -1.442695, %v1580_v0  ;;  %v7846_v37 = vld [vmem:[#allocation12 + $0x8c] sm:$0xf0]  ;;  %v7843_v55 = vld [vmem:[#allocation12 + $0x74] sm:$0xf0] }
 0x2b4   :  { %v8195_v60 = vpop.eup %8194  ;;  %v9351_v39 = vadd.f32 1.0, %v8193_v13  ;;  %v6767_v13 = vor.u32 %v7848_v36, %v6764_v63  ;;  %1954 = vmatpush.bf16.msra.mxu3 %v6775_v29  ;;  %v6747_v4 = vor.u32 %v7846_v37, %v6746_v35 }
 0x2b5   :  { %v9353_v7 = vpop.eup %8196  ;;  %v9357_v53 = vadd.f32 1.0, %v8195_v60 }
 0x2b6   :  { %v9359_v34 = vpop.eup %8198  ;;  %v1590_v1 = vmul.f32 %v9353_v7, %v9340_v3  ;;  %8202 = vrcp.f32 %v9351_v39  ;;  %vm1595_vm4 = vweird.f32 %v9353_v7  ;;  %1926 = vmatpush.bf16.msrb.mxu1 %v6767_v13  ;;  %v6738_v13 = vld [vmem:[#allocation12 + $0x68] sm:$0xf]  ;;  %1913 = vmatpush.bf16.msra.mxu0 %v6747_v4  ;;  %v7835_v4 = vld [vmem:[#allocation12 + $0x34] sm:$0xf0] }
 0x2b7   :  { %v8201_v28 = vpop.eup %8200  ;;  %v1628_v12 = vmul.f32 %v9359_v34, %v9342_v19  ;;  %8204 = vrcp.f32 %v9357_v53  ;;  %v1615_v59 = vand.u32 2147483648, %v9357_v53  ;;  %v1613_v51 = vand.u32 2147483647, %v9357_v53  ;;  %vm9394_vm6 = vmor %vm1594_vm2, %vm1595_vm4 }
 0x2b8   :  { %v1591_v24 = vsub.f32 1.0, %v1590_v1  ;;  %8206 = vtanh.f32 %v1575_v5  ;;  %v9375_v9 = vadd.f32 1.0, %v8201_v28  ;;  %vm1633_vm5 = vweird.f32 %v9359_v34  ;;  %v7844_v28 = vld [vmem:[#allocation12 + $0x84] sm:$0xf] }
 0x2b9   :  { %v1629_v6 = vsub.f32 1.0, %v1628_v12  ;;  %8208 = vpow2.f32 %v6679_v10  ;;  %v9404_v5 = vor.u32 1.1754944e-38, %v1615_v59  ;;  %vm9410_vm8 = vmor %vm1632_vm3, %vm1633_vm5  ;;  %vm9419_vm9 = vcmp.eq.f32.partialorder %v1613_v51, 8.507059e+37  ;;  %v7845_v51 = vld [vmem:[#allocation12 + $0x8c] sm:$0xf] }
 0x2ba   :  { %v1592_v44 = vmul.f32 %v9353_v7, %v1591_v24  ;;  %8210 = vrcp.f32 %v9375_v9  ;;  %v1653_v60 = vand.u32 2147483648, %v9375_v9  ;;  %v1651_v1 = vand.u32 2147483647, %v9375_v9 }
 0x2bb   :  { %v1630_v46 = vmul.f32 %v9359_v34, %v1629_v6  ;;  %v6771_v19 = vor.u32 %v7851_v42, %v6770_v11  ;;  %v7847_v6 = vld [vmem:[#allocation12 + $0x94] sm:$0xf0]  ;;  %8212 = vtanh.f32 %v1579_v38  ;;  %v6730_v11 = vld [vmem:[#allocation12 + $0x60] sm:$0xf]  ;;  %v7842_v42 = vld [vmem:[#allocation12 + $0x6c] sm:$0xf0]  ;;  %vm1609_vm11 = vweird.f32 %v9357_v53 }
 0x2bc   :  { %v9385_v0 = vpop.eup %8202  ;;  %v1593_v2 = vadd.f32 %v9353_v7, %v1592_v44  ;;  %v6740_v38 = vld [vmem:[#allocation12 + $0x78] sm:$0xf0]  ;;  %v6731_v35 = vor.u32 %v7842_v42, %v6730_v11  ;;  %vm1647_vm15 = vweird.f32 %v9375_v9  ;;  %vm1672_vm2 = vweird.f32 %v9351_v39 }
 0x2bd   :  { %v9388_v56 = vpop.eup %8204  ;;  %v1631_v52 = vadd.f32 %v9359_v34, %v1630_v46  ;;  %v9431_v24 = vmul.f32 %v9385_v0, %v9351_v39  ;;  %1940 = vmatpush.bf16.msra.mxu2 %v6771_v19  ;;  %v6714_v19 = vld [vmem:[#allocation12 + $0x40] sm:$0xf]  ;;  %vm1673_vm14 = vweird.f32 %v9385_v0 }
 0x2be   :  { %v8207_v57 = vpop.eup %8206  ;;  %v1597_v15 = vsel %vm9394_vm6, %v9353_v7, %v1593_v2  ;;  %v1605_v10 = vmul.f32 %v9388_v56, %v9357_v53  ;;  %vm1610_vm10 = vweird.f32 %v9388_v56  ;;  %v7840_v2 = vld [vmem:[#allocation12 + $0x64] sm:$0xf]  ;;  %1914 = vmatpush.bf16.msra.mxu0 %v6731_v35  ;;  %vm9485_vm3 = vmor %vm1672_vm2, %vm1673_vm14  ;;  %v6682_v35 = vld [vmem:[#allocation12] sm:$0xf] }
 0x2bf   :  { %v8209_v12 = vpop.eup %8208  ;;  %v1602_v8 = vsel %vm9368_vm1, %v1601_v47, %v1597_v15  ;;  %v1635_v7 = vsel %vm9410_vm8, %v9359_v34, %v1631_v52  ;;  %v6756_v34 = vld [vmem:[#allocation12 + $0x98] sm:$0xf0]  ;;  %v6751_v52 = vor.u32 %v7844_v28, %v6748_v41  ;;  %vm9452_vm12 = vmor %vm1609_vm11, %vm1610_vm10  ;;  %v6755_v15 = vor.u32 %v7847_v6, %v6754_v32  ;;  %v7838_v28 = vld [vmem:[#allocation12 + $0x4c] sm:$0xf0] }
 0x2c0   :  { %v9433_v59 = vpop.eup %8210  ;;  %v1640_v36 = vsel %vm9399_vm7, %v1639_v33, %v1635_v7  ;;  %v1699_v63 = vmul.f32 %v8207_v57, %v1602_v8  ;;  %v1606_v48 = vsub.f32 1.0, %v1605_v10  ;;  %v9437_v44 = vadd.f32 1.0, %v8209_v12  ;;  %v7836_v8 = vld [vmem:[#allocation12 + $0x44] sm:$0xf]  ;;  %v6716_v7 = vld [vmem:[#allocation12 + $0x50] sm:$0xf0] }
 0x2c1   :  { %v1697_v46 = vmul.f32 %v1640_v36, %v9268_v43  ;;  %v1643_v47 = vmul.f32 %v9433_v59, %v9375_v9  ;;  %v1669_v57 = vsub.f32 1.0, %v9431_v24  ;;  %v6759_v10 = vor.u32 %v7845_v51, %v6756_v34  ;;  %1927 = vmatpush.bf16.msrb.mxu1 %v6751_v52  ;;  %1941 = vmatpush.bf16.msra.mxu2 %v6755_v15  ;;  %v6722_v6 = vld [vmem:[#allocation12 + $0x48] sm:$0xf]  ;;  %v8213_v36 = vpop.eup %8212  ;;  %v7837_v51 = vld [vmem:[#allocation12 + $0x4c] sm:$0xf] }
 0x2c2   :  { %v1607_v33 = vmul.f32 %v9388_v56, %v1606_v48  ;;  %8214 = vrcp.f32 %v9437_v44  ;;  %vm1648_vm13 = vweird.f32 %v9433_v59  ;;  %v6735_v37 = vor.u32 %v7840_v2, %v6732_v50  ;;  %v7839_v48 = vld [vmem:[#allocation12 + $0x54] sm:$0xf0]  ;;  %v6724_v34 = vld [vmem:[#allocation12 + $0x58] sm:$0xf0]  ;;  %v6698_v2 = vld [vmem:[#allocation12 + $0x20] sm:$0xf] }
 0x2c3   :  { %v9446_v43 = vadd.f32 %v1699_v63, %v1697_v46  ;;  %v1644_v62 = vsub.f32 1.0, %v1643_v47  ;;  %v1654_v24 = vor.u32 1.1754944e-38, %v1653_v60  ;;  %1955 = vmatpush.bf16.msra.mxu3 %v6759_v10  ;;  %v6739_v41 = vor.u32 %v7843_v55, %v6738_v13  ;;  %vm1649_vm0 = vmor %vm1647_vm15, %vm1648_vm13  ;;  %v7832_v50 = vld [vmem:[#allocation12 + $0x24] sm:$0xf]  ;;  %v6700_v55 = vld [vmem:[#allocation12 + $0x30] sm:$0xf0] }
 0x2c4   :  { %v1608_v3 = vadd.f32 %v9388_v56, %v1607_v33  ;;  %v6743_v32 = vor.u32 %v7841_v30, %v6740_v38  ;;  %v1670_v46 = vmul.f32 %v9385_v0, %v1669_v57  ;;  %vm1652_vm1 = vcmp.eq.f32.partialorder %v1651_v1, 8.507059e+37  ;;  %v7834_v33 = vld [vmem:[#allocation12 + $0x2c] sm:$0xf0]  ;;  %v7833_v38 = vld [vmem:[#allocation12 + $0x2c] sm:$0xf] }
 0x2c5   :  { %v1645_v12 = vmul.f32 %v9433_v59, %v1644_v62  ;;  %v6715_v47 = vor.u32 %v7838_v28, %v6714_v19  ;;  %v6719_v11 = vor.u32 %v7836_v8, %v6716_v7  ;;  %8216 = vtanh.f32 %v9446_v43  ;;  %1928 = vmatpush.bf16.msrb.mxu1 %v6735_v37  ;;  %1942 = vmatpush.bf16.msra.mxu2 %v6739_v41  ;;  %v6706_v62 = vld [vmem:[#allocation12 + $0x28] sm:$0xf]  ;;  %v6708_v57 = vld [vmem:[#allocation12 + $0x38] sm:$0xf0]  ;;  %v7830_v37 = vld [vmem:[#allocation12 + $0xc] sm:$0xf0] }
 0x2c6   :  { %v1612_v29 = vsel %vm9452_vm12, %v9388_v56, %v1608_v3  ;;  %v6723_v9 = vor.u32 %v7839_v48, %v6722_v6  ;;  %v6727_v1 = vor.u32 %v7837_v51, %v6724_v34  ;;  %v6699_v53 = vor.u32 %v7834_v33, %v6698_v2  ;;  %v7828_v28 = vld [vmem:[#allocation12 + $0x4] sm:$0xf]  ;;  %v7831_v41 = vld [vmem:[#allocation12 + $0x14] sm:$0xf0] }
 0x2c7   :  { %v1617_v63 = vsel %vm9419_vm9, %v9404_v5, %v1612_v29  ;;  %v1646_v60 = vadd.f32 %v9433_v59, %v1645_v12  ;;  %1956 = vmatpush.bf16.msra.mxu3 %v6743_v32  ;;  %v1671_v15 = vadd.f32 %v9385_v0, %v1670_v46  ;;  %v1676_v10 = vand.u32 2147483647, %v9351_v39  ;;  %1915 = vmatpush.bf16.msra.mxu0 %v6715_v47  ;;  %v6690_v29 = vld [vmem:[#allocation12 + $0x8] sm:$0xf] }
 0x2c8   :  { %v9469_v56 = vpop.eup %8214  ;;  %v1700_v54 = vmul.f32 %v8213_v36, %v1617_v63  ;;  %v6707_v8 = vor.u32 %v7835_v4, %v6706_v62  ;;  %v6711_v7 = vor.u32 %v7833_v38, %v6708_v57  ;;  %v1693_v36 = vand.u32 2147483648, %v9437_v44  ;;  %v7829_v63 = vld [vmem:[#allocation12 + $0xc] sm:$0xf] }
 0x2c9   :  { %v1650_v5 = vsel %vm1649_vm0, %v9433_v59, %v1646_v60  ;;  %v1683_v42 = vmul.f32 %v9469_v56, %v9437_v44  ;;  %v1678_v59 = vand.u32 2147483648, %v9351_v39  ;;  %1929 = vmatpush.bf16.msrb.mxu1 %v6719_v11  ;;  %1943 = vmatpush.bf16.msra.mxu2 %v6723_v9  ;;  %v1675_v39 = vsel %vm9485_vm3, %v9385_v0, %v1671_v15  ;;  %v6692_v60 = vld [vmem:[#allocation12 + $0x18] sm:$0xf0] }
 0x2ca   :  { %v1655_v13 = vsel %vm1652_vm1, %v1654_v24, %v1650_v5  ;;  %v6684_v24 = vld [vmem:[#allocation12 + $0x10] sm:$0xf0]  ;;  %vm1688_vm4 = vweird.f32 %v9469_v56  ;;  %vm1687_vm5 = vweird.f32 %v9437_v44  ;;  %v6683_v51 = vor.u32 %v7830_v37, %v6682_v35 }
 0x2cb   :  { %v1698_v52 = vmul.f32 %v1655_v13, %v9317_v61  ;;  %v1684_v30 = vsub.f32 1.0, %v1683_v42  ;;  %v6703_v61 = vor.u32 %v7832_v50, %v6700_v55  ;;  %1957 = vmatpush.bf16.msra.mxu3 %v6727_v1  ;;  %v8217_v32 = vpop.eup %8216  ;;  %v1679_v6 = vor.u32 1.1754944e-38, %v1678_v59  ;;  %1916 = vmatpush.bf16.msra.mxu0 %v6699_v53  ;;  %vm1689_vm7 = vmor %vm1687_vm5, %vm1688_vm4 }
 0x2cc   :  { %vm1677_vm6 = vcmp.eq.f32.partialorder %v1676_v10, 8.507059e+37  ;;  %v1691_v34 = vand.u32 2147483647, %v9437_v44  ;;  %v6687_v0 = vor.u32 %v7828_v28, %v6684_v24  ;;  %v6691_v46 = vor.u32 %v7831_v41, %v6690_v29 }
 0x2cd   :  { %v9491_v19 = vadd.f32 %v1700_v54, %v1698_v52  ;;  %v1685_v12 = vmul.f32 %v9469_v56, %v1684_v30  ;;  %1930 = vmatpush.bf16.msrb.mxu1 %v6703_v61  ;;  %v1680_v47 = vsel %vm1677_vm6, %v1679_v6, %v1675_v39  ;;  %1944 = vmatpush.bf16.msra.mxu2 %v6707_v8  ;;  %v1694_v42 = vor.u32 1.1754944e-38, %v1693_v36  ;;  %v6928_v8 = vld [vmem:[#allocation12 + $0xe0] sm:$0xf]  ;;  %v6930_v6 = vld [vmem:[#allocation12 + $0xf0] sm:$0xf0] }
 0x2ce   :  { %v6695_v11 = vor.u32 %v7829_v63, %v6692_v60  ;;  %v1705_v54 = vmul.f32 %v8217_v32, %v1680_v47  ;;  %vm1692_vm8 = vcmp.eq.f32.partialorder %v1691_v34, 8.507059e+37  ;;  %v323_v4 = vadd.f32 %v9000_v23, %v9071_v58  ;;  %v6936_v60 = vld [vmem:[#allocation12 + $0xe8] sm:$0xf]  ;;  %v6912_v47 = vld [vmem:[#allocation12 + $0xc0] sm:$0xf] }
 0x2cf   :  { %8218 = vtanh.f32 %v9491_v19  ;;  %v1686_v48 = vadd.f32 %v9469_v56, %v1685_v12  ;;  %1958 = vmatpush.bf16.msra.mxu3 %v6711_v7  ;;  %1917 = vmatpush.bf16.msra.mxu0 %v6683_v51  ;;  %v421_v53 = vadd.f32 %v8988_v17, %v9069_v40  ;;  %v276_v15 = vadd.f32 %v8990_v18, %v9042_v45  ;;  %v7890_v7 = vld [vmem:[#allocation12 + $0xec] sm:$0xf0]  ;;  %v7888_v17 = vld [vmem:[#allocation12 + $0xe4] sm:$0xf] }
 0x2d0   :  { %v1707_v50 = vpack.c.bf16 %v1705_v54, %v1705_v54  ;;  %v6929_v41 = vor.u32 %v7890_v7, %v6928_v8  ;;  %v6933_v63 = vor.u32 %v7888_v17, %v6930_v6  ;;  %v423_v51 = vadd.f32 %v8996_v21, %v9069_v40  ;;  %v6896_v7 = vld [vmem:[#allocation12 + $0xa0] sm:$0xf]  ;;  %v7880_v17 = vld [vmem:[#allocation12 + $0xa4] sm:$0xf] }
 0x2d1   :  { %v1690_v5 = vsel %vm1689_vm7, %v9469_v56, %v1686_v48  ;;  %1931 = vmatpush.bf16.msrb.mxu1 %v6687_v0  ;;  %1945 = vmatpush.bf16.msra.mxu2 %v6691_v46  ;;  %v274_v56 = vadd.f32 %v8982_v14, %v9042_v45  ;;  %v325_v14 = vadd.f32 %v9008_v27, %v9071_v58  ;;  %v7891_v48 = vld [vmem:[#allocation12 + $0xf4] sm:$0xf0]  ;;  %v7889_v0 = vld [vmem:[#allocation12 + $0xec] sm:$0xf]  ;;  %v6938_v46 = vld [vmem:[#allocation12 + $0xf8] sm:$0xf0] }
 0x2d2   :  { %v1695_v44 = vsel %vm1692_vm8, %v1694_v42, %v1690_v5  ;;  %v1746_v1 = vunpack.c.l.b16 %v1707_v50  ;;  %v7884_v5 = vld [vmem:[#allocation12 + $0xc4] sm:$0xf]  ;;  %v6920_v50 = vld [vmem:[#allocation12 + $0xc8] sm:$0xf] }
 0x2d3   :  { %1959 = vmatpush.bf16.msra.mxu3 %v6695_v11  ;;  %2312 = vmatpush.bf16.msrb.mxu0 %v6929_v41  ;;  %v7886_v11 = vld [vmem:[#allocation12 + $0xcc] sm:$0xf0] }
 0x2d5   :  { %v8219_v2 = vpop.eup %8218  ;;  %2326 = vmatpush.bf16.msra.mxu1 %v6933_v63 }
 0x2d6   :  { %v1706_v33 = vmul.f32 %v8219_v2, %v1695_v44  ;;  %v6937_v44 = vor.u32 %v7891_v48, %v6936_v60  ;;  %v6904_v48 = vld [vmem:[#allocation12 + $0xa8] sm:$0xf] }
 0x2d8   :  { %v1708_v13 = vpack.c.bf16 %v1706_v33, %v1706_v33  ;;  %v8081_v9 = vpack.c.bf16 %v1706_v33, %v1705_v54  ;;  %v372_v54 = vadd.f32 %v8986_v16, %v9065_v49  ;;  %v6914_v33 = vld [vmem:[#allocation12 + $0xd0] sm:$0xf0]  ;;  %2340 = vmatpush.bf16.msrb.mxu2 %v6937_v44 }
 0x2da   :  { %8082 = vst [vmem:[#allocation4 + $0x18] sm:$0xff] %v8081_v9   ;;  %v1747_v55 = vunpack.c.l.b16 %v1708_v13  ;;  %v6941_v13 = vor.u32 %v7889_v0, %v6938_v46  ;;  %v6913_v9 = vor.u32 %v7886_v11, %v6912_v47 }
 0x2dc   :  { %v1748_v62 = vpack.c.b16 %v1747_v55, %v1746_v1  ;;  %v6917_v1 = vor.u32 %v7884_v5, %v6914_v33  ;;  %v7887_v55 = vld [vmem:[#allocation12 + $0xd4] sm:$0xf0]  ;;  %2354 = vmatpush.bf16.msrb.mxu3 %v6941_v13  ;;  %2313 = vmatpush.bf16.msrb.mxu0 %v6913_v9  ;;  %v7881_v5 = vld [vmem:[#allocation12 + $0xac] sm:$0xf] }
 0x2de   :  { %1918 = vmatmul.bf16.vlgmr.msra.gmra.mxu0 %v1748_v62  ;;  %1932 = vmatmul.bf16.vlgmr.msrb.gmra.mxu1 %v1748_v62 }
 0x2df   :  { %1946 = vmatmul.bf16.vlgmr.msra.gmra.mxu2 %v1748_v62  ;;  %1960 = vmatmul.bf16.vlgmr.msra.gmra.mxu3 %v1748_v62  ;;  %v7885_v62 = vld [vmem:[#allocation12 + $0xcc] sm:$0xf] }
 0x2e0   :  { %2327 = vmatpush.bf16.msra.mxu1 %v6917_v1 }
 0x35b   :  { %v1919_v59 = vpop.f32.mrf.mxu0  ;;  %v1933_v52 = vpop.f32.mrf.mxu1 }
 0x35c   :  { %v1975_v30 = vadd.f32 %v1919_v59, %v274_v56  ;;  %v1976_v38 = vadd.f32 %v1933_v52, %v323_v4  ;;  %v6922_v56 = vld [vmem:[#allocation12 + $0xd8] sm:$0xf0] }
 0x35e   :  { %v6808_v57 = vmul.f32 -1.442695, %v1975_v30  ;;  %v6810_v3 = vmul.f32 -1.442695, %v1976_v38  ;;  %v6921_v30 = vor.u32 %v7887_v55, %v6920_v50  ;;  %v374_v38 = vadd.f32 %v8994_v20, %v9065_v49 }
 0x360   :  { %8220 = vpow2.f32 %v6808_v57  ;;  %2341 = vmatpush.bf16.msrb.mxu2 %v6921_v30 }
 0x361   :  { %8222 = vpow2.f32 %v6810_v3 }
 0x362   :  { %v1961_v10 = vpop.f32.mrf.mxu3  ;;  %v1947_v36 = vpop.f32.mrf.mxu2 }
 0x363   :  { %v1978_v12 = vadd.f32 %v1961_v10, %v421_v53  ;;  %v1921_v23 = vpop.f32.mrf.mxu0  ;;  %v1935_v61 = vpop.f32.mrf.mxu1  ;;  %v1977_v59 = vadd.f32 %v1947_v36, %v372_v54  ;;  %v6925_v53 = vor.u32 %v7885_v62, %v6922_v56  ;;  %v6906_v54 = vld [vmem:[#allocation12 + $0xb8] sm:$0xf0]  ;;  %v6880_v56 = vld [vmem:[#allocation12 + $0x80] sm:$0xf] }
 0x364   :  { %v1979_v35 = vadd.f32 %v1921_v23, %v276_v15  ;;  %v1980_v37 = vadd.f32 %v1935_v61, %v325_v14 }
 0x365   :  { %v6812_v28 = vmul.f32 -1.442695, %v1978_v12  ;;  %2355 = vmatpush.bf16.msrb.mxu3 %v6925_v53  ;;  %v6909_v53 = vor.u32 %v7881_v5, %v6906_v54  ;;  %v6848_v54 = vld [vmem:[#allocation12 + $0x40] sm:$0xf] }
 0x366   :  { %v8221_v24 = vpop.eup %8220  ;;  %v6809_v29 = vmul.f32 -1.442695, %v1979_v35  ;;  %v6811_v18 = vmul.f32 -1.442695, %v1980_v37 }
 0x367   :  { %v8223_v39 = vpop.eup %8222  ;;  %v9516_v32 = vadd.f32 1.0, %v8221_v24  ;;  %8224 = vpow2.f32 %v6812_v28  ;;  %v7882_v24 = vld [vmem:[#allocation12 + $0xac] sm:$0xf0] }
 0x368   :  { %v9518_v27 = vadd.f32 1.0, %v8223_v39  ;;  %8226 = vpow2.f32 %v6809_v29  ;;  %v6898_v39 = vld [vmem:[#allocation12 + $0xb0] sm:$0xf0]  ;;  %v6897_v47 = vor.u32 %v7882_v24, %v6896_v7 }
 0x369   :  { %8228 = vrcp.f32 %v9516_v32  ;;  %v2000_v42 = vand.u32 2147483647, %v9516_v32  ;;  %v2002_v12 = vand.u32 2147483648, %v9516_v32  ;;  %vm1996_vm10 = vweird.f32 %v9516_v32  ;;  %2356 = vmatpush.bf16.msrb.mxu3 %v6909_v53  ;;  %v6858_v53 = vld [vmem:[#allocation12 + $0x58] sm:$0xf0] }
 0x36a   :  { %8230 = vrcp.f32 %v9518_v27  ;;  %v1963_v34 = vpop.f32.mrf.mxu3  ;;  %v2040_v10 = vand.u32 2147483648, %v9518_v27  ;;  %v2038_v35 = vand.u32 2147483647, %v9518_v27  ;;  %v1949_v8 = vpop.f32.mrf.mxu2  ;;  %vm2034_vm11 = vweird.f32 %v9518_v27  ;;  %2314 = vmatpush.bf16.msrb.mxu0 %v6897_v47 }
 0x36b   :  { %8232 = vpow2.f32 %v6811_v18  ;;  %v1982_v2 = vadd.f32 %v1963_v34, %v423_v51  ;;  %vm9544_vm9 = vcmp.eq.f32.partialorder %v2000_v42, 8.507059e+37  ;;  %v2003_v63 = vor.u32 1.1754944e-38, %v2002_v12  ;;  %v7883_v51 = vld [vmem:[#allocation12 + $0xb4] sm:$0xf0] }
 0x36c   :  { %v1981_v60 = vadd.f32 %v1949_v8, %v374_v38  ;;  %v2041_v0 = vor.u32 1.1754944e-38, %v2040_v10  ;;  %v6901_v11 = vor.u32 %v7880_v17, %v6898_v39  ;;  %vm9575_vm15 = vcmp.eq.f32.partialorder %v2038_v35, 8.507059e+37  ;;  %v6888_v10 = vld [vmem:[#allocation12 + $0x88] sm:$0xf]  ;;  %v7879_v12 = vld [vmem:[#allocation12 + $0x94] sm:$0xf0] }
 0x36d   :  { %v8225_v21 = vpop.eup %8224  ;;  %v6813_v3 = vmul.f32 -1.442695, %v1982_v2  ;;  %v7877_v8 = vld [vmem:[#allocation12 + $0x8c] sm:$0xf]  ;;  %v7872_v17 = vld [vmem:[#allocation12 + $0x64] sm:$0xf] }
 0x36e   :  { %v8227_v4 = vpop.eup %8226  ;;  %v9527_v52 = vadd.f32 1.0, %v8225_v21  ;;  %2328 = vmatpush.bf16.msra.mxu1 %v6901_v11  ;;  %v6889_v11 = vor.u32 %v7879_v12, %v6888_v10 }
 0x36f   :  { %v9529_v16 = vpop.eup %8228  ;;  %v9533_v57 = vadd.f32 1.0, %v8227_v4  ;;  %v7878_v4 = vld [vmem:[#allocation12 + $0x8c] sm:$0xf0] }
 0x370   :  { %v9535_v15 = vpop.eup %8230  ;;  %v1992_v14 = vmul.f32 %v9529_v16, %v9516_v32  ;;  %8234 = vrcp.f32 %v9527_v52  ;;  %vm1997_vm12 = vweird.f32 %v9529_v16  ;;  %v7868_v32 = vld [vmem:[#allocation12 + $0x44] sm:$0xf] }
 0x371   :  { %v8233_v23 = vpop.eup %8232  ;;  %v2030_v20 = vmul.f32 %v9535_v15, %v9518_v27  ;;  %8236 = vrcp.f32 %v9533_v57  ;;  %v2017_v41 = vand.u32 2147483648, %v9533_v57  ;;  %v2015_v6 = vand.u32 2147483647, %v9533_v57  ;;  %vm9570_vm14 = vmor %vm1996_vm10, %vm1997_vm12 }
 0x372   :  { %v1993_v37 = vsub.f32 1.0, %v1992_v14  ;;  %8238 = vtanh.f32 %v1977_v59  ;;  %v9551_v28 = vadd.f32 1.0, %v8233_v23  ;;  %vm2035_vm13 = vweird.f32 %v9535_v15  ;;  %v7876_v59 = vld [vmem:[#allocation12 + $0x84] sm:$0xf]  ;;  %v6882_v14 = vld [vmem:[#allocation12 + $0x90] sm:$0xf0] }
 0x373   :  { %v2031_v29 = vsub.f32 1.0, %v2030_v20  ;;  %8240 = vpow2.f32 %v6813_v3  ;;  %v9580_v21 = vor.u32 1.1754944e-38, %v2017_v41  ;;  %vm9586_vm0 = vmor %vm2034_vm11, %vm2035_vm13  ;;  %vm9595_vm1 = vcmp.eq.f32.partialorder %v2015_v6, 8.507059e+37  ;;  %v7874_v41 = vld [vmem:[#allocation12 + $0x6c] sm:$0xf0] }
 0x374   :  { %v1994_v18 = vmul.f32 %v9529_v16, %v1993_v37  ;;  %8242 = vrcp.f32 %v9551_v28  ;;  %v2055_v50 = vand.u32 2147483648, %v9551_v28  ;;  %v2053_v62 = vand.u32 2147483647, %v9551_v28  ;;  %v6872_v6 = vld [vmem:[#allocation12 + $0x68] sm:$0xf] }
 0x375   :  { %v2032_v36 = vmul.f32 %v9535_v15, %v2031_v29  ;;  %v6905_v27 = vor.u32 %v7883_v51, %v6904_v48  ;;  %8244 = vtanh.f32 %v1981_v60  ;;  %v6864_v29 = vld [vmem:[#allocation12 + $0x60] sm:$0xf]  ;;  %vm2011_vm3 = vweird.f32 %v9533_v57  ;;  %v6874_v60 = vld [vmem:[#allocation12 + $0x78] sm:$0xf0] }
 0x376   :  { %v9561_v34 = vpop.eup %8234  ;;  %v1995_v46 = vadd.f32 %v9529_v16, %v1994_v18  ;;  %v6866_v18 = vld [vmem:[#allocation12 + $0x70] sm:$0xf0]  ;;  %v6881_v48 = vor.u32 %v7878_v4, %v6880_v56  ;;  %v6885_v51 = vor.u32 %v7876_v59, %v6882_v14  ;;  %v6856_v59 = vld [vmem:[#allocation12 + $0x48] sm:$0xf]  ;;  %vm2049_vm7 = vweird.f32 %v9551_v28 }
 0x377   :  { %v9564_v42 = vpop.eup %8236  ;;  %v2033_v44 = vadd.f32 %v9535_v15, %v2032_v36  ;;  %v9607_v3 = vmul.f32 %v9561_v34, %v9527_v52  ;;  %2342 = vmatpush.bf16.msrb.mxu2 %v6905_v27  ;;  %v7875_v36 = vld [vmem:[#allocation12 + $0x74] sm:$0xf0]  ;;  %v6869_v33 = vor.u32 %v7872_v17, %v6866_v18  ;;  %vm2075_vm6 = vweird.f32 %v9561_v34  ;;  %v6842_v18 = vld [vmem:[#allocation12 + $0x38] sm:$0xf0] }
 0x378   :  { %v8239_v13 = vpop.eup %8238  ;;  %v1999_v9 = vsel %vm9570_vm14, %v9529_v16, %v1995_v46  ;;  %v2007_v1 = vmul.f32 %v9564_v42, %v9533_v57  ;;  %vm2012_vm2 = vweird.f32 %v9564_v42  ;;  %2315 = vmatpush.bf16.msrb.mxu0 %v6881_v48  ;;  %2329 = vmatpush.bf16.msra.mxu1 %v6885_v51  ;;  %v6873_v56 = vor.u32 %v7875_v36, %v6872_v6 }
 0x379   :  { %v8241_v30 = vpop.eup %8240  ;;  %v2004_v38 = vsel %vm9544_vm9, %v2003_v63, %v1999_v9  ;;  %v2037_v16 = vsel %vm9586_vm0, %v9535_v15, %v2033_v44  ;;  %v6890_v15 = vld [vmem:[#allocation12 + $0x98] sm:$0xf0]  ;;  %v2071_v46 = vsub.f32 1.0, %v9607_v3  ;;  %vm9628_vm4 = vmor %vm2011_vm3, %vm2012_vm2  ;;  %v6865_v44 = vor.u32 %v7874_v41, %v6864_v29  ;;  %v6850_v9 = vld [vmem:[#allocation12 + $0x50] sm:$0xf0] }
 0x37a   :  { %v9609_v23 = vpop.eup %8242  ;;  %v2042_v20 = vsel %vm9575_vm15, %v2041_v0, %v2037_v16  ;;  %v2101_v35 = vmul.f32 %v8239_v13, %v2004_v38  ;;  %v2008_v61 = vsub.f32 1.0, %v2007_v1  ;;  %v9613_v37 = vadd.f32 1.0, %v8241_v30  ;;  %v7873_v0 = vld [vmem:[#allocation12 + $0x6c] sm:$0xf]  ;;  %v7870_v13 = vld [vmem:[#allocation12 + $0x4c] sm:$0xf0] }
 0x37b   :  { %v2099_v7 = vmul.f32 %v2042_v20, %v9446_v43  ;;  %v2045_v24 = vmul.f32 %v9609_v23, %v9551_v28  ;;  %v6893_v5 = vor.u32 %v7877_v8, %v6890_v15  ;;  %vm2050_vm5 = vweird.f32 %v9609_v23  ;;  %2343 = vmatpush.bf16.msrb.mxu2 %v6889_v11  ;;  %v8245_v30 = vpop.eup %8244  ;;  %v7871_v16 = vld [vmem:[#allocation12 + $0x54] sm:$0xf0]  ;;  %v7869_v3 = vld [vmem:[#allocation12 + $0x4c] sm:$0xf]  ;;  %v7864_v8 = vld [vmem:[#allocation12 + $0x24] sm:$0xf] }
 0x37c   :  { %v2009_v39 = vmul.f32 %v9564_v42, %v2008_v61  ;;  %8246 = vrcp.f32 %v9613_v37  ;;  %v2056_v1 = vor.u32 1.1754944e-38, %v2055_v50  ;;  %v6877_v4 = vor.u32 %v7873_v0, %v6874_v60  ;;  %vm2051_vm8 = vmor %vm2049_vm7, %vm2050_vm5  ;;  %2316 = vmatpush.bf16.msrb.mxu0 %v6865_v44  ;;  %2330 = vmatpush.bf16.msra.mxu1 %v6869_v33  ;;  %v7866_v61 = vld [vmem:[#allocation12 + $0x2c] sm:$0xf0]  ;;  %v7867_v29 = vld [vmem:[#allocation12 + $0x34] sm:$0xf0] }
 0x37d   :  { %v9622_v43 = vadd.f32 %v2101_v35, %v2099_v7  ;;  %v2046_v63 = vsub.f32 1.0, %v2045_v24  ;;  %2357 = vmatpush.bf16.msrb.mxu3 %v6893_v5  ;;  %v2072_v14 = vmul.f32 %v9561_v34, %v2071_v46  ;;  %vm2054_vm9 = vcmp.eq.f32.partialorder %v2053_v62, 8.507059e+37  ;;  %v6832_v35 = vld [vmem:[#allocation12 + $0x20] sm:$0xf]  ;;  %v6834_v7 = vld [vmem:[#allocation12 + $0x30] sm:$0xf0] }
 0x37e   :  { %v2010_v47 = vadd.f32 %v9564_v42, %v2009_v39  ;;  %v6849_v10 = vor.u32 %v7870_v13, %v6848_v54  ;;  %v6853_v12 = vor.u32 %v7868_v32, %v6850_v9  ;;  %v6857_v28 = vor.u32 %v7871_v16, %v6856_v59  ;;  %v6840_v24 = vld [vmem:[#allocation12 + $0x28] sm:$0xf]  ;;  %v7865_v39 = vld [vmem:[#allocation12 + $0x2c] sm:$0xf]  ;;  %v6816_v60 = vld [vmem:[#allocation12] sm:$0xf] }
 0x37f   :  { %v2047_v2 = vmul.f32 %v9609_v23, %v2046_v63  ;;  %8248 = vtanh.f32 %v9622_v43  ;;  %2344 = vmatpush.bf16.msrb.mxu2 %v6873_v56  ;;  %v6861_v62 = vor.u32 %v7869_v3, %v6858_v53  ;;  %vm2074_vm10 = vweird.f32 %v9527_v52  ;;  %v7862_v46 = vld [vmem:[#allocation12 + $0xc] sm:$0xf0]  ;;  %v6818_v5 = vld [vmem:[#allocation12 + $0x10] sm:$0xf0]  ;;  %v6824_v54 = vld [vmem:[#allocation12 + $0x8] sm:$0xf] }
 0x380   :  { %v2014_v27 = vsel %vm9628_vm4, %v9564_v42, %v2010_v47  ;;  %vm9661_vm11 = vmor %vm2074_vm10, %vm2075_vm6  ;;  %v6833_v36 = vor.u32 %v7866_v61, %v6832_v35  ;;  %v2073_v63 = vadd.f32 %v9561_v34, %v2072_v14  ;;  %v2078_v48 = vand.u32 2147483647, %v9527_v52  ;;  %2317 = vmatpush.bf16.msrb.mxu0 %v6849_v10  ;;  %2331 = vmatpush.bf16.msra.mxu1 %v6853_v12  ;;  %v7860_v47 = vld [vmem:[#allocation12 + $0x4] sm:$0xf]  ;;  %v7861_v32 = vld [vmem:[#allocation12 + $0xc] sm:$0xf] }
 0x381   :  { %v2019_v38 = vsel %vm9595_vm1, %v9580_v21, %v2014_v27  ;;  %v2048_v50 = vadd.f32 %v9609_v23, %v2047_v2  ;;  %2358 = vmatpush.bf16.msrb.mxu3 %v6877_v4  ;;  %v6841_v57 = vor.u32 %v7867_v29, %v6840_v24  ;;  %v6845_v11 = vor.u32 %v7865_v39, %v6842_v18  ;;  %v7863_v2 = vld [vmem:[#allocation12 + $0x14] sm:$0xf0]  ;;  %v6826_v9 = vld [vmem:[#allocation12 + $0x18] sm:$0xf0] }
 0x382   :  { %v9645_v42 = vpop.eup %8246  ;;  %v2102_v55 = vmul.f32 %v8245_v30, %v2019_v38  ;;  %v2095_v13 = vand.u32 2147483648, %v9613_v37  ;;  %vm2089_vm13 = vweird.f32 %v9613_v37  ;;  %v6817_v27 = vor.u32 %v7862_v46, %v6816_v60 }
 0x383   :  { %v2052_v21 = vsel %vm2051_vm8, %v9609_v23, %v2048_v50  ;;  %v2085_v20 = vmul.f32 %v9645_v42, %v9613_v37  ;;  %v2080_v23 = vand.u32 2147483648, %v9527_v52  ;;  %2345 = vmatpush.bf16.msrb.mxu2 %v6857_v28  ;;  %v2077_v52 = vsel %vm9661_vm11, %v9561_v34, %v2073_v63  ;;  %v7062_v63 = vld [vmem:[#allocation12 + $0xe0] sm:$0xf] }
 0x384   :  { %v2057_v15 = vsel %vm2054_vm9, %v2056_v1, %v2052_v21  ;;  %vm2090_vm12 = vweird.f32 %v9645_v42  ;;  %vm2079_vm14 = vcmp.eq.f32.partialorder %v2078_v48, 8.507059e+37  ;;  %v2093_v56 = vand.u32 2147483647, %v9613_v37  ;;  %2318 = vmatpush.bf16.msrb.mxu0 %v6833_v36  ;;  %v7922_v48 = vld [vmem:[#allocation12 + $0xec] sm:$0xf0] }
 0x385   :  { %v2100_v41 = vmul.f32 %v2057_v15, %v9491_v19  ;;  %v2086_v17 = vsub.f32 1.0, %v2085_v20  ;;  %v6837_v19 = vor.u32 %v7864_v8, %v6834_v7  ;;  %2359 = vmatpush.bf16.msrb.mxu3 %v6861_v62  ;;  %v8249_v44 = vpop.eup %8248  ;;  %v2081_v33 = vor.u32 1.1754944e-38, %v2080_v23  ;;  %vm2091_vm15 = vmor %vm2089_vm13, %vm2090_vm12  ;;  %v11310_v23 = vld [vmem:[#allocation32_spill] sm:$0xff] }
 0x386   :  { %v6821_v34 = vor.u32 %v7860_v47, %v6818_v5  ;;  %v6825_v4 = vor.u32 %v7863_v2, %v6824_v54  ;;  %v6829_v30 = vor.u32 %v7861_v32, %v6826_v9  ;;  %v2096_v16 = vor.u32 1.1754944e-38, %v2095_v13  ;;  %v7070_v2 = vld [vmem:[#allocation12 + $0xe8] sm:$0xf]  ;;  %v7046_v13 = vld [vmem:[#allocation12 + $0xc0] sm:$0xf] }
 0x387   :  { %v9667_v51 = vadd.f32 %v2102_v55, %v2100_v41  ;;  %v2087_v0 = vmul.f32 %v9645_v42, %v2086_v17  ;;  %2332 = vmatpush.bf16.msra.mxu1 %v6837_v19  ;;  %v2082_v59 = vsel %vm2079_vm14, %v2081_v33, %v2077_v52  ;;  %2346 = vmatpush.bf16.msrb.mxu2 %v6841_v57  ;;  %vm2094_vm0 = vcmp.eq.f32.partialorder %v2093_v56, 8.507059e+37  ;;  %v7064_v57 = vld [vmem:[#allocation12 + $0xf0] sm:$0xf0]  ;;  %v7923_v52 = vld [vmem:[#allocation12 + $0xf4] sm:$0xf0]  ;;  %v11311_v32 = vld [vmem:[#allocation25_spill] sm:$0xff] }
 0x388   :  { %v2107_v50 = vmul.f32 %v8249_v44, %v2082_v59  ;;  %2319 = vmatpush.bf16.msrb.mxu0 %v6817_v27  ;;  %v328_v35 = vadd.f32 %v9016_v31, %v9071_v58  ;;  %v426_v24 = vadd.f32 %v9004_v25, %v9069_v40  ;;  %v281_v29 = vadd.f32 %v9006_v26, %v9042_v45  ;;  %v7920_v25 = vld [vmem:[#allocation12 + $0xe4] sm:$0xf]  ;;  %v7921_v44 = vld [vmem:[#allocation12 + $0xec] sm:$0xf]  ;;  %v7072_v33 = vld [vmem:[#allocation12 + $0xf8] sm:$0xf0] }
 0x389   :  { %8250 = vtanh.f32 %v9667_v51  ;;  %v2088_v1 = vadd.f32 %v9645_v42, %v2087_v0  ;;  %2360 = vmatpush.bf16.msrb.mxu3 %v6845_v11  ;;  %v7063_v60 = vor.u32 %v7922_v48, %v7062_v63  ;;  %v7067_v54 = vor.u32 %v7920_v25, %v7064_v57  ;;  %v7918_v27 = vld [vmem:[#allocation12 + $0xcc] sm:$0xf0]  ;;  %v7916_v56 = vld [vmem:[#allocation12 + $0xc4] sm:$0xf] }
 0x38a   :  { %v2109_v14 = vpack.c.bf16 %v2107_v50, %v2107_v50  ;;  %v377_v9 = vadd.f32 %v11311_v32, %v9065_v49  ;;  %v7008_v32 = vld [vmem:[#allocation12 + $0x78] sm:$0xf0] }
 0x38b   :  { %v2092_v38 = vsel %vm2091_vm15, %v9645_v42, %v2088_v1  ;;  %2333 = vmatpush.bf16.msra.mxu1 %v6821_v34  ;;  %2347 = vmatpush.bf16.msrb.mxu2 %v6825_v4  ;;  %v279_v42 = vadd.f32 %v8998_v22, %v9042_v45  ;;  %v330_v22 = vadd.f32 %v11310_v23, %v9071_v58  ;;  %v11312_v34 = vld [vmem:[#allocation27_spill] sm:$0xff] }
 0x38c   :  { %v2097_v37 = vsel %vm2094_vm0, %v2096_v16, %v2092_v38  ;;  %v2148_v21 = vunpack.c.l.b16 %v2109_v14  ;;  %2714 = vmatpush.bf16.msra.mxu0 %v7063_v60  ;;  %v428_v4 = vadd.f32 %v11312_v34, %v9069_v40  ;;  %v7048_v38 = vld [vmem:[#allocation12 + $0xd0] sm:$0xf0] }
 0x38d   :  { %2361 = vmatpush.bf16.msrb.mxu3 %v6829_v30  ;;  %v7071_v30 = vor.u32 %v7923_v52, %v7070_v2  ;;  %v7051_v14 = vor.u32 %v7916_v56, %v7048_v38  ;;  %v7038_v2 = vld [vmem:[#allocation12 + $0xa8] sm:$0xf]  ;;  %v7915_v52 = vld [vmem:[#allocation12 + $0xb4] sm:$0xf0]  ;;  %v7900_v56 = vld [vmem:[#allocation12 + $0x44] sm:$0xf] }
 0x38f   :  { %v8251_v3 = vpop.eup %8250  ;;  %2728 = vmatpush.bf16.msrb.mxu1 %v7067_v54  ;;  %2742 = vmatpush.bf16.msra.mxu2 %v7071_v30  ;;  %v7014_v30 = vld [vmem:[#allocation12 + $0x80] sm:$0xf] }
 0x390   :  { %v2108_v53 = vmul.f32 %v8251_v3, %v2097_v37  ;;  %v7075_v37 = vor.u32 %v7921_v44, %v7072_v33 }
 0x392   :  { %v2110_v10 = vpack.c.bf16 %v2108_v53, %v2108_v53  ;;  %v8086_v12 = vpack.c.bf16 %v2108_v53, %v2107_v50  ;;  %v7054_v50 = vld [vmem:[#allocation12 + $0xc8] sm:$0xf]  ;;  %v7047_v53 = vor.u32 %v7918_v27, %v7046_v13  ;;  %2756 = vmatpush.bf16.msra.mxu3 %v7075_v37  ;;  %v7039_v37 = vor.u32 %v7915_v52, %v7038_v2  ;;  %v7905_v13 = vld [vmem:[#allocation12 + $0x6c] sm:$0xf] }
 0x393   :  { %2729 = vmatpush.bf16.msrb.mxu1 %v7051_v14  ;;  %v7908_v14 = vld [vmem:[#allocation12 + $0x84] sm:$0xf] }
 0x394   :  { %8087 = vst [vmem:[#allocation4 + $0x10] sm:$0xff] %v8086_v12   ;;  %v2149_v55 = vunpack.c.l.b16 %v2110_v10  ;;  %v7919_v10 = vld [vmem:[#allocation12 + $0xd4] sm:$0xf0]  ;;  %v7917_v12 = vld [vmem:[#allocation12 + $0xcc] sm:$0xf]  ;;  %2715 = vmatpush.bf16.msra.mxu0 %v7047_v53 }
 0x395   :  { %v7910_v53 = vld [vmem:[#allocation12 + $0x8c] sm:$0xf0] }
 0x396   :  { %v2150_v20 = vpack.c.b16 %v2149_v55, %v2148_v21  ;;  %v7056_v21 = vld [vmem:[#allocation12 + $0xd8] sm:$0xf0] }
 0x398   :  { %2320 = vmatmul.bf16.vlgmr.msrb.gmra.mxu0 %v2150_v20  ;;  %2334 = vmatmul.bf16.vlgmr.msra.gmra.mxu1 %v2150_v20 }
 0x399   :  { %2348 = vmatmul.bf16.vlgmr.msrb.gmra.mxu2 %v2150_v20  ;;  %2362 = vmatmul.bf16.vlgmr.msrb.gmra.mxu3 %v2150_v20 }
 0x415   :  { %v2321_v61 = vpop.f32.mrf.mxu0  ;;  %v2335_v8 = vpop.f32.mrf.mxu1 }
 0x416   :  { %v2377_v15 = vadd.f32 %v2321_v61, %v279_v42  ;;  %v2378_v28 = vadd.f32 %v2335_v8, %v328_v35  ;;  %v7055_v35 = vor.u32 %v7919_v10, %v7054_v50  ;;  %v7016_v10 = vld [vmem:[#allocation12 + $0x90] sm:$0xf0] }
 0x418   :  { %v6942_v62 = vmul.f32 -1.442695, %v2377_v15  ;;  %v6944_v7 = vmul.f32 -1.442695, %v2378_v28  ;;  %v7059_v28 = vor.u32 %v7917_v12, %v7056_v21  ;;  %2743 = vmatpush.bf16.msra.mxu2 %v7055_v35  ;;  %v7022_v35 = vld [vmem:[#allocation12 + $0x88] sm:$0xf] }
 0x41a   :  { %8252 = vpow2.f32 %v6942_v62  ;;  %2757 = vmatpush.bf16.msra.mxu3 %v7059_v28 }
 0x41b   :  { %8254 = vpow2.f32 %v6944_v7  ;;  %v11313_v7 = vld [vmem:[#allocation26_spill] sm:$0xff] }
 0x41c   :  { %v2363_v41 = vpop.f32.mrf.mxu3  ;;  %v2349_v5 = vpop.f32.mrf.mxu2  ;;  %2744 = vmatpush.bf16.msra.mxu2 %v7039_v37 }
 0x41d   :  { %v2380_v17 = vadd.f32 %v2363_v41, %v426_v24  ;;  %v2323_v31 = vpop.f32.mrf.mxu0  ;;  %v2337_v39 = vpop.f32.mrf.mxu1  ;;  %v2379_v3 = vadd.f32 %v2349_v5, %v377_v9  ;;  %v379_v24 = vadd.f32 %v11313_v7, %v9065_v49  ;;  %v7913_v9 = vld [vmem:[#allocation12 + $0xac] sm:$0xf] }
 0x41e   :  { %v2381_v18 = vadd.f32 %v2323_v31, %v281_v29  ;;  %v2382_v6 = vadd.f32 %v2337_v39, %v330_v22 }
 0x41f   :  { %v6946_v36 = vmul.f32 -1.442695, %v2380_v17 }
 0x420   :  { %v8253_v0 = vpop.eup %8252  ;;  %v6943_v19 = vmul.f32 -1.442695, %v2381_v18  ;;  %v6945_v26 = vmul.f32 -1.442695, %v2382_v6 }
 0x421   :  { %v8255_v46 = vpop.eup %8254  ;;  %v9692_v47 = vadd.f32 1.0, %v8253_v0  ;;  %8256 = vpow2.f32 %v6946_v36  ;;  %v7030_v0 = vld [vmem:[#allocation12 + $0xa0] sm:$0xf] }
 0x422   :  { %v9694_v11 = vadd.f32 1.0, %v8255_v46  ;;  %8258 = vpow2.f32 %v6943_v19  ;;  %v7914_v19 = vld [vmem:[#allocation12 + $0xac] sm:$0xf0]  ;;  %v7912_v46 = vld [vmem:[#allocation12 + $0xa4] sm:$0xf] }
 0x423   :  { %8260 = vrcp.f32 %v9692_v47  ;;  %v2402_v59 = vand.u32 2147483647, %v9692_v47  ;;  %v2404_v8 = vand.u32 2147483648, %v9692_v47  ;;  %vm2398_vm2 = vweird.f32 %v9692_v47 }
 0x424   :  { %8262 = vrcp.f32 %v9694_v11  ;;  %v2365_v1 = vpop.f32.mrf.mxu3  ;;  %v2442_v23 = vand.u32 2147483648, %v9694_v11  ;;  %v2440_v31 = vand.u32 2147483647, %v9694_v11  ;;  %v2351_v6 = vpop.f32.mrf.mxu2  ;;  %vm2436_vm5 = vweird.f32 %v9694_v11 }
 0x425   :  { %8264 = vpow2.f32 %v6945_v26  ;;  %v2384_v42 = vadd.f32 %v2365_v1, %v428_v4  ;;  %vm9720_vm1 = vcmp.eq.f32.partialorder %v2402_v59, 8.507059e+37  ;;  %v2405_v48 = vor.u32 1.1754944e-38, %v2404_v8  ;;  %v7032_v26 = vld [vmem:[#allocation12 + $0xb0] sm:$0xf0]  ;;  %v7040_v1 = vld [vmem:[#allocation12 + $0xb8] sm:$0xf0] }
 0x426   :  { %v2443_v60 = vor.u32 1.1754944e-38, %v2442_v23  ;;  %v2383_v5 = vadd.f32 %v2351_v6, %v379_v24  ;;  %vm9747_vm7 = vcmp.eq.f32.partialorder %v2440_v31, 8.507059e+37  ;;  %v7909_v8 = vld [vmem:[#allocation12 + $0x8c] sm:$0xf]  ;;  %v6998_v23 = vld [vmem:[#allocation12 + $0x60] sm:$0xf] }
 0x427   :  { %v8257_v16 = vpop.eup %8256  ;;  %v6947_v36 = vmul.f32 -1.442695, %v2384_v42  ;;  %v7000_v6 = vld [vmem:[#allocation12 + $0x70] sm:$0xf0] }
 0x428   :  { %v8259_v55 = vpop.eup %8258  ;;  %v9703_v20 = vadd.f32 1.0, %v8257_v16 }
 0x429   :  { %v9705_v61 = vpop.eup %8260  ;;  %v9708_v15 = vadd.f32 1.0, %v8259_v55 }
 0x42a   :  { %v9710_v62 = vpop.eup %8262  ;;  %v2394_v29 = vmul.f32 %v9705_v61, %v9692_v47  ;;  %8266 = vrcp.f32 %v9703_v20  ;;  %vm2399_vm3 = vweird.f32 %v9705_v61 }
 0x42b   :  { %v8265_v22 = vpop.eup %8264  ;;  %v2432_v41 = vmul.f32 %v9710_v62, %v9694_v11  ;;  %8268 = vtanh.f32 %v2379_v3  ;;  %vm2437_vm4 = vweird.f32 %v9710_v62  ;;  %v2417_v54 = vand.u32 2147483647, %v9708_v15  ;;  %vm9743_vm6 = vmor %vm2398_vm2, %vm2399_vm3 }
 0x42c   :  { %v2395_v39 = vsub.f32 1.0, %v2394_v29  ;;  %8270 = vrcp.f32 %v9708_v15  ;;  %v9726_v18 = vadd.f32 1.0, %v8265_v22  ;;  %v7031_v11 = vor.u32 %v7914_v19, %v7030_v0  ;;  %vm9753_vm8 = vmor %vm2436_vm5, %vm2437_vm4  ;;  %v7024_v29 = vld [vmem:[#allocation12 + $0x98] sm:$0xf0]  ;;  %v7906_v22 = vld [vmem:[#allocation12 + $0x6c] sm:$0xf0] }
 0x42d   :  { %v2433_v63 = vsub.f32 1.0, %v2432_v41  ;;  %v2419_v4 = vand.u32 2147483648, %v9708_v15  ;;  %v7035_v3 = vor.u32 %v7912_v46, %v7032_v26  ;;  %vm9775_vm9 = vcmp.eq.f32.partialorder %v2417_v54, 8.507059e+37  ;;  %v7006_v26 = vld [vmem:[#allocation12 + $0x68] sm:$0xf] }
 0x42e   :  { %v2396_v25 = vmul.f32 %v9705_v61, %v2395_v39  ;;  %8272 = vrcp.f32 %v9726_v18  ;;  %v2457_v34 = vand.u32 2147483648, %v9726_v18  ;;  %v2455_v59 = vand.u32 2147483647, %v9726_v18  ;;  %2716 = vmatpush.bf16.msra.mxu0 %v7031_v11  ;;  %v7904_v39 = vld [vmem:[#allocation12 + $0x64] sm:$0xf] }
 0x42f   :  { %v2434_v57 = vmul.f32 %v9710_v62, %v2433_v63  ;;  %8274 = vpow2.f32 %v6947_v36  ;;  %vm2413_vm10 = vweird.f32 %v9708_v15  ;;  %2730 = vmatpush.bf16.msrb.mxu1 %v7035_v3  ;;  %v7019_v0 = vor.u32 %v7908_v14, %v7016_v10  ;;  %v7901_v14 = vld [vmem:[#allocation12 + $0x4c] sm:$0xf]  ;;  %v6992_v10 = vld [vmem:[#allocation12 + $0x58] sm:$0xf0] }
 0x430   :  { %v9736_v44 = vpop.eup %8266  ;;  %v2397_v33 = vadd.f32 %v9705_v61, %v2396_v25  ;;  %8276 = vtanh.f32 %v2383_v5  ;;  %v7027_v2 = vor.u32 %v7909_v8, %v7024_v29  ;;  %v6999_v52 = vor.u32 %v7906_v22, %v6998_v23  ;;  %v6968_v29 = vld [vmem:[#allocation12 + $0x30] sm:$0xf0]  ;;  %v7899_v23 = vld [vmem:[#allocation12 + $0x34] sm:$0xf0]  ;;  %v6958_v5 = vld [vmem:[#allocation12 + $0x8] sm:$0xf] }
 0x431   :  { %v8269_v27 = vpop.eup %8268  ;;  %v2435_v47 = vadd.f32 %v9710_v62, %v2434_v57  ;;  %v2472_v16 = vmul.f32 %v9736_v44, %v9703_v20  ;;  %v7907_v57 = vld [vmem:[#allocation12 + $0x74] sm:$0xf0]  ;;  %vm2451_vm14 = vweird.f32 %v9726_v18  ;;  %vm2456_vm0 = vcmp.eq.f32.partialorder %v2455_v59, 8.507059e+37  ;;  %v6974_v59 = vld [vmem:[#allocation12 + $0x28] sm:$0xf] }
 0x432   :  { %v9761_v38 = vpop.eup %8270  ;;  %v2401_v50 = vsel %vm9743_vm6, %v9705_v61, %v2397_v33  ;;  %v7911_v61 = vld [vmem:[#allocation12 + $0x94] sm:$0xf0]  ;;  %v7003_v33 = vor.u32 %v7904_v39, %v7000_v6  ;;  %v7007_v37 = vor.u32 %v7907_v57, %v7006_v26  ;;  %v2482_v6 = vand.u32 2147483648, %v9703_v20 }
 0x433   :  { %v2406_v12 = vsel %vm9720_vm1, %v2405_v48, %v2401_v50  ;;  %v2439_v21 = vsel %vm9753_vm8, %v9710_v62, %v2435_v47  ;;  %v2409_v55 = vmul.f32 %v9761_v38, %v9708_v15  ;;  %v7043_v62 = vor.u32 %v7913_v9, %v7040_v1  ;;  %2731 = vmatpush.bf16.msrb.mxu1 %v7019_v0  ;;  %v6982_v1 = vld [vmem:[#allocation12 + $0x40] sm:$0xf]  ;;  %v7903_v50 = vld [vmem:[#allocation12 + $0x54] sm:$0xf0] }
 0x434   :  { %v9779_v28 = vpop.eup %8272  ;;  %v2444_v7 = vsel %vm9747_vm7, %v2443_v60, %v2439_v21  ;;  %v2503_v24 = vmul.f32 %v8269_v27, %v2406_v12  ;;  %vm2414_vm11 = vweird.f32 %v9761_v38  ;;  %v2473_v63 = vsub.f32 1.0, %v2472_v16  ;;  %v7902_v27 = vld [vmem:[#allocation12 + $0x4c] sm:$0xf0] }
 0x435   :  { %v2501_v41 = vmul.f32 %v2444_v7, %v9622_v43  ;;  %v2410_v17 = vsub.f32 1.0, %v2409_v55  ;;  %v2447_v31 = vmul.f32 %v9779_v28, %v9726_v18  ;;  %v8275_v36 = vpop.eup %8274  ;;  %2758 = vmatpush.bf16.msra.mxu3 %v7043_v62  ;;  %v7015_v48 = vor.u32 %v7910_v53, %v7014_v30  ;;  %vm9795_vm12 = vmor %vm2413_vm10, %vm2414_vm11  ;;  %v6990_v30 = vld [vmem:[#allocation12 + $0x48] sm:$0xf]  ;;  %v7898_v62 = vld [vmem:[#allocation12 + $0x2c] sm:$0xf0] }
 0x436   :  { %v7023_v19 = vor.u32 %v7911_v61, %v7022_v35  ;;  %v2420_v43 = vor.u32 1.1754944e-38, %v2419_v4  ;;  %v9799_v54 = vadd.f32 1.0, %v8275_v36  ;;  %v8277_v11 = vpop.eup %8276  ;;  %vm2452_vm13 = vweird.f32 %v9779_v28  ;;  %v6984_v4 = vld [vmem:[#allocation12 + $0x50] sm:$0xf0]  ;;  %v6966_v35 = vld [vmem:[#allocation12 + $0x20] sm:$0xf] }
 0x437   :  { %v9788_v60 = vadd.f32 %v2503_v24, %v2501_v41  ;;  %v2448_v25 = vsub.f32 1.0, %v2447_v31  ;;  %v2411_v46 = vmul.f32 %v9761_v38, %v2410_v17  ;;  %2717 = vmatpush.bf16.msra.mxu0 %v7015_v48  ;;  %v2474_v47 = vmul.f32 %v9736_v44, %v2473_v63  ;;  %vm9813_vm15 = vmor %vm2451_vm14, %vm2452_vm13  ;;  %2732 = vmatpush.bf16.msrb.mxu1 %v7003_v33  ;;  %v7897_v17 = vld [vmem:[#allocation12 + $0x2c] sm:$0xf]  ;;  %v6976_v31 = vld [vmem:[#allocation12 + $0x38] sm:$0xf0] }
 0x438   :  { %2745 = vmatpush.bf16.msra.mxu2 %v7023_v19  ;;  %8278 = vrcp.f32 %v9799_v54  ;;  %v7011_v53 = vor.u32 %v7905_v13, %v7008_v32  ;;  %v2458_v21 = vor.u32 1.1754944e-38, %v2457_v34  ;;  %v6987_v7 = vor.u32 %v7900_v56, %v6984_v4  ;;  %v7896_v34 = vld [vmem:[#allocation12 + $0x24] sm:$0xf]  ;;  %v6950_v48 = vld [vmem:[#allocation12] sm:$0xf] }
 0x439   :  { %v2449_v9 = vmul.f32 %v9779_v28, %v2448_v25  ;;  %v2412_v15 = vadd.f32 %v9761_v38, %v2411_v46  ;;  %2759 = vmatpush.bf16.msra.mxu3 %v7027_v2  ;;  %v6991_v24 = vor.u32 %v7903_v50, %v6990_v30  ;;  %8280 = vtanh.f32 %v9788_v60  ;;  %v7894_v46 = vld [vmem:[#allocation12 + $0xc] sm:$0xf0]  ;;  %v7895_v2 = vld [vmem:[#allocation12 + $0x14] sm:$0xf0]  ;;  %v7893_v13 = vld [vmem:[#allocation12 + $0xc] sm:$0xf] }
 0x43a   :  { %v6995_v18 = vor.u32 %v7901_v14, %v6992_v10  ;;  %v2475_v22 = vadd.f32 %v9736_v44, %v2474_v47  ;;  %vm2477_vm1 = vweird.f32 %v9736_v44  ;;  %v6967_v36 = vor.u32 %v7898_v62, %v6966_v35  ;;  %v6960_v32 = vld [vmem:[#allocation12 + $0x18] sm:$0xf0] }
 0x43b   :  { %v2416_v16 = vsel %vm9795_vm12, %v9761_v38, %v2412_v15  ;;  %v2450_v3 = vadd.f32 %v9779_v28, %v2449_v9  ;;  %2718 = vmatpush.bf16.msra.mxu0 %v6999_v52  ;;  %v6983_v38 = vor.u32 %v7902_v27, %v6982_v1  ;;  %2733 = vmatpush.bf16.msrb.mxu1 %v6987_v7  ;;  %vm2476_vm2 = vweird.f32 %v9703_v20  ;;  %v11333_v7 = vld [vmem:[#allocation36_spill] sm:$0xff] }
 0x43c   :  { %v2421_v55 = vsel %vm9775_vm9, %v2420_v43, %v2416_v16  ;;  %2746 = vmatpush.bf16.msra.mxu2 %v7007_v37  ;;  %v6971_v63 = vor.u32 %v7896_v34, %v6968_v29  ;;  %v6975_v25 = vor.u32 %v7899_v23, %v6974_v59  ;;  %v6952_v43 = vld [vmem:[#allocation12 + $0x10] sm:$0xf0]  ;;  %vm9838_vm3 = vmor %vm2476_vm2, %vm2477_vm1  ;;  %v6979_v57 = vor.u32 %v7897_v17, %v6976_v31  ;;  %v7952_v17 = vld [vmem:[#allocation12 + $0xe4] sm:$0xf] }
 0x43d   :  { %v2454_v61 = vsel %vm9813_vm15, %v9779_v28, %v2450_v3  ;;  %v2504_v8 = vmul.f32 %v8277_v11, %v2421_v55  ;;  %2760 = vmatpush.bf16.msra.mxu3 %v7011_v53  ;;  %v2480_v28 = vand.u32 2147483647, %v9703_v20  ;;  %v2479_v20 = vsel %vm9838_vm3, %v9736_v44, %v2475_v22  ;;  %v11334_v23 = vld [vmem:[#allocation30_spill] sm:$0xff]  ;;  %v11335_v31 = vld [vmem:[#allocation31_spill] sm:$0xff] }
 0x43e   :  { %v2459_v42 = vsel %vm2456_vm0, %v2458_v21, %v2454_v61  ;;  %v8279_v39 = vpop.eup %8278  ;;  %v2483_v9 = vor.u32 1.1754944e-38, %v2482_v6  ;;  %v2497_v15 = vand.u32 2147483648, %v9799_v54  ;;  %v6951_v1 = vor.u32 %v7894_v46, %v6950_v48  ;;  %v11336_v6 = vld [vmem:[#allocation40_spill] sm:$0xff]  ;;  %v7955_v46 = vld [vmem:[#allocation12 + $0xf4] sm:$0xf0] }
 0x43f   :  { %v2502_v41 = vmul.f32 %v2459_v42, %v9667_v51  ;;  %2719 = vmatpush.bf16.msra.mxu0 %v6983_v38  ;;  %v2487_v19 = vmul.f32 %v8279_v39, %v9799_v54  ;;  %v7892_v51 = vld [vmem:[#allocation12 + $0x4] sm:$0xf]  ;;  %vm9845_vm4 = vcmp.eq.f32.partialorder %v2480_v28, 8.507059e+37  ;;  %v8281_v11 = vpop.eup %8280  ;;  %2734 = vmatpush.bf16.msrb.mxu1 %v6971_v63  ;;  %vm2492_vm5 = vweird.f32 %v8279_v39  ;;  %v7196_v28 = vld [vmem:[#allocation12 + $0xe0] sm:$0xf] }
 0x440   :  { %2747 = vmatpush.bf16.msra.mxu2 %v6991_v24  ;;  %v6955_v27 = vor.u32 %v7892_v51, %v6952_v43  ;;  %v2495_v44 = vand.u32 2147483647, %v9799_v54  ;;  %v6959_v47 = vor.u32 %v7895_v2, %v6958_v5  ;;  %v6963_v4 = vor.u32 %v7893_v13, %v6960_v32  ;;  %v7953_v2 = vld [vmem:[#allocation12 + $0xec] sm:$0xf] }
 0x441   :  { %v9833_v0 = vadd.f32 %v2504_v8, %v2502_v41  ;;  %2761 = vmatpush.bf16.msra.mxu3 %v6995_v18  ;;  %v2488_v33 = vsub.f32 1.0, %v2487_v19  ;;  %v2484_v30 = vsel %vm9845_vm4, %v2483_v9, %v2479_v20  ;;  %vm2491_vm6 = vweird.f32 %v9799_v54  ;;  %v11332_v54 = vld [vmem:[#allocation28_spill] sm:$0xff]  ;;  %v7954_v41 = vld [vmem:[#allocation12 + $0xec] sm:$0xf0]  ;;  %v7198_v19 = vld [vmem:[#allocation12 + $0xf0] sm:$0xf0] }
 0x442   :  { %v2509_v16 = vmul.f32 %v8281_v11, %v2484_v30  ;;  %vm2493_vm7 = vmor %vm2491_vm6, %vm2492_vm5  ;;  %v2498_v3 = vor.u32 1.1754944e-38, %v2497_v15  ;;  %vm2496_vm8 = vcmp.eq.f32.partialorder %v2495_v44, 8.507059e+37  ;;  %v284_v8 = vadd.f32 %v11332_v54, %v9042_v45  ;;  %v7206_v20 = vld [vmem:[#allocation12 + $0xf8] sm:$0xf0]  ;;  %v7180_v11 = vld [vmem:[#allocation12 + $0xc0] sm:$0xf] }
 0x443   :  { %8282 = vtanh.f32 %v9833_v0  ;;  %2720 = vmatpush.bf16.msra.mxu0 %v6967_v36  ;;  %v2489_v56 = vmul.f32 %v8279_v39, %v2488_v33  ;;  %2735 = vmatpush.bf16.msrb.mxu1 %v6955_v27  ;;  %v333_v24 = vadd.f32 %v11333_v7, %v9071_v58  ;;  %v431_v22 = vadd.f32 %v11334_v23, %v9069_v40  ;;  %v7950_v9 = vld [vmem:[#allocation12 + $0xcc] sm:$0xf0]  ;;  %v7182_v30 = vld [vmem:[#allocation12 + $0xd0] sm:$0xf0] }
 0x444   :  { %2748 = vmatpush.bf16.msra.mxu2 %v6975_v25  ;;  %v2511_v12 = vpack.c.bf16 %v2509_v16, %v2509_v16  ;;  %v335_v36 = vadd.f32 %v11336_v6, %v9071_v58  ;;  %v7197_v48 = vor.u32 %v7954_v41, %v7196_v28  ;;  %v7204_v25 = vld [vmem:[#allocation12 + $0xe8] sm:$0xf]  ;;  %v7209_v13 = vor.u32 %v7953_v2, %v7206_v20  ;;  %v11338_v54 = vld [vmem:[#allocation34_spill] sm:$0xff]  ;;  %v7945_v28 = vld [vmem:[#allocation12 + $0xac] sm:$0xf] }
 0x445   :  { %2762 = vmatpush.bf16.msra.mxu3 %v6979_v57  ;;  %v2490_v50 = vadd.f32 %v8279_v39, %v2489_v56  ;;  %v7201_v57 = vor.u32 %v7952_v17, %v7198_v19  ;;  %v7205_v5 = vor.u32 %v7955_v46, %v7204_v25  ;;  %v7181_v27 = vor.u32 %v7950_v9, %v7180_v11  ;;  %v7948_v56 = vld [vmem:[#allocation12 + $0xc4] sm:$0xf]  ;;  %v7174_v41 = vld [vmem:[#allocation12 + $0xb8] sm:$0xf0]  ;;  %v11339_v46 = vld [vmem:[#allocation33_spill] sm:$0xff] }
 0x446   :  { %v2550_v38 = vunpack.c.l.b16 %v2511_v12  ;;  %v7164_v12 = vld [vmem:[#allocation12 + $0xa0] sm:$0xf]  ;;  %v7177_v19 = vor.u32 %v7945_v28, %v7174_v41 }
 0x447   :  { %2721 = vmatpush.bf16.msra.mxu0 %v6951_v1  ;;  %v2494_v53 = vsel %vm2493_vm7, %v8279_v39, %v2490_v50  ;;  %v286_v39 = vadd.f32 %v11335_v31, %v9042_v45  ;;  %3130 = vmatpush.bf16.msra.mxu1 %v7201_v57 }
 0x448   :  { %2749 = vmatpush.bf16.msra.mxu2 %v6959_v47  ;;  %v2499_v14 = vsel %vm2496_vm8, %v2498_v3, %v2494_v53  ;;  %v7185_v3 = vor.u32 %v7948_v56, %v7182_v30  ;;  %v7951_v53 = vld [vmem:[#allocation12 + $0xd4] sm:$0xf0] }
 0x449   :  { %v8283_v37 = vpop.eup %8282  ;;  %2763 = vmatpush.bf16.msra.mxu3 %v6963_v4 }
 0x44a   :  { %v2510_v10 = vmul.f32 %v8283_v37, %v2499_v14  ;;  %v7188_v37 = vld [vmem:[#allocation12 + $0xc8] sm:$0xf]  ;;  %v7949_v14 = vld [vmem:[#allocation12 + $0xcc] sm:$0xf] }
 0x44b   :  { %3116 = vmatpush.bf16.msrb.mxu0 %v7197_v48  ;;  %3131 = vmatpush.bf16.msra.mxu1 %v7185_v3 }
 0x44c   :  { %v2512_v21 = vpack.c.bf16 %v2510_v10, %v2510_v10  ;;  %v8091_v55 = vpack.c.bf16 %v2510_v10, %v2509_v16  ;;  %3144 = vmatpush.bf16.msrb.mxu2 %v7205_v5  ;;  %v7190_v10 = vld [vmem:[#allocation12 + $0xd8] sm:$0xf0] }
 0x44d   :  { %3158 = vmatpush.bf16.msrb.mxu3 %v7209_v13 }
 0x44e   :  { %8092 = vst [vmem:[#allocation4 + $0x8] sm:$0xff] %v8091_v55   ;;  %v2551_v35 = vunpack.c.l.b16 %v2512_v21  ;;  %v11337_v21 = vld [vmem:[#allocation29_spill] sm:$0xff] }
 0x44f   :  { %3117 = vmatpush.bf16.msrb.mxu0 %v7181_v27  ;;  %v382_v55 = vadd.f32 %v11337_v21, %v9065_v49  ;;  %v7126_v21 = vld [vmem:[#allocation12 + $0x58] sm:$0xf0] }
 0x450   :  { %v2552_v61 = vpack.c.b16 %v2551_v35, %v2550_v38  ;;  %v7946_v35 = vld [vmem:[#allocation12 + $0xac] sm:$0xf0] }
 0x452   :  { %2722 = vmatmul.bf16.vlgmr.msra.gmra.mxu0 %v2552_v61  ;;  %2736 = vmatmul.bf16.vlgmr.msrb.gmra.mxu1 %v2552_v61 }
 0x453   :  { %2750 = vmatmul.bf16.vlgmr.msra.gmra.mxu2 %v2552_v61  ;;  %2764 = vmatmul.bf16.vlgmr.msra.gmra.mxu3 %v2552_v61  ;;  %v7944_v61 = vld [vmem:[#allocation12 + $0xa4] sm:$0xf] }
 0x4cf   :  { %v2723_v62 = vpop.f32.mrf.mxu0  ;;  %v2737_v34 = vpop.f32.mrf.mxu1 }
 0x4d0   :  { %v2779_v29 = vadd.f32 %v2723_v62, %v284_v8  ;;  %v2780_v42 = vadd.f32 %v2737_v34, %v333_v24  ;;  %v433_v8 = vadd.f32 %v11338_v54, %v9069_v40  ;;  %v7189_v24 = vor.u32 %v7951_v53, %v7188_v37  ;;  %v7166_v62 = vld [vmem:[#allocation12 + $0xb0] sm:$0xf0]  ;;  %v7172_v34 = vld [vmem:[#allocation12 + $0xa8] sm:$0xf]  ;;  %v7943_v53 = vld [vmem:[#allocation12 + $0x94] sm:$0xf0] }
 0x4d1   :  { %v7169_v23 = vor.u32 %v7944_v61, %v7166_v62  ;;  %v7156_v37 = vld [vmem:[#allocation12 + $0x88] sm:$0xf]  ;;  %v7928_v61 = vld [vmem:[#allocation12 + $0x24] sm:$0xf] }
 0x4d2   :  { %v7076_v18 = vmul.f32 -1.442695, %v2779_v29  ;;  %v7078_v59 = vmul.f32 -1.442695, %v2780_v42  ;;  %3145 = vmatpush.bf16.msrb.mxu2 %v7189_v24  ;;  %v7132_v24 = vld [vmem:[#allocation12 + $0x60] sm:$0xf] }
 0x4d3   :  { %3132 = vmatpush.bf16.msra.mxu1 %v7169_v23  ;;  %v7936_v23 = vld [vmem:[#allocation12 + $0x64] sm:$0xf] }
 0x4d4   :  { %8284 = vpow2.f32 %v7076_v18  ;;  %v7193_v18 = vor.u32 %v7949_v14, %v7190_v10 }
 0x4d5   :  { %8286 = vpow2.f32 %v7078_v59  ;;  %v7165_v59 = vor.u32 %v7946_v35, %v7164_v12  ;;  %v7933_v12 = vld [vmem:[#allocation12 + $0x4c] sm:$0xf] }
 0x4d6   :  { %v2765_v63 = vpop.f32.mrf.mxu3  ;;  %v2751_v16 = vpop.f32.mrf.mxu2  ;;  %3159 = vmatpush.bf16.msrb.mxu3 %v7193_v18  ;;  %v7157_v18 = vor.u32 %v7943_v53, %v7156_v37 }
 0x4d7   :  { %v2782_v51 = vadd.f32 %v2765_v63, %v431_v22  ;;  %v2725_v43 = vpop.f32.mrf.mxu0  ;;  %v2739_v26 = vpop.f32.mrf.mxu1  ;;  %v2781_v42 = vadd.f32 %v2751_v16, %v382_v55  ;;  %v7947_v22 = vld [vmem:[#allocation12 + $0xb4] sm:$0xf0]  ;;  %3118 = vmatpush.bf16.msrb.mxu0 %v7165_v59  ;;  %v7941_v55 = vld [vmem:[#allocation12 + $0x8c] sm:$0xf]  ;;  %v7938_v59 = vld [vmem:[#allocation12 + $0x6c] sm:$0xf0] }
 0x4d8   :  { %v2783_v52 = vadd.f32 %v2725_v43, %v286_v39  ;;  %v2784_v33 = vadd.f32 %v2739_v26, %v335_v36  ;;  %v7173_v6 = vor.u32 %v7947_v22, %v7172_v34  ;;  %v7134_v22 = vld [vmem:[#allocation12 + $0x70] sm:$0xf0] }
 0x4d9   :  { %v7080_v32 = vmul.f32 -1.442695, %v2782_v51  ;;  %v384_v51 = vadd.f32 %v11339_v46, %v9065_v49 }
 0x4da   :  { %v8285_v15 = vpop.eup %8284  ;;  %v7077_v1 = vmul.f32 -1.442695, %v2783_v52  ;;  %v7079_v4 = vmul.f32 -1.442695, %v2784_v33  ;;  %3146 = vmatpush.bf16.msrb.mxu2 %v7173_v6  ;;  %3160 = vmatpush.bf16.msrb.mxu3 %v7177_v19  ;;  %v7140_v6 = vld [vmem:[#allocation12 + $0x68] sm:$0xf] }
 0x4db   :  { %v8287_v44 = vpop.eup %8286  ;;  %v9865_v47 = vadd.f32 1.0, %v8285_v15  ;;  %8288 = vpow2.f32 %v7080_v32  ;;  %v7148_v15 = vld [vmem:[#allocation12 + $0x80] sm:$0xf] }
 0x4dc   :  { %v9867_v50 = vadd.f32 1.0, %v8287_v44  ;;  %8290 = vpow2.f32 %v7077_v1  ;;  %v7942_v1 = vld [vmem:[#allocation12 + $0x8c] sm:$0xf0]  ;;  %v7940_v44 = vld [vmem:[#allocation12 + $0x84] sm:$0xf] }
 0x4dd   :  { %8292 = vrcp.f32 %v9865_v47  ;;  %v2804_v7 = vand.u32 2147483647, %v9865_v47  ;;  %v2806_v63 = vand.u32 2147483648, %v9865_v47  ;;  %vm2800_vm10 = vweird.f32 %v9865_v47 }
 0x4de   :  { %8294 = vrcp.f32 %v9867_v50  ;;  %v2767_v38 = vpop.f32.mrf.mxu3  ;;  %v2844_v26 = vand.u32 2147483648, %v9867_v50  ;;  %v2842_v20 = vand.u32 2147483647, %v9867_v50  ;;  %v2753_v13 = vpop.f32.mrf.mxu2  ;;  %vm2838_vm13 = vweird.f32 %v9867_v50  ;;  %3147 = vmatpush.bf16.msrb.mxu2 %v7157_v18 }
 0x4df   :  { %8296 = vpow2.f32 %v7079_v4  ;;  %v2786_v39 = vadd.f32 %v2767_v38, %v433_v8  ;;  %vm9893_vm9 = vcmp.eq.f32.partialorder %v2804_v7, 8.507059e+37  ;;  %v2807_v9 = vor.u32 1.1754944e-38, %v2806_v63  ;;  %v7150_v4 = vld [vmem:[#allocation12 + $0x90] sm:$0xf0]  ;;  %v7158_v38 = vld [vmem:[#allocation12 + $0x98] sm:$0xf0] }
 0x4e0   :  { %v2845_v27 = vor.u32 1.1754944e-38, %v2844_v26  ;;  %v2785_v16 = vadd.f32 %v2753_v13, %v384_v51  ;;  %vm9920_vm15 = vcmp.eq.f32.partialorder %v2842_v20, 8.507059e+37  ;;  %v7937_v63 = vld [vmem:[#allocation12 + $0x6c] sm:$0xf]  ;;  %v7116_v26 = vld [vmem:[#allocation12 + $0x40] sm:$0xf] }
 0x4e1   :  { %v8289_v29 = vpop.eup %8288  ;;  %v7081_v32 = vmul.f32 -1.442695, %v2786_v39  ;;  %v7118_v13 = vld [vmem:[#allocation12 + $0x50] sm:$0xf0] }
 0x4e2   :  { %v8291_v17 = vpop.eup %8290  ;;  %v9876_v31 = vadd.f32 1.0, %v8289_v29 }
 0x4e3   :  { %v9878_v36 = vpop.eup %8292  ;;  %v9881_v48 = vadd.f32 1.0, %v8291_v17 }
 0x4e4   :  { %v9883_v25 = vpop.eup %8294  ;;  %v2796_v43 = vmul.f32 %v9878_v36, %v9865_v47  ;;  %8298 = vrcp.f32 %v9876_v31  ;;  %vm2801_vm11 = vweird.f32 %v9878_v36 }
 0x4e5   :  { %v8297_v57 = vpop.eup %8296  ;;  %v2834_v5 = vmul.f32 %v9883_v25, %v9867_v50  ;;  %8300 = vtanh.f32 %v2781_v42  ;;  %vm2839_vm12 = vweird.f32 %v9883_v25  ;;  %v2819_v3 = vand.u32 2147483647, %v9881_v48  ;;  %vm9916_vm14 = vmor %vm2800_vm10, %vm2801_vm11 }
 0x4e6   :  { %v2797_v52 = vsub.f32 1.0, %v2796_v43  ;;  %8302 = vrcp.f32 %v9881_v48  ;;  %v9899_v33 = vadd.f32 1.0, %v8297_v57  ;;  %v7149_v50 = vor.u32 %v7942_v1, %v7148_v15  ;;  %vm9926_vm0 = vmor %vm2838_vm13, %vm2839_vm12  ;;  %v7142_v43 = vld [vmem:[#allocation12 + $0x78] sm:$0xf0]  ;;  %v7934_v57 = vld [vmem:[#allocation12 + $0x4c] sm:$0xf0] }
 0x4e7   :  { %v2835_v11 = vsub.f32 1.0, %v2834_v5  ;;  %v2821_v8 = vand.u32 2147483648, %v9881_v48  ;;  %v7153_v42 = vor.u32 %v7940_v44, %v7150_v4  ;;  %vm9948_vm1 = vcmp.eq.f32.partialorder %v2819_v3, 8.507059e+37  ;;  %v7124_v4 = vld [vmem:[#allocation12 + $0x48] sm:$0xf] }
 0x4e8   :  { %v2798_v56 = vmul.f32 %v9878_v36, %v2797_v52  ;;  %8304 = vrcp.f32 %v9899_v33  ;;  %v2859_v54 = vand.u32 2147483648, %v9899_v33  ;;  %v2857_v7 = vand.u32 2147483647, %v9899_v33  ;;  %3119 = vmatpush.bf16.msrb.mxu0 %v7149_v50  ;;  %v7932_v52 = vld [vmem:[#allocation12 + $0x44] sm:$0xf] }
 0x4e9   :  { %v2836_v30 = vmul.f32 %v9883_v25, %v2835_v11  ;;  %8306 = vpow2.f32 %v7081_v32  ;;  %vm2815_vm2 = vweird.f32 %v9881_v48  ;;  %3133 = vmatpush.bf16.msra.mxu1 %v7153_v42  ;;  %v7137_v15 = vor.u32 %v7936_v23, %v7134_v22  ;;  %v7929_v23 = vld [vmem:[#allocation12 + $0x2c] sm:$0xf]  ;;  %v7110_v22 = vld [vmem:[#allocation12 + $0x38] sm:$0xf0] }
 0x4ea   :  { %v9909_v14 = vpop.eup %8298  ;;  %v2799_v10 = vadd.f32 %v9878_v36, %v2798_v56  ;;  %8308 = vtanh.f32 %v2785_v16  ;;  %v7145_v37 = vor.u32 %v7937_v63, %v7142_v43  ;;  %v7117_v53 = vor.u32 %v7934_v57, %v7116_v26  ;;  %v7086_v43 = vld [vmem:[#allocation12 + $0x10] sm:$0xf0]  ;;  %v7927_v26 = vld [vmem:[#allocation12 + $0x14] sm:$0xf0] }
 0x4eb   :  { %v8301_v35 = vpop.eup %8300  ;;  %v2837_v47 = vadd.f32 %v9883_v25, %v2836_v30  ;;  %v2874_v29 = vmul.f32 %v9909_v14, %v9876_v31  ;;  %v7935_v30 = vld [vmem:[#allocation12 + $0x54] sm:$0xf0]  ;;  %vm2853_vm6 = vweird.f32 %v9899_v33  ;;  %vm2858_vm8 = vcmp.eq.f32.partialorder %v2857_v7, 8.507059e+37  ;;  %v7092_v7 = vld [vmem:[#allocation12 + $0x8] sm:$0xf] }
 0x4ec   :  { %v9934_v62 = vpop.eup %8302  ;;  %v2803_v34 = vsel %vm9916_vm14, %v9878_v36, %v2799_v10  ;;  %v7939_v36 = vld [vmem:[#allocation12 + $0x74] sm:$0xf0]  ;;  %v7121_v10 = vor.u32 %v7932_v52, %v7118_v13  ;;  %v7125_v18 = vor.u32 %v7935_v30, %v7124_v4  ;;  %vm2878_vm10 = vweird.f32 %v9876_v31 }
 0x4ed   :  { %v2808_v28 = vsel %vm9893_vm9, %v2807_v9, %v2803_v34  ;;  %v2841_v41 = vsel %vm9926_vm0, %v9883_v25, %v2837_v47  ;;  %v2811_v17 = vmul.f32 %v9934_v62, %v9881_v48  ;;  %v7161_v25 = vor.u32 %v7941_v55, %v7158_v38  ;;  %3134 = vmatpush.bf16.msra.mxu1 %v7137_v15  ;;  %v7100_v38 = vld [vmem:[#allocation12 + $0x20] sm:$0xf]  ;;  %v7931_v34 = vld [vmem:[#allocation12 + $0x34] sm:$0xf0] }
 0x4ee   :  { %v9952_v19 = vpop.eup %8304  ;;  %v2846_v46 = vsel %vm9920_vm15, %v2845_v27, %v2841_v41  ;;  %v2905_v51 = vmul.f32 %v8301_v35, %v2808_v28  ;;  %vm2816_vm3 = vweird.f32 %v9934_v62  ;;  %v2875_v11 = vsub.f32 1.0, %v2874_v29  ;;  %v7930_v35 = vld [vmem:[#allocation12 + $0x2c] sm:$0xf0] }
 0x4ef   :  { %v2903_v5 = vmul.f32 %v2846_v46, %v9788_v60  ;;  %v2812_v2 = vsub.f32 1.0, %v2811_v17  ;;  %v2849_v20 = vmul.f32 %v9952_v19, %v9899_v33  ;;  %v8307_v32 = vpop.eup %8306  ;;  %3161 = vmatpush.bf16.msrb.mxu3 %v7161_v25  ;;  %v7133_v9 = vor.u32 %v7938_v59, %v7132_v24  ;;  %vm9968_vm4 = vmor %vm2815_vm2, %vm2816_vm3  ;;  %v7108_v24 = vld [vmem:[#allocation12 + $0x28] sm:$0xf]  ;;  %v7926_v25 = vld [vmem:[#allocation12 + $0xc] sm:$0xf0] }
 0x4f0   :  { %v7141_v1 = vor.u32 %v7939_v36, %v7140_v6  ;;  %v2822_v60 = vor.u32 1.1754944e-38, %v2821_v8  ;;  %v9972_v3 = vadd.f32 1.0, %v8307_v32  ;;  %v8309_v50 = vpop.eup %8308  ;;  %vm2854_vm5 = vweird.f32 %v9952_v19  ;;  %v7102_v8 = vld [vmem:[#allocation12 + $0x30] sm:$0xf0]  ;;  %v7084_v6 = vld [vmem:[#allocation12] sm:$0xf] }
 0x4f1   :  { %v9961_v27 = vadd.f32 %v2905_v51, %v2903_v5  ;;  %v2850_v56 = vsub.f32 1.0, %v2849_v20  ;;  %v2813_v44 = vmul.f32 %v9934_v62, %v2812_v2  ;;  %3120 = vmatpush.bf16.msrb.mxu0 %v7133_v9  ;;  %v2876_v47 = vmul.f32 %v9909_v14, %v2875_v11  ;;  %vm9986_vm7 = vmor %vm2853_vm6, %vm2854_vm5  ;;  %3135 = vmatpush.bf16.msra.mxu1 %v7121_v10  ;;  %v7925_v5 = vld [vmem:[#allocation12 + $0xc] sm:$0xf]  ;;  %v7094_v2 = vld [vmem:[#allocation12 + $0x18] sm:$0xf0] }
 0x4f2   :  { %3148 = vmatpush.bf16.msrb.mxu2 %v7141_v1  ;;  %8310 = vrcp.f32 %v9972_v3  ;;  %v7129_v59 = vor.u32 %v7933_v12, %v7126_v21  ;;  %v2860_v41 = vor.u32 1.1754944e-38, %v2859_v54  ;;  %v7105_v46 = vor.u32 %v7928_v61, %v7102_v8  ;;  %v7924_v54 = vld [vmem:[#allocation12 + $0x4] sm:$0xf] }
 0x4f3   :  { %v2851_v55 = vmul.f32 %v9952_v19, %v2850_v56  ;;  %v2814_v48 = vadd.f32 %v9934_v62, %v2813_v44  ;;  %3162 = vmatpush.bf16.msrb.mxu3 %v7145_v37  ;;  %v7109_v51 = vor.u32 %v7931_v34, %v7108_v24  ;;  %8312 = vtanh.f32 %v9961_v27  ;;  %v7986_v34 = vld [vmem:[#allocation12 + $0xec] sm:$0xf0] }
 0x4f4   :  { %v7113_v33 = vor.u32 %v7929_v23, %v7110_v22  ;;  %v2877_v57 = vadd.f32 %v9909_v14, %v2876_v47  ;;  %vm2879_vm9 = vweird.f32 %v9909_v14  ;;  %v2884_v52 = vand.u32 2147483648, %v9876_v31  ;;  %v7987_v23 = vld [vmem:[#allocation12 + $0xf4] sm:$0xf0] }
 0x4f5   :  { %v2818_v29 = vsel %vm9968_vm4, %v9934_v62, %v2814_v48  ;;  %v2852_v42 = vadd.f32 %v9952_v19, %v2851_v55  ;;  %3121 = vmatpush.bf16.msrb.mxu0 %v7117_v53  ;;  %v7101_v62 = vor.u32 %v7930_v35, %v7100_v38  ;;  %3136 = vmatpush.bf16.msra.mxu1 %v7105_v46  ;;  %v2882_v11 = vand.u32 2147483647, %v9876_v31  ;;  %vm10011_vm11 = vmor %vm2878_vm10, %vm2879_vm9 }
 0x4f6   :  { %v2823_v17 = vsel %vm9948_vm1, %v2822_v60, %v2818_v29  ;;  %3149 = vmatpush.bf16.msrb.mxu2 %v7125_v18  ;;  %v7085_v13 = vor.u32 %v7926_v25, %v7084_v6  ;;  %v7089_v32 = vor.u32 %v7924_v54, %v7086_v43  ;;  %v7093_v1 = vor.u32 %v7927_v26, %v7092_v7  ;;  %v7984_v29 = vld [vmem:[#allocation12 + $0xe4] sm:$0xf]  ;;  %v7332_v18 = vld [vmem:[#allocation12 + $0xf0] sm:$0xf0]  ;;  %v7314_v6 = vld [vmem:[#allocation12 + $0xc0] sm:$0xf] }
 0x4f7   :  { %v2856_v36 = vsel %vm9986_vm7, %v9952_v19, %v2852_v42  ;;  %v2906_v63 = vmul.f32 %v8309_v50, %v2823_v17  ;;  %3163 = vmatpush.bf16.msrb.mxu3 %v7129_v59  ;;  %v7097_v56 = vor.u32 %v7925_v5, %v7094_v2  ;;  %v2881_v44 = vsel %vm10011_vm11, %v9909_v14, %v2877_v57  ;;  %v7338_v59 = vld [vmem:[#allocation12 + $0xe8] sm:$0xf]  ;;  %v7340_v17 = vld [vmem:[#allocation12 + $0xf8] sm:$0xf0]  ;;  %v7983_v54 = vld [vmem:[#allocation12 + $0xd4] sm:$0xf0] }
 0x4f8   :  { %v2861_v39 = vsel %vm2858_vm8, %v2860_v41, %v2856_v36  ;;  %v8311_v20 = vpop.eup %8310  ;;  %v2885_v4 = vor.u32 1.1754944e-38, %v2884_v52  ;;  %v2899_v30 = vand.u32 2147483648, %v9972_v3  ;;  %vm2883_vm12 = vcmp.eq.f32.partialorder %v2882_v11, 8.507059e+37  ;;  %v7985_v41 = vld [vmem:[#allocation12 + $0xec] sm:$0xf] }
 0x4f9   :  { %v2904_v19 = vmul.f32 %v2861_v39, %v9833_v0  ;;  %3122 = vmatpush.bf16.msrb.mxu0 %v7101_v62  ;;  %v2889_v15 = vmul.f32 %v8311_v20, %v9972_v3  ;;  %v8313_v60 = vpop.eup %8312  ;;  %3137 = vmatpush.bf16.msra.mxu1 %v7089_v32  ;;  %vm2894_vm13 = vweird.f32 %v8311_v20  ;;  %v2897_v37 = vand.u32 2147483647, %v9972_v3  ;;  %v7982_v36 = vld [vmem:[#allocation12 + $0xcc] sm:$0xf0]  ;;  %v7322_v25 = vld [vmem:[#allocation12 + $0xc8] sm:$0xf] }
 0x4fa   :  { %3150 = vmatpush.bf16.msrb.mxu2 %v7109_v51  ;;  %v2886_v53 = vsel %vm2883_vm12, %v2885_v4, %v2881_v44  ;;  %vm2893_vm14 = vweird.f32 %v9972_v3  ;;  %v2900_v12 = vor.u32 1.1754944e-38, %v2899_v30  ;;  %v7330_v3 = vld [vmem:[#allocation12 + $0xe0] sm:$0xf]  ;;  %v7335_v22 = vor.u32 %v7984_v29, %v7332_v18  ;;  %v7316_v51 = vld [vmem:[#allocation12 + $0xd0] sm:$0xf0]  ;;  %v11356_v32 = vld [vmem:[#allocation35_spill] sm:$0xff] }
 0x4fb   :  { %v10006_v9 = vadd.f32 %v2906_v63, %v2904_v19  ;;  %3164 = vmatpush.bf16.msrb.mxu3 %v7113_v33  ;;  %v2890_v31 = vsub.f32 1.0, %v2889_v15  ;;  %v2911_v14 = vmul.f32 %v8313_v60, %v2886_v53  ;;  %vm2895_vm15 = vmor %vm2893_vm14, %vm2894_vm13  ;;  %vm2898_vm0 = vcmp.eq.f32.partialorder %v2897_v37, 8.507059e+37  ;;  %v7980_v63 = vld [vmem:[#allocation12 + $0xc4] sm:$0xf]  ;;  %v7981_v33 = vld [vmem:[#allocation12 + $0xcc] sm:$0xf] }
 0x4fc   :  { %v7331_v42 = vor.u32 %v7986_v34, %v7330_v3  ;;  %v7339_v28 = vor.u32 %v7987_v23, %v7338_v59  ;;  %v7343_v62 = vor.u32 %v7985_v41, %v7340_v17  ;;  %v7315_v46 = vor.u32 %v7982_v36, %v7314_v6  ;;  %v7324_v7 = vld [vmem:[#allocation12 + $0xd8] sm:$0xf0]  ;;  %v7298_v57 = vld [vmem:[#allocation12 + $0xa0] sm:$0xf]  ;;  %v7978_v19 = vld [vmem:[#allocation12 + $0xac] sm:$0xf0] }
 0x4fd   :  { %8314 = vtanh.f32 %v10006_v9  ;;  %3123 = vmatpush.bf16.msrb.mxu0 %v7085_v13  ;;  %v2891_v16 = vmul.f32 %v8311_v20, %v2890_v31  ;;  %v2913_v38 = vpack.c.bf16 %v2911_v14, %v2911_v14  ;;  %3532 = vmatpush.bf16.msrb.mxu1 %v7335_v22  ;;  %v7319_v43 = vor.u32 %v7980_v63, %v7316_v51  ;;  %v7976_v5 = vld [vmem:[#allocation12 + $0xa4] sm:$0xf]  ;;  %v7306_v52 = vld [vmem:[#allocation12 + $0xa8] sm:$0xf]  ;;  %v7979_v13 = vld [vmem:[#allocation12 + $0xb4] sm:$0xf0] }
 0x4fe   :  { %3151 = vmatpush.bf16.msrb.mxu2 %v7093_v1  ;;  %v7323_v39 = vor.u32 %v7983_v54, %v7322_v25  ;;  %v7327_v26 = vor.u32 %v7981_v33, %v7324_v7  ;;  %v7299_v2 = vor.u32 %v7978_v19, %v7298_v57  ;;  %v289_v11 = vadd.f32 %v11356_v32, %v9042_v45  ;;  %v11357_v15 = vld [vmem:[#allocation43_spill] sm:$0xff]  ;;  %v7977_v44 = vld [vmem:[#allocation12 + $0xac] sm:$0xf]  ;;  %v7282_v53 = vld [vmem:[#allocation12 + $0x80] sm:$0xf] }
 0x4ff   :  { %3165 = vmatpush.bf16.msrb.mxu3 %v7097_v56  ;;  %v2892_v10 = vadd.f32 %v8311_v20, %v2891_v16  ;;  %v2952_v47 = vunpack.c.l.b16 %v2913_v38  ;;  %v338_v1 = vadd.f32 %v11357_v15, %v9071_v58  ;;  %v7307_v56 = vor.u32 %v7979_v13, %v7306_v52  ;;  %v7308_v31 = vld [vmem:[#allocation12 + $0xb8] sm:$0xf0]  ;;  %v7266_v3 = vld [vmem:[#allocation12 + $0x60] sm:$0xf]  ;;  %v7970_v34 = vld [vmem:[#allocation12 + $0x6c] sm:$0xf0] }
 0x500   :  { %v7311_v30 = vor.u32 %v7977_v44, %v7308_v31  ;;  %v7968_v29 = vld [vmem:[#allocation12 + $0x64] sm:$0xf]  ;;  %v7267_v59 = vor.u32 %v7970_v34, %v7266_v3  ;;  %v7268_v23 = vld [vmem:[#allocation12 + $0x70] sm:$0xf0]  ;;  %v7274_v22 = vld [vmem:[#allocation12 + $0x68] sm:$0xf] }
 0x501   :  { %v2896_v50 = vsel %vm2895_vm15, %v8311_v20, %v2892_v10  ;;  %3518 = vmatpush.bf16.msra.mxu0 %v7331_v42  ;;  %3533 = vmatpush.bf16.msrb.mxu1 %v7319_v43  ;;  %v7300_v20 = vld [vmem:[#allocation12 + $0xb0] sm:$0xf0]  ;;  %v7974_v10 = vld [vmem:[#allocation12 + $0x8c] sm:$0xf0]  ;;  %v11359_v41 = vld [vmem:[#allocation39_spill] sm:$0xff]  ;;  %v7271_v63 = vor.u32 %v7968_v29, %v7268_v23 }
 0x502   :  { %v2901_v55 = vsel %vm2898_vm0, %v2900_v12, %v2896_v50  ;;  %3546 = vmatpush.bf16.msra.mxu2 %v7339_v28  ;;  %v7303_v0 = vor.u32 %v7976_v5, %v7300_v20  ;;  %v7283_v12 = vor.u32 %v7974_v10, %v7282_v53  ;;  %v7290_v50 = vld [vmem:[#allocation12 + $0x88] sm:$0xf]  ;;  %v11358_v42 = vld [vmem:[#allocation38_spill] sm:$0xff]  ;;  %v7971_v28 = vld [vmem:[#allocation12 + $0x74] sm:$0xf0]  ;;  %v291_v17 = vadd.f32 %v11359_v41, %v9042_v45 }
 0x503   :  { %v8315_v21 = vpop.eup %8314  ;;  %3560 = vmatpush.bf16.msra.mxu3 %v7343_v62  ;;  %v436_v18 = vadd.f32 %v11358_v42, %v9069_v40  ;;  %v11360_v62 = vld [vmem:[#allocation46_spill] sm:$0xff]  ;;  %v7969_v51 = vld [vmem:[#allocation12 + $0x6c] sm:$0xf]  ;;  %v7276_v25 = vld [vmem:[#allocation12 + $0x78] sm:$0xf0] }
 0x504   :  { %v2912_v48 = vmul.f32 %v8315_v21, %v2901_v55  ;;  %v7284_v21 = vld [vmem:[#allocation12 + $0x90] sm:$0xf0]  ;;  %v7975_v55 = vld [vmem:[#allocation12 + $0x94] sm:$0xf0]  ;;  %v340_v6 = vadd.f32 %v11360_v62, %v9071_v58  ;;  %v7279_v33 = vor.u32 %v7969_v51, %v7276_v25  ;;  %v7250_v57 = vld [vmem:[#allocation12 + $0x40] sm:$0xf] }
 0x505   :  { %3519 = vmatpush.bf16.msra.mxu0 %v7315_v46  ;;  %3534 = vmatpush.bf16.msrb.mxu1 %v7303_v0  ;;  %v7275_v46 = vor.u32 %v7971_v28, %v7274_v22  ;;  %v7966_v19 = vld [vmem:[#allocation12 + $0x4c] sm:$0xf0]  ;;  %v7964_v5 = vld [vmem:[#allocation12 + $0x44] sm:$0xf]  ;;  %v7252_v52 = vld [vmem:[#allocation12 + $0x50] sm:$0xf0] }
 0x506   :  { %v2914_v35 = vpack.c.bf16 %v2912_v48, %v2912_v48  ;;  %v8096_v61 = vpack.c.bf16 %v2912_v48, %v2911_v14  ;;  %3547 = vmatpush.bf16.msra.mxu2 %v7323_v39  ;;  %v7972_v14 = vld [vmem:[#allocation12 + $0x84] sm:$0xf]  ;;  %v7251_v20 = vor.u32 %v7966_v19, %v7250_v57  ;;  %v7258_v13 = vld [vmem:[#allocation12 + $0x48] sm:$0xf]  ;;  %v7967_v0 = vld [vmem:[#allocation12 + $0x54] sm:$0xf0] }
 0x507   :  { %3561 = vmatpush.bf16.msra.mxu3 %v7327_v26  ;;  %v7259_v31 = vor.u32 %v7967_v0, %v7258_v13  ;;  %v7234_v53 = vld [vmem:[#allocation12 + $0x20] sm:$0xf]  ;;  %v7962_v10 = vld [vmem:[#allocation12 + $0x2c] sm:$0xf0]  ;;  %v7244_v3 = vld [vmem:[#allocation12 + $0x38] sm:$0xf0] }
 0x508   :  { %8097 = vst [vmem:[#allocation4 + $0x20] sm:$0xff] %v8096_v61   ;;  %v2953_v8 = vunpack.c.l.b16 %v2914_v35  ;;  %v7287_v35 = vor.u32 %v7972_v14, %v7284_v21  ;;  %v7291_v61 = vor.u32 %v7975_v55, %v7290_v50  ;;  %v7960_v14 = vld [vmem:[#allocation12 + $0x24] sm:$0xf]  ;;  %v11361_v21 = vld [vmem:[#allocation37_spill] sm:$0xff]  ;;  %v7218_v23 = vld [vmem:[#allocation12] sm:$0xf] }
 0x509   :  { %3520 = vmatpush.bf16.msra.mxu0 %v7299_v2  ;;  %v387_v50 = vadd.f32 %v11361_v21, %v9065_v49  ;;  %v7958_v22 = vld [vmem:[#allocation12 + $0xc] sm:$0xf0]  ;;  %v7956_v28 = vld [vmem:[#allocation12 + $0x4] sm:$0xf] }
 0x50a   :  { %v2954_v24 = vpack.c.b16 %v2953_v8, %v2952_v47  ;;  %3548 = vmatpush.bf16.msra.mxu2 %v7307_v56  ;;  %v7973_v47 = vld [vmem:[#allocation12 + $0x8c] sm:$0xf]  ;;  %v7292_v8 = vld [vmem:[#allocation12 + $0x98] sm:$0xf0]  ;;  %3535 = vmatpush.bf16.msrb.mxu1 %v7287_v35  ;;  %v11362_v35 = vld [vmem:[#allocation42_spill] sm:$0xff] }
 0x50b   :  { %3562 = vmatpush.bf16.msra.mxu3 %v7311_v30  ;;  %v8016_v21 = vld [vmem:[#allocation11 + $0xa4] sm:$0xf] }
 0x50c   :  { %3124 = vmatmul.bf16.vlgmr.msrb.gmra.mxu0 %v2954_v24  ;;  %3138 = vmatmul.bf16.vlgmr.msra.gmra.mxu1 %v2954_v24 }
 0x50d   :  { %3152 = vmatmul.bf16.vlgmr.msrb.gmra.mxu2 %v2954_v24  ;;  %3166 = vmatmul.bf16.vlgmr.msrb.gmra.mxu3 %v2954_v24  ;;  %v7295_v24 = vor.u32 %v7973_v47, %v7292_v8  ;;  %v7235_v8 = vor.u32 %v7962_v10, %v7234_v53  ;;  %v7496_v53 = vld [vmem:[#allocation11 + $0xe0] sm:$0xf]  ;;  %v8026_v10 = vld [vmem:[#allocation11 + $0xec] sm:$0xf0] }
 0x50e   :  { %3521 = vmatpush.bf16.msra.mxu0 %v7283_v12  ;;  %3549 = vmatpush.bf16.msra.mxu2 %v7291_v61  ;;  %v7236_v12 = vld [vmem:[#allocation12 + $0x30] sm:$0xf0]  ;;  %v438_v61 = vadd.f32 %v11362_v35, %v9069_v40  ;;  %v8017_v35 = vld [vmem:[#allocation11 + $0xac] sm:$0xf] }
 0x50f   :  { %3563 = vmatpush.bf16.msra.mxu3 %v7295_v24  ;;  %3536 = vmatpush.bf16.msrb.mxu1 %v7271_v63  ;;  %v7961_v24 = vld [vmem:[#allocation12 + $0x2c] sm:$0xf]  ;;  %v7239_v42 = vor.u32 %v7960_v14, %v7236_v12 }
 0x512   :  { %3522 = vmatpush.bf16.msra.mxu0 %v7267_v59  ;;  %3550 = vmatpush.bf16.msra.mxu2 %v7275_v46  ;;  %v7247_v59 = vor.u32 %v7961_v24, %v7244_v3  ;;  %v7504_v24 = vld [vmem:[#allocation11 + $0xe8] sm:$0xf] }
 0x513   :  { %3564 = vmatpush.bf16.msra.mxu3 %v7279_v33 }
 0x516   :  { %3523 = vmatpush.bf16.msra.mxu0 %v7251_v20  ;;  %3551 = vmatpush.bf16.msra.mxu2 %v7259_v31  ;;  %v7957_v31 = vld [vmem:[#allocation12 + $0xc] sm:$0xf] }
 0x51a   :  { %3524 = vmatpush.bf16.msra.mxu0 %v7235_v8 }
 0x589   :  { %v3125_v60 = vpop.f32.mrf.mxu0  ;;  %v3139_v4 = vpop.f32.mrf.mxu1 }
 0x58a   :  { %v3181_v16 = vadd.f32 %v3125_v60, %v289_v11  ;;  %v3182_v37 = vadd.f32 %v3139_v4, %v338_v1  ;;  %v7255_v1 = vor.u32 %v7964_v5, %v7252_v52  ;;  %v7965_v60 = vld [vmem:[#allocation12 + $0x4c] sm:$0xf]  ;;  %v7260_v4 = vld [vmem:[#allocation12 + $0x58] sm:$0xf0] }
 0x58c   :  { %v7210_v48 = vmul.f32 -1.442695, %v3181_v16  ;;  %v7212_v38 = vmul.f32 -1.442695, %v3182_v37  ;;  %3537 = vmatpush.bf16.msrb.mxu1 %v7255_v1  ;;  %v7263_v37 = vor.u32 %v7965_v60, %v7260_v4  ;;  %v7959_v1 = vld [vmem:[#allocation12 + $0x14] sm:$0xf0] }
 0x58d   :  { %v7228_v60 = vld [vmem:[#allocation12 + $0x18] sm:$0xf0] }
 0x58e   :  { %8316 = vpow2.f32 %v7210_v48  ;;  %3565 = vmatpush.bf16.msra.mxu3 %v7263_v37  ;;  %v7242_v48 = vld [vmem:[#allocation12 + $0x28] sm:$0xf] }
 0x58f   :  { %8318 = vpow2.f32 %v7212_v38  ;;  %v7963_v38 = vld [vmem:[#allocation12 + $0x34] sm:$0xf0] }
 0x590   :  { %v3167_v36 = vpop.f32.mrf.mxu3  ;;  %v3153_v16 = vpop.f32.mrf.mxu2  ;;  %3538 = vmatpush.bf16.msrb.mxu1 %v7239_v42  ;;  %v7231_v42 = vor.u32 %v7957_v31, %v7228_v60  ;;  %v7464_v60 = vld [vmem:[#allocation11 + $0xa0] sm:$0xf] }
 0x591   :  { %v3184_v54 = vadd.f32 %v3167_v36, %v436_v18  ;;  %v3127_v43 = vpop.f32.mrf.mxu0  ;;  %v3141_v39 = vpop.f32.mrf.mxu1  ;;  %v3183_v29 = vadd.f32 %v3153_v16, %v387_v50  ;;  %v7243_v18 = vor.u32 %v7963_v38, %v7242_v48  ;;  %v7220_v36 = vld [vmem:[#allocation12 + $0x10] sm:$0xf0] }
 0x592   :  { %v3185_v7 = vadd.f32 %v3127_v43, %v291_v17  ;;  %v3186_v26 = vadd.f32 %v3141_v39, %v340_v6  ;;  %v7219_v6 = vor.u32 %v7958_v22, %v7218_v23  ;;  %v7223_v25 = vor.u32 %v7956_v28, %v7220_v36  ;;  %v11363_v43 = vld [vmem:[#allocation41_spill] sm:$0xff]  ;;  %3566 = vmatpush.bf16.msra.mxu3 %v7247_v59  ;;  %v7498_v48 = vld [vmem:[#allocation11 + $0xf0] sm:$0xf0]  ;;  %v8027_v59 = vld [vmem:[#allocation11 + $0xf4] sm:$0xf0] }
 0x593   :  { %v7214_v2 = vmul.f32 -1.442695, %v3184_v54  ;;  %3552 = vmatpush.bf16.msra.mxu2 %v7243_v18  ;;  %v389_v39 = vadd.f32 %v11363_v43, %v9065_v49  ;;  %v7497_v18 = vor.u32 %v8026_v10, %v7496_v53  ;;  %v8025_v23 = vld [vmem:[#allocation11 + $0xec] sm:$0xf]  ;;  %v7506_v22 = vld [vmem:[#allocation11 + $0xf8] sm:$0xf0] }
 0x594   :  { %v8317_v32 = vpop.eup %8316  ;;  %v7211_v11 = vmul.f32 -1.442695, %v3185_v7  ;;  %v7213_v15 = vmul.f32 -1.442695, %v3186_v26  ;;  %3525 = vmatpush.bf16.msra.mxu0 %v7219_v6  ;;  %3539 = vmatpush.bf16.msrb.mxu1 %v7223_v25  ;;  %v7480_v36 = vld [vmem:[#allocation11 + $0xc0] sm:$0xf] }
 0x595   :  { %v8319_v56 = vpop.eup %8318  ;;  %v10032_v44 = vadd.f32 1.0, %v8317_v32  ;;  %8320 = vpow2.f32 %v7214_v2  ;;  %v7466_v50 = vld [vmem:[#allocation11 + $0xb0] sm:$0xf0] }
 0x596   :  { %v10034_v30 = vadd.f32 1.0, %v8319_v56  ;;  %8322 = vpow2.f32 %v7211_v11  ;;  %3567 = vmatpush.bf16.msra.mxu3 %v7231_v42 }
 0x597   :  { %8324 = vrcp.f32 %v10032_v44  ;;  %v3206_v47 = vand.u32 2147483647, %v10032_v44  ;;  %v3208_v46 = vand.u32 2147483648, %v10032_v44  ;;  %vm3202_vm2 = vweird.f32 %v10032_v44 }
 0x598   :  { %8326 = vrcp.f32 %v10034_v30  ;;  %v3169_v55 = vpop.f32.mrf.mxu3  ;;  %v3246_v7 = vand.u32 2147483648, %v10034_v30  ;;  %v3244_v5 = vand.u32 2147483647, %v10034_v30  ;;  %v3155_v52 = vpop.f32.mrf.mxu2  ;;  %vm3240_vm5 = vweird.f32 %v10034_v30  ;;  %3993 = vmatpush.bf16.msrb.mxu0 %v7497_v18 }
 0x599   :  { %8328 = vpow2.f32 %v7213_v15  ;;  %v3188_v62 = vadd.f32 %v3169_v55, %v438_v61  ;;  %vm10060_vm1 = vcmp.eq.f32.partialorder %v3206_v47, 8.507059e+37  ;;  %v3209_v11 = vor.u32 1.1754944e-38, %v3208_v46  ;;  %v7226_v15 = vld [vmem:[#allocation12 + $0x8] sm:$0xf]  ;;  %v8024_v55 = vld [vmem:[#allocation11 + $0xe4] sm:$0xf] }
 0x59a   :  { %v3247_v0 = vor.u32 1.1754944e-38, %v3246_v7  ;;  %v3187_v16 = vadd.f32 %v3155_v52, %v389_v39  ;;  %vm10087_vm7 = vcmp.eq.f32.partialorder %v3244_v5, 8.507059e+37  ;;  %v8020_v46 = vld [vmem:[#allocation11 + $0xc4] sm:$0xf]  ;;  %v7488_v7 = vld [vmem:[#allocation11 + $0xc8] sm:$0xf] }
 0x59b   :  { %v8321_v34 = vpop.eup %8320  ;;  %v7215_v13 = vmul.f32 -1.442695, %v3188_v62  ;;  %v7490_v52 = vld [vmem:[#allocation11 + $0xd8] sm:$0xf0] }
 0x59c   :  { %v8323_v41 = vpop.eup %8322  ;;  %v10043_v17 = vadd.f32 1.0, %v8321_v34 }
 0x59d   :  { %v10045_v63 = vpop.eup %8324  ;;  %v10048_v51 = vadd.f32 1.0, %v8323_v41 }
 0x59e   :  { %v10050_v54 = vpop.eup %8326  ;;  %v3198_v33 = vmul.f32 %v10045_v63, %v10032_v44  ;;  %8330 = vrcp.f32 %v10043_v17  ;;  %vm3203_vm3 = vweird.f32 %v10045_v63 }
 0x59f   :  { %v8329_v26 = vpop.eup %8328  ;;  %v3236_v57 = vmul.f32 %v10050_v54, %v10034_v30  ;;  %8332 = vtanh.f32 %v3183_v29  ;;  %vm3241_vm4 = vweird.f32 %v10050_v54  ;;  %v3221_v37 = vand.u32 2147483647, %v10048_v51  ;;  %vm10083_vm6 = vmor %vm3202_vm2, %vm3203_vm3 }
 0x5a0   :  { %v3199_v2 = vsub.f32 1.0, %v3198_v33  ;;  %8334 = vrcp.f32 %v10048_v51  ;;  %v10066_v20 = vadd.f32 1.0, %v8329_v26  ;;  %v7227_v30 = vor.u32 %v7959_v1, %v7226_v15  ;;  %vm10093_vm8 = vmor %vm3240_vm5, %vm3241_vm4  ;;  %v7482_v33 = vld [vmem:[#allocation11 + $0xd0] sm:$0xf0]  ;;  %v8023_v26 = vld [vmem:[#allocation11 + $0xd4] sm:$0xf0] }
 0x5a1   :  { %v3237_v32 = vsub.f32 1.0, %v3236_v57  ;;  %v3223_v47 = vand.u32 2147483648, %v10048_v51  ;;  %vm10115_vm9 = vcmp.eq.f32.partialorder %v3221_v37, 8.507059e+37  ;;  %vm3217_vm10 = vweird.f32 %v10048_v51 }
 0x5a2   :  { %v3200_v56 = vmul.f32 %v10045_v63, %v3199_v2  ;;  %8336 = vrcp.f32 %v10066_v20  ;;  %v3261_v61 = vand.u32 2147483648, %v10066_v20  ;;  %v3259_v8 = vand.u32 2147483647, %v10066_v20  ;;  %3553 = vmatpush.bf16.msra.mxu2 %v7227_v30  ;;  %v8021_v2 = vld [vmem:[#allocation11 + $0xcc] sm:$0xf] }
 0x5a3   :  { %v3238_v4 = vmul.f32 %v10050_v54, %v3237_v32  ;;  %8338 = vpow2.f32 %v7215_v13  ;;  %v7509_v15 = vor.u32 %v8025_v23, %v7506_v22  ;;  %v7485_v53 = vor.u32 %v8020_v46, %v7482_v33  ;;  %v8012_v23 = vld [vmem:[#allocation11 + $0x84] sm:$0xf]  ;;  %v7450_v22 = vld [vmem:[#allocation11 + $0x90] sm:$0xf0]  ;;  %v7458_v33 = vld [vmem:[#allocation11 + $0x98] sm:$0xf0] }
 0x5a4   :  { %v10076_v14 = vpop.eup %8330  ;;  %v3201_v12 = vadd.f32 %v10045_v63, %v3200_v56  ;;  %8340 = vtanh.f32 %v3187_v16  ;;  %v7489_v10 = vor.u32 %v8023_v26, %v7488_v7  ;;  %vm3255_vm14 = vweird.f32 %v10066_v20  ;;  %v7432_v7 = vld [vmem:[#allocation11 + $0x60] sm:$0xf]  ;;  %v8010_v26 = vld [vmem:[#allocation11 + $0x6c] sm:$0xf0] }
 0x5a5   :  { %v8333_v38 = vpop.eup %8332  ;;  %v3239_v44 = vadd.f32 %v10050_v54, %v3238_v4  ;;  %v3276_v29 = vmul.f32 %v10076_v14, %v10043_v17  ;;  %v8018_v4 = vld [vmem:[#allocation11 + $0xac] sm:$0xf0]  ;;  %4140 = vmatpush.bf16.msrb.mxu3 %v7509_v15  ;;  %vm3260_vm0 = vcmp.eq.f32.partialorder %v3259_v8, 8.507059e+37  ;;  %v7453_v6 = vor.u32 %v8012_v23, %v7450_v22  ;;  %v7416_v16 = vld [vmem:[#allocation11 + $0x40] sm:$0xf] }
 0x5a6   :  { %v10101_v3 = vpop.eup %8334  ;;  %v3205_v34 = vsel %vm10083_vm6, %v10045_v63, %v3201_v12  ;;  %v8022_v63 = vld [vmem:[#allocation11 + $0xcc] sm:$0xf0]  ;;  %v7493_v12 = vor.u32 %v8021_v2, %v7490_v52  ;;  %v7465_v18 = vor.u32 %v8018_v4, %v7464_v60  ;;  %v7434_v2 = vld [vmem:[#allocation11 + $0x70] sm:$0xf0]  ;;  %vm3280_vm2 = vweird.f32 %v10043_v17 }
 0x5a7   :  { %v3210_v28 = vsel %vm10060_vm1, %v3209_v11, %v3205_v34  ;;  %v3243_v41 = vsel %vm10093_vm8, %v10050_v54, %v3239_v44  ;;  %v3213_v62 = vmul.f32 %v10101_v3, %v10048_v51  ;;  %v7501_v54 = vor.u32 %v8024_v55, %v7498_v48  ;;  %v7472_v48 = vld [vmem:[#allocation11 + $0xa8] sm:$0xf]  ;;  %v8014_v34 = vld [vmem:[#allocation11 + $0x8c] sm:$0xf0] }
 0x5a8   :  { %v10119_v25 = vpop.eup %8336  ;;  %v3248_v43 = vsel %vm10087_vm7, %v3247_v0, %v3243_v41  ;;  %v3307_v39 = vmul.f32 %v8333_v38, %v3210_v28  ;;  %vm3218_vm11 = vweird.f32 %v10101_v3  ;;  %v3277_v32 = vsub.f32 1.0, %v3276_v29  ;;  %v8019_v38 = vld [vmem:[#allocation11 + $0xb4] sm:$0xf0]  ;;  %v8002_v23 = vld [vmem:[#allocation11 + $0x2c] sm:$0xf0] }
 0x5a9   :  { %v3305_v57 = vmul.f32 %v3248_v43, %v9961_v27  ;;  %v3214_v19 = vsub.f32 1.0, %v3213_v62  ;;  %v3251_v5 = vmul.f32 %v10119_v25, %v10066_v20  ;;  %v8339_v13 = vpop.eup %8338  ;;  %4042 = vmatpush.bf16.msra.mxu1 %v7501_v54  ;;  %v7505_v11 = vor.u32 %v8027_v59, %v7504_v24  ;;  %vm10135_vm12 = vmor %vm3217_vm10, %vm3218_vm11  ;;  %v7448_v24 = vld [vmem:[#allocation11 + $0x80] sm:$0xf]  ;;  %4141 = vmatpush.bf16.msrb.mxu3 %v7493_v12  ;;  %v8015_v54 = vld [vmem:[#allocation11 + $0x94] sm:$0xf0] }
 0x5aa   :  { %v7481_v1 = vor.u32 %v8022_v63, %v7480_v36  ;;  %v3224_v27 = vor.u32 1.1754944e-38, %v3223_v47  ;;  %v10139_v37 = vadd.f32 1.0, %v8339_v13  ;;  %v8341_v30 = vpop.eup %8340  ;;  %vm3256_vm13 = vweird.f32 %v10119_v25  ;;  %v7474_v47 = vld [vmem:[#allocation11 + $0xb8] sm:$0xf0]  ;;  %v7456_v36 = vld [vmem:[#allocation11 + $0x88] sm:$0xf] }
 0x5ab   :  { %v10128_v0 = vadd.f32 %v3307_v39, %v3305_v57  ;;  %v3252_v56 = vsub.f32 1.0, %v3251_v5  ;;  %v3215_v31 = vmul.f32 %v10101_v3, %v3214_v19  ;;  %4091 = vmatpush.bf16.msrb.mxu2 %v7505_v11  ;;  %v3278_v44 = vmul.f32 %v10076_v14, %v3277_v32  ;;  %vm10153_vm15 = vmor %vm3255_vm14, %vm3256_vm13  ;;  %v8008_v5 = vld [vmem:[#allocation11 + $0x64] sm:$0xf]  ;;  %v7440_v11 = vld [vmem:[#allocation11 + $0x68] sm:$0xf] }
 0x5ac   :  { %3994 = vmatpush.bf16.msrb.mxu0 %v7481_v1  ;;  %8342 = vrcp.f32 %v10139_v37  ;;  %v7469_v59 = vor.u32 %v8016_v21, %v7466_v50  ;;  %v3262_v41 = vor.u32 1.1754944e-38, %v3261_v61  ;;  %v7477_v43 = vor.u32 %v8017_v35, %v7474_v47  ;;  %v8013_v61 = vld [vmem:[#allocation11 + $0x8c] sm:$0xf]  ;;  %v8004_v50 = vld [vmem:[#allocation11 + $0x44] sm:$0xf] }
 0x5ad   :  { %v3253_v55 = vmul.f32 %v10119_v25, %v3252_v56  ;;  %v3216_v51 = vadd.f32 %v10101_v3, %v3215_v31  ;;  %4043 = vmatpush.bf16.msra.mxu1 %v7485_v53  ;;  %v7449_v39 = vor.u32 %v8014_v34, %v7448_v24  ;;  %8344 = vtanh.f32 %v10128_v0  ;;  %v8011_v31 = vld [vmem:[#allocation11 + $0x74] sm:$0xf0]  ;;  %v8006_v53 = vld [vmem:[#allocation11 + $0x4c] sm:$0xf0]  ;;  %v8005_v34 = vld [vmem:[#allocation11 + $0x4c] sm:$0xf] }
 0x5ae   :  { %v3284_v20 = vand.u32 2147483647, %v10043_v17  ;;  %v3279_v57 = vadd.f32 %v10076_v14, %v3278_v44  ;;  %vm3281_vm1 = vweird.f32 %v10076_v14  ;;  %4142 = vmatpush.bf16.msrb.mxu3 %v7477_v43  ;;  %v7457_v13 = vor.u32 %v8015_v54, %v7456_v36  ;;  %v7424_v44 = vld [vmem:[#allocation11 + $0x48] sm:$0xf]  ;;  %v8007_v24 = vld [vmem:[#allocation11 + $0x54] sm:$0xf0] }
 0x5af   :  { %v3220_v29 = vsel %vm10135_vm12, %v10101_v3, %v3216_v51  ;;  %v3254_v42 = vadd.f32 %v10119_v25, %v3253_v55  ;;  %4092 = vmatpush.bf16.msrb.mxu2 %v7489_v10  ;;  %v7473_v3 = vor.u32 %v8019_v38, %v7472_v48  ;;  %v7461_v32 = vor.u32 %v8013_v61, %v7458_v33  ;;  %vm10181_vm3 = vmor %vm3280_vm2, %vm3281_vm1  ;;  %v7408_v43 = vld [vmem:[#allocation11 + $0x28] sm:$0xf]  ;;  %v8003_v61 = vld [vmem:[#allocation11 + $0x34] sm:$0xf0] }
 0x5b0   :  { %v3225_v62 = vsel %vm10115_vm9, %v3224_v27, %v3220_v29  ;;  %3995 = vmatpush.bf16.msrb.mxu0 %v7465_v18  ;;  %v7433_v56 = vor.u32 %v8010_v26, %v7432_v7  ;;  %v7442_v27 = vld [vmem:[#allocation11 + $0x78] sm:$0xf0]  ;;  %vm10185_vm4 = vcmp.eq.f32.partialorder %v3284_v20, 8.507059e+37  ;;  %v3283_v10 = vsel %vm10181_vm3, %v10076_v14, %v3279_v57  ;;  %v8001_v33 = vld [vmem:[#allocation11 + $0x2c] sm:$0xf] }
 0x5b1   :  { %v3258_v63 = vsel %vm10153_vm15, %v10119_v25, %v3254_v42  ;;  %v3308_v46 = vmul.f32 %v8341_v30, %v3225_v62  ;;  %4044 = vmatpush.bf16.msra.mxu1 %v7469_v59  ;;  %v3286_v25 = vand.u32 2147483648, %v10043_v17  ;;  %v7437_v17 = vor.u32 %v8008_v5, %v7434_v2  ;;  %v7418_v30 = vld [vmem:[#allocation11 + $0x50] sm:$0xf0]  ;;  %v7426_v29 = vld [vmem:[#allocation11 + $0x58] sm:$0xf0] }
 0x5b2   :  { %v3263_v8 = vsel %vm3260_vm0, %v3262_v41, %v3258_v63  ;;  %v10172_v52 = vpop.eup %8342  ;;  %v3299_v51 = vand.u32 2147483647, %v10139_v37  ;;  %v3301_v48 = vand.u32 2147483648, %v10139_v37  ;;  %4143 = vmatpush.bf16.msrb.mxu3 %v7461_v32  ;;  %v7441_v38 = vor.u32 %v8011_v31, %v7440_v11  ;;  %v7400_v59 = vld [vmem:[#allocation11 + $0x20] sm:$0xf] }
 0x5b3   :  { %v3306_v19 = vmul.f32 %v3263_v8, %v10006_v9  ;;  %4093 = vmatpush.bf16.msrb.mxu2 %v7473_v3  ;;  %v3291_v1 = vmul.f32 %v10172_v52, %v10139_v37  ;;  %v8009_v9 = vld [vmem:[#allocation11 + $0x6c] sm:$0xf]  ;;  %v3287_v12 = vor.u32 1.1754944e-38, %v3286_v25  ;;  %v8345_v55 = vpop.eup %8344  ;;  %vm3296_vm5 = vweird.f32 %v10172_v52  ;;  %v8000_v41 = vld [vmem:[#allocation11 + $0x24] sm:$0xf] }
 0x5b4   :  { %3996 = vmatpush.bf16.msrb.mxu0 %v7449_v39  ;;  %v7445_v35 = vor.u32 %v8009_v9, %v7442_v27  ;;  %v7417_v14 = vor.u32 %v8006_v53, %v7416_v16  ;;  %v7421_v18 = vor.u32 %v8004_v50, %v7418_v30  ;;  %vm3295_vm6 = vweird.f32 %v10139_v37  ;;  %v7402_v62 = vld [vmem:[#allocation11 + $0x30] sm:$0xf0]  ;;  %v7410_v20 = vld [vmem:[#allocation11 + $0x38] sm:$0xf0]  ;;  %v7384_v7 = vld [vmem:[#allocation11] sm:$0xf] }
 0x5b5   :  { %v10175_v15 = vadd.f32 %v3308_v46, %v3306_v19  ;;  %4045 = vmatpush.bf16.msra.mxu1 %v7453_v6  ;;  %v3292_v21 = vsub.f32 1.0, %v3291_v1  ;;  %v3288_v42 = vsel %vm10185_vm4, %v3287_v12, %v3283_v10  ;;  %vm10203_vm7 = vmor %vm3295_vm6, %vm3296_vm5  ;;  %vm3300_vm8 = vcmp.eq.f32.partialorder %v3299_v51, 8.507059e+37  ;;  %v7998_v26 = vld [vmem:[#allocation11 + $0xc] sm:$0xf0]  ;;  %v7996_v19 = vld [vmem:[#allocation11 + $0x4] sm:$0xf] }
 0x5b6   :  { %v3313_v28 = vmul.f32 %v8345_v55, %v3288_v42  ;;  %v3302_v36 = vor.u32 1.1754944e-38, %v3301_v48  ;;  %4144 = vmatpush.bf16.msrb.mxu3 %v7445_v35  ;;  %v7425_v63 = vor.u32 %v8007_v24, %v7424_v44  ;;  %v7429_v46 = vor.u32 %v8005_v34, %v7426_v29  ;;  %v7386_v5 = vld [vmem:[#allocation11 + $0x10] sm:$0xf0]  ;;  %v7392_v1 = vld [vmem:[#allocation11 + $0x8] sm:$0xf]  ;;  %v7989_v12 = vld [vmem:[#allocation4] sm:$0xff] }
 0x5b7   :  { %8346 = vtanh.f32 %v10175_v15  ;;  %4094 = vmatpush.bf16.msrb.mxu2 %v7457_v13  ;;  %v3293_v47 = vmul.f32 %v10172_v52, %v3292_v21  ;;  %v7401_v54 = vor.u32 %v8002_v23, %v7400_v59  ;;  %v7405_v6 = vor.u32 %v8000_v41, %v7402_v62  ;;  %v7999_v31 = vld [vmem:[#allocation11 + $0x14] sm:$0xf0]  ;;  %v7997_v9 = vld [vmem:[#allocation11 + $0xc] sm:$0xf]  ;;  %v7394_v27 = vld [vmem:[#allocation11 + $0x18] sm:$0xf0] }
 0x5b8   :  { %3997 = vmatpush.bf16.msrb.mxu0 %v7433_v56  ;;  %v3315_v25 = vpack.c.bf16 %v3313_v28, %v3313_v28  ;;  %v7409_v2 = vor.u32 %v8003_v61, %v7408_v43  ;;  %v7413_v13 = vor.u32 %v8001_v33, %v7410_v20  ;;  %v7385_v11 = vor.u32 %v7998_v26, %v7384_v7  ;;  %v7988_v10 = vld [vmem:[#allocation4 + $0x30] sm:$0xff]  ;;  %v7624_v21 = vld [vmem:[#allocation12 + $0x1e0] sm:$0xf]  ;;  %v8056_v30 = vld [vmem:[#allocation12 + $0x1e4] sm:$0xf] }
 0x5b9   :  { %4046 = vmatpush.bf16.msra.mxu1 %v7437_v17  ;;  %v3294_v22 = vadd.f32 %v10172_v52, %v3293_v47  ;;  %v7389_v56 = vor.u32 %v7996_v19, %v7386_v5  ;;  %v7393_v16 = vor.u32 %v7999_v31, %v7392_v1  ;;  %v7397_v53 = vor.u32 %v7997_v9, %v7394_v27  ;;  %v8058_v50 = vld [vmem:[#allocation12 + $0x1ec] sm:$0xf0]  ;;  %v7626_v51 = vld [vmem:[#allocation12 + $0x1f0] sm:$0xf0]  ;;  %v8057_v35 = vld [vmem:[#allocation12 + $0x1ec] sm:$0xf] }
 0x5ba   :  { %4145 = vmatpush.bf16.msrb.mxu3 %v7429_v46  ;;  %v3354_v60 = vunpack.c.l.b16 %v3315_v25  ;;  %v10210_v55 = vor.u32 %v8058_v50, %v7624_v21  ;;  %v10212_v48 = vor.u32 %v8056_v30, %v7626_v51  ;;  %v7634_v44 = vld [vmem:[#allocation12 + $0x1f8] sm:$0xf0]  ;;  %v7632_v47 = vld [vmem:[#allocation12 + $0x1e8] sm:$0xf]  ;;  %v8059_v24 = vld [vmem:[#allocation12 + $0x1f4] sm:$0xf0] }
 0x5bb   :  { %4095 = vmatpush.bf16.msrb.mxu2 %v7441_v38  ;;  %v3298_v37 = vsel %vm10203_vm7, %v10172_v52, %v3294_v22  ;;  %v7990_v38 = vld [vmem:[#allocation4 + $0x18] sm:$0xff]  ;;  %v7608_v34 = vld [vmem:[#allocation12 + $0x1c0] sm:$0xf]  ;;  %v8054_v29 = vld [vmem:[#allocation12 + $0x1cc] sm:$0xf0]  ;;  %v10218_v42 = vor.u32 %v8059_v24, %v7632_v47 }
 0x5bc   :  { %3998 = vmatpush.bf16.msrb.mxu0 %v7417_v14  ;;  %v3303_v8 = vsel %vm3300_vm8, %v3302_v36, %v3298_v37  ;;  %v10216_v14 = vor.u32 %v8057_v35, %v7634_v44  ;;  %v8052_v59 = vld [vmem:[#allocation12 + $0x1c4] sm:$0xf]  ;;  %v7610_v23 = vld [vmem:[#allocation12 + $0x1d0] sm:$0xf0]  ;;  %v8053_v41 = vld [vmem:[#allocation12 + $0x1cc] sm:$0xf] }
 0x5bd   :  { %v8347_v39 = vpop.eup %8346  ;;  %4047 = vmatpush.bf16.msra.mxu1 %v7421_v18  ;;  %v10220_v18 = vor.u32 %v8054_v29, %v7608_v34  ;;  %v10223_v22 = vor.u32 %v8052_v59, %v7610_v23  ;;  %v7618_v62 = vld [vmem:[#allocation12 + $0x1d8] sm:$0xf0]  ;;  %v7616_v3 = vld [vmem:[#allocation12 + $0x1c8] sm:$0xf]  ;;  %v7592_v46 = vld [vmem:[#allocation12 + $0x1a0] sm:$0xf] }
 0x5be   :  { %v3314_v57 = vmul.f32 %v8347_v39, %v3303_v8  ;;  %4146 = vmatpush.bf16.msrb.mxu3 %v7413_v13  ;;  %v10228_v36 = vor.u32 %v8053_v41, %v7618_v62  ;;  %v8050_v43 = vld [vmem:[#allocation12 + $0x1ac] sm:$0xf0]  ;;  %v7594_v61 = vld [vmem:[#allocation12 + $0x1b0] sm:$0xf0]  ;;  %v7992_v20 = vld [vmem:[#allocation4 + $0x8] sm:$0xff] }
 0x5bf   :  { %4096 = vmatpush.bf16.msrb.mxu2 %v7425_v63  ;;  %v8055_v63 = vld [vmem:[#allocation12 + $0x1d4] sm:$0xf0]  ;;  %v10232_v37 = vor.u32 %v8050_v43, %v7592_v46  ;;  %v8049_v8 = vld [vmem:[#allocation12 + $0x1ac] sm:$0xf]  ;;  %v7600_v7 = vld [vmem:[#allocation12 + $0x1a8] sm:$0xf] }
 0x5c0   :  { %v3316_v32 = vpack.c.bf16 %v3314_v57, %v3314_v57  ;;  %v8101_v52 = vpack.c.bf16 %v3314_v57, %v3313_v28  ;;  %3999 = vmatpush.bf16.msrb.mxu0 %v7401_v54  ;;  %v7991_v28 = vld [vmem:[#allocation4 + $0x10] sm:$0xff]  ;;  %v10230_v39 = vor.u32 %v8055_v63, %v7616_v3  ;;  %v8048_v54 = vld [vmem:[#allocation12 + $0x1a4] sm:$0xf]  ;;  %v8051_v57 = vld [vmem:[#allocation12 + $0x1b4] sm:$0xf0] }
 0x5c1   :  { %4048 = vmatpush.bf16.msra.mxu1 %v7405_v6  ;;  %v10235_v33 = vor.u32 %v8048_v54, %v7594_v61  ;;  %v7602_v6 = vld [vmem:[#allocation12 + $0x1b8] sm:$0xf0]  ;;  %v10242_v25 = vor.u32 %v8051_v57, %v7600_v7  ;;  %v7993_v19 = vld [vmem:[#allocation4 + $0x20] sm:$0xff]  ;;  %v8046_v13 = vld [vmem:[#allocation12 + $0x18c] sm:$0xf0] }
 0x5c2   :  { %8102 = vst [vmem:[#allocation4 + $0x28] sm:$0xff] %v8101_v52   ;;  %v3355_v4 = vunpack.c.l.b16 %v3316_v32  ;;  %4147 = vmatpush.bf16.msrb.mxu3 %v7397_v53  ;;  %v10240_v26 = vor.u32 %v8049_v8, %v7602_v6  ;;  %v8044_v32 = vld [vmem:[#allocation12 + $0x184] sm:$0xf]  ;;  %v8045_v1 = vld [vmem:[#allocation12 + $0x18c] sm:$0xf]  ;;  %v11384_v27 = vld [vmem:[#allocation23_spill] sm:$0xff] }
 0x5c3   :  { %4097 = vmatpush.bf16.msrb.mxu2 %v7409_v2  ;;  %v7576_v2 = vld [vmem:[#allocation12 + $0x180] sm:$0xf]  ;;  %v11386_v30 = vld [vmem:[#allocation45_spill] sm:$0xff]  ;;  %v11388_v44 = vld [vmem:[#allocation50_spill] sm:$0xff] }
 0x5c4   :  { %v3356_v17 = vpack.c.b16 %v3355_v4, %v3354_v60  ;;  %4000 = vmatpush.bf16.msrb.mxu0 %v7385_v11  ;;  %v10246_v52 = vor.u32 %v8046_v13, %v7576_v2  ;;  %v7578_v11 = vld [vmem:[#allocation12 + $0x190] sm:$0xf0]  ;;  %v294_v60 = vadd.f32 %v11384_v27, %v9042_v45  ;;  %v11385_v4 = vld [vmem:[#allocation49_spill] sm:$0xff]  ;;  %v441_v51 = vadd.f32 %v11386_v30, %v9069_v40  ;;  %v11390_v6 = vld [vmem:[#allocation48_spill] sm:$0xff] }
 0x5c5   :  { %4049 = vmatpush.bf16.msra.mxu1 %v7389_v56  ;;  %v7586_v56 = vld [vmem:[#allocation12 + $0x198] sm:$0xf0]  ;;  %v10248_v31 = vor.u32 %v8044_v32, %v7578_v11  ;;  %v345_v47 = vadd.f32 %v11388_v44, %v9071_v58  ;;  %v443_v7 = vadd.f32 %v11390_v6, %v9069_v40 }
 0x5c6   :  { %3526 = vmatmul.bf16.vlgmr.msra.gmra.mxu0 %v3356_v17  ;;  %3540 = vmatmul.bf16.vlgmr.msrb.gmra.mxu1 %v3356_v17  ;;  %v10250_v9 = vor.u32 %v8045_v1, %v7586_v56  ;;  %v11391_v11 = vld [vmem:[#allocation47_spill] sm:$0xff] }
 0x5c7   :  { %3554 = vmatmul.bf16.vlgmr.msra.gmra.mxu2 %v3356_v17  ;;  %3568 = vmatmul.bf16.vlgmr.msra.gmra.mxu3 %v3356_v17  ;;  %v343_v17 = vadd.f32 %v11385_v4, %v9071_v58  ;;  %v394_v1 = vadd.f32 %v11391_v11, %v9065_v49  ;;  %v8041_v11 = vld [vmem:[#allocation12 + $0x16c] sm:$0xf] }
 0x5c8   :  { %4098 = vmatpush.bf16.msrb.mxu2 %v7393_v16  ;;  %4453 = vmatpush.bf16.msra.mxu0 %v10210_v55 }
 0x5c9   :  { %4467 = vmatpush.bf16.msrb.mxu1 %v10212_v48  ;;  %4495 = vmatpush.bf16.msra.mxu3 %v10216_v14  ;;  %v7994_v5 = vld [vmem:[#allocation4 + $0x28] sm:$0xff] }
 0x5cc   :  { %4481 = vmatpush.bf16.msra.mxu2 %v10218_v42  ;;  %4454 = vmatpush.bf16.msra.mxu0 %v10220_v18 }
 0x5cd   :  { %4468 = vmatpush.bf16.msrb.mxu1 %v10223_v22  ;;  %4496 = vmatpush.bf16.msra.mxu3 %v10228_v36 }
 0x5d0   :  { %4482 = vmatpush.bf16.msra.mxu2 %v10230_v39  ;;  %4455 = vmatpush.bf16.msra.mxu0 %v10232_v37 }
 0x5d1   :  { %4469 = vmatpush.bf16.msrb.mxu1 %v10235_v33  ;;  %4497 = vmatpush.bf16.msra.mxu3 %v10240_v26 }
 0x5d4   :  { %4483 = vmatpush.bf16.msra.mxu2 %v10242_v25  ;;  %4456 = vmatpush.bf16.msra.mxu0 %v10246_v52 }
 0x5d5   :  { %4470 = vmatpush.bf16.msrb.mxu1 %v10248_v31  ;;  %4498 = vmatpush.bf16.msra.mxu3 %v10250_v9 }
 0x5d6   :  { %4001 = vmatmul.bf16.vlgmr.msrb.gmra.mxu0 %v7988_v10  ;;  %4050 = vmatmul.bf16.vlgmr.msra.gmra.mxu1 %v7988_v10 }
 0x5d7   :  { %4099 = vmatmul.bf16.vlgmr.msrb.gmra.mxu2 %v7988_v10  ;;  %4148 = vmatmul.bf16.vlgmr.msrb.gmra.mxu3 %v7988_v10 }
 0x5e6   :  { %4006 = vmatmul.bf16.gmra.mxu0 %v7989_v12  ;;  %4055 = vmatmul.bf16.gmra.mxu1 %v7989_v12 }
 0x5e7   :  { %4104 = vmatmul.bf16.gmra.mxu2 %v7989_v12  ;;  %4153 = vmatmul.bf16.gmra.mxu3 %v7989_v12 }
 0x5f6   :  { %4011 = vmatmul.bf16.gmra.mxu0 %v7990_v38  ;;  %4060 = vmatmul.bf16.gmra.mxu1 %v7990_v38 }
 0x5f7   :  { %4109 = vmatmul.bf16.gmra.mxu2 %v7990_v38  ;;  %4158 = vmatmul.bf16.gmra.mxu3 %v7990_v38  ;;  %v11387_v38 = vld [vmem:[#allocation24_spill] sm:$0xff] }
 0x5f8   :  { %v296_v35 = vadd.f32 %v11387_v38, %v9042_v45  ;;  %v11389_v45 = vld [vmem:[#allocation44_spill] sm:$0xff] }
 0x606   :  { %4016 = vmatmul.bf16.gmra.mxu0 %v7991_v28  ;;  %4065 = vmatmul.bf16.gmra.mxu1 %v7991_v28 }
 0x607   :  { %4114 = vmatmul.bf16.gmra.mxu2 %v7991_v28  ;;  %4163 = vmatmul.bf16.gmra.mxu3 %v7991_v28 }
 0x616   :  { %4021 = vmatmul.bf16.gmra.mxu0 %v7992_v20  ;;  %4070 = vmatmul.bf16.gmra.mxu1 %v7992_v20 }
 0x617   :  { %4119 = vmatmul.bf16.gmra.mxu2 %v7992_v20  ;;  %4168 = vmatmul.bf16.gmra.mxu3 %v7992_v20  ;;  %v392_v20 = vadd.f32 %v11389_v45, %v9065_v49  ;;  %v8040_v45 = vld [vmem:[#allocation12 + $0x164] sm:$0xf] }
 0x626   :  { %4026 = vmatmul.bf16.gmra.mxu0 %v7993_v19  ;;  %4075 = vmatmul.bf16.gmra.mxu1 %v7993_v19 }
 0x627   :  { %4124 = vmatmul.bf16.gmra.mxu2 %v7993_v19  ;;  %4173 = vmatmul.bf16.gmra.mxu3 %v7993_v19 }
 0x636   :  { %4031 = vmatmul.bf16.gmra.mxu0 %v7994_v5  ;;  %4080 = vmatmul.bf16.gmra.mxu1 %v7994_v5 }
 0x637   :  { %4129 = vmatmul.bf16.gmra.mxu2 %v7994_v5  ;;  %4178 = vmatmul.bf16.gmra.mxu3 %v7994_v5 }
 0x643   :  { %v3527_v16 = vpop.f32.mrf.mxu0  ;;  %v3541_v53 = vpop.f32.mrf.mxu1 }
 0x644   :  { %v3583_v10 = vadd.f32 %v3527_v16, %v294_v60  ;;  %v3584_v12 = vadd.f32 %v3541_v53, %v343_v17 }
 0x646   :  { %v7344_v21 = vmul.f32 -1.442695, %v3583_v10  ;;  %v7346_v50 = vmul.f32 -1.442695, %v3584_v12 }
 0x648   :  { %8348 = vpow2.f32 %v7344_v21 }
 0x649   :  { %8350 = vpow2.f32 %v7346_v50 }
 0x64a   :  { %v3569_v24 = vpop.f32.mrf.mxu3  ;;  %v3555_v23 = vpop.f32.mrf.mxu2 }
 0x64b   :  { %v3586_v34 = vadd.f32 %v3569_v24, %v441_v51  ;;  %v3529_v29 = vpop.f32.mrf.mxu0  ;;  %v3543_v59 = vpop.f32.mrf.mxu1  ;;  %v3585_v58 = vadd.f32 %v3555_v23, %v392_v20 }
 0x64c   :  { %v3587_v28 = vadd.f32 %v3529_v29, %v296_v35  ;;  %v3588_v41 = vadd.f32 %v3543_v59, %v345_v47 }
 0x64d   :  { %v7348_v62 = vmul.f32 -1.442695, %v3586_v34  ;;  %v7584_v34 = vld [vmem:[#allocation12 + $0x188] sm:$0xf] }
 0x64e   :  { %v8349_v3 = vpop.eup %8348  ;;  %v7345_v63 = vmul.f32 -1.442695, %v3587_v28  ;;  %v7347_v54 = vmul.f32 -1.442695, %v3588_v41  ;;  %v8047_v41 = vld [vmem:[#allocation12 + $0x194] sm:$0xf0] }
 0x64f   :  { %v8351_v46 = vpop.eup %8350  ;;  %v3597_v43 = vadd.f32 1.0, %v8349_v3  ;;  %8352 = vpow2.f32 %v7348_v62  ;;  %v7560_v62 = vld [vmem:[#allocation12 + $0x160] sm:$0xf] }
 0x650   :  { %v3635_v61 = vadd.f32 1.0, %v8351_v46  ;;  %8354 = vpow2.f32 %v7345_v63 }
 0x651   :  { %8356 = vrcp.f32 %v3597_v43  ;;  %v3608_v56 = vand.u32 2147483647, %v3597_v43  ;;  %v3610_v17 = vand.u32 2147483648, %v3597_v43  ;;  %vm3604_vm10 = vweird.f32 %v3597_v43 }
 0x652   :  { %8358 = vrcp.f32 %v3635_v61  ;;  %v3571_v8 = vpop.f32.mrf.mxu3  ;;  %v3557_v2 = vpop.f32.mrf.mxu2  ;;  %v3648_v53 = vand.u32 2147483648, %v3635_v61  ;;  %v3646_v10 = vand.u32 2147483647, %v3635_v61  ;;  %vm3642_vm9 = vweird.f32 %v3635_v61 }
 0x653   :  { %8360 = vpow2.f32 %v7347_v54  ;;  %v3590_v13 = vadd.f32 %v3571_v8, %v443_v7  ;;  %v3589_v12 = vadd.f32 %v3557_v2, %v394_v1  ;;  %vm10279_vm11 = vcmp.eq.f32.partialorder %v3608_v56, 8.507059e+37  ;;  %v8042_v54 = vld [vmem:[#allocation12 + $0x16c] sm:$0xf0]  ;;  %v7562_v7 = vld [vmem:[#allocation12 + $0x170] sm:$0xf0] }
 0x654   :  { %8362 = vtanh.f32 %v3585_v58  ;;  %v3611_v24 = vor.u32 1.1754944e-38, %v3610_v17  ;;  %v3649_v59 = vor.u32 1.1754944e-38, %v3648_v53  ;;  %vm10287_vm14 = vcmp.eq.f32.partialorder %v3646_v10, 8.507059e+37  ;;  %v7570_v1 = vld [vmem:[#allocation12 + $0x178] sm:$0xf0] }
 0x655   :  { %v8353_v57 = vpop.eup %8352  ;;  %v7349_v49 = vmul.f32 -1.442695, %v3590_v13  ;;  %v10305_v6 = vor.u32 %v8042_v54, %v7560_v62  ;;  %v10318_v17 = vor.u32 %v8040_v45, %v7562_v7  ;;  %v8037_v7 = vld [vmem:[#allocation12 + $0x14c] sm:$0xf]  ;;  %v7522_v62 = vld [vmem:[#allocation12 + $0x118] sm:$0xf0] }
 0x656   :  { %v8355_v19 = vpop.eup %8354  ;;  %v10269_v5 = vadd.f32 1.0, %v8353_v57 }
 0x657   :  { %v8357_v32 = vpop.eup %8356  ;;  %v10273_v27 = vadd.f32 1.0, %v8355_v19  ;;  %4457 = vmatpush.bf16.msra.mxu0 %v10305_v6  ;;  %4471 = vmatpush.bf16.msrb.mxu1 %v10318_v17 }
 0x658   :  { %v8359_v60 = vpop.eup %8358  ;;  %v3600_v4 = vmul.f32 %v8357_v32, %v3597_v43  ;;  %8364 = vrcp.f32 %v10269_v5  ;;  %vm3605_vm12 = vweird.f32 %v8357_v32  ;;  %v3688_v35 = vand.u32 2147483648, %v10269_v5 }
 0x659   :  { %v8361_v40 = vpop.eup %8360  ;;  %v3638_v16 = vmul.f32 %v8359_v60, %v3635_v61  ;;  %8366 = vrcp.f32 %v10273_v27  ;;  %vm3643_vm13 = vweird.f32 %v8359_v60  ;;  %vm3606_vm15 = vmor %vm3604_vm10, %vm3605_vm12  ;;  %vm3682_vm0 = vweird.f32 %v10269_v5 }
 0x65a   :  { %v3601_v21 = vsub.f32 1.0, %v3600_v4  ;;  %v10277_v50 = vadd.f32 1.0, %v8361_v40  ;;  %v8363_v44 = vpop.eup %8362  ;;  %v3686_v46 = vand.u32 2147483647, %v10269_v5  ;;  %vm3644_vm1 = vmor %vm3642_vm9, %vm3643_vm13  ;;  %v10301_v8 = vor.u32 1.1754944e-38, %v3688_v35 }
 0x65b   :  { %v3639_v30 = vsub.f32 1.0, %v3638_v16  ;;  %v10303_v43 = vor.u32 %v8047_v41, %v7584_v34  ;;  %v3623_v4 = vand.u32 2147483647, %v10273_v27  ;;  %vm3619_vm5 = vweird.f32 %v10273_v27  ;;  %v7568_v34 = vld [vmem:[#allocation12 + $0x168] sm:$0xf] }
 0x65c   :  { %v3602_v38 = vmul.f32 %v8357_v32, %v3601_v21  ;;  %8368 = vrcp.f32 %v10277_v50  ;;  %vm10325_vm3 = vcmp.eq.f32.partialorder %v3686_v46, 8.507059e+37  ;;  %v7544_v41 = vld [vmem:[#allocation12 + $0x140] sm:$0xf]  ;;  %vm3657_vm10 = vweird.f32 %v10277_v50  ;;  %v8030_v21 = vld [vmem:[#allocation12 + $0x10c] sm:$0xf0] }
 0x65d   :  { %v3640_v47 = vmul.f32 %v8359_v60, %v3639_v30  ;;  %8370 = vtanh.f32 %v3589_v12  ;;  %4484 = vmatpush.bf16.msra.mxu2 %v10303_v43  ;;  %v3661_v30 = vand.u32 2147483647, %v10277_v50  ;;  %vm3624_vm9 = vcmp.eq.f32.partialorder %v3623_v4, 8.507059e+37  ;;  %v8034_v4 = vld [vmem:[#allocation12 + $0x12c] sm:$0xf0] }
 0x65e   :  { %v10285_v29 = vpop.eup %8364  ;;  %v3603_v23 = vadd.f32 %v8357_v32, %v3602_v38  ;;  %8372 = vpow2.f32 %v7349_v49  ;;  %v3625_v49 = vand.u32 2147483648, %v10273_v27 }
 0x65f   :  { %v3641_v3 = vadd.f32 %v8359_v60, %v3640_v47  ;;  %v3678_v63 = vmul.f32 %v10285_v29, %v10269_v5  ;;  %v10297_v20 = vpop.eup %8366  ;;  %vm3683_vm2 = vweird.f32 %v10285_v29  ;;  %v3663_v47 = vand.u32 2147483648, %v10277_v50  ;;  %v8038_v5 = vld [vmem:[#allocation12 + $0x14c] sm:$0xf0] }
 0x660   :  { %v3607_v58 = vsel %vm3606_vm15, %v8357_v32, %v3603_v23  ;;  %v3615_v13 = vmul.f32 %v10297_v20, %v10273_v27  ;;  %vm3620_vm4 = vweird.f32 %v10297_v20  ;;  %vm10346_vm6 = vmor %vm3682_vm0, %vm3683_vm2  ;;  %vm3662_vm12 = vcmp.eq.f32.partialorder %v3661_v30, 8.507059e+37  ;;  %v7538_v30 = vld [vmem:[#allocation12 + $0x138] sm:$0xf0] }
 0x661   :  { %v3612_v57 = vsel %vm10279_vm11, %v3611_v24, %v3607_v58  ;;  %v3645_v19 = vsel %vm3644_vm1, %v8359_v60, %v3641_v3  ;;  %v3679_v2 = vsub.f32 1.0, %v3678_v63  ;;  %vm10353_vm8 = vmor %vm3619_vm5, %vm3620_vm4  ;;  %v3626_v3 = vor.u32 1.1754944e-38, %v3625_v49  ;;  %v8036_v63 = vld [vmem:[#allocation12 + $0x144] sm:$0xf]  ;;  %v7546_v58 = vld [vmem:[#allocation12 + $0x150] sm:$0xf0] }
 0x662   :  { %v10311_v61 = vpop.eup %8368  ;;  %v3650_v32 = vsel %vm10287_vm14, %v3649_v59, %v3645_v19  ;;  %v3709_v56 = vmul.f32 %v8363_v44, %v3612_v57  ;;  %v3616_v53 = vsub.f32 1.0, %v3615_v13  ;;  %v8043_v59 = vld [vmem:[#allocation12 + $0x174] sm:$0xf0]  ;;  %v7554_v57 = vld [vmem:[#allocation12 + $0x158] sm:$0xf0] }
 0x663   :  { %v8371_v60 = vpop.eup %8370  ;;  %v3707_v40 = vmul.f32 %v3650_v32, %v10128_v0  ;;  %v3680_v16 = vmul.f32 %v10285_v29, %v3679_v2  ;;  %v3653_v10 = vmul.f32 %v10311_v61, %v10277_v50  ;;  %v10332_v0 = vor.u32 %v8041_v11, %v7570_v1  ;;  %v7552_v13 = vld [vmem:[#allocation12 + $0x148] sm:$0xf]  ;;  %v8039_v32 = vld [vmem:[#allocation12 + $0x154] sm:$0xf0] }
 0x664   :  { %v8373_v12 = vpop.eup %8372  ;;  %v3617_v35 = vmul.f32 %v10297_v20, %v3616_v53  ;;  %vm3658_vm7 = vweird.f32 %v10311_v61  ;;  %v10363_v45 = vor.u32 %v8043_v59, %v7568_v34  ;;  %v3664_v2 = vor.u32 1.1754944e-38, %v3663_v47  ;;  %v8032_v53 = vld [vmem:[#allocation12 + $0x124] sm:$0xf]  ;;  %v7512_v59 = vld [vmem:[#allocation12 + $0x100] sm:$0xf] }
 0x665   :  { %v3711_v51 = vadd.f32 %v3709_v56, %v3707_v40  ;;  %v3654_v38 = vsub.f32 1.0, %v3653_v10  ;;  %v3681_v44 = vadd.f32 %v10285_v29, %v3680_v16  ;;  %v10339_v24 = vadd.f32 1.0, %v8373_v12  ;;  %4499 = vmatpush.bf16.msra.mxu3 %v10332_v0  ;;  %vm3659_vm11 = vmor %vm3657_vm10, %vm3658_vm7  ;;  %v7528_v56 = vld [vmem:[#allocation12 + $0x120] sm:$0xf]  ;;  %v7530_v10 = vld [vmem:[#allocation12 + $0x130] sm:$0xf0] }
 0x666   :  { %v3618_v27 = vadd.f32 %v10297_v20, %v3617_v35  ;;  %4485 = vmatpush.bf16.msra.mxu2 %v10363_v45  ;;  %v10372_v1 = vor.u32 %v8038_v5, %v7544_v41  ;;  %v10374_v16 = vor.u32 %v8036_v63, %v7546_v58  ;;  %v8033_v12 = vld [vmem:[#allocation12 + $0x12c] sm:$0xf]  ;;  %v10385_v47 = vor.u32 %v8039_v32, %v7552_v13  ;;  %v8031_v58 = vld [vmem:[#allocation12 + $0x114] sm:$0xf0] }
 0x667   :  { %8374 = vtanh.f32 %v3711_v51  ;;  %v3655_v28 = vmul.f32 %v10311_v61, %v3654_v38  ;;  %v3685_v19 = vsel %vm10346_vm6, %v10285_v29, %v3681_v44  ;;  %v10376_v29 = vor.u32 %v8037_v7, %v7554_v57  ;;  %v7536_v51 = vld [vmem:[#allocation12 + $0x128] sm:$0xf]  ;;  %v8035_v38 = vld [vmem:[#allocation12 + $0x134] sm:$0xf0]  ;;  %v8029_v41 = vld [vmem:[#allocation12 + $0x10c] sm:$0xf] }
 0x668   :  { %8376 = vrcp.f32 %v10339_v24  ;;  %v3622_v46 = vsel %vm10353_vm8, %v10297_v20, %v3618_v27  ;;  %4458 = vmatpush.bf16.msra.mxu0 %v10372_v1  ;;  %4472 = vmatpush.bf16.msrb.mxu1 %v10374_v16  ;;  %v10387_v34 = vor.u32 %v8034_v4, %v7528_v56  ;;  %v7514_v27 = vld [vmem:[#allocation12 + $0x110] sm:$0xf0]  ;;  %v10395_v5 = vor.u32 %v8035_v38, %v7536_v51 }
 0x669   :  { %v3656_v54 = vadd.f32 %v10311_v61, %v3655_v28  ;;  %v3627_v50 = vsel %vm3624_vm9, %v3626_v3, %v3622_v46  ;;  %4500 = vmatpush.bf16.msra.mxu3 %v10376_v29  ;;  %v10390_v28 = vor.u32 %v8032_v53, %v7530_v10  ;;  %v10393_v3 = vor.u32 %v8033_v12, %v7538_v30  ;;  %v10421_v53 = vpop.f32.mrf.mxu1  ;;  %v10430_v12 = vpop.f32.mrf.mxu3 }
 0x66a   :  { %v3710_v11 = vmul.f32 %v8371_v60, %v3627_v50  ;;  %4486 = vmatpush.bf16.msra.mxu2 %v10385_v47  ;;  %v10398_v46 = vor.u32 %v8030_v21, %v7512_v59  ;;  %v3703_v7 = vand.u32 2147483648, %v10339_v24  ;;  %v3701_v50 = vand.u32 2147483647, %v10339_v24 }
 0x66b   :  { %v3660_v20 = vsel %vm3659_vm11, %v10311_v61, %v3656_v54  ;;  %v3690_v61 = vsel %vm10325_vm3, %v10301_v8, %v3685_v19  ;;  %v8028_v8 = vld [vmem:[#allocation12 + $0x104] sm:$0xf]  ;;  %v7520_v54 = vld [vmem:[#allocation12 + $0x108] sm:$0xf]  ;;  %v10405_v19 = vor.u32 %v8029_v41, %v7522_v62  ;;  %vm3697_vm14 = vweird.f32 %v10339_v24 }
 0x66c   :  { %v3665_v40 = vsel %vm3662_vm12, %v3664_v2, %v3660_v20  ;;  %4459 = vmatpush.bf16.msra.mxu0 %v10387_v34  ;;  %4473 = vmatpush.bf16.msrb.mxu1 %v10390_v28  ;;  %v10403_v57 = vor.u32 %v8028_v8, %v7514_v27  ;;  %v10409_v13 = vor.u32 %v8031_v58, %v7520_v54  ;;  %vm3702_vm0 = vcmp.eq.f32.partialorder %v3701_v50, 8.507059e+37 }
 0x66d   :  { %v8375_v49 = vpop.eup %8374  ;;  %v3708_v60 = vmul.f32 %v3665_v40, %v10175_v15  ;;  %4501 = vmatpush.bf16.msra.mxu3 %v10393_v3  ;;  %v10419_v40 = vpop.f32.mrf.mxu0  ;;  %v11404_v21 = vmov 0.0|0.0  }
 0x66e   :  { %v8377_v35 = vpop.eup %8376  ;;  %v3715_v44 = vmul.f32 %v8375_v49, %v3690_v61  ;;  %4487 = vmatpush.bf16.msra.mxu2 %v10395_v5 }
 0x66f   :  { %v3712_v23 = vadd.f32 %v3710_v11, %v3708_v60  ;;  %v3693_v15 = vmul.f32 %v8377_v35, %v10339_v24  ;;  %vm3698_vm13 = vweird.f32 %v8377_v35  ;;  %v3704_v11 = vor.u32 1.1754944e-38, %v3703_v7  ;;  %v10440_v60 = vpop.f32.mrf.mxu2 }
 0x670   :  { %4460 = vmatpush.bf16.msra.mxu0 %v10398_v46  ;;  %vm3699_vm15 = vmor %vm3697_vm14, %vm3698_vm13  ;;  %4474 = vmatpush.bf16.msrb.mxu1 %v10403_v57 }
 0x671   :  { %8378 = vtanh.f32 %v3712_v23  ;;  %v3694_v63 = vsub.f32 1.0, %v3693_v15  ;;  %4502 = vmatpush.bf16.msra.mxu3 %v10405_v19  ;;  %v10436_v61 = vpop.f32.mrf.mxu1  ;;  %v10448_v51 = vpop.f32.mrf.mxu3 }
 0x672   :  { %4488 = vmatpush.bf16.msra.mxu2 %v10409_v13 }
 0x673   :  { %v3695_v2 = vmul.f32 %v8377_v35, %v3694_v63 }
 0x674   :  { %4652 = vmatpush.bf16.msrb.mxu0 %v10210_v55  ;;  %4666 = vmatpush.bf16.msra.mxu1 %v10212_v48 }
 0x675   :  { %v3696_v20 = vadd.f32 %v8377_v35, %v3695_v2  ;;  %4694 = vmatpush.bf16.msrb.mxu3 %v10216_v14  ;;  %v10434_v49 = vpop.f32.mrf.mxu0 }
 0x676   :  { %4680 = vmatpush.bf16.msrb.mxu2 %v10218_v42 }
 0x677   :  { %v8379_v32 = vpop.eup %8378  ;;  %v3700_v56 = vsel %vm3699_vm15, %v8377_v35, %v3696_v20 }
 0x678   :  { %v3705_v4 = vsel %vm3702_vm0, %v3704_v11, %v3700_v56  ;;  %4653 = vmatpush.bf16.msrb.mxu0 %v10220_v18  ;;  %4667 = vmatpush.bf16.msra.mxu1 %v10223_v22 }
 0x679   :  { %v3716_v24 = vmul.f32 %v8379_v32, %v3705_v4  ;;  %4695 = vmatpush.bf16.msrb.mxu3 %v10228_v36  ;;  %v10454_v35 = vpop.f32.mrf.mxu1  ;;  %v10464_v59 = vpop.f32.mrf.mxu3 }
 0x67a   :  { %4681 = vmatpush.bf16.msrb.mxu2 %v10230_v39  ;;  %11402 = vst [vmem:[#allocation32_spill] sm:$0xff] %v10454_v35 }
 0x67b   :  { %v8106_v10 = vpack.c.bf16 %v3716_v24, %v3715_v44  ;;  %v10458_v44 = vpop.f32.mrf.mxu2  ;;  %11403 = vst [vmem:[#allocation25_spill] sm:$0xff] %v10464_v59 }
 0x67c   :  { %4654 = vmatpush.bf16.msrb.mxu0 %v10232_v37  ;;  %4668 = vmatpush.bf16.msra.mxu1 %v10235_v33 }
 0x67d   :  { %8107 = vst [vmem:[#allocation4 + $0x38] sm:$0xff] %v8106_v10   ;;  %4696 = vmatpush.bf16.msrb.mxu3 %v10240_v26  ;;  %v10452_v38 = vpop.f32.mrf.mxu0 }
 0x67e   :  { %4682 = vmatpush.bf16.msrb.mxu2 %v10242_v25 }
 0x680   :  { %4655 = vmatpush.bf16.msrb.mxu0 %v10246_v52  ;;  %4669 = vmatpush.bf16.msra.mxu1 %v10248_v31 }
 0x681   :  { %4697 = vmatpush.bf16.msrb.mxu3 %v10250_v9  ;;  %v10474_v23 = vpop.f32.mrf.mxu1  ;;  %v10488_v27 = vpop.f32.mrf.mxu3 }
 0x682   :  { %4683 = vmatpush.bf16.msrb.mxu2 %v10303_v43  ;;  %11406 = vst [vmem:[#allocation26_spill] sm:$0xff] %v10474_v23 }
 0x683   :  { %v10478_v15 = vpop.f32.mrf.mxu2  ;;  %11408 = vst [vmem:[#allocation36_spill] sm:$0xff] %v10488_v27 }
 0x684   :  { %v7995_v30 = vld [vmem:[#allocation4 + $0x38] sm:$0xff]  ;;  %4656 = vmatpush.bf16.msrb.mxu0 %v10305_v6  ;;  %4670 = vmatpush.bf16.msra.mxu1 %v10318_v17  ;;  %11407 = vst [vmem:[#allocation28_spill] sm:$0xff] %v10478_v15 }
 0x685   :  { %4036 = vmatmul.bf16.gmra.mxu0 %v7995_v30  ;;  %4085 = vmatmul.bf16.gmra.mxu1 %v7995_v30  ;;  %v10472_v8 = vpop.f32.mrf.mxu0 }
 0x686   :  { %4134 = vmatmul.bf16.gmra.mxu2 %v7995_v30  ;;  %4183 = vmatmul.bf16.gmra.mxu3 %v7995_v30  ;;  %11405 = vst [vmem:[#allocation27_spill] sm:$0xff] %v10472_v8 }
 0x687   :  { %4684 = vmatpush.bf16.msrb.mxu2 %v10363_v45  ;;  %4698 = vmatpush.bf16.msrb.mxu3 %v10332_v0 }
 0x688   :  { %4657 = vmatpush.bf16.msrb.mxu0 %v10372_v1  ;;  %4671 = vmatpush.bf16.msra.mxu1 %v10374_v16 }
 0x689   :  { %v10494_v62 = vpop.f32.mrf.mxu1  ;;  %v10504_v54 = vpop.f32.mrf.mxu3 }
 0x68a   :  { %11410 = vst [vmem:[#allocation31_spill] sm:$0xff] %v10494_v62 }
 0x68b   :  { %4685 = vmatpush.bf16.msrb.mxu2 %v10385_v47  ;;  %4699 = vmatpush.bf16.msrb.mxu3 %v10376_v29  ;;  %v10498_v63 = vpop.f32.mrf.mxu2  ;;  %11412 = vst [vmem:[#allocation29_spill] sm:$0xff] %v10504_v54 }
 0x68c   :  { %4658 = vmatpush.bf16.msrb.mxu0 %v10387_v34  ;;  %4672 = vmatpush.bf16.msra.mxu1 %v10390_v28  ;;  %11411 = vst [vmem:[#allocation40_spill] sm:$0xff] %v10498_v63 }
 0x68d   :  { %v10492_v41 = vpop.f32.mrf.mxu0 }
 0x68e   :  { %11409 = vst [vmem:[#allocation30_spill] sm:$0xff] %v10492_v41 }
 0x68f   :  { %4686 = vmatpush.bf16.msrb.mxu2 %v10395_v5  ;;  %4700 = vmatpush.bf16.msrb.mxu3 %v10393_v3 }
 0x690   :  { %4659 = vmatpush.bf16.msrb.mxu0 %v10398_v46  ;;  %4673 = vmatpush.bf16.msra.mxu1 %v10403_v57 }
 0x691   :  { %v10512_v7 = vpop.f32.mrf.mxu1  ;;  %v10524_v50 = vpop.f32.mrf.mxu3 }
 0x692   :  { %11414 = vst [vmem:[#allocation33_spill] sm:$0xff] %v10512_v7 }
 0x693   :  { %4687 = vmatpush.bf16.msrb.mxu2 %v10409_v13  ;;  %4701 = vmatpush.bf16.msrb.mxu3 %v10405_v19  ;;  %v10514_v2 = vpop.f32.mrf.mxu2  ;;  %11416 = vst [vmem:[#allocation43_spill] sm:$0xff] %v10524_v50 }
 0x694   :  { %11415 = vst [vmem:[#allocation35_spill] sm:$0xff] %v10514_v2 }
 0x695   :  { %4461 = vmatmul.bf16.vlgmr.msra.gmra.mxu0 %v11404_v21  ;;  %4475 = vmatmul.bf16.vlgmr.msrb.gmra.mxu1 %v11404_v21  ;;  %v10510_v58 = vpop.f32.mrf.mxu0 }
 0x696   :  { %4489 = vmatmul.bf16.vlgmr.msra.gmra.mxu2 %v11404_v21  ;;  %4503 = vmatmul.bf16.vlgmr.msra.gmra.mxu3 %v11404_v21  ;;  %11413 = vst [vmem:[#allocation34_spill] sm:$0xff] %v10510_v58 }
 0x697   :  { %4851 = vmatpush.bf16.msra.mxu0 %v10210_v55  ;;  %4865 = vmatpush.bf16.msrb.mxu1 %v10212_v48 }
 0x698   :  { %4879 = vmatpush.bf16.msra.mxu2 %v10218_v42  ;;  %4893 = vmatpush.bf16.msra.mxu3 %v10216_v14 }
 0x699   :  { %v10530_v11 = vpop.f32.mrf.mxu1  ;;  %v10536_v56 = vpop.f32.mrf.mxu3 }
 0x69a   :  { %11418 = vst [vmem:[#allocation39_spill] sm:$0xff] %v10530_v11 }
 0x69b   :  { %4852 = vmatpush.bf16.msra.mxu0 %v10220_v18  ;;  %4866 = vmatpush.bf16.msrb.mxu1 %v10223_v22  ;;  %v10534_v32 = vpop.f32.mrf.mxu2  ;;  %11420 = vst [vmem:[#allocation37_spill] sm:$0xff] %v10536_v56 }
 0x69c   :  { %4880 = vmatpush.bf16.msra.mxu2 %v10230_v39  ;;  %4894 = vmatpush.bf16.msra.mxu3 %v10228_v36  ;;  %11419 = vst [vmem:[#allocation46_spill] sm:$0xff] %v10534_v32 }
 0x69d   :  { %v10528_v20 = vpop.f32.mrf.mxu0 }
 0x69e   :  { %11417 = vst [vmem:[#allocation38_spill] sm:$0xff] %v10528_v20 }
 0x69f   :  { %4853 = vmatpush.bf16.msra.mxu0 %v10232_v37  ;;  %4867 = vmatpush.bf16.msrb.mxu1 %v10235_v33 }
 0x6a0   :  { %4881 = vmatpush.bf16.msra.mxu2 %v10242_v25  ;;  %4895 = vmatpush.bf16.msra.mxu3 %v10240_v26 }
 0x6a1   :  { %v10540_v24 = vpop.f32.mrf.mxu1  ;;  %v10544_v30 = vpop.f32.mrf.mxu3 }
 0x6a2   :  { %11422 = vst [vmem:[#allocation41_spill] sm:$0xff] %v10540_v24 }
 0x6a3   :  { %4854 = vmatpush.bf16.msra.mxu0 %v10246_v52  ;;  %4868 = vmatpush.bf16.msrb.mxu1 %v10248_v31  ;;  %v10542_v10 = vpop.f32.mrf.mxu2  ;;  %11424 = vst [vmem:[#allocation49_spill] sm:$0xff] %v10544_v30 }
 0x6a4   :  { %4882 = vmatpush.bf16.msra.mxu2 %v10303_v43  ;;  %4896 = vmatpush.bf16.msra.mxu3 %v10250_v9  ;;  %11423 = vst [vmem:[#allocation23_spill] sm:$0xff] %v10542_v10 }
 0x6a5   :  { %v10538_v4 = vpop.f32.mrf.mxu0 }
 0x6a6   :  { %11421 = vst [vmem:[#allocation42_spill] sm:$0xff] %v10538_v4 }
 0x6a7   :  { %4855 = vmatpush.bf16.msra.mxu0 %v10305_v6  ;;  %4869 = vmatpush.bf16.msrb.mxu1 %v10318_v17 }
 0x6a8   :  { %4883 = vmatpush.bf16.msra.mxu2 %v10363_v45  ;;  %4897 = vmatpush.bf16.msra.mxu3 %v10332_v0 }
 0x6a9   :  { %v10548_v20 = vpop.f32.mrf.mxu1  ;;  %v10552_v50 = vpop.f32.mrf.mxu3 }
 0x6aa   :  { %11426 = vst [vmem:[#allocation24_spill] sm:$0xff] %v10548_v20 }
 0x6ab   :  { %4856 = vmatpush.bf16.msra.mxu0 %v10372_v1  ;;  %4870 = vmatpush.bf16.msrb.mxu1 %v10374_v16  ;;  %v10550_v11 = vpop.f32.mrf.mxu2  ;;  %11428 = vst [vmem:[#allocation44_spill] sm:$0xff] %v10552_v50 }
 0x6ac   :  { %4884 = vmatpush.bf16.msra.mxu2 %v10385_v47  ;;  %4898 = vmatpush.bf16.msra.mxu3 %v10376_v29  ;;  %11427 = vst [vmem:[#allocation50_spill] sm:$0xff] %v10550_v11 }
 0x6ad   :  { %v10546_v21 = vpop.f32.mrf.mxu0 }
 0x6ae   :  { %11425 = vst [vmem:[#allocation45_spill] sm:$0xff] %v10546_v21 }
 0x6af   :  { %4857 = vmatpush.bf16.msra.mxu0 %v10387_v34  ;;  %4871 = vmatpush.bf16.msrb.mxu1 %v10390_v28 }
 0x6b0   :  { %4885 = vmatpush.bf16.msra.mxu2 %v10395_v5  ;;  %4899 = vmatpush.bf16.msra.mxu3 %v10393_v3 }
 0x6b1   :  { %v10556_v32 = vpop.f32.mrf.mxu1  ;;  %v10560_v4 = vpop.f32.mrf.mxu3 }
 0x6b2   :  { %11430 = vst [vmem:[#allocation47_spill] sm:$0xff] %v10556_v32 }
 0x6b3   :  { %4858 = vmatpush.bf16.msra.mxu0 %v10398_v46  ;;  %4872 = vmatpush.bf16.msrb.mxu1 %v10403_v57  ;;  %v10558_v56 = vpop.f32.mrf.mxu2  ;;  %11432 = vst [vmem:[#allocation52_spill] sm:$0xff] %v10560_v4 }
 0x6b4   :  { %4886 = vmatpush.bf16.msra.mxu2 %v10409_v13  ;;  %4900 = vmatpush.bf16.msra.mxu3 %v10405_v19  ;;  %11431 = vst [vmem:[#allocation51_spill] sm:$0xff] %v10558_v56 }
 0x6b5   :  { %v10554_v2 = vpop.f32.mrf.mxu0 }
 0x6b6   :  { %11429 = vst [vmem:[#allocation48_spill] sm:$0xff] %v10554_v2 }
 0x6b9   :  { %v10564_v10 = vpop.f32.mrf.mxu1  ;;  %v10568_v21 = vpop.f32.mrf.mxu3 }
 0x6ba   :  { %11434 = vst [vmem:[#allocation54_spill] sm:$0xff] %v10564_v10 }
 0x6bb   :  { %v10566_v30 = vpop.f32.mrf.mxu2  ;;  %11436 = vst [vmem:[#allocation56_spill] sm:$0xff] %v10568_v21 }
 0x6bc   :  { %11435 = vst [vmem:[#allocation55_spill] sm:$0xff] %v10566_v30 }
 0x6bd   :  { %v10562_v24 = vpop.f32.mrf.mxu0 }
 0x6be   :  { %11433 = vst [vmem:[#allocation53_spill] sm:$0xff] %v10562_v24 }
 0x6c1   :  { %v10572_v11 = vpop.f32.mrf.mxu1  ;;  %v10576_v2 = vpop.f32.mrf.mxu3 }
 0x6c2   :  { %11438 = vst [vmem:[#allocation58_spill] sm:$0xff] %v10572_v11 }
 0x6c3   :  { %v10574_v50 = vpop.f32.mrf.mxu2  ;;  %11440 = vst [vmem:[#allocation60_spill] sm:$0xff] %v10576_v2 }
 0x6c4   :  { %11439 = vst [vmem:[#allocation59_spill] sm:$0xff] %v10574_v50 }
 0x6c5   :  { %v10570_v20 = vpop.f32.mrf.mxu0 }
 0x6c6   :  { %11437 = vst [vmem:[#allocation57_spill] sm:$0xff] %v10570_v20 }
 0x6c9   :  { %v10580_v56 = vpop.f32.mrf.mxu1  ;;  %v10584_v24 = vpop.f32.mrf.mxu3 }
 0x6ca   :  { %11442 = vst [vmem:[#allocation62_spill] sm:$0xff] %v10580_v56  ;;  %v3775_v56 = vld [vmem:[#allocation14 + $0x4] sm:$0xf] }
 0x6cb   :  { %v10582_v4 = vpop.f32.mrf.mxu2  ;;  %11444 = vst [vmem:[#allocation64_spill] sm:$0xff] %v10584_v24  ;;  %v10618_v58 = vperm.slane %v3775_v56, 3  ;;  %v10628_v63 = vperm.slane %v3775_v56, 2 }
 0x6cc   :  { %11443 = vst [vmem:[#allocation63_spill] sm:$0xff] %v10582_v4 }
 0x6cd   :  { %v10578_v32 = vpop.f32.mrf.mxu0  ;;  %11458 = vst [vmem:[#allocation78_spill] sm:$0xff] %v10618_v58 }
 0x6ce   :  { %11441 = vst [vmem:[#allocation61_spill] sm:$0xff] %v10578_v32 }
 0x6cf   :  { %11460 = vst [vmem:[#allocation80_spill] sm:$0xff] %v10628_v63 }
 0x6d1   :  { %v10588_v30 = vpop.f32.mrf.mxu1  ;;  %v10592_v20 = vpop.f32.mrf.mxu3 }
 0x6d2   :  { %11446 = vst [vmem:[#allocation66_spill] sm:$0xff] %v10588_v30  ;;  %v10608_v30 = vperm.slane %v3775_v56, 1 }
 0x6d3   :  { %v10590_v21 = vpop.f32.mrf.mxu2  ;;  %11448 = vst [vmem:[#allocation68_spill] sm:$0xff] %v10592_v20 }
 0x6d4   :  { %11447 = vst [vmem:[#allocation67_spill] sm:$0xff] %v10590_v21 }
 0x6d5   :  { %v10586_v10 = vpop.f32.mrf.mxu0  ;;  %11455 = vst [vmem:[#allocation75_spill] sm:$0xff] %v10608_v30 }
 0x6d6   :  { %11445 = vst [vmem:[#allocation65_spill] sm:$0xff] %v10586_v10  ;;  %v10606_v10 = vperm.slane %v3775_v56, 0 }
 0x6db   :  { %v10598_v2 = vpop.f32.mrf.mxu2 }
 0x6dc   :  { %11451 = vst [vmem:[#allocation71_spill] sm:$0xff] %v10598_v2 }
 0x702   :  { %v10594_v11 = vpop.f32.mrf.mxu0  ;;  %v10596_v50 = vpop.f32.mrf.mxu1 }
 0x703   :  { %11449 = vst [vmem:[#allocation69_spill] sm:$0xff] %v10594_v11  ;;  %v4003_v11 = vadd.f32 %v10419_v40, %v10606_v10  ;;  %v4005_v40 = vadd.f32 %v10434_v49, %v10606_v10 }
 0x704   :  { %11450 = vst [vmem:[#allocation70_spill] sm:$0xff] %v10596_v50  ;;  %v4052_v50 = vadd.f32 %v10421_v53, %v10608_v30  ;;  %v4054_v53 = vadd.f32 %v10436_v61, %v10608_v30  ;;  %v4101_v61 = vadd.f32 %v10440_v60, %v10628_v63 }
 0x709   :  { %v10600_v32 = vpop.f32.mrf.mxu3  ;;  %v10610_v21 = vpop.f32.mrf.mxu2 }
 0x70a   :  { %11452 = vst [vmem:[#allocation72_spill] sm:$0xff] %v10600_v32  ;;  %v10602_v4 = vpop.f32.mrf.mxu0  ;;  %v10604_v24 = vpop.f32.mrf.mxu1 }
 0x70b   :  { %11453 = vst [vmem:[#allocation73_spill] sm:$0xff] %v10602_v4 }
 0x70c   :  { %11454 = vst [vmem:[#allocation74_spill] sm:$0xff] %v10604_v24 }
 0x70d   :  { %11456 = vst [vmem:[#allocation76_spill] sm:$0xff] %v10610_v21  ;;  %v4150_v21 = vadd.f32 %v10430_v12, %v10618_v58 }
 0x711   :  { %v10616_v2 = vpop.f32.mrf.mxu3  ;;  %v10620_v62 = vpop.f32.mrf.mxu2 }
 0x712   :  { %11457 = vst [vmem:[#allocation77_spill] sm:$0xff] %v10616_v2  ;;  %v4462_v32 = vpop.f32.mrf.mxu0  ;;  %v4476_v20 = vpop.f32.mrf.mxu1 }
 0x713   :  { %v4517_v7 = vadd.f32 %v4462_v32, %v4003_v11  ;;  %v4518_v4 = vadd.f32 %v4476_v20, %v4052_v50  ;;  %11459 = vst [vmem:[#allocation79_spill] sm:$0xff] %v10620_v62 }
 0x715   :  { %v7638_v24 = vmul.f32 -1.442695, %v4517_v7  ;;  %v7640_v54 = vmul.f32 -1.442695, %v4518_v4 }
 0x717   :  { %8380 = vpow2.f32 %v7638_v24 }
 0x718   :  { %8382 = vpow2.f32 %v7640_v54 }
 0x719   :  { %v4504_v2 = vpop.f32.mrf.mxu3  ;;  %v4490_v49 = vpop.f32.mrf.mxu2 }
 0x71a   :  { %v4520_v11 = vadd.f32 %v4504_v2, %v4150_v21  ;;  %v4464_v50 = vpop.f32.mrf.mxu0  ;;  %v4478_v20 = vpop.f32.mrf.mxu1  ;;  %v4152_v21 = vadd.f32 %v10448_v51, %v10618_v58 }
 0x71b   :  { %v4521_v32 = vadd.f32 %v4464_v50, %v4005_v40  ;;  %v4522_v7 = vadd.f32 %v4478_v20, %v4054_v53  ;;  %v4519_v53 = vadd.f32 %v4490_v49, %v4101_v61 }
 0x71c   :  { %v7642_v4 = vmul.f32 -1.442695, %v4520_v11 }
 0x71d   :  { %v8381_v41 = vpop.eup %8380  ;;  %v7639_v62 = vmul.f32 -1.442695, %v4521_v32  ;;  %v7641_v54 = vmul.f32 -1.442695, %v4522_v7 }
 0x71e   :  { %v8383_v24 = vpop.eup %8382  ;;  %v4531_v12 = vadd.f32 1.0, %v8381_v41  ;;  %8384 = vpow2.f32 %v7642_v4 }
 0x71f   :  { %v4569_v27 = vadd.f32 1.0, %v8383_v24  ;;  %8386 = vpow2.f32 %v7639_v62 }
 0x720   :  { %8388 = vrcp.f32 %v4531_v12  ;;  %v4542_v49 = vand.u32 2147483647, %v4531_v12  ;;  %v4544_v61 = vand.u32 2147483648, %v4531_v12  ;;  %vm4538_vm3 = vweird.f32 %v4531_v12 }
 0x721   :  { %8390 = vrcp.f32 %v4569_v27  ;;  %v4506_v2 = vpop.f32.mrf.mxu3  ;;  %vm4576_vm4 = vweird.f32 %v4569_v27 }
 0x722   :  { %8392 = vpow2.f32 %v7641_v54  ;;  %v4524_v11 = vadd.f32 %v4506_v2, %v4152_v21  ;;  %v4582_v2 = vand.u32 2147483648, %v4569_v27  ;;  %vm4543_vm6 = vcmp.eq.f32.partialorder %v4542_v49, 8.507059e+37 }
 0x723   :  { %8394 = vtanh.f32 %v4519_v53  ;;  %v4492_v53 = vpop.f32.mrf.mxu2 }
 0x724   :  { %v8385_v40 = vpop.eup %8384  ;;  %v7643_v51 = vmul.f32 -1.442695, %v4524_v11 }
 0x725   :  { %v8387_v56 = vpop.eup %8386  ;;  %v10634_v50 = vadd.f32 1.0, %v8385_v40 }
 0x726   :  { %v8389_v41 = vpop.eup %8388  ;;  %v10636_v20 = vadd.f32 1.0, %v8387_v56  ;;  %v4580_v56 = vand.u32 2147483647, %v4569_v27 }
 0x727   :  { %v8391_v62 = vpop.eup %8390  ;;  %v4534_v32 = vmul.f32 %v8389_v41, %v4531_v12  ;;  %vm4539_vm1 = vweird.f32 %v8389_v41 }
 0x728   :  { %v8393_v7 = vpop.eup %8392  ;;  %v4572_v4 = vmul.f32 %v8391_v62, %v4569_v27  ;;  %8396 = vrcp.f32 %v10636_v20  ;;  %vm4577_vm2 = vweird.f32 %v8391_v62  ;;  %vm4540_vm5 = vmor %vm4538_vm3, %vm4539_vm1  ;;  %vm4581_vm8 = vcmp.eq.f32.partialorder %v4580_v56, 8.507059e+37 }
 0x729   :  { %v4535_v60 = vsub.f32 1.0, %v4534_v32  ;;  %v10639_v24 = vadd.f32 1.0, %v8393_v7  ;;  %8398 = vrcp.f32 %v10634_v50  ;;  %v4103_v32 = vadd.f32 %v10458_v44, %v10628_v63  ;;  %v8395_v11 = vpop.eup %8394  ;;  %vm4578_vm7 = vmor %vm4576_vm4, %vm4577_vm2 }
 0x72a   :  { %v4573_v54 = vsub.f32 1.0, %v4572_v4  ;;  %v4545_v4 = vor.u32 1.1754944e-38, %v4544_v61  ;;  %v4557_v49 = vand.u32 2147483647, %v10636_v20  ;;  %vm4553_vm10 = vweird.f32 %v10636_v20 }
 0x72b   :  { %v4536_v21 = vmul.f32 %v8389_v41, %v4535_v60  ;;  %8400 = vrcp.f32 %v10639_v24  ;;  %v4583_v60 = vor.u32 1.1754944e-38, %v4582_v2  ;;  %vm4591_vm12 = vweird.f32 %v10639_v24 }
 0x72c   :  { %v4574_v40 = vmul.f32 %v8391_v62, %v4573_v54  ;;  %8402 = vpow2.f32 %v7643_v51  ;;  %v4523_v54 = vadd.f32 %v4492_v53, %v4103_v32  ;;  %v4559_v53 = vand.u32 2147483648, %v10636_v20 }
 0x72d   :  { %v4537_v7 = vadd.f32 %v8389_v41, %v4536_v21  ;;  %vm4558_vm14 = vcmp.eq.f32.partialorder %v4557_v49, 8.507059e+37  ;;  %vm4616_vm2 = vweird.f32 %v10634_v50 }
 0x72e   :  { %v4575_v15 = vadd.f32 %v8391_v62, %v4574_v40  ;;  %v8397_v23 = vpop.eup %8396  ;;  %8404 = vtanh.f32 %v4523_v54 }
 0x72f   :  { %v4541_v8 = vsel %vm4540_vm5, %v8389_v41, %v4537_v7  ;;  %v10646_v59 = vpop.eup %8398  ;;  %v4549_v44 = vmul.f32 %v8397_v23, %v10636_v20  ;;  %vm4554_vm9 = vweird.f32 %v8397_v23  ;;  %v4595_v7 = vand.u32 2147483647, %v10639_v24 }
 0x730   :  { %v4546_v58 = vsel %vm4543_vm6, %v4545_v4, %v4541_v8  ;;  %v4579_v35 = vsel %vm4578_vm7, %v8391_v62, %v4575_v15  ;;  %v4612_v41 = vmul.f32 %v10646_v59, %v10634_v50  ;;  %vm4555_vm13 = vmor %vm4553_vm10, %vm4554_vm9  ;;  %vm4617_vm1 = vweird.f32 %v10646_v59 }
 0x731   :  { %v8401_v12 = vpop.eup %8400  ;;  %v4584_v51 = vsel %vm4581_vm8, %v4583_v60, %v4579_v35  ;;  %v4643_v27 = vmul.f32 %v8395_v11, %v4546_v58  ;;  %v4550_v61 = vsub.f32 1.0, %v4549_v44  ;;  %v4597_v35 = vand.u32 2147483648, %v10639_v24  ;;  %vm4618_vm4 = vmor %vm4616_vm2, %vm4617_vm1 }
 0x732   :  { %v4641_v21 = vmul.f32 0.0, %v4584_v51  ;;  %v4587_v40 = vmul.f32 %v8401_v12, %v10639_v24  ;;  %v8403_v2 = vpop.eup %8402  ;;  %vm4592_vm11 = vweird.f32 %v8401_v12  ;;  %v4560_v11 = vor.u32 1.1754944e-38, %v4559_v53 }
 0x733   :  { %v4551_v62 = vmul.f32 %v8397_v23, %v4550_v61  ;;  %v4610_v58 = vadd.f32 1.0, %v8403_v2  ;;  %v4613_v4 = vsub.f32 1.0, %v4612_v41  ;;  %v4598_v51 = vor.u32 1.1754944e-38, %v4597_v35  ;;  %vm4593_vm15 = vmor %vm4591_vm12, %vm4592_vm11 }
 0x734   :  { %v10654_v8 = vadd.f32 %v4643_v27, %v4641_v21  ;;  %v4588_v15 = vsub.f32 1.0, %v4587_v40  ;;  %v8405_v44 = vpop.eup %8404  ;;  %vm4596_vm0 = vcmp.eq.f32.partialorder %v4595_v7, 8.507059e+37 }
 0x735   :  { %v4552_v32 = vadd.f32 %v8397_v23, %v4551_v62  ;;  %8406 = vrcp.f32 %v4610_v58  ;;  %v4614_v40 = vmul.f32 %v10646_v59, %v4613_v4  ;;  %v4637_v49 = vand.u32 2147483648, %v4610_v58 }
 0x736   :  { %v4589_v56 = vmul.f32 %v8401_v12, %v4588_v15  ;;  %8408 = vtanh.f32 %v10654_v8  ;;  %v4620_v62 = vand.u32 2147483647, %v10634_v50  ;;  %vm4631_vm5 = vweird.f32 %v4610_v58 }
 0x737   :  { %v4556_v60 = vsel %vm4555_vm13, %v8397_v23, %v4552_v32  ;;  %v4615_v23 = vadd.f32 %v10646_v59, %v4614_v40 }
 0x738   :  { %v4590_v54 = vadd.f32 %v8401_v12, %v4589_v56  ;;  %v4561_v27 = vsel %vm4558_vm14, %v4560_v11, %v4556_v60  ;;  %v4635_v56 = vand.u32 2147483647, %v4610_v58  ;;  %v4638_v60 = vor.u32 1.1754944e-38, %v4637_v49  ;;  %v11463_v49 = vld [vmem:[#allocation25_spill] sm:$0xff] }
 0x739   :  { %v4644_v21 = vmul.f32 %v8405_v44, %v4561_v27  ;;  %v4619_v7 = vsel %vm4618_vm4, %v10646_v59, %v4615_v23  ;;  %vm4621_vm7 = vcmp.eq.f32.partialorder %v4620_v62, 8.507059e+37  ;;  %v4008_v59 = vadd.f32 %v10452_v38, %v10606_v10 }
 0x73a   :  { %v4594_v20 = vsel %vm4593_vm15, %v8401_v12, %v4590_v54  ;;  %v4622_v12 = vand.u32 2147483648, %v10634_v50  ;;  %vm4636_vm8 = vcmp.eq.f32.partialorder %v4635_v56, 8.507059e+37 }
 0x73b   :  { %v4599_v61 = vsel %vm4596_vm0, %v4598_v51, %v4594_v20  ;;  %v8407_v15 = vpop.eup %8406 }
 0x73c   :  { %v4642_v2 = vmul.f32 0.0, %v4599_v61  ;;  %v4627_v53 = vmul.f32 %v8407_v15, %v4610_v58  ;;  %vm4632_vm3 = vweird.f32 %v8407_v15  ;;  %v8409_v11 = vpop.eup %8408  ;;  %v4623_v4 = vor.u32 1.1754944e-38, %v4622_v12  ;;  %v11461_v58 = vld [vmem:[#allocation32_spill] sm:$0xff]  ;;  %v11462_v12 = vld [vmem:[#allocation78_spill] sm:$0xff] }
 0x73d   :  { %vm4633_vm6 = vmor %vm4631_vm5, %vm4632_vm3  ;;  %v4057_v61 = vadd.f32 %v11461_v58, %v10608_v30  ;;  %v4155_v62 = vadd.f32 %v11463_v49, %v11462_v12 }
 0x73e   :  { %v10661_v24 = vadd.f32 %v4644_v21, %v4642_v2  ;;  %v4628_v41 = vsub.f32 1.0, %v4627_v53  ;;  %v4624_v51 = vsel %vm4621_vm7, %v4623_v4, %v4619_v7 }
 0x73f   :  { %v4649_v20 = vmul.f32 %v8409_v11, %v4624_v51 }
 0x740   :  { %8410 = vtanh.f32 %v10661_v24  ;;  %v4629_v35 = vmul.f32 %v8407_v15, %v4628_v41 }
 0x742   :  { %v4630_v32 = vadd.f32 %v8407_v15, %v4629_v35  ;;  %v11464_v35 = vld [vmem:[#allocation27_spill] sm:$0xff] }
 0x743   :  { %v4010_v56 = vadd.f32 %v11464_v35, %v10606_v10 }
 0x744   :  { %v4634_v44 = vsel %vm4633_vm6, %v8407_v15, %v4630_v32  ;;  %v11465_v32 = vld [vmem:[#allocation26_spill] sm:$0xff] }
 0x745   :  { %v4639_v27 = vsel %vm4636_vm8, %v4638_v60, %v4634_v44  ;;  %v4059_v38 = vadd.f32 %v11465_v32, %v10608_v30 }
 0x746   :  { %v8411_v54 = vpop.eup %8410 }
 0x747   :  { %v4650_v50 = vmul.f32 %v8411_v54, %v4639_v27 }
 0x749   :  { %v4651_v21 = vpack.c.bf16 %v4650_v50, %v4649_v20 }
 0x74b   :  { %4660 = vmatmul.bf16.vlgmr.msrb.gmra.mxu0 %v4651_v21  ;;  %4674 = vmatmul.bf16.vlgmr.msra.gmra.mxu1 %v4651_v21 }
 0x74c   :  { %4688 = vmatmul.bf16.vlgmr.msrb.gmra.mxu2 %v4651_v21  ;;  %4702 = vmatmul.bf16.vlgmr.msrb.gmra.mxu3 %v4651_v21 }
 0x74d   :  { %5050 = vmatpush.bf16.msrb.mxu0 %v10210_v55  ;;  %5064 = vmatpush.bf16.msra.mxu1 %v10212_v48 }
 0x74e   :  { %5078 = vmatpush.bf16.msrb.mxu2 %v10218_v42  ;;  %5092 = vmatpush.bf16.msrb.mxu3 %v10216_v14 }
 0x751   :  { %5051 = vmatpush.bf16.msrb.mxu0 %v10220_v18  ;;  %5065 = vmatpush.bf16.msra.mxu1 %v10223_v22 }
 0x752   :  { %5079 = vmatpush.bf16.msrb.mxu2 %v10230_v39  ;;  %5093 = vmatpush.bf16.msrb.mxu3 %v10228_v36 }
 0x755   :  { %5052 = vmatpush.bf16.msrb.mxu0 %v10232_v37  ;;  %5066 = vmatpush.bf16.msra.mxu1 %v10235_v33 }
 0x756   :  { %5080 = vmatpush.bf16.msrb.mxu2 %v10242_v25  ;;  %5094 = vmatpush.bf16.msrb.mxu3 %v10240_v26 }
 0x759   :  { %5053 = vmatpush.bf16.msrb.mxu0 %v10246_v52  ;;  %5067 = vmatpush.bf16.msra.mxu1 %v10248_v31 }
 0x75a   :  { %5081 = vmatpush.bf16.msrb.mxu2 %v10303_v43  ;;  %5095 = vmatpush.bf16.msrb.mxu3 %v10250_v9 }
 0x75d   :  { %5054 = vmatpush.bf16.msrb.mxu0 %v10305_v6  ;;  %5068 = vmatpush.bf16.msra.mxu1 %v10318_v17 }
 0x75e   :  { %5082 = vmatpush.bf16.msrb.mxu2 %v10363_v45  ;;  %5096 = vmatpush.bf16.msrb.mxu3 %v10332_v0 }
 0x761   :  { %5055 = vmatpush.bf16.msrb.mxu0 %v10372_v1  ;;  %5069 = vmatpush.bf16.msra.mxu1 %v10374_v16 }
 0x762   :  { %5083 = vmatpush.bf16.msrb.mxu2 %v10385_v47  ;;  %5097 = vmatpush.bf16.msrb.mxu3 %v10376_v29 }
 0x765   :  { %5056 = vmatpush.bf16.msrb.mxu0 %v10387_v34  ;;  %5070 = vmatpush.bf16.msra.mxu1 %v10390_v28 }
 0x766   :  { %5084 = vmatpush.bf16.msrb.mxu2 %v10395_v5  ;;  %5098 = vmatpush.bf16.msrb.mxu3 %v10393_v3 }
 0x769   :  { %5057 = vmatpush.bf16.msrb.mxu0 %v10398_v46  ;;  %5071 = vmatpush.bf16.msra.mxu1 %v10403_v57 }
 0x76a   :  { %5085 = vmatpush.bf16.msrb.mxu2 %v10409_v13  ;;  %5099 = vmatpush.bf16.msrb.mxu3 %v10405_v19 }
 0x7c8   :  { %v4661_v40 = vpop.f32.mrf.mxu0  ;;  %v4675_v2 = vpop.f32.mrf.mxu1 }
 0x7c9   :  { %v4716_v15 = vadd.f32 %v4661_v40, %v4008_v59  ;;  %v4717_v53 = vadd.f32 %v4675_v2, %v4057_v61  ;;  %v11466_v40 = vld [vmem:[#allocation28_spill] sm:$0xff] }
 0x7ca   :  { %v4106_v2 = vadd.f32 %v11466_v40, %v10628_v63 }
 0x7cb   :  { %v7644_v23 = vmul.f32 -1.442695, %v4716_v15  ;;  %v7646_v41 = vmul.f32 -1.442695, %v4717_v53  ;;  %v11467_v53 = vld [vmem:[#allocation36_spill] sm:$0xff] }
 0x7cd   :  { %8412 = vpow2.f32 %v7644_v23  ;;  %v4157_v23 = vadd.f32 %v11467_v53, %v11462_v12  ;;  %v11468_v53 = vld [vmem:[#allocation40_spill] sm:$0xff] }
 0x7ce   :  { %8414 = vpow2.f32 %v7646_v41 }
 0x7cf   :  { %v4703_v7 = vpop.f32.mrf.mxu3  ;;  %v4689_v61 = vpop.f32.mrf.mxu2 }
 0x7d0   :  { %v4719_v11 = vadd.f32 %v4703_v7, %v4155_v62  ;;  %v4663_v4 = vpop.f32.mrf.mxu0  ;;  %v4677_v60 = vpop.f32.mrf.mxu1  ;;  %v4718_v49 = vadd.f32 %v4689_v61, %v4106_v2 }
 0x7d1   :  { %v4720_v54 = vadd.f32 %v4663_v4, %v4010_v56  ;;  %v4721_v44 = vadd.f32 %v4677_v60, %v4059_v38 }
 0x7d2   :  { %v7648_v51 = vmul.f32 -1.442695, %v4719_v11 }
 0x7d3   :  { %v8413_v27 = vpop.eup %8412  ;;  %v7645_v20 = vmul.f32 -1.442695, %v4720_v54  ;;  %v7647_v59 = vmul.f32 -1.442695, %v4721_v44 }
 0x7d4   :  { %v8415_v50 = vpop.eup %8414  ;;  %v4730_v21 = vadd.f32 1.0, %v8413_v27  ;;  %8416 = vpow2.f32 %v7648_v51 }
 0x7d5   :  { %v4768_v58 = vadd.f32 1.0, %v8415_v50  ;;  %8418 = vpow2.f32 %v7645_v20 }
 0x7d6   :  { %8420 = vrcp.f32 %v4730_v21  ;;  %v4741_v20 = vand.u32 2147483647, %v4730_v21  ;;  %v4743_v50 = vand.u32 2147483648, %v4730_v21  ;;  %vm4737_vm11 = vweird.f32 %v4730_v21 }
 0x7d7   :  { %8422 = vrcp.f32 %v4768_v58  ;;  %v4705_v15 = vpop.f32.mrf.mxu3  ;;  %v4779_v2 = vand.u32 2147483647, %v4768_v58  ;;  %vm4775_vm12 = vweird.f32 %v4768_v58 }
 0x7d8   :  { %8424 = vpow2.f32 %v7647_v59  ;;  %v4723_v35 = vadd.f32 %v4705_v15, %v4157_v23  ;;  %v4781_v59 = vand.u32 2147483648, %v4768_v58  ;;  %v4691_v15 = vpop.f32.mrf.mxu2  ;;  %v4108_v23 = vadd.f32 %v11468_v53, %v10628_v63 }
 0x7d9   :  { %8426 = vtanh.f32 %v4718_v49  ;;  %vm4742_vm15 = vcmp.eq.f32.partialorder %v4741_v20, 8.507059e+37  ;;  %vm4780_vm0 = vcmp.eq.f32.partialorder %v4779_v2, 8.507059e+37 }
 0x7da   :  { %v8417_v41 = vpop.eup %8416  ;;  %v7649_v51 = vmul.f32 -1.442695, %v4723_v35 }
 0x7db   :  { %v8419_v62 = vpop.eup %8418  ;;  %v10717_v32 = vadd.f32 1.0, %v8417_v41 }
 0x7dc   :  { %v8421_v56 = vpop.eup %8420  ;;  %v10719_v38 = vadd.f32 1.0, %v8419_v62  ;;  %v4744_v62 = vor.u32 1.1754944e-38, %v4743_v50 }
 0x7dd   :  { %v8423_v7 = vpop.eup %8422  ;;  %v4733_v11 = vmul.f32 %v8421_v56, %v4730_v21  ;;  %vm4738_vm9 = vweird.f32 %v8421_v56 }
 0x7de   :  { %v8425_v4 = vpop.eup %8424  ;;  %v4771_v60 = vmul.f32 %v8423_v7, %v4768_v58  ;;  %8428 = vrcp.f32 %v10719_v38  ;;  %vm4776_vm10 = vweird.f32 %v8423_v7  ;;  %vm4739_vm13 = vmor %vm4737_vm11, %vm4738_vm9  ;;  %v4756_v20 = vand.u32 2147483647, %v10719_v38 }
 0x7df   :  { %v4734_v54 = vsub.f32 1.0, %v4733_v11  ;;  %v10722_v44 = vadd.f32 1.0, %v8425_v4  ;;  %8430 = vrcp.f32 %v10717_v32  ;;  %v8427_v49 = vpop.eup %8426  ;;  %vm4777_vm14 = vmor %vm4775_vm12, %vm4776_vm10  ;;  %v4782_v4 = vor.u32 1.1754944e-38, %v4781_v59 }
 0x7e0   :  { %v4772_v27 = vsub.f32 1.0, %v4771_v60  ;;  %v4758_v59 = vand.u32 2147483648, %v10719_v38  ;;  %vm4752_vm2 = vweird.f32 %v10719_v38  ;;  %vm4757_vm6 = vcmp.eq.f32.partialorder %v4756_v20, 8.507059e+37 }
 0x7e1   :  { %v4735_v61 = vmul.f32 %v8421_v56, %v4734_v54  ;;  %8432 = vrcp.f32 %v10722_v44  ;;  %v4722_v54 = vadd.f32 %v4691_v15, %v4108_v23  ;;  %vm4790_vm4 = vweird.f32 %v10722_v44 }
 0x7e2   :  { %v4773_v40 = vmul.f32 %v8423_v7, %v4772_v27  ;;  %8434 = vpow2.f32 %v7649_v51  ;;  %vm4815_vm10 = vweird.f32 %v10717_v32 }
 0x7e3   :  { %v4736_v41 = vadd.f32 %v8421_v56, %v4735_v61  ;;  %8436 = vtanh.f32 %v4722_v54 }
 0x7e4   :  { %v4774_v35 = vadd.f32 %v8423_v7, %v4773_v40  ;;  %v8429_v11 = vpop.eup %8428 }
 0x7e5   :  { %v4740_v60 = vsel %vm4739_vm13, %v8421_v56, %v4736_v41  ;;  %v10728_v27 = vpop.eup %8430  ;;  %v4748_v61 = vmul.f32 %v8429_v11, %v10719_v38  ;;  %vm4753_vm1 = vweird.f32 %v8429_v11  ;;  %v4794_v41 = vand.u32 2147483647, %v10722_v44 }
 0x7e6   :  { %v4745_v12 = vsel %vm4742_vm15, %v4744_v62, %v4740_v60  ;;  %v4778_v30 = vsel %vm4777_vm14, %v8423_v7, %v4774_v35  ;;  %v4811_v56 = vmul.f32 %v10728_v27, %v10717_v32  ;;  %vm4754_vm5 = vmor %vm4752_vm2, %vm4753_vm1  ;;  %vm4816_vm9 = vweird.f32 %v10728_v27 }
 0x7e7   :  { %v8433_v21 = vpop.eup %8432  ;;  %v4783_v51 = vsel %vm4780_vm0, %v4782_v4, %v4778_v30  ;;  %v4842_v53 = vmul.f32 %v8427_v49, %v4745_v12  ;;  %v4749_v50 = vsub.f32 1.0, %v4748_v61  ;;  %v4796_v30 = vand.u32 2147483648, %v10722_v44  ;;  %vm4817_vm12 = vmor %vm4815_vm10, %vm4816_vm9 }
 0x7e8   :  { %v4840_v58 = vmul.f32 %v4783_v51, %v10654_v8  ;;  %v4786_v40 = vmul.f32 %v8433_v21, %v10722_v44  ;;  %v8435_v63 = vpop.eup %8434  ;;  %vm4791_vm3 = vweird.f32 %v8433_v21  ;;  %v4759_v49 = vor.u32 1.1754944e-38, %v4758_v59 }
 0x7e9   :  { %v4750_v15 = vmul.f32 %v8429_v11, %v4749_v50  ;;  %v4809_v8 = vadd.f32 1.0, %v8435_v63  ;;  %v4812_v62 = vsub.f32 1.0, %v4811_v56  ;;  %v8437_v60 = vpop.eup %8436  ;;  %vm4792_vm7 = vmor %vm4790_vm4, %vm4791_vm3  ;;  %v4797_v54 = vor.u32 1.1754944e-38, %v4796_v30 }
 0x7ea   :  { %v10737_v7 = vadd.f32 %v4842_v53, %v4840_v58  ;;  %v4787_v2 = vsub.f32 1.0, %v4786_v40  ;;  %vm4795_vm8 = vcmp.eq.f32.partialorder %v4794_v41, 8.507059e+37  ;;  %v4821_v56 = vand.u32 2147483648, %v10717_v32 }
 0x7eb   :  { %v4751_v23 = vadd.f32 %v8429_v11, %v4750_v15  ;;  %8438 = vrcp.f32 %v4809_v8  ;;  %v4813_v53 = vmul.f32 %v10728_v27, %v4812_v62  ;;  %v4836_v20 = vand.u32 2147483648, %v4809_v8 }
 0x7ec   :  { %v4788_v12 = vmul.f32 %v8433_v21, %v4787_v2  ;;  %8440 = vtanh.f32 %v10737_v7  ;;  %v4834_v2 = vand.u32 2147483647, %v4809_v8  ;;  %vm4830_vm13 = vweird.f32 %v4809_v8 }
 0x7ed   :  { %v4755_v35 = vsel %vm4754_vm5, %v8429_v11, %v4751_v23  ;;  %v4814_v11 = vadd.f32 %v10728_v27, %v4813_v53  ;;  %v4822_v23 = vor.u32 1.1754944e-38, %v4821_v56  ;;  %v4837_v41 = vor.u32 1.1754944e-38, %v4836_v20  ;;  %v11473_v56 = vld [vmem:[#allocation29_spill] sm:$0xff] }
 0x7ee   :  { %v4789_v4 = vadd.f32 %v8433_v21, %v4788_v12  ;;  %v4760_v61 = vsel %vm4757_vm6, %v4759_v49, %v4755_v35  ;;  %vm4835_vm0 = vcmp.eq.f32.partialorder %v4834_v2, 8.507059e+37  ;;  %v11475_v2 = vld [vmem:[#allocation33_spill] sm:$0xff] }
 0x7ef   :  { %v4843_v63 = vmul.f32 %v8437_v60, %v4760_v61  ;;  %v4818_v30 = vsel %vm4817_vm12, %v10728_v27, %v4814_v11  ;;  %v11469_v27 = vld [vmem:[#allocation30_spill] sm:$0xff]  ;;  %v11470_v61 = vld [vmem:[#allocation75_spill] sm:$0xff] }
 0x7f0   :  { %v4793_v38 = vsel %vm4792_vm7, %v8433_v21, %v4789_v4 }
 0x7f1   :  { %v4798_v51 = vsel %vm4795_vm8, %v4797_v54, %v4793_v38  ;;  %v8439_v44 = vpop.eup %8438  ;;  %v11471_v38 = vld [vmem:[#allocation31_spill] sm:$0xff] }
 0x7f2   :  { %v4841_v58 = vmul.f32 %v4798_v51, %v10661_v24  ;;  %v4826_v40 = vmul.f32 %v8439_v44, %v4809_v8  ;;  %v4819_v24 = vand.u32 2147483647, %v10717_v32  ;;  %vm4831_vm11 = vweird.f32 %v8439_v44  ;;  %v8441_v12 = vpop.eup %8440 }
 0x7f3   :  { %vm4832_vm14 = vmor %vm4830_vm13, %vm4831_vm11  ;;  %v4013_v8 = vadd.f32 %v11469_v27, %v10606_v10 }
 0x7f4   :  { %v10745_v50 = vadd.f32 %v4843_v63, %v4841_v58  ;;  %v4827_v21 = vsub.f32 1.0, %v4826_v40  ;;  %vm4820_vm15 = vcmp.eq.f32.partialorder %v4819_v24, 8.507059e+37  ;;  %v4062_v63 = vadd.f32 %v11471_v38, %v11470_v61  ;;  %v11474_v24 = vld [vmem:[#allocation34_spill] sm:$0xff] }
 0x7f5   :  { %v4823_v35 = vsel %vm4820_vm15, %v4822_v23, %v4818_v30 }
 0x7f6   :  { %8442 = vtanh.f32 %v10745_v50  ;;  %v4828_v59 = vmul.f32 %v8439_v44, %v4827_v21  ;;  %v4848_v60 = vmul.f32 %v8441_v12, %v4823_v35  ;;  %v11472_v21 = vld [vmem:[#allocation78_spill] sm:$0xff] }
 0x7f7   :  { %v4160_v20 = vadd.f32 %v11473_v56, %v11472_v21 }
 0x7f8   :  { %v4829_v15 = vadd.f32 %v8439_v44, %v4828_v59  ;;  %v4015_v59 = vadd.f32 %v11474_v24, %v10606_v10 }
 0x7fa   :  { %v4833_v62 = vsel %vm4832_vm14, %v8439_v44, %v4829_v15  ;;  %v4064_v15 = vadd.f32 %v11475_v2, %v11470_v61 }
 0x7fb   :  { %v4838_v4 = vsel %vm4835_vm0, %v4837_v41, %v4833_v62 }
 0x7fc   :  { %v8443_v49 = vpop.eup %8442 }
 0x7fd   :  { %v4849_v32 = vmul.f32 %v8443_v49, %v4838_v4 }
 0x7ff   :  { %v4850_v54 = vpack.c.bf16 %v4849_v32, %v4848_v60 }
 0x801   :  { %4859 = vmatmul.bf16.vlgmr.msra.gmra.mxu0 %v4850_v54  ;;  %4873 = vmatmul.bf16.vlgmr.msrb.gmra.mxu1 %v4850_v54 }
 0x802   :  { %4887 = vmatmul.bf16.vlgmr.msra.gmra.mxu2 %v4850_v54  ;;  %4901 = vmatmul.bf16.vlgmr.msra.gmra.mxu3 %v4850_v54 }
 0x803   :  { %5249 = vmatpush.bf16.msra.mxu0 %v10210_v55  ;;  %5263 = vmatpush.bf16.msrb.mxu1 %v10212_v48 }
 0x804   :  { %5277 = vmatpush.bf16.msra.mxu2 %v10218_v42  ;;  %5291 = vmatpush.bf16.msra.mxu3 %v10216_v14 }
 0x807   :  { %5250 = vmatpush.bf16.msra.mxu0 %v10220_v18  ;;  %5264 = vmatpush.bf16.msrb.mxu1 %v10223_v22 }
 0x808   :  { %5278 = vmatpush.bf16.msra.mxu2 %v10230_v39  ;;  %5292 = vmatpush.bf16.msra.mxu3 %v10228_v36 }
 0x80b   :  { %5251 = vmatpush.bf16.msra.mxu0 %v10232_v37  ;;  %5265 = vmatpush.bf16.msrb.mxu1 %v10235_v33 }
 0x80c   :  { %5279 = vmatpush.bf16.msra.mxu2 %v10242_v25  ;;  %5293 = vmatpush.bf16.msra.mxu3 %v10240_v26 }
 0x80f   :  { %5252 = vmatpush.bf16.msra.mxu0 %v10246_v52  ;;  %5266 = vmatpush.bf16.msrb.mxu1 %v10248_v31 }
 0x810   :  { %5280 = vmatpush.bf16.msra.mxu2 %v10303_v43  ;;  %5294 = vmatpush.bf16.msra.mxu3 %v10250_v9 }
 0x813   :  { %5253 = vmatpush.bf16.msra.mxu0 %v10305_v6  ;;  %5267 = vmatpush.bf16.msrb.mxu1 %v10318_v17 }
 0x814   :  { %5281 = vmatpush.bf16.msra.mxu2 %v10363_v45  ;;  %5295 = vmatpush.bf16.msra.mxu3 %v10332_v0 }
 0x817   :  { %5254 = vmatpush.bf16.msra.mxu0 %v10372_v1  ;;  %5268 = vmatpush.bf16.msrb.mxu1 %v10374_v16 }
 0x818   :  { %5282 = vmatpush.bf16.msra.mxu2 %v10385_v47  ;;  %5296 = vmatpush.bf16.msra.mxu3 %v10376_v29 }
 0x81b   :  { %5255 = vmatpush.bf16.msra.mxu0 %v10387_v34  ;;  %5269 = vmatpush.bf16.msrb.mxu1 %v10390_v28 }
 0x81c   :  { %5283 = vmatpush.bf16.msra.mxu2 %v10395_v5  ;;  %5297 = vmatpush.bf16.msra.mxu3 %v10393_v3 }
 0x81f   :  { %5256 = vmatpush.bf16.msra.mxu0 %v10398_v46  ;;  %5270 = vmatpush.bf16.msrb.mxu1 %v10403_v57 }
 0x820   :  { %5284 = vmatpush.bf16.msra.mxu2 %v10409_v13  ;;  %5298 = vmatpush.bf16.msra.mxu3 %v10405_v19 }
 0x87e   :  { %v4860_v51 = vpop.f32.mrf.mxu0  ;;  %v4874_v53 = vpop.f32.mrf.mxu1 }
 0x87f   :  { %v4915_v58 = vadd.f32 %v4860_v51, %v4013_v8  ;;  %v4916_v44 = vadd.f32 %v4874_v53, %v4062_v63  ;;  %v11476_v63 = vld [vmem:[#allocation80_spill] sm:$0xff]  ;;  %v11477_v51 = vld [vmem:[#allocation35_spill] sm:$0xff] }
 0x880   :  { %v4111_v53 = vadd.f32 %v11477_v51, %v11476_v63 }
 0x881   :  { %v7650_v40 = vmul.f32 -1.442695, %v4915_v58  ;;  %v7652_v11 = vmul.f32 -1.442695, %v4916_v44  ;;  %v11478_v44 = vld [vmem:[#allocation43_spill] sm:$0xff] }
 0x883   :  { %8444 = vpow2.f32 %v7650_v40  ;;  %v4162_v40 = vadd.f32 %v11478_v44, %v11472_v21  ;;  %v11479_v44 = vld [vmem:[#allocation46_spill] sm:$0xff] }
 0x884   :  { %8446 = vpow2.f32 %v7652_v11 }
 0x885   :  { %v4902_v30 = vpop.f32.mrf.mxu3  ;;  %v4888_v38 = vpop.f32.mrf.mxu2 }
 0x886   :  { %v4918_v12 = vadd.f32 %v4902_v30, %v4160_v20  ;;  %v4862_v23 = vpop.f32.mrf.mxu0  ;;  %v4876_v41 = vpop.f32.mrf.mxu1  ;;  %v4917_v56 = vadd.f32 %v4888_v38, %v4111_v53 }
 0x887   :  { %v4919_v49 = vadd.f32 %v4862_v23, %v4015_v59  ;;  %v4920_v62 = vadd.f32 %v4876_v41, %v4064_v15 }
 0x888   :  { %v7654_v35 = vmul.f32 -1.442695, %v4918_v12 }
 0x889   :  { %v8445_v4 = vpop.eup %8444  ;;  %v7651_v60 = vmul.f32 -1.442695, %v4919_v49  ;;  %v7653_v27 = vmul.f32 -1.442695, %v4920_v62 }
 0x88a   :  { %v8447_v32 = vpop.eup %8446  ;;  %v4929_v54 = vadd.f32 1.0, %v8445_v4  ;;  %8448 = vpow2.f32 %v7654_v35 }
 0x88b   :  { %v4967_v8 = vadd.f32 1.0, %v8447_v32  ;;  %8450 = vpow2.f32 %v7651_v60 }
 0x88c   :  { %8452 = vrcp.f32 %v4929_v54  ;;  %v4940_v60 = vand.u32 2147483647, %v4929_v54  ;;  %v4942_v32 = vand.u32 2147483648, %v4929_v54  ;;  %vm4936_vm3 = vweird.f32 %v4929_v54 }
 0x88d   :  { %8454 = vrcp.f32 %v4967_v8  ;;  %v4904_v58 = vpop.f32.mrf.mxu3  ;;  %v4978_v53 = vand.u32 2147483647, %v4967_v8  ;;  %vm4974_vm4 = vweird.f32 %v4967_v8 }
 0x88e   :  { %8456 = vpow2.f32 %v7653_v27  ;;  %v4922_v24 = vadd.f32 %v4904_v58, %v4162_v40  ;;  %v4980_v27 = vand.u32 2147483648, %v4967_v8  ;;  %v4890_v58 = vpop.f32.mrf.mxu2  ;;  %v4113_v40 = vadd.f32 %v11479_v44, %v11476_v63 }
 0x88f   :  { %8458 = vtanh.f32 %v4917_v56  ;;  %vm4941_vm7 = vcmp.eq.f32.partialorder %v4940_v60, 8.507059e+37  ;;  %vm4979_vm8 = vcmp.eq.f32.partialorder %v4978_v53, 8.507059e+37 }
 0x890   :  { %v8449_v11 = vpop.eup %8448  ;;  %v7655_v35 = vmul.f32 -1.442695, %v4922_v24 }
 0x891   :  { %v8451_v20 = vpop.eup %8450  ;;  %v10801_v2 = vadd.f32 1.0, %v8449_v11 }
 0x892   :  { %v8453_v59 = vpop.eup %8452  ;;  %v10803_v15 = vadd.f32 1.0, %v8451_v20  ;;  %v4943_v20 = vor.u32 1.1754944e-38, %v4942_v32 }
 0x893   :  { %v8455_v30 = vpop.eup %8454  ;;  %v4932_v12 = vmul.f32 %v8453_v59, %v4929_v54  ;;  %vm4937_vm1 = vweird.f32 %v8453_v59 }
 0x894   :  { %v8457_v23 = vpop.eup %8456  ;;  %v4970_v41 = vmul.f32 %v8455_v30, %v4967_v8  ;;  %8460 = vrcp.f32 %v10803_v15  ;;  %vm4975_vm2 = vweird.f32 %v8455_v30  ;;  %vm4938_vm5 = vmor %vm4936_vm3, %vm4937_vm1  ;;  %v4955_v60 = vand.u32 2147483647, %v10803_v15 }
 0x895   :  { %v4933_v49 = vsub.f32 1.0, %v4932_v12  ;;  %v10806_v62 = vadd.f32 1.0, %v8457_v23  ;;  %8462 = vrcp.f32 %v10801_v2  ;;  %v8459_v56 = vpop.eup %8458  ;;  %vm4976_vm6 = vmor %vm4974_vm4, %vm4975_vm2  ;;  %v4981_v23 = vor.u32 1.1754944e-38, %v4980_v27 }
 0x896   :  { %v4971_v4 = vsub.f32 1.0, %v4970_v41  ;;  %v4957_v27 = vand.u32 2147483648, %v10803_v15  ;;  %vm4951_vm10 = vweird.f32 %v10803_v15  ;;  %vm4956_vm14 = vcmp.eq.f32.partialorder %v4955_v60, 8.507059e+37 }
 0x897   :  { %v4934_v38 = vmul.f32 %v8453_v59, %v4933_v49  ;;  %8464 = vrcp.f32 %v10806_v62  ;;  %v4921_v49 = vadd.f32 %v4890_v58, %v4113_v40  ;;  %vm4989_vm12 = vweird.f32 %v10806_v62 }
 0x898   :  { %v4972_v51 = vmul.f32 %v8455_v30, %v4971_v4  ;;  %8466 = vpow2.f32 %v7655_v35  ;;  %vm5014_vm2 = vweird.f32 %v10801_v2 }
 0x899   :  { %v4935_v11 = vadd.f32 %v8453_v59, %v4934_v38  ;;  %8468 = vtanh.f32 %v4921_v49 }
 0x89a   :  { %v4973_v24 = vadd.f32 %v8455_v30, %v4972_v51  ;;  %v8461_v12 = vpop.eup %8460 }
 0x89b   :  { %v4939_v41 = vsel %vm4938_vm5, %v8453_v59, %v4935_v11  ;;  %v10812_v4 = vpop.eup %8462  ;;  %v4947_v38 = vmul.f32 %v8461_v12, %v10803_v15  ;;  %vm4952_vm9 = vweird.f32 %v8461_v12  ;;  %v4993_v11 = vand.u32 2147483647, %v10806_v62 }
 0x89c   :  { %v4944_v21 = vsel %vm4941_vm7, %v4943_v20, %v4939_v41  ;;  %v4977_v61 = vsel %vm4976_vm6, %v8455_v30, %v4973_v24  ;;  %v5010_v59 = vmul.f32 %v10812_v4, %v10801_v2  ;;  %vm4953_vm13 = vmor %vm4951_vm10, %vm4952_vm9  ;;  %vm5015_vm1 = vweird.f32 %v10812_v4 }
 0x89d   :  { %v8465_v54 = vpop.eup %8464  ;;  %v4982_v35 = vsel %vm4979_vm8, %v4981_v23, %v4977_v61  ;;  %v5041_v44 = vmul.f32 %v8459_v56, %v4944_v21  ;;  %v4948_v32 = vsub.f32 1.0, %v4947_v38  ;;  %v4995_v61 = vand.u32 2147483648, %v10806_v62  ;;  %vm5016_vm4 = vmor %vm5014_vm2, %vm5015_vm1 }
 0x89e   :  { %v5039_v8 = vmul.f32 %v4982_v35, %v10737_v7  ;;  %v4985_v51 = vmul.f32 %v8465_v54, %v10806_v62  ;;  %v8467_v63 = vpop.eup %8466  ;;  %vm4990_vm11 = vweird.f32 %v8465_v54  ;;  %v4958_v56 = vor.u32 1.1754944e-38, %v4957_v27 }
 0x89f   :  { %v4949_v58 = vmul.f32 %v8461_v12, %v4948_v32  ;;  %v5008_v7 = vadd.f32 1.0, %v8467_v63  ;;  %v5011_v20 = vsub.f32 1.0, %v5010_v59  ;;  %v8469_v41 = vpop.eup %8468  ;;  %vm4991_vm15 = vmor %vm4989_vm12, %vm4990_vm11  ;;  %v4996_v49 = vor.u32 1.1754944e-38, %v4995_v61 }
 0x8a0   :  { %v10821_v30 = vadd.f32 %v5041_v44, %v5039_v8  ;;  %v4986_v53 = vsub.f32 1.0, %v4985_v51  ;;  %vm4994_vm0 = vcmp.eq.f32.partialorder %v4993_v11, 8.507059e+37  ;;  %v5020_v59 = vand.u32 2147483648, %v10801_v2 }
 0x8a1   :  { %v4950_v40 = vadd.f32 %v8461_v12, %v4949_v58  ;;  %8470 = vrcp.f32 %v5008_v7  ;;  %v5012_v44 = vmul.f32 %v10812_v4, %v5011_v20  ;;  %v5035_v60 = vand.u32 2147483648, %v5008_v7 }
 0x8a2   :  { %v4987_v21 = vmul.f32 %v8465_v54, %v4986_v53  ;;  %8472 = vtanh.f32 %v10821_v30  ;;  %v5033_v53 = vand.u32 2147483647, %v5008_v7  ;;  %vm5029_vm5 = vweird.f32 %v5008_v7 }
 0x8a3   :  { %v4954_v24 = vsel %vm4953_vm13, %v8461_v12, %v4950_v40  ;;  %v5013_v12 = vadd.f32 %v10812_v4, %v5012_v44  ;;  %v5021_v40 = vor.u32 1.1754944e-38, %v5020_v59  ;;  %v5036_v11 = vor.u32 1.1754944e-38, %v5035_v60  ;;  %v11484_v59 = vld [vmem:[#allocation37_spill] sm:$0xff] }
 0x8a4   :  { %v4988_v23 = vadd.f32 %v8465_v54, %v4987_v21  ;;  %v4959_v38 = vsel %vm4956_vm14, %v4958_v56, %v4954_v24  ;;  %vm5034_vm8 = vcmp.eq.f32.partialorder %v5033_v53, 8.507059e+37  ;;  %v11486_v53 = vld [vmem:[#allocation41_spill] sm:$0xff] }
 0x8a5   :  { %v5042_v63 = vmul.f32 %v8469_v41, %v4959_v38  ;;  %v5017_v61 = vsel %vm5016_vm4, %v10812_v4, %v5013_v12  ;;  %v11480_v4 = vld [vmem:[#allocation38_spill] sm:$0xff]  ;;  %v11481_v38 = vld [vmem:[#allocation75_spill] sm:$0xff] }
 0x8a6   :  { %v4992_v15 = vsel %vm4991_vm15, %v8465_v54, %v4988_v23 }
 0x8a7   :  { %v4997_v35 = vsel %vm4994_vm0, %v4996_v49, %v4992_v15  ;;  %v8471_v62 = vpop.eup %8470  ;;  %v11482_v15 = vld [vmem:[#allocation39_spill] sm:$0xff] }
 0x8a8   :  { %v5040_v8 = vmul.f32 %v4997_v35, %v10745_v50  ;;  %v5025_v51 = vmul.f32 %v8471_v62, %v5008_v7  ;;  %v5018_v50 = vand.u32 2147483647, %v10801_v2  ;;  %vm5030_vm3 = vweird.f32 %v8471_v62  ;;  %v8473_v21 = vpop.eup %8472 }
 0x8a9   :  { %vm5031_vm6 = vmor %vm5029_vm5, %vm5030_vm3  ;;  %v4018_v7 = vadd.f32 %v11480_v4, %v10606_v10 }
 0x8aa   :  { %v10829_v32 = vadd.f32 %v5042_v63, %v5040_v8  ;;  %v5026_v54 = vsub.f32 1.0, %v5025_v51  ;;  %vm5019_vm7 = vcmp.eq.f32.partialorder %v5018_v50, 8.507059e+37  ;;  %v4067_v63 = vadd.f32 %v11482_v15, %v11481_v38  ;;  %v11485_v50 = vld [vmem:[#allocation42_spill] sm:$0xff] }
 0x8ab   :  { %v5022_v24 = vsel %vm5019_vm7, %v5021_v40, %v5017_v61 }
 0x8ac   :  { %8474 = vtanh.f32 %v10829_v32  ;;  %v5027_v27 = vmul.f32 %v8471_v62, %v5026_v54  ;;  %v5047_v41 = vmul.f32 %v8473_v21, %v5022_v24  ;;  %v11483_v54 = vld [vmem:[#allocation78_spill] sm:$0xff] }
 0x8ad   :  { %v4165_v60 = vadd.f32 %v11484_v59, %v11483_v54 }
 0x8ae   :  { %v5028_v58 = vadd.f32 %v8471_v62, %v5027_v27  ;;  %v4020_v27 = vadd.f32 %v11485_v50, %v10606_v10 }
 0x8b0   :  { %v5032_v20 = vsel %vm5031_vm6, %v8471_v62, %v5028_v58  ;;  %v4069_v58 = vadd.f32 %v11486_v53, %v11481_v38 }
 0x8b1   :  { %v5037_v23 = vsel %vm5034_vm8, %v5036_v11, %v5032_v20 }
 0x8b2   :  { %v8475_v56 = vpop.eup %8474 }
 0x8b3   :  { %v5048_v2 = vmul.f32 %v8475_v56, %v5037_v23 }
 0x8b5   :  { %v5049_v49 = vpack.c.bf16 %v5048_v2, %v5047_v41 }
 0x8b7   :  { %5058 = vmatmul.bf16.vlgmr.msrb.gmra.mxu0 %v5049_v49  ;;  %5072 = vmatmul.bf16.vlgmr.msra.gmra.mxu1 %v5049_v49 }
 0x8b8   :  { %5086 = vmatmul.bf16.vlgmr.msrb.gmra.mxu2 %v5049_v49  ;;  %5100 = vmatmul.bf16.vlgmr.msrb.gmra.mxu3 %v5049_v49 }
 0x8b9   :  { %5448 = vmatpush.bf16.msrb.mxu0 %v10210_v55  ;;  %5462 = vmatpush.bf16.msra.mxu1 %v10212_v48 }
 0x8ba   :  { %5476 = vmatpush.bf16.msrb.mxu2 %v10218_v42  ;;  %5490 = vmatpush.bf16.msrb.mxu3 %v10216_v14 }
 0x8bd   :  { %5449 = vmatpush.bf16.msrb.mxu0 %v10220_v18  ;;  %5463 = vmatpush.bf16.msra.mxu1 %v10223_v22 }
 0x8be   :  { %5477 = vmatpush.bf16.msrb.mxu2 %v10230_v39  ;;  %5491 = vmatpush.bf16.msrb.mxu3 %v10228_v36 }
 0x8c1   :  { %5450 = vmatpush.bf16.msrb.mxu0 %v10232_v37  ;;  %5464 = vmatpush.bf16.msra.mxu1 %v10235_v33 }
 0x8c2   :  { %5478 = vmatpush.bf16.msrb.mxu2 %v10242_v25  ;;  %5492 = vmatpush.bf16.msrb.mxu3 %v10240_v26 }
 0x8c5   :  { %5451 = vmatpush.bf16.msrb.mxu0 %v10246_v52  ;;  %5465 = vmatpush.bf16.msra.mxu1 %v10248_v31 }
 0x8c6   :  { %5479 = vmatpush.bf16.msrb.mxu2 %v10303_v43  ;;  %5493 = vmatpush.bf16.msrb.mxu3 %v10250_v9 }
 0x8c9   :  { %5452 = vmatpush.bf16.msrb.mxu0 %v10305_v6  ;;  %5466 = vmatpush.bf16.msra.mxu1 %v10318_v17 }
 0x8ca   :  { %5480 = vmatpush.bf16.msrb.mxu2 %v10363_v45  ;;  %5494 = vmatpush.bf16.msrb.mxu3 %v10332_v0 }
 0x8cd   :  { %5453 = vmatpush.bf16.msrb.mxu0 %v10372_v1  ;;  %5467 = vmatpush.bf16.msra.mxu1 %v10374_v16 }
 0x8ce   :  { %5481 = vmatpush.bf16.msrb.mxu2 %v10385_v47  ;;  %5495 = vmatpush.bf16.msrb.mxu3 %v10376_v29 }
 0x8d1   :  { %5454 = vmatpush.bf16.msrb.mxu0 %v10387_v34  ;;  %5468 = vmatpush.bf16.msra.mxu1 %v10390_v28 }
 0x8d2   :  { %5482 = vmatpush.bf16.msrb.mxu2 %v10395_v5  ;;  %5496 = vmatpush.bf16.msrb.mxu3 %v10393_v3 }
 0x8d5   :  { %5455 = vmatpush.bf16.msrb.mxu0 %v10398_v46  ;;  %5469 = vmatpush.bf16.msra.mxu1 %v10403_v57 }
 0x8d6   :  { %5483 = vmatpush.bf16.msrb.mxu2 %v10409_v13  ;;  %5497 = vmatpush.bf16.msrb.mxu3 %v10405_v19 }
 0x934   :  { %v5059_v35 = vpop.f32.mrf.mxu0  ;;  %v5073_v44 = vpop.f32.mrf.mxu1 }
 0x935   :  { %v5114_v8 = vadd.f32 %v5059_v35, %v4018_v7  ;;  %v5115_v62 = vadd.f32 %v5073_v44, %v4067_v63  ;;  %v11487_v63 = vld [vmem:[#allocation80_spill] sm:$0xff]  ;;  %v11488_v35 = vld [vmem:[#allocation23_spill] sm:$0xff] }
 0x936   :  { %v4116_v44 = vadd.f32 %v11488_v35, %v11487_v63 }
 0x937   :  { %v7656_v51 = vmul.f32 -1.442695, %v5114_v8  ;;  %v7658_v12 = vmul.f32 -1.442695, %v5115_v62  ;;  %v11489_v62 = vld [vmem:[#allocation49_spill] sm:$0xff] }
 0x939   :  { %8476 = vpow2.f32 %v7656_v51  ;;  %v4167_v51 = vadd.f32 %v11489_v62, %v11483_v54  ;;  %v11490_v62 = vld [vmem:[#allocation50_spill] sm:$0xff] }
 0x93a   :  { %8478 = vpow2.f32 %v7658_v12 }
 0x93b   :  { %v5101_v61 = vpop.f32.mrf.mxu3  ;;  %v5087_v15 = vpop.f32.mrf.mxu2 }
 0x93c   :  { %v5117_v21 = vadd.f32 %v5101_v61, %v4165_v60  ;;  %v5061_v40 = vpop.f32.mrf.mxu0  ;;  %v5075_v11 = vpop.f32.mrf.mxu1  ;;  %v5116_v59 = vadd.f32 %v5087_v15, %v4116_v44 }
 0x93d   :  { %v5118_v56 = vadd.f32 %v5061_v40, %v4020_v27  ;;  %v5119_v20 = vadd.f32 %v5075_v11, %v4069_v58 }
 0x93e   :  { %v7660_v24 = vmul.f32 -1.442695, %v5117_v21 }
 0x93f   :  { %v8477_v23 = vpop.eup %8476  ;;  %v7657_v41 = vmul.f32 -1.442695, %v5118_v56  ;;  %v7659_v4 = vmul.f32 -1.442695, %v5119_v20 }
 0x940   :  { %v8479_v2 = vpop.eup %8478  ;;  %v5128_v49 = vadd.f32 1.0, %v8477_v23  ;;  %8480 = vpow2.f32 %v7660_v24 }
 0x941   :  { %v5166_v7 = vadd.f32 1.0, %v8479_v2  ;;  %8482 = vpow2.f32 %v7657_v41 }
 0x942   :  { %8484 = vrcp.f32 %v5128_v49  ;;  %v5139_v41 = vand.u32 2147483647, %v5128_v49  ;;  %v5141_v2 = vand.u32 2147483648, %v5128_v49  ;;  %vm5135_vm11 = vweird.f32 %v5128_v49 }
 0x943   :  { %8486 = vrcp.f32 %v5166_v7  ;;  %v5103_v8 = vpop.f32.mrf.mxu3  ;;  %v5177_v44 = vand.u32 2147483647, %v5166_v7  ;;  %vm5173_vm12 = vweird.f32 %v5166_v7 }
 0x944   :  { %8488 = vpow2.f32 %v7659_v4  ;;  %v5121_v50 = vadd.f32 %v5103_v8, %v4167_v51  ;;  %v5179_v4 = vand.u32 2147483648, %v5166_v7  ;;  %v5089_v8 = vpop.f32.mrf.mxu2  ;;  %v4118_v51 = vadd.f32 %v11490_v62, %v11487_v63 }
 0x945   :  { %8490 = vtanh.f32 %v5116_v59  ;;  %vm5140_vm15 = vcmp.eq.f32.partialorder %v5139_v41, 8.507059e+37  ;;  %vm5178_vm0 = vcmp.eq.f32.partialorder %v5177_v44, 8.507059e+37 }
 0x946   :  { %v8481_v12 = vpop.eup %8480  ;;  %v7661_v24 = vmul.f32 -1.442695, %v5121_v50 }
 0x947   :  { %v8483_v60 = vpop.eup %8482  ;;  %v10885_v53 = vadd.f32 1.0, %v8481_v12 }
 0x948   :  { %v8485_v27 = vpop.eup %8484  ;;  %v10887_v58 = vadd.f32 1.0, %v8483_v60  ;;  %v5142_v60 = vor.u32 1.1754944e-38, %v5141_v2 }
 0x949   :  { %v8487_v61 = vpop.eup %8486  ;;  %v5131_v21 = vmul.f32 %v8485_v27, %v5128_v49  ;;  %vm5136_vm9 = vweird.f32 %v8485_v27 }
 0x94a   :  { %v8489_v40 = vpop.eup %8488  ;;  %v5169_v11 = vmul.f32 %v8487_v61, %v5166_v7  ;;  %8492 = vrcp.f32 %v10887_v58  ;;  %vm5174_vm10 = vweird.f32 %v8487_v61  ;;  %vm5137_vm13 = vmor %vm5135_vm11, %vm5136_vm9  ;;  %v5154_v41 = vand.u32 2147483647, %v10887_v58 }
 0x94b   :  { %v5132_v56 = vsub.f32 1.0, %v5131_v21  ;;  %v10890_v20 = vadd.f32 1.0, %v8489_v40  ;;  %8494 = vrcp.f32 %v10885_v53  ;;  %v8491_v59 = vpop.eup %8490  ;;  %vm5175_vm14 = vmor %vm5173_vm12, %vm5174_vm10  ;;  %v5180_v40 = vor.u32 1.1754944e-38, %v5179_v4 }
 0x94c   :  { %v5170_v23 = vsub.f32 1.0, %v5169_v11  ;;  %v5156_v4 = vand.u32 2147483648, %v10887_v58  ;;  %vm5150_vm2 = vweird.f32 %v10887_v58  ;;  %vm5155_vm6 = vcmp.eq.f32.partialorder %v5154_v41, 8.507059e+37 }
 0x94d   :  { %v5133_v15 = vmul.f32 %v8485_v27, %v5132_v56  ;;  %8496 = vrcp.f32 %v10890_v20  ;;  %v5120_v56 = vadd.f32 %v5089_v8, %v4118_v51  ;;  %vm5188_vm4 = vweird.f32 %v10890_v20 }
 0x94e   :  { %v5171_v35 = vmul.f32 %v8487_v61, %v5170_v23  ;;  %8498 = vpow2.f32 %v7661_v24  ;;  %vm5213_vm10 = vweird.f32 %v10885_v53 }
 0x94f   :  { %v5134_v12 = vadd.f32 %v8485_v27, %v5133_v15  ;;  %8500 = vtanh.f32 %v5120_v56 }
 0x950   :  { %v5172_v50 = vadd.f32 %v8487_v61, %v5171_v35  ;;  %v8493_v21 = vpop.eup %8492 }
 0x951   :  { %v5138_v11 = vsel %vm5137_vm13, %v8485_v27, %v5134_v12  ;;  %v10896_v23 = vpop.eup %8494  ;;  %v5146_v15 = vmul.f32 %v8493_v21, %v10887_v58  ;;  %vm5151_vm1 = vweird.f32 %v8493_v21  ;;  %v5192_v12 = vand.u32 2147483647, %v10890_v20 }
 0x952   :  { %v5143_v54 = vsel %vm5140_vm15, %v5142_v60, %v5138_v11  ;;  %v5176_v38 = vsel %vm5175_vm14, %v8487_v61, %v5172_v50  ;;  %v5209_v27 = vmul.f32 %v10896_v23, %v10885_v53  ;;  %vm5152_vm5 = vmor %vm5150_vm2, %vm5151_vm1  ;;  %vm5214_vm9 = vweird.f32 %v10896_v23 }
 0x953   :  { %v8497_v49 = vpop.eup %8496  ;;  %v5181_v24 = vsel %vm5178_vm0, %v5180_v40, %v5176_v38  ;;  %v5240_v62 = vmul.f32 %v8491_v59, %v5143_v54  ;;  %v5147_v2 = vsub.f32 1.0, %v5146_v15  ;;  %v5194_v38 = vand.u32 2147483648, %v10890_v20  ;;  %vm5215_vm12 = vmor %vm5213_vm10, %vm5214_vm9 }
 0x954   :  { %v5238_v7 = vmul.f32 %v5181_v24, %v10821_v30  ;;  %v5184_v35 = vmul.f32 %v8497_v49, %v10890_v20  ;;  %v8499_v63 = vpop.eup %8498  ;;  %vm5189_vm3 = vweird.f32 %v8497_v49  ;;  %v5157_v59 = vor.u32 1.1754944e-38, %v5156_v4 }
 0x955   :  { %v5148_v8 = vmul.f32 %v8493_v21, %v5147_v2  ;;  %v5207_v30 = vadd.f32 1.0, %v8499_v63  ;;  %v5210_v60 = vsub.f32 1.0, %v5209_v27  ;;  %v8501_v11 = vpop.eup %8500  ;;  %vm5190_vm7 = vmor %vm5188_vm4, %vm5189_vm3  ;;  %v5195_v56 = vor.u32 1.1754944e-38, %v5194_v38 }
 0x956   :  { %v10905_v61 = vadd.f32 %v5240_v62, %v5238_v7  ;;  %v5185_v44 = vsub.f32 1.0, %v5184_v35  ;;  %vm5193_vm8 = vcmp.eq.f32.partialorder %v5192_v12, 8.507059e+37  ;;  %v5219_v27 = vand.u32 2147483648, %v10885_v53 }
 0x957   :  { %v5149_v51 = vadd.f32 %v8493_v21, %v5148_v8  ;;  %8502 = vrcp.f32 %v5207_v30  ;;  %v5211_v62 = vmul.f32 %v10896_v23, %v5210_v60  ;;  %v5234_v41 = vand.u32 2147483648, %v5207_v30 }
 0x958   :  { %v5186_v54 = vmul.f32 %v8497_v49, %v5185_v44  ;;  %8504 = vtanh.f32 %v10905_v61  ;;  %v5232_v44 = vand.u32 2147483647, %v5207_v30  ;;  %vm5228_vm13 = vweird.f32 %v5207_v30 }
 0x959   :  { %v5153_v50 = vsel %vm5152_vm5, %v8493_v21, %v5149_v51  ;;  %v5212_v21 = vadd.f32 %v10896_v23, %v5211_v62  ;;  %v5220_v51 = vor.u32 1.1754944e-38, %v5219_v27  ;;  %v5235_v12 = vor.u32 1.1754944e-38, %v5234_v41  ;;  %v11495_v27 = vld [vmem:[#allocation44_spill] sm:$0xff] }
 0x95a   :  { %v5187_v40 = vadd.f32 %v8497_v49, %v5186_v54  ;;  %v5158_v15 = vsel %vm5155_vm6, %v5157_v59, %v5153_v50  ;;  %vm5233_vm0 = vcmp.eq.f32.partialorder %v5232_v44, 8.507059e+37  ;;  %v11497_v44 = vld [vmem:[#allocation47_spill] sm:$0xff] }
 0x95b   :  { %v5241_v63 = vmul.f32 %v8501_v11, %v5158_v15  ;;  %v5216_v38 = vsel %vm5215_vm12, %v10896_v23, %v5212_v21  ;;  %v11491_v23 = vld [vmem:[#allocation45_spill] sm:$0xff]  ;;  %v11492_v15 = vld [vmem:[#allocation75_spill] sm:$0xff] }
 0x95c   :  { %v5191_v58 = vsel %vm5190_vm7, %v8497_v49, %v5187_v40 }
 0x95d   :  { %v5196_v24 = vsel %vm5193_vm8, %v5195_v56, %v5191_v58  ;;  %v8503_v20 = vpop.eup %8502  ;;  %v11493_v58 = vld [vmem:[#allocation24_spill] sm:$0xff] }
 0x95e   :  { %v5239_v7 = vmul.f32 %v5196_v24, %v10829_v32  ;;  %v5224_v35 = vmul.f32 %v8503_v20, %v5207_v30  ;;  %v5217_v32 = vand.u32 2147483647, %v10885_v53  ;;  %vm5229_vm11 = vweird.f32 %v8503_v20  ;;  %v8505_v54 = vpop.eup %8504 }
 0x95f   :  { %vm5230_vm14 = vmor %vm5228_vm13, %vm5229_vm11  ;;  %v4023_v30 = vadd.f32 %v11491_v23, %v10606_v10 }
 0x960   :  { %v10913_v2 = vadd.f32 %v5241_v63, %v5239_v7  ;;  %v5225_v49 = vsub.f32 1.0, %v5224_v35  ;;  %vm5218_vm15 = vcmp.eq.f32.partialorder %v5217_v32, 8.507059e+37  ;;  %v4072_v63 = vadd.f32 %v11493_v58, %v11492_v15  ;;  %v11496_v32 = vld [vmem:[#allocation48_spill] sm:$0xff] }
 0x961   :  { %v5221_v50 = vsel %vm5218_vm15, %v5220_v51, %v5216_v38 }
 0x962   :  { %8506 = vtanh.f32 %v10913_v2  ;;  %v5226_v4 = vmul.f32 %v8503_v20, %v5225_v49  ;;  %v5246_v11 = vmul.f32 %v8505_v54, %v5221_v50  ;;  %v11494_v49 = vld [vmem:[#allocation78_spill] sm:$0xff] }
 0x963   :  { %v4170_v41 = vadd.f32 %v11495_v27, %v11494_v49 }
 0x964   :  { %v5227_v8 = vadd.f32 %v8503_v20, %v5226_v4  ;;  %v4025_v4 = vadd.f32 %v11496_v32, %v10606_v10 }
 0x966   :  { %v5231_v60 = vsel %vm5230_vm14, %v8503_v20, %v5227_v8  ;;  %v4074_v8 = vadd.f32 %v11497_v44, %v11492_v15 }
 0x967   :  { %v5236_v40 = vsel %vm5233_vm0, %v5235_v12, %v5231_v60 }
 0x968   :  { %v8507_v59 = vpop.eup %8506 }
 0x969   :  { %v5247_v53 = vmul.f32 %v8507_v59, %v5236_v40 }
 0x96b   :  { %v5248_v56 = vpack.c.bf16 %v5247_v53, %v5246_v11 }
 0x96d   :  { %5257 = vmatmul.bf16.vlgmr.msra.gmra.mxu0 %v5248_v56  ;;  %5271 = vmatmul.bf16.vlgmr.msrb.gmra.mxu1 %v5248_v56 }
 0x96e   :  { %5285 = vmatmul.bf16.vlgmr.msra.gmra.mxu2 %v5248_v56  ;;  %5299 = vmatmul.bf16.vlgmr.msra.gmra.mxu3 %v5248_v56 }
 0x96f   :  { %5647 = vmatpush.bf16.msra.mxu0 %v10210_v55  ;;  %5661 = vmatpush.bf16.msrb.mxu1 %v10212_v48 }
 0x970   :  { %5675 = vmatpush.bf16.msra.mxu2 %v10218_v42  ;;  %5689 = vmatpush.bf16.msra.mxu3 %v10216_v14 }
 0x973   :  { %5648 = vmatpush.bf16.msra.mxu0 %v10220_v18  ;;  %5662 = vmatpush.bf16.msrb.mxu1 %v10223_v22 }
 0x974   :  { %5676 = vmatpush.bf16.msra.mxu2 %v10230_v39  ;;  %5690 = vmatpush.bf16.msra.mxu3 %v10228_v36 }
 0x977   :  { %5649 = vmatpush.bf16.msra.mxu0 %v10232_v37  ;;  %5663 = vmatpush.bf16.msrb.mxu1 %v10235_v33 }
 0x978   :  { %5677 = vmatpush.bf16.msra.mxu2 %v10242_v25  ;;  %5691 = vmatpush.bf16.msra.mxu3 %v10240_v26 }
 0x97b   :  { %5650 = vmatpush.bf16.msra.mxu0 %v10246_v52  ;;  %5664 = vmatpush.bf16.msrb.mxu1 %v10248_v31 }
 0x97c   :  { %5678 = vmatpush.bf16.msra.mxu2 %v10303_v43  ;;  %5692 = vmatpush.bf16.msra.mxu3 %v10250_v9 }
 0x97f   :  { %5651 = vmatpush.bf16.msra.mxu0 %v10305_v6  ;;  %5665 = vmatpush.bf16.msrb.mxu1 %v10318_v17 }
 0x980   :  { %5679 = vmatpush.bf16.msra.mxu2 %v10363_v45  ;;  %5693 = vmatpush.bf16.msra.mxu3 %v10332_v0 }
 0x983   :  { %5652 = vmatpush.bf16.msra.mxu0 %v10372_v1  ;;  %5666 = vmatpush.bf16.msrb.mxu1 %v10374_v16 }
 0x984   :  { %5680 = vmatpush.bf16.msra.mxu2 %v10385_v47  ;;  %5694 = vmatpush.bf16.msra.mxu3 %v10376_v29 }
 0x987   :  { %5653 = vmatpush.bf16.msra.mxu0 %v10387_v34  ;;  %5667 = vmatpush.bf16.msrb.mxu1 %v10390_v28 }
 0x988   :  { %5681 = vmatpush.bf16.msra.mxu2 %v10395_v5  ;;  %5695 = vmatpush.bf16.msra.mxu3 %v10393_v3 }
 0x98b   :  { %5654 = vmatpush.bf16.msra.mxu0 %v10398_v46  ;;  %5668 = vmatpush.bf16.msrb.mxu1 %v10403_v57 }
 0x98c   :  { %5682 = vmatpush.bf16.msra.mxu2 %v10409_v13  ;;  %5696 = vmatpush.bf16.msra.mxu3 %v10405_v19 }
 0x9ea   :  { %v5258_v24 = vpop.f32.mrf.mxu0  ;;  %v5272_v62 = vpop.f32.mrf.mxu1 }
 0x9eb   :  { %v5313_v7 = vadd.f32 %v5258_v24, %v4023_v30  ;;  %v5314_v20 = vadd.f32 %v5272_v62, %v4072_v63  ;;  %v11498_v63 = vld [vmem:[#allocation80_spill] sm:$0xff]  ;;  %v11499_v24 = vld [vmem:[#allocation51_spill] sm:$0xff] }
 0x9ec   :  { %v4121_v62 = vadd.f32 %v11499_v24, %v11498_v63 }
 0x9ed   :  { %v7662_v35 = vmul.f32 -1.442695, %v5313_v7  ;;  %v7664_v21 = vmul.f32 -1.442695, %v5314_v20  ;;  %v11500_v20 = vld [vmem:[#allocation52_spill] sm:$0xff] }
 0x9ef   :  { %8508 = vpow2.f32 %v7662_v35  ;;  %v4172_v35 = vadd.f32 %v11500_v20, %v11494_v49  ;;  %v11501_v20 = vld [vmem:[#allocation55_spill] sm:$0xff] }
 0x9f0   :  { %8510 = vpow2.f32 %v7664_v21 }
 0x9f1   :  { %v5300_v38 = vpop.f32.mrf.mxu3  ;;  %v5286_v58 = vpop.f32.mrf.mxu2 }
 0x9f2   :  { %v5316_v54 = vadd.f32 %v5300_v38, %v4170_v41  ;;  %v5260_v51 = vpop.f32.mrf.mxu0  ;;  %v5274_v12 = vpop.f32.mrf.mxu1  ;;  %v5315_v27 = vadd.f32 %v5286_v58, %v4121_v62 }
 0x9f3   :  { %v5317_v59 = vadd.f32 %v5260_v51, %v4025_v4  ;;  %v5318_v60 = vadd.f32 %v5274_v12, %v4074_v8 }
 0x9f4   :  { %v7666_v50 = vmul.f32 -1.442695, %v5316_v54 }
 0x9f5   :  { %v8509_v40 = vpop.eup %8508  ;;  %v7663_v11 = vmul.f32 -1.442695, %v5317_v59  ;;  %v7665_v23 = vmul.f32 -1.442695, %v5318_v60 }
 0x9f6   :  { %v8511_v53 = vpop.eup %8510  ;;  %v5327_v56 = vadd.f32 1.0, %v8509_v40  ;;  %8512 = vpow2.f32 %v7666_v50 }
 0x9f7   :  { %v5365_v30 = vadd.f32 1.0, %v8511_v53  ;;  %8514 = vpow2.f32 %v7663_v11 }
 0x9f8   :  { %8516 = vrcp.f32 %v5327_v56  ;;  %v5338_v11 = vand.u32 2147483647, %v5327_v56  ;;  %v5340_v53 = vand.u32 2147483648, %v5327_v56  ;;  %vm5334_vm3 = vweird.f32 %v5327_v56 }
 0x9f9   :  { %8518 = vrcp.f32 %v5365_v30  ;;  %v5302_v7 = vpop.f32.mrf.mxu3  ;;  %v5376_v62 = vand.u32 2147483647, %v5365_v30  ;;  %vm5372_vm4 = vweird.f32 %v5365_v30 }
 0x9fa   :  { %8520 = vpow2.f32 %v7665_v23  ;;  %v5320_v32 = vadd.f32 %v5302_v7, %v4172_v35  ;;  %v5378_v23 = vand.u32 2147483648, %v5365_v30  ;;  %v5288_v7 = vpop.f32.mrf.mxu2  ;;  %v4123_v35 = vadd.f32 %v11501_v20, %v11498_v63 }
 0x9fb   :  { %8522 = vtanh.f32 %v5315_v27  ;;  %vm5339_vm7 = vcmp.eq.f32.partialorder %v5338_v11, 8.507059e+37  ;;  %vm5377_vm8 = vcmp.eq.f32.partialorder %v5376_v62, 8.507059e+37 }
 0x9fc   :  { %v8513_v21 = vpop.eup %8512  ;;  %v7667_v50 = vmul.f32 -1.442695, %v5320_v32 }
 0x9fd   :  { %v8515_v41 = vpop.eup %8514  ;;  %v10969_v44 = vadd.f32 1.0, %v8513_v21 }
 0x9fe   :  { %v8517_v4 = vpop.eup %8516  ;;  %v10971_v8 = vadd.f32 1.0, %v8515_v41  ;;  %v5341_v41 = vor.u32 1.1754944e-38, %v5340_v53 }
 0x9ff   :  { %v8519_v38 = vpop.eup %8518  ;;  %v5330_v54 = vmul.f32 %v8517_v4, %v5327_v56  ;;  %vm5335_vm1 = vweird.f32 %v8517_v4 }
 0xa00   :  { %v8521_v51 = vpop.eup %8520  ;;  %v5368_v12 = vmul.f32 %v8519_v38, %v5365_v30  ;;  %8524 = vrcp.f32 %v10971_v8  ;;  %vm5373_vm2 = vweird.f32 %v8519_v38  ;;  %vm5336_vm5 = vmor %vm5334_vm3, %vm5335_vm1  ;;  %v5353_v11 = vand.u32 2147483647, %v10971_v8 }
 0xa01   :  { %v5331_v59 = vsub.f32 1.0, %v5330_v54  ;;  %v10974_v60 = vadd.f32 1.0, %v8521_v51  ;;  %8526 = vrcp.f32 %v10969_v44  ;;  %v8523_v27 = vpop.eup %8522  ;;  %vm5374_vm6 = vmor %vm5372_vm4, %vm5373_vm2  ;;  %v5379_v51 = vor.u32 1.1754944e-38, %v5378_v23 }
 0xa02   :  { %v5369_v40 = vsub.f32 1.0, %v5368_v12  ;;  %v5355_v23 = vand.u32 2147483648, %v10971_v8  ;;  %vm5349_vm10 = vweird.f32 %v10971_v8  ;;  %vm5354_vm14 = vcmp.eq.f32.partialorder %v5353_v11, 8.507059e+37 }
 0xa03   :  { %v5332_v58 = vmul.f32 %v8517_v4, %v5331_v59  ;;  %8528 = vrcp.f32 %v10974_v60  ;;  %v5319_v59 = vadd.f32 %v5288_v7, %v4123_v35  ;;  %vm5387_vm12 = vweird.f32 %v10974_v60 }
 0xa04   :  { %v5370_v24 = vmul.f32 %v8519_v38, %v5369_v40  ;;  %8530 = vpow2.f32 %v7667_v50  ;;  %vm5412_vm2 = vweird.f32 %v10969_v44 }
 0xa05   :  { %v5333_v21 = vadd.f32 %v8517_v4, %v5332_v58  ;;  %8532 = vtanh.f32 %v5319_v59 }
 0xa06   :  { %v5371_v32 = vadd.f32 %v8519_v38, %v5370_v24  ;;  %v8525_v54 = vpop.eup %8524 }
 0xa07   :  { %v5337_v12 = vsel %vm5336_vm5, %v8517_v4, %v5333_v21  ;;  %v10980_v40 = vpop.eup %8526  ;;  %v5345_v58 = vmul.f32 %v8525_v54, %v10971_v8  ;;  %vm5350_vm9 = vweird.f32 %v8525_v54  ;;  %v5391_v21 = vand.u32 2147483647, %v10974_v60 }
 0xa08   :  { %v5342_v49 = vsel %vm5339_vm7, %v5341_v41, %v5337_v12  ;;  %v5375_v15 = vsel %vm5374_vm6, %v8519_v38, %v5371_v32  ;;  %v5408_v4 = vmul.f32 %v10980_v40, %v10969_v44  ;;  %vm5351_vm13 = vmor %vm5349_vm10, %vm5350_vm9  ;;  %vm5413_vm1 = vweird.f32 %v10980_v40 }
 0xa09   :  { %v8529_v56 = vpop.eup %8528  ;;  %v5380_v50 = vsel %vm5377_vm8, %v5379_v51, %v5375_v15  ;;  %v5439_v20 = vmul.f32 %v8523_v27, %v5342_v49  ;;  %v5346_v53 = vsub.f32 1.0, %v5345_v58  ;;  %v5393_v15 = vand.u32 2147483648, %v10974_v60  ;;  %vm5414_vm4 = vmor %vm5412_vm2, %vm5413_vm1 }
 0xa0a   :  { %v5437_v30 = vmul.f32 %v5380_v50, %v10905_v61  ;;  %v5383_v24 = vmul.f32 %v8529_v56, %v10974_v60  ;;  %v8531_v63 = vpop.eup %8530  ;;  %vm5388_vm11 = vweird.f32 %v8529_v56  ;;  %v5356_v27 = vor.u32 1.1754944e-38, %v5355_v23 }
 0xa0b   :  { %v5347_v7 = vmul.f32 %v8525_v54, %v5346_v53  ;;  %v5406_v61 = vadd.f32 1.0, %v8531_v63  ;;  %v5409_v41 = vsub.f32 1.0, %v5408_v4  ;;  %v8533_v12 = vpop.eup %8532  ;;  %vm5389_vm15 = vmor %vm5387_vm12, %vm5388_vm11  ;;  %v5394_v59 = vor.u32 1.1754944e-38, %v5393_v15 }
 0xa0c   :  { %v10989_v38 = vadd.f32 %v5439_v20, %v5437_v30  ;;  %v5384_v62 = vsub.f32 1.0, %v5383_v24  ;;  %vm5392_vm0 = vcmp.eq.f32.partialorder %v5391_v21, 8.507059e+37  ;;  %v5418_v4 = vand.u32 2147483648, %v10969_v44 }
 0xa0d   :  { %v5348_v35 = vadd.f32 %v8525_v54, %v5347_v7  ;;  %8534 = vrcp.f32 %v5406_v61  ;;  %v5410_v20 = vmul.f32 %v10980_v40, %v5409_v41  ;;  %v5433_v11 = vand.u32 2147483648, %v5406_v61 }
 0xa0e   :  { %v5385_v49 = vmul.f32 %v8529_v56, %v5384_v62  ;;  %8536 = vtanh.f32 %v10989_v38  ;;  %v5431_v62 = vand.u32 2147483647, %v5406_v61  ;;  %vm5427_vm5 = vweird.f32 %v5406_v61 }
 0xa0f   :  { %v5352_v32 = vsel %vm5351_vm13, %v8525_v54, %v5348_v35  ;;  %v5411_v54 = vadd.f32 %v10980_v40, %v5410_v20  ;;  %v5419_v35 = vor.u32 1.1754944e-38, %v5418_v4  ;;  %v5434_v21 = vor.u32 1.1754944e-38, %v5433_v11 }
 0xa10   :  { %v5386_v51 = vadd.f32 %v8529_v56, %v5385_v49  ;;  %v5357_v58 = vsel %vm5354_vm14, %v5356_v27, %v5352_v32  ;;  %vm5432_vm8 = vcmp.eq.f32.partialorder %v5431_v62, 8.507059e+37 }
 0xa11   :  { %v5440_v63 = vmul.f32 %v8533_v12, %v5357_v58  ;;  %v5415_v15 = vsel %vm5414_vm4, %v10980_v40, %v5411_v54  ;;  %v11509_v40 = vld [vmem:[#allocation80_spill] sm:$0xff] }
 0xa12   :  { %v5390_v8 = vsel %vm5389_vm15, %v8529_v56, %v5386_v51 }
 0xa13   :  { %v5395_v50 = vsel %vm5392_vm0, %v5394_v59, %v5390_v8  ;;  %v8535_v60 = vpop.eup %8534 }
 0xa14   :  { %v5438_v30 = vmul.f32 %v5395_v50, %v10913_v2  ;;  %v5423_v24 = vmul.f32 %v8535_v60, %v5406_v61  ;;  %v5416_v2 = vand.u32 2147483647, %v10969_v44  ;;  %vm5428_vm3 = vweird.f32 %v8535_v60  ;;  %v8537_v49 = vpop.eup %8536  ;;  %v11510_v61 = vld [vmem:[#allocation59_spill] sm:$0xff] }
 0xa15   :  { %vm5429_vm6 = vmor %vm5427_vm5, %vm5428_vm3  ;;  %v4126_v58 = vadd.f32 %v11510_v61, %v11509_v40 }
 0xa16   :  { %v10997_v53 = vadd.f32 %v5440_v63, %v5438_v30  ;;  %v5424_v56 = vsub.f32 1.0, %v5423_v24  ;;  %vm5417_vm7 = vcmp.eq.f32.partialorder %v5416_v2, 8.507059e+37  ;;  %v11511_v63 = vld [vmem:[#allocation60_spill] sm:$0xff] }
 0xa17   :  { %v5420_v32 = vsel %vm5417_vm7, %v5419_v35, %v5415_v15 }
 0xa18   :  { %8538 = vtanh.f32 %v10997_v53  ;;  %v5425_v23 = vmul.f32 %v8535_v60, %v5424_v56  ;;  %v5445_v12 = vmul.f32 %v8537_v49, %v5420_v32 }
 0xa1a   :  { %v5426_v7 = vadd.f32 %v8535_v60, %v5425_v23 }
 0xa1c   :  { %v5430_v41 = vsel %vm5429_vm6, %v8535_v60, %v5426_v7 }
 0xa1d   :  { %v5435_v51 = vsel %vm5432_vm8, %v5434_v21, %v5430_v41 }
 0xa1e   :  { %v8539_v27 = vpop.eup %8538 }
 0xa1f   :  { %v5446_v44 = vmul.f32 %v8539_v27, %v5435_v51 }
 0xa21   :  { %v5447_v59 = vpack.c.bf16 %v5446_v44, %v5445_v12 }
 0xa23   :  { %5456 = vmatmul.bf16.vlgmr.msrb.gmra.mxu0 %v5447_v59  ;;  %5470 = vmatmul.bf16.vlgmr.msra.gmra.mxu1 %v5447_v59 }
 0xa24   :  { %5484 = vmatmul.bf16.vlgmr.msrb.gmra.mxu2 %v5447_v59  ;;  %5498 = vmatmul.bf16.vlgmr.msrb.gmra.mxu3 %v5447_v59  ;;  %v11512_v59 = vld [vmem:[#allocation63_spill] sm:$0xff] }
 0xa25   :  { %5846 = vmatpush.bf16.msrb.mxu0 %v10210_v55  ;;  %5860 = vmatpush.bf16.msra.mxu1 %v10212_v48  ;;  %v11502_v55 = vld [vmem:[#allocation53_spill] sm:$0xff] }
 0xa26   :  { %5874 = vmatpush.bf16.msrb.mxu2 %v10218_v42  ;;  %5888 = vmatpush.bf16.msrb.mxu3 %v10216_v14  ;;  %v4028_v48 = vadd.f32 %v11502_v55, %v10606_v10  ;;  %v11503_v14 = vld [vmem:[#allocation75_spill] sm:$0xff]  ;;  %v11504_v42 = vld [vmem:[#allocation54_spill] sm:$0xff]  ;;  %v4128_v55 = vadd.f32 %v11512_v59, %v11509_v40 }
 0xa29   :  { %5847 = vmatpush.bf16.msrb.mxu0 %v10220_v18  ;;  %5861 = vmatpush.bf16.msra.mxu1 %v10223_v22  ;;  %v4077_v18 = vadd.f32 %v11504_v42, %v11503_v14 }
 0xa2a   :  { %5875 = vmatpush.bf16.msrb.mxu2 %v10230_v39  ;;  %5889 = vmatpush.bf16.msrb.mxu3 %v10228_v36 }
 0xa2d   :  { %5848 = vmatpush.bf16.msrb.mxu0 %v10232_v37  ;;  %5862 = vmatpush.bf16.msra.mxu1 %v10235_v33 }
 0xa2e   :  { %5876 = vmatpush.bf16.msrb.mxu2 %v10242_v25  ;;  %5890 = vmatpush.bf16.msrb.mxu3 %v10240_v26  ;;  %v11505_v25 = vld [vmem:[#allocation78_spill] sm:$0xff] }
 0xa2f   :  { %v4177_v50 = vadd.f32 %v11511_v63, %v11505_v25 }
 0xa31   :  { %5849 = vmatpush.bf16.msrb.mxu0 %v10246_v52  ;;  %5863 = vmatpush.bf16.msra.mxu1 %v10248_v31  ;;  %v11506_v52 = vld [vmem:[#allocation56_spill] sm:$0xff] }
 0xa32   :  { %5877 = vmatpush.bf16.msrb.mxu2 %v10303_v43  ;;  %5891 = vmatpush.bf16.msrb.mxu3 %v10250_v9  ;;  %v4175_v31 = vadd.f32 %v11506_v52, %v11505_v25  ;;  %v11507_v9 = vld [vmem:[#allocation57_spill] sm:$0xff] }
 0xa33   :  { %v4030_v43 = vadd.f32 %v11507_v9, %v10606_v10 }
 0xa35   :  { %5850 = vmatpush.bf16.msrb.mxu0 %v10305_v6  ;;  %5864 = vmatpush.bf16.msra.mxu1 %v10318_v17  ;;  %v11508_v6 = vld [vmem:[#allocation58_spill] sm:$0xff] }
 0xa36   :  { %5878 = vmatpush.bf16.msrb.mxu2 %v10363_v45  ;;  %5892 = vmatpush.bf16.msrb.mxu3 %v10332_v0  ;;  %v4079_v17 = vadd.f32 %v11508_v6, %v11503_v14 }
 0xa39   :  { %5851 = vmatpush.bf16.msrb.mxu0 %v10372_v1  ;;  %5865 = vmatpush.bf16.msra.mxu1 %v10374_v16 }
 0xa3a   :  { %5879 = vmatpush.bf16.msrb.mxu2 %v10385_v47  ;;  %5893 = vmatpush.bf16.msrb.mxu3 %v10376_v29 }
 0xa3d   :  { %5852 = vmatpush.bf16.msrb.mxu0 %v10387_v34  ;;  %5866 = vmatpush.bf16.msra.mxu1 %v10390_v28 }
 0xa3e   :  { %5880 = vmatpush.bf16.msrb.mxu2 %v10395_v5  ;;  %5894 = vmatpush.bf16.msrb.mxu3 %v10393_v3 }
 0xa41   :  { %5853 = vmatpush.bf16.msrb.mxu0 %v10398_v46  ;;  %5867 = vmatpush.bf16.msra.mxu1 %v10403_v57 }
 0xa42   :  { %5881 = vmatpush.bf16.msrb.mxu2 %v10409_v13  ;;  %5895 = vmatpush.bf16.msrb.mxu3 %v10405_v19 }
 0xaa0   :  { %v5457_v22 = vpop.f32.mrf.mxu0  ;;  %v5471_v36 = vpop.f32.mrf.mxu1 }
 0xaa1   :  { %v5512_v39 = vadd.f32 %v5457_v22, %v4028_v48  ;;  %v5513_v37 = vadd.f32 %v5471_v36, %v4077_v18 }
 0xaa3   :  { %v7668_v33 = vmul.f32 -1.442695, %v5512_v39  ;;  %v7670_v26 = vmul.f32 -1.442695, %v5513_v37 }
 0xaa5   :  { %8540 = vpow2.f32 %v7668_v33 }
 0xaa6   :  { %8542 = vpow2.f32 %v7670_v26 }
 0xaa7   :  { %v5499_v0 = vpop.f32.mrf.mxu3  ;;  %v5485_v13 = vpop.f32.mrf.mxu2 }
 0xaa8   :  { %v5515_v45 = vadd.f32 %v5499_v0, %v4175_v31  ;;  %v5459_v1 = vpop.f32.mrf.mxu0  ;;  %v5473_v16 = vpop.f32.mrf.mxu1  ;;  %v5514_v30 = vadd.f32 %v5485_v13, %v4126_v58 }
 0xaa9   :  { %v5516_v29 = vadd.f32 %v5459_v1, %v4030_v43  ;;  %v5517_v47 = vadd.f32 %v5473_v16, %v4079_v17 }
 0xaaa   :  { %v7672_v34 = vmul.f32 -1.442695, %v5515_v45 }
 0xaab   :  { %v8541_v28 = vpop.eup %8540  ;;  %v7669_v3 = vmul.f32 -1.442695, %v5516_v29  ;;  %v7671_v57 = vmul.f32 -1.442695, %v5517_v47 }
 0xaac   :  { %v8543_v5 = vpop.eup %8542  ;;  %v5526_v46 = vadd.f32 1.0, %v8541_v28  ;;  %8544 = vpow2.f32 %v7672_v34 }
 0xaad   :  { %v5564_v19 = vadd.f32 1.0, %v8543_v5  ;;  %8546 = vpow2.f32 %v7669_v3 }
 0xaae   :  { %8548 = vrcp.f32 %v5526_v46  ;;  %v5537_v21 = vand.u32 2147483647, %v5526_v46  ;;  %v5539_v27 = vand.u32 2147483648, %v5526_v46  ;;  %vm5533_vm11 = vweird.f32 %v5526_v46 }
 0xaaf   :  { %8550 = vrcp.f32 %v5564_v19  ;;  %v5501_v8 = vpop.f32.mrf.mxu3  ;;  %v5577_v41 = vand.u32 2147483648, %v5564_v19  ;;  %v5575_v12 = vand.u32 2147483647, %v5564_v19  ;;  %v5487_v44 = vpop.f32.mrf.mxu2  ;;  %vm5571_vm12 = vweird.f32 %v5564_v19 }
 0xab0   :  { %8552 = vpow2.f32 %v7671_v57  ;;  %v5519_v24 = vadd.f32 %v5501_v8, %v4177_v50  ;;  %v5540_v18 = vor.u32 1.1754944e-38, %v5539_v27  ;;  %vm5538_vm15 = vcmp.eq.f32.partialorder %v5537_v21, 8.507059e+37 }
 0xab1   :  { %8554 = vtanh.f32 %v5514_v30  ;;  %v5578_v39 = vor.u32 1.1754944e-38, %v5577_v41  ;;  %v5518_v33 = vadd.f32 %v5487_v44, %v4128_v55  ;;  %vm5576_vm0 = vcmp.eq.f32.partialorder %v5575_v12, 8.507059e+37 }
 0xab2   :  { %v8545_v20 = vpop.eup %8544  ;;  %v7673_v49 = vmul.f32 -1.442695, %v5519_v24 }
 0xab3   :  { %v8547_v60 = vpop.eup %8546  ;;  %v11053_v56 = vadd.f32 1.0, %v8545_v20 }
 0xab4   :  { %v8549_v54 = vpop.eup %8548  ;;  %v11055_v4 = vadd.f32 1.0, %v8547_v60 }
 0xab5   :  { %v8551_v11 = vpop.eup %8550  ;;  %v5529_v2 = vmul.f32 %v8549_v54, %v5526_v46  ;;  %vm5534_vm9 = vweird.f32 %v8549_v54 }
 0xab6   :  { %v8553_v23 = vpop.eup %8552  ;;  %v5567_v62 = vmul.f32 %v8551_v11, %v5564_v19  ;;  %8556 = vrcp.f32 %v11055_v4  ;;  %vm5572_vm10 = vweird.f32 %v8551_v11  ;;  %vm5535_vm13 = vmor %vm5533_vm11, %vm5534_vm9  ;;  %v5552_v47 = vand.u32 2147483647, %v11055_v4 }
 0xab7   :  { %v5530_v7 = vsub.f32 1.0, %v5529_v2  ;;  %v11058_v15 = vadd.f32 1.0, %v8553_v23  ;;  %8558 = vrcp.f32 %v11053_v56  ;;  %v8555_v42 = vpop.eup %8554  ;;  %vm5573_vm14 = vmor %vm5571_vm12, %vm5572_vm10  ;;  %v5554_v34 = vand.u32 2147483648, %v11055_v4 }
 0xab8   :  { %v5568_v35 = vsub.f32 1.0, %v5567_v62  ;;  %vm5548_vm2 = vweird.f32 %v11055_v4  ;;  %vm5553_vm6 = vcmp.eq.f32.partialorder %v5552_v47, 8.507059e+37  ;;  %vm5611_vm10 = vweird.f32 %v11053_v56 }
 0xab9   :  { %v5531_v32 = vmul.f32 %v8549_v54, %v5530_v7  ;;  %8560 = vrcp.f32 %v11058_v15  ;;  %v5592_v46 = vand.u32 2147483648, %v11058_v15  ;;  %v5590_v13 = vand.u32 2147483647, %v11058_v15 }
 0xaba   :  { %v5569_v51 = vmul.f32 %v8551_v11, %v5568_v35  ;;  %8562 = vpow2.f32 %v7673_v49  ;;  %vm5586_vm4 = vweird.f32 %v11058_v15  ;;  %v5555_v61 = vor.u32 1.1754944e-38, %v5554_v34 }
 0xabb   :  { %v5532_v48 = vadd.f32 %v8549_v54, %v5531_v32  ;;  %8564 = vtanh.f32 %v5518_v33  ;;  %v5593_v20 = vor.u32 1.1754944e-38, %v5592_v46  ;;  %vm5591_vm8 = vcmp.eq.f32.partialorder %v5590_v13, 8.507059e+37 }
 0xabc   :  { %v5570_v22 = vadd.f32 %v8551_v11, %v5569_v51  ;;  %v8557_v36 = vpop.eup %8556  ;;  %v5617_v49 = vand.u32 2147483648, %v11053_v56 }
 0xabd   :  { %v5536_v37 = vsel %vm5535_vm13, %v8549_v54, %v5532_v48  ;;  %v11064_v26 = vpop.eup %8558  ;;  %v5544_v9 = vmul.f32 %v8557_v36, %v11055_v4  ;;  %vm5549_vm1 = vweird.f32 %v8557_v36 }
 0xabe   :  { %v5541_v52 = vsel %vm5538_vm15, %v5540_v18, %v5536_v37  ;;  %v5574_v31 = vsel %vm5573_vm14, %v8551_v11, %v5570_v22  ;;  %v5607_v29 = vmul.f32 %v11064_v26, %v11053_v56  ;;  %vm5550_vm5 = vmor %vm5548_vm2, %vm5549_vm1  ;;  %vm5612_vm9 = vweird.f32 %v11064_v26  ;;  %v11514_v37 = vld [vmem:[#allocation62_spill] sm:$0xff] }
 0xabf   :  { %v8561_v43 = vpop.eup %8560  ;;  %v5579_v6 = vsel %vm5576_vm0, %v5578_v39, %v5574_v31  ;;  %v5638_v17 = vmul.f32 %v8555_v42, %v5541_v52  ;;  %v5545_v45 = vsub.f32 1.0, %v5544_v9  ;;  %vm5613_vm12 = vmor %vm5611_vm10, %vm5612_vm9  ;;  %v5618_v12 = vor.u32 1.1754944e-38, %v5617_v49 }
 0xac0   :  { %v5636_v0 = vmul.f32 %v5579_v6, %v10989_v38  ;;  %v5582_v1 = vmul.f32 %v8561_v43, %v11058_v15  ;;  %v8563_v16 = vpop.eup %8562  ;;  %vm5587_vm3 = vweird.f32 %v8561_v43  ;;  %v5608_v58 = vsub.f32 1.0, %v5607_v29 }
 0xac1   :  { %v5546_v5 = vmul.f32 %v8557_v36, %v5545_v45  ;;  %v5605_v38 = vadd.f32 1.0, %v8563_v16  ;;  %v8565_v50 = vpop.eup %8564  ;;  %vm5588_vm7 = vmor %vm5586_vm4, %vm5587_vm3  ;;  %v4082_v33 = vadd.f32 %v11514_v37, %v11503_v14  ;;  %v11516_v45 = vld [vmem:[#allocation65_spill] sm:$0xff]  ;;  %v11517_v16 = vld [vmem:[#allocation66_spill] sm:$0xff] }
 0xac2   :  { %v11073_v28 = vadd.f32 %v5638_v17, %v5636_v0  ;;  %v5583_v3 = vsub.f32 1.0, %v5582_v1  ;;  %v5609_v4 = vmul.f32 %v11064_v26, %v5608_v58  ;;  %v11515_v17 = vld [vmem:[#allocation64_spill] sm:$0xff]  ;;  %v4035_v1 = vadd.f32 %v11516_v45, %v10606_v10 }
 0xac3   :  { %v5547_v19 = vadd.f32 %v8557_v36, %v5546_v5  ;;  %8566 = vrcp.f32 %v5605_v38  ;;  %v5632_v35 = vand.u32 2147483648, %v5605_v38  ;;  %v5630_v27 = vand.u32 2147483647, %v5605_v38 }
 0xac4   :  { %v5584_v57 = vmul.f32 %v8561_v43, %v5583_v3  ;;  %8568 = vtanh.f32 %v11073_v28  ;;  %v5610_v7 = vadd.f32 %v11064_v26, %v5609_v4  ;;  %vm5626_vm13 = vweird.f32 %v5605_v38 }
 0xac5   :  { %v5551_v8 = vsel %vm5550_vm5, %v8557_v36, %v5547_v19  ;;  %v5633_v44 = vor.u32 1.1754944e-38, %v5632_v35  ;;  %vm5631_vm0 = vcmp.eq.f32.partialorder %v5630_v27, 8.507059e+37  ;;  %v11513_v36 = vld [vmem:[#allocation61_spill] sm:$0xff]  ;;  %v4180_v0 = vadd.f32 %v11515_v17, %v11505_v25 }
 0xac6   :  { %v5585_v63 = vadd.f32 %v8561_v43, %v5584_v57  ;;  %v5556_v30 = vsel %vm5553_vm6, %v5555_v61, %v5551_v8  ;;  %v5614_v32 = vsel %vm5613_vm12, %v11064_v26, %v5610_v7  ;;  %v4033_v39 = vadd.f32 %v11513_v36, %v10606_v10 }
 0xac7   :  { %v5639_v24 = vmul.f32 %v8565_v50, %v5556_v30  ;;  %v4084_v29 = vadd.f32 %v11517_v16, %v11503_v14 }
 0xac8   :  { %v5589_v60 = vsel %vm5588_vm7, %v8561_v43, %v5585_v63 }
 0xac9   :  { %v5594_v54 = vsel %vm5591_vm8, %v5593_v20, %v5589_v60  ;;  %v8567_v2 = vpop.eup %8566  ;;  %v11518_v20 = vld [vmem:[#allocation67_spill] sm:$0xff] }
 0xaca   :  { %v5637_v11 = vmul.f32 %v5594_v54, %v10997_v53  ;;  %v5622_v62 = vmul.f32 %v8567_v2, %v5605_v38  ;;  %v5615_v53 = vand.u32 2147483647, %v11053_v56  ;;  %vm5627_vm11 = vweird.f32 %v8567_v2  ;;  %v8569_v51 = vpop.eup %8568 }
 0xacb   :  { %vm5628_vm14 = vmor %vm5626_vm13, %vm5627_vm11  ;;  %v4131_v30 = vadd.f32 %v11518_v20, %v11509_v40 }
 0xacc   :  { %v11081_v23 = vadd.f32 %v5639_v24, %v5637_v11  ;;  %v5623_v15 = vsub.f32 1.0, %v5622_v62  ;;  %vm5616_vm15 = vcmp.eq.f32.partialorder %v5615_v53, 8.507059e+37  ;;  %v11519_v24 = vld [vmem:[#allocation68_spill] sm:$0xff] }
 0xacd   :  { %v5619_v48 = vsel %vm5616_vm15, %v5618_v12, %v5614_v32  ;;  %v4182_v54 = vadd.f32 %v11519_v24, %v11505_v25 }
 0xace   :  { %8570 = vtanh.f32 %v11081_v23  ;;  %v5624_v21 = vmul.f32 %v8567_v2, %v5623_v15  ;;  %v5644_v18 = vmul.f32 %v8569_v51, %v5619_v48 }
 0xad0   :  { %v5625_v41 = vadd.f32 %v8567_v2, %v5624_v21 }
 0xad2   :  { %v5629_v55 = vsel %vm5628_vm14, %v8567_v2, %v5625_v41 }
 0xad3   :  { %v5634_v42 = vsel %vm5631_vm0, %v5633_v44, %v5629_v55 }
 0xad4   :  { %v8571_v59 = vpop.eup %8570 }
 0xad5   :  { %v5645_v56 = vmul.f32 %v8571_v59, %v5634_v42 }
 0xad7   :  { %v5646_v22 = vpack.c.bf16 %v5645_v56, %v5644_v18 }
 0xad9   :  { %5655 = vmatmul.bf16.vlgmr.msra.gmra.mxu0 %v5646_v22  ;;  %5669 = vmatmul.bf16.vlgmr.msrb.gmra.mxu1 %v5646_v22 }
 0xada   :  { %5683 = vmatmul.bf16.vlgmr.msra.gmra.mxu2 %v5646_v22  ;;  %5697 = vmatmul.bf16.vlgmr.msra.gmra.mxu3 %v5646_v22  ;;  %v11520_v22 = vld [vmem:[#allocation71_spill] sm:$0xff] }
 0xadb   :  { %v4133_v36 = vadd.f32 %v11520_v22, %v11509_v40 }
 0xb56   :  { %v5656_v26 = vpop.f32.mrf.mxu0  ;;  %v5670_v52 = vpop.f32.mrf.mxu1 }
 0xb57   :  { %v5711_v31 = vadd.f32 %v5656_v26, %v4033_v39  ;;  %v5712_v9 = vadd.f32 %v5670_v52, %v4082_v33 }
 0xb59   :  { %v7674_v43 = vmul.f32 -1.442695, %v5711_v31  ;;  %v7676_v6 = vmul.f32 -1.442695, %v5712_v9 }
 0xb5b   :  { %8572 = vpow2.f32 %v7674_v43 }
 0xb5c   :  { %8574 = vpow2.f32 %v7676_v6 }
 0xb5d   :  { %v5698_v47 = vpop.f32.mrf.mxu3  ;;  %v5684_v50 = vpop.f32.mrf.mxu2 }
 0xb5e   :  { %v5714_v34 = vadd.f32 %v5698_v47, %v4180_v0  ;;  %v5658_v3 = vpop.f32.mrf.mxu0  ;;  %v5672_v5 = vpop.f32.mrf.mxu1  ;;  %v5713_v11 = vadd.f32 %v5684_v50, %v4131_v30 }
 0xb5f   :  { %v5715_v46 = vadd.f32 %v5658_v3, %v4035_v1  ;;  %v5716_v38 = vadd.f32 %v5672_v5, %v4084_v29 }
 0xb60   :  { %v7678_v57 = vmul.f32 -1.442695, %v5714_v34 }
 0xb61   :  { %v8573_v19 = vpop.eup %8572  ;;  %v7675_v13 = vmul.f32 -1.442695, %v5715_v46  ;;  %v7677_v8 = vmul.f32 -1.442695, %v5716_v38 }
 0xb62   :  { %v8575_v61 = vpop.eup %8574  ;;  %v5725_v58 = vadd.f32 1.0, %v8573_v19  ;;  %8576 = vpow2.f32 %v7678_v57 }
 0xb63   :  { %v5763_v63 = vadd.f32 1.0, %v8575_v61  ;;  %8578 = vpow2.f32 %v7675_v13 }
 0xb64   :  { %8580 = vrcp.f32 %v5725_v58  ;;  %v5736_v44 = vand.u32 2147483647, %v5725_v58  ;;  %v5738_v59 = vand.u32 2147483648, %v5725_v58  ;;  %vm5732_vm3 = vweird.f32 %v5725_v58 }
 0xb65   :  { %8582 = vrcp.f32 %v5763_v63  ;;  %v5700_v60 = vpop.f32.mrf.mxu3  ;;  %v5776_v55 = vand.u32 2147483648, %v5763_v63  ;;  %v5774_v18 = vand.u32 2147483647, %v5763_v63  ;;  %v5686_v56 = vpop.f32.mrf.mxu2  ;;  %vm5770_vm4 = vweird.f32 %v5763_v63 }
 0xb66   :  { %8584 = vpow2.f32 %v7677_v8  ;;  %v5718_v62 = vadd.f32 %v5700_v60, %v4182_v54  ;;  %v5739_v33 = vor.u32 1.1754944e-38, %v5738_v59  ;;  %vm5737_vm7 = vcmp.eq.f32.partialorder %v5736_v44, 8.507059e+37 }
 0xb67   :  { %8586 = vtanh.f32 %v5713_v11  ;;  %v5777_v31 = vor.u32 1.1754944e-38, %v5776_v55  ;;  %v5717_v43 = vadd.f32 %v5686_v56, %v4133_v36  ;;  %vm5775_vm8 = vcmp.eq.f32.partialorder %v5774_v18, 8.507059e+37 }
 0xb68   :  { %v8577_v4 = vpop.eup %8576  ;;  %v7679_v51 = vmul.f32 -1.442695, %v5718_v62 }
 0xb69   :  { %v8579_v2 = vpop.eup %8578  ;;  %v11105_v15 = vadd.f32 1.0, %v8577_v4 }
 0xb6a   :  { %v8581_v7 = vpop.eup %8580  ;;  %v11107_v49 = vadd.f32 1.0, %v8579_v2 }
 0xb6b   :  { %v8583_v35 = vpop.eup %8582  ;;  %v5728_v53 = vmul.f32 %v8581_v7, %v5725_v58  ;;  %vm5733_vm1 = vweird.f32 %v8581_v7 }
 0xb6c   :  { %v8585_v21 = vpop.eup %8584  ;;  %v5766_v27 = vmul.f32 %v8583_v35, %v5763_v63  ;;  %8588 = vrcp.f32 %v11107_v49  ;;  %vm5771_vm2 = vweird.f32 %v8583_v35  ;;  %vm5734_vm5 = vmor %vm5732_vm3, %vm5733_vm1  ;;  %v5751_v38 = vand.u32 2147483647, %v11107_v49 }
 0xb6d   :  { %v5729_v41 = vsub.f32 1.0, %v5728_v53  ;;  %v11110_v32 = vadd.f32 1.0, %v8585_v21  ;;  %8590 = vrcp.f32 %v11105_v15  ;;  %v8587_v37 = vpop.eup %8586  ;;  %vm5772_vm6 = vmor %vm5770_vm4, %vm5771_vm2  ;;  %v5753_v57 = vand.u32 2147483648, %v11107_v49 }
 0xb6e   :  { %v5767_v12 = vsub.f32 1.0, %v5766_v27  ;;  %vm5747_vm10 = vweird.f32 %v11107_v49  ;;  %vm5752_vm14 = vcmp.eq.f32.partialorder %v5751_v38, 8.507059e+37  ;;  %vm5810_vm2 = vweird.f32 %v11105_v15 }
 0xb6f   :  { %v5730_v48 = vmul.f32 %v8581_v7, %v5729_v41  ;;  %8592 = vrcp.f32 %v11110_v32  ;;  %v5791_v58 = vand.u32 2147483648, %v11110_v32  ;;  %v5789_v50 = vand.u32 2147483647, %v11110_v32 }
 0xb70   :  { %v5768_v42 = vmul.f32 %v8583_v35, %v5767_v12  ;;  %8594 = vpow2.f32 %v7679_v51  ;;  %vm5785_vm12 = vweird.f32 %v11110_v32  ;;  %v5754_v20 = vor.u32 1.1754944e-38, %v5753_v57  ;;  %v11525_v57 = vld [vmem:[#allocation74_spill] sm:$0xff] }
 0xb71   :  { %v5731_v39 = vadd.f32 %v8581_v7, %v5730_v48  ;;  %8596 = vtanh.f32 %v5717_v43  ;;  %v5792_v4 = vor.u32 1.1754944e-38, %v5791_v58  ;;  %vm5790_vm0 = vcmp.eq.f32.partialorder %v5789_v50, 8.507059e+37  ;;  %v11522_v43 = vld [vmem:[#allocation70_spill] sm:$0xff] }
 0xb72   :  { %v5769_v26 = vadd.f32 %v8583_v35, %v5768_v42  ;;  %v8589_v52 = vpop.eup %8588  ;;  %v5816_v51 = vand.u32 2147483648, %v11105_v15 }
 0xb73   :  { %v5735_v9 = vsel %vm5734_vm5, %v8581_v7, %v5731_v39  ;;  %v11116_v6 = vpop.eup %8590  ;;  %v5743_v45 = vmul.f32 %v8589_v52, %v11107_v49  ;;  %vm5748_vm9 = vweird.f32 %v8589_v52 }
 0xb74   :  { %v5740_v17 = vsel %vm5737_vm7, %v5739_v33, %v5735_v9  ;;  %v5773_v0 = vsel %vm5772_vm6, %v8583_v35, %v5769_v26  ;;  %v5806_v46 = vmul.f32 %v11116_v6, %v11105_v15  ;;  %vm5749_vm13 = vmor %vm5747_vm10, %vm5748_vm9  ;;  %vm5811_vm1 = vweird.f32 %v11116_v6 }
 0xb75   :  { %v8593_v1 = vpop.eup %8592  ;;  %v5778_v16 = vsel %vm5775_vm8, %v5777_v31, %v5773_v0  ;;  %v5837_v29 = vmul.f32 %v8587_v37, %v5740_v17  ;;  %v5744_v34 = vsub.f32 1.0, %v5743_v45  ;;  %vm5812_vm4 = vmor %vm5810_vm2, %vm5811_vm1  ;;  %v5817_v18 = vor.u32 1.1754944e-38, %v5816_v51  ;;  %v11521_v31 = vld [vmem:[#allocation69_spill] sm:$0xff] }
 0xb76   :  { %v5835_v47 = vmul.f32 %v5778_v16, %v11073_v28  ;;  %v5781_v3 = vmul.f32 %v8593_v1, %v11110_v32  ;;  %v8595_v5 = vpop.eup %8594  ;;  %vm5786_vm11 = vweird.f32 %v8593_v1  ;;  %v5807_v30 = vsub.f32 1.0, %v5806_v46  ;;  %v8066_v16 = vld [vmem:[#allocation15 + $0x30] sm:$0xff]  ;;  %v11524_v46 = vld [vmem:[#allocation73_spill] sm:$0xff] }
 0xb77   :  { %v5745_v61 = vmul.f32 %v8589_v52, %v5744_v34  ;;  %v5804_v28 = vadd.f32 1.0, %v8595_v5  ;;  %v8597_v54 = vpop.eup %8596  ;;  %vm5787_vm15 = vmor %vm5785_vm12, %vm5786_vm11  ;;  %v4038_v9 = vadd.f32 %v11521_v31, %v10606_v10  ;;  %v11523_v34 = vld [vmem:[#allocation72_spill] sm:$0xff]  ;;  %v8065_v5 = vld [vmem:[#allocation15 + $0x28] sm:$0xff]  ;;  %v4040_v38 = vadd.f32 %v11524_v46, %v10606_v10 }
 0xb78   :  { %v11125_v19 = vadd.f32 %v5837_v29, %v5835_v47  ;;  %v5782_v13 = vsub.f32 1.0, %v5781_v3  ;;  %v5808_v49 = vmul.f32 %v11116_v6, %v5807_v30  ;;  %v4185_v3 = vadd.f32 %v11523_v34, %v11505_v25  ;;  %v8064_v30 = vld [vmem:[#allocation15 + $0x20] sm:$0xff] }
 0xb79   :  { %v5746_v63 = vadd.f32 %v8589_v52, %v5745_v61  ;;  %8598 = vrcp.f32 %v5804_v28  ;;  %v5831_v12 = vand.u32 2147483648, %v5804_v28  ;;  %v5829_v59 = vand.u32 2147483647, %v5804_v28 }
 0xb7a   :  { %v5783_v8 = vmul.f32 %v8593_v1, %v5782_v13  ;;  %8600 = vtanh.f32 %v11125_v19  ;;  %v5809_v41 = vadd.f32 %v11116_v6, %v5808_v49  ;;  %vm5825_vm5 = vweird.f32 %v5804_v28 }
 0xb7b   :  { %v5750_v60 = vsel %vm5749_vm13, %v8589_v52, %v5746_v63  ;;  %v5832_v56 = vor.u32 1.1754944e-38, %v5831_v12  ;;  %vm5830_vm8 = vcmp.eq.f32.partialorder %v5829_v59, 8.507059e+37  ;;  %v8067_v52 = vld [vmem:[#allocation15 + $0x38] sm:$0xff]  ;;  %v4089_v13 = vadd.f32 %v11525_v57, %v11503_v14 }
 0xb7c   :  { %v5784_v24 = vadd.f32 %v8593_v1, %v5783_v8  ;;  %v5755_v11 = vsel %vm5752_vm14, %v5754_v20, %v5750_v60  ;;  %v5813_v48 = vsel %vm5812_vm4, %v11116_v6, %v5809_v41  ;;  %v4087_v6 = vadd.f32 %v11522_v43, %v11503_v14  ;;  %6122 = vmatpush.bf16.msra.mxu0 %v8067_v52 }
 0xb7d   :  { %v5838_v62 = vmul.f32 %v8597_v54, %v5755_v11 }
 0xb7e   :  { %v5788_v2 = vsel %vm5787_vm15, %v8593_v1, %v5784_v24 }
 0xb7f   :  { %v5793_v7 = vsel %vm5790_vm0, %v5792_v4, %v5788_v2  ;;  %v8599_v53 = vpop.eup %8598  ;;  %v8063_v2 = vld [vmem:[#allocation15 + $0x18] sm:$0xff] }
 0xb80   :  { %v5836_v35 = vmul.f32 %v5793_v7, %v11081_v23  ;;  %v5821_v27 = vmul.f32 %v8599_v53, %v5804_v28  ;;  %v5814_v23 = vand.u32 2147483647, %v11105_v15  ;;  %vm5826_vm3 = vweird.f32 %v8599_v53  ;;  %v8601_v42 = vpop.eup %8600  ;;  %6123 = vmatpush.bf16.msra.mxu0 %v8066_v16 }
 0xb81   :  { %vm5827_vm6 = vmor %vm5825_vm5, %vm5826_vm3 }
 0xb82   :  { %v11133_v21 = vadd.f32 %v5838_v62, %v5836_v35  ;;  %v5822_v32 = vsub.f32 1.0, %v5821_v27  ;;  %vm5815_vm7 = vcmp.eq.f32.partialorder %v5814_v23, 8.507059e+37  ;;  %v11526_v62 = vld [vmem:[#allocation76_spill] sm:$0xff]  ;;  %v11527_v35 = vld [vmem:[#allocation77_spill] sm:$0xff] }
 0xb83   :  { %v5818_v39 = vsel %vm5815_vm7, %v5817_v18, %v5813_v48  ;;  %v4136_v7 = vadd.f32 %v11526_v62, %v11509_v40 }
 0xb84   :  { %8602 = vtanh.f32 %v11133_v21  ;;  %v5823_v44 = vmul.f32 %v8599_v53, %v5822_v32  ;;  %v5843_v33 = vmul.f32 %v8601_v42, %v5818_v39  ;;  %6124 = vmatpush.bf16.msra.mxu0 %v8065_v5  ;;  %v8062_v32 = vld [vmem:[#allocation15 + $0x10] sm:$0xff] }
 0xb86   :  { %v5824_v55 = vadd.f32 %v8599_v53, %v5823_v44 }
 0xb88   :  { %v5828_v36 = vsel %vm5827_vm6, %v8599_v53, %v5824_v55  ;;  %6125 = vmatpush.bf16.msra.mxu0 %v8064_v30  ;;  %v4187_v53 = vadd.f32 %v11527_v35, %v11505_v25  ;;  %v8061_v55 = vld [vmem:[#allocation15 + $0x8] sm:$0xff]  ;;  %v11528_v25 = vld [vmem:[#allocation79_spill] sm:$0xff] }
 0xb89   :  { %v5833_v37 = vsel %vm5830_vm8, %v5832_v56, %v5828_v36  ;;  %v4138_v56 = vadd.f32 %v11528_v25, %v11509_v40 }
 0xb8a   :  { %v8603_v22 = vpop.eup %8602 }
 0xb8b   :  { %v5844_v15 = vmul.f32 %v8603_v22, %v5833_v37 }
 0xb8c   :  { %6126 = vmatpush.bf16.msra.mxu0 %v8063_v2 }
 0xb8d   :  { %v5845_v26 = vpack.c.bf16 %v5844_v15, %v5843_v33 }
 0xb8f   :  { %5854 = vmatmul.bf16.vlgmr.msrb.gmra.mxu0 %v5845_v26  ;;  %5868 = vmatmul.bf16.vlgmr.msra.gmra.mxu1 %v5845_v26 }
 0xb90   :  { %5882 = vmatmul.bf16.vlgmr.msrb.gmra.mxu2 %v5845_v26  ;;  %5896 = vmatmul.bf16.vlgmr.msrb.gmra.mxu3 %v5845_v26 }
 0xb91   :  { %6127 = vmatpush.bf16.msra.mxu0 %v8062_v32 }
 0xb95   :  { %6128 = vmatpush.bf16.msra.mxu0 %v8061_v55 }
 0xc0c   :  { %v5855_v17 = vpop.f32.mrf.mxu0  ;;  %v5869_v0 = vpop.f32.mrf.mxu1 }
 0xc0d   :  { %v5910_v45 = vadd.f32 %v5855_v17, %v4038_v9  ;;  %v5911_v1 = vadd.f32 %v5869_v0, %v4087_v6  ;;  %v8060_v9 = vld [vmem:[#allocation15] sm:$0xff] }
 0xc0e   :  { %6129 = vmatpush.bf16.msra.mxu0 %v8060_v9 }
 0xc0f   :  { %v7680_v29 = vmul.f32 -1.442695, %v5910_v45  ;;  %v7682_v47 = vmul.f32 -1.442695, %v5911_v1 }
 0xc11   :  { %8604 = vpow2.f32 %v7680_v29 }
 0xc12   :  { %8606 = vpow2.f32 %v7682_v47 }
 0xc13   :  { %v5897_v61 = vpop.f32.mrf.mxu3  ;;  %v5883_v14 = vpop.f32.mrf.mxu2 }
 0xc14   :  { %v5913_v58 = vadd.f32 %v5897_v61, %v4185_v3  ;;  %v5857_v28 = vpop.f32.mrf.mxu0  ;;  %v5871_v8 = vpop.f32.mrf.mxu1  ;;  %v5912_v41 = vadd.f32 %v5883_v14, %v4136_v7 }
 0xc15   :  { %v5914_v63 = vadd.f32 %v5857_v28, %v4040_v38  ;;  %v5915_v50 = vadd.f32 %v5871_v8, %v4089_v13 }
 0xc16   :  { %v7684_v20 = vmul.f32 -1.442695, %v5913_v58 }
 0xc17   :  { %v8605_v60 = vpop.eup %8604  ;;  %v7681_v24 = vmul.f32 -1.442695, %v5914_v63  ;;  %v7683_v11 = vmul.f32 -1.442695, %v5915_v50 }
 0xc18   :  { %v8607_v54 = vpop.eup %8606  ;;  %v11153_v4 = vadd.f32 1.0, %v8605_v60  ;;  %8608 = vpow2.f32 %v7684_v20 }
 0xc19   :  { %v5962_v10 = vadd.f32 1.0, %v8607_v54  ;;  %8610 = vpow2.f32 %v7681_v24 }
 0xc1a   :  { %8612 = vrcp.f32 %v11153_v4  ;;  %v5935_v26 = vand.u32 2147483647, %v11153_v4  ;;  %v5937_v52 = vand.u32 2147483648, %v11153_v4  ;;  %vm5931_vm11 = vweird.f32 %v11153_v4 }
 0xc1b   :  { %8614 = vrcp.f32 %v5962_v10  ;;  %v5899_v49 = vpop.f32.mrf.mxu3  ;;  %v5975_v15 = vand.u32 2147483648, %v5962_v10  ;;  %v5885_v31 = vpop.f32.mrf.mxu2  ;;  %v5973_v40 = vand.u32 2147483647, %v5962_v10  ;;  %vm5969_vm12 = vweird.f32 %v5962_v10 }
 0xc1c   :  { %8616 = vpow2.f32 %v7683_v11  ;;  %v5917_v23 = vadd.f32 %v5899_v49, %v4187_v53  ;;  %v5916_v45 = vadd.f32 %v5885_v31, %v4138_v56  ;;  %v5938_v16 = vor.u32 1.1754944e-38, %v5937_v52 }
 0xc1d   :  { %v5976_v3 = vor.u32 1.1754944e-38, %v5975_v15  ;;  %vm5936_vm15 = vcmp.eq.f32.partialorder %v5935_v26, 8.507059e+37  ;;  %vm5974_vm0 = vcmp.eq.f32.partialorder %v5973_v40, 8.507059e+37 }
 0xc1e   :  { %v8609_v27 = vpop.eup %8608  ;;  %v7685_v37 = vmul.f32 -1.442695, %v5917_v23 }
 0xc1f   :  { %v8611_v51 = vpop.eup %8610  ;;  %v11160_v12 = vadd.f32 1.0, %v8609_v27 }
 0xc20   :  { %v8613_v44 = vpop.eup %8612  ;;  %v11162_v59 = vadd.f32 1.0, %v8611_v51 }
 0xc21   :  { %v8615_v48 = vpop.eup %8614  ;;  %v5927_v42 = vmul.f32 %v8613_v44, %v11153_v4  ;;  %8618 = vrcp.f32 %v11160_v12  ;;  %vm5932_vm9 = vweird.f32 %v8613_v44  ;;  %v6015_v8 = vand.u32 2147483648, %v11160_v12 }
 0xc22   :  { %v8617_v18 = vpop.eup %8616  ;;  %v5965_v22 = vmul.f32 %v8615_v48, %v5962_v10  ;;  %8620 = vtanh.f32 %v5912_v41  ;;  %vm5970_vm10 = vweird.f32 %v8615_v48  ;;  %vm5933_vm13 = vmor %vm5931_vm11, %vm5932_vm9  ;;  %vm5946_vm1 = vweird.f32 %v11162_v59 }
 0xc23   :  { %v5928_v36 = vsub.f32 1.0, %v5927_v42  ;;  %8622 = vrcp.f32 %v11162_v59  ;;  %v11169_v39 = vadd.f32 1.0, %v8617_v18  ;;  %vm5971_vm14 = vmor %vm5969_vm12, %vm5970_vm10  ;;  %v5950_v54 = vand.u32 2147483647, %v11162_v59 }
 0xc24   :  { %v5966_v33 = vsub.f32 1.0, %v5965_v22  ;;  %v5952_v4 = vand.u32 2147483648, %v11162_v59  ;;  %vm6009_vm5 = vweird.f32 %v11160_v12  ;;  %v6013_v53 = vand.u32 2147483647, %v11160_v12 }
 0xc25   :  { %v5929_v43 = vmul.f32 %v8613_v44, %v5928_v36  ;;  %8624 = vrcp.f32 %v11169_v39  ;;  %v5990_v24 = vand.u32 2147483648, %v11169_v39  ;;  %v5988_v2 = vand.u32 2147483647, %v11169_v39 }
 0xc26   :  { %v5967_v6 = vmul.f32 %v8615_v48, %v5966_v33  ;;  %8626 = vpow2.f32 %v7685_v37  ;;  %v5953_v27 = vor.u32 1.1754944e-38, %v5952_v4  ;;  %vm5984_vm8 = vweird.f32 %v11169_v39 }
 0xc27   :  { %v11174_v17 = vpop.eup %8618  ;;  %v5930_v0 = vadd.f32 %v8613_v44, %v5929_v43  ;;  %8628 = vtanh.f32 %v5916_v45  ;;  %vm5951_vm9 = vcmp.eq.f32.partialorder %v5950_v54, 8.507059e+37  ;;  %v5991_v23 = vor.u32 1.1754944e-38, %v5990_v24 }
 0xc28   :  { %v8621_v1 = vpop.eup %8620  ;;  %v5968_v29 = vadd.f32 %v8615_v48, %v5967_v6  ;;  %v6005_v47 = vmul.f32 %v11174_v17, %v11160_v12  ;;  %vm6010_vm3 = vweird.f32 %v11174_v17  ;;  %vm5989_vm11 = vcmp.eq.f32.partialorder %v5988_v2, 8.507059e+37 }
 0xc29   :  { %v8623_v34 = vpop.eup %8622  ;;  %v5934_v5 = vsel %vm5933_vm13, %v8613_v44, %v5930_v0  ;;  %vm11195_vm7 = vmor %vm6009_vm5, %vm6010_vm3  ;;  %vm6014_vm12 = vcmp.eq.f32.partialorder %v6013_v53, 8.507059e+37  ;;  %v8123_v0 = vld [vmem:[%s11216_s6] ss:$0 sm:$0xff]  ;;  %s8833_s6 = smov [#allocation17]  }
 0xc2a   :  { %v5939_v46 = vsel %vm5936_vm15, %v5938_v16, %v5934_v5  ;;  %v5972_v38 = vsel %vm5971_vm14, %v8615_v48, %v5968_v29  ;;  %v6006_v57 = vsub.f32 1.0, %v6005_v47  ;;  %v5942_v13 = vmul.f32 %v8623_v34, %v11162_v59  ;;  %s6180_s8 = sshll.u32 %s8833_s6, 4  ;;  %s6181_s8 = int_to_ptr.vmem [resolvable:$true] %s6180_s8 }
 0xc2b   :  { %v8625_v61 = vpop.eup %8624  ;;  %v5977_v58 = vsel %vm5974_vm0, %v5976_v3, %v5972_v38  ;;  %v6036_v28 = vmul.f32 %v8621_v1, %v5939_v46  ;;  %vm5947_vm2 = vweird.f32 %v8623_v34  ;;  %v6016_v59 = vor.u32 1.1754944e-38, %v6015_v8 }
 0xc2c   :  { %v6034_v63 = vmul.f32 %v5977_v58, %v11125_v19  ;;  %v6007_v50 = vmul.f32 %v11174_v17, %v6006_v57  ;;  %v5943_v20 = vsub.f32 1.0, %v5942_v13  ;;  %v5980_v30 = vmul.f32 %v8625_v61, %v11169_v39  ;;  %v8627_v60 = vpop.eup %8626  ;;  %vm5948_vm6 = vmor %vm5946_vm1, %vm5947_vm2 }
 0xc2d   :  { %v6003_v62 = vadd.f32 1.0, %v8627_v60  ;;  %vm5985_vm4 = vweird.f32 %v8625_v61  ;;  %v8629_v35 = vpop.eup %8628 }
 0xc2e   :  { %v6038_v11 = vadd.f32 %v6036_v28, %v6034_v63  ;;  %v5981_v10 = vsub.f32 1.0, %v5980_v30  ;;  %v5944_v14 = vmul.f32 %v8623_v34, %v5943_v20  ;;  %v6008_v19 = vadd.f32 %v11174_v17, %v6007_v50  ;;  %vm5986_vm10 = vmor %vm5984_vm8, %vm5985_vm4 }
 0xc2f   :  { %v6030_v15 = vand.u32 2147483648, %v6003_v62  ;;  %v6028_v52 = vand.u32 2147483647, %v6003_v62  ;;  %vm6024_vm14 = vweird.f32 %v6003_v62 }
 0xc30   :  { %8630 = vtanh.f32 %v6038_v11  ;;  %v5982_v7 = vmul.f32 %v8625_v61, %v5981_v10  ;;  %v5945_v49 = vadd.f32 %v8623_v34, %v5944_v14  ;;  %v6012_v12 = vsel %vm11195_vm7, %v11174_v17, %v6008_v19 }
 0xc31   :  { %8632 = vrcp.f32 %v6003_v62  ;;  %v6017_v56 = vsel %vm6014_vm12, %v6016_v59, %v6012_v12  ;;  %v6031_v9 = vor.u32 1.1754944e-38, %v6030_v15  ;;  %vm6029_vm0 = vcmp.eq.f32.partialorder %v6028_v52, 8.507059e+37 }
 0xc32   :  { %v5949_v32 = vsel %vm5948_vm6, %v8623_v34, %v5945_v49  ;;  %v5983_v51 = vadd.f32 %v8625_v61, %v5982_v7 }
 0xc33   :  { %v5954_v44 = vsel %vm5951_vm9, %v5953_v27, %v5949_v32 }
 0xc34   :  { %v5987_v55 = vsel %vm5986_vm10, %v8625_v61, %v5983_v51  ;;  %v6037_v48 = vmul.f32 %v8629_v35, %v5954_v44 }
 0xc35   :  { %v5992_v42 = vsel %vm5989_vm11, %v5991_v23, %v5987_v55 }
 0xc36   :  { %v8631_v18 = vpop.eup %8630  ;;  %v6035_v25 = vmul.f32 %v5992_v42, %v11133_v21 }
 0xc37   :  { %v8633_v22 = vpop.eup %8632  ;;  %v6042_v36 = vmul.f32 %v8631_v18, %v6017_v56 }
 0xc38   :  { %v6039_v39 = vadd.f32 %v6037_v48, %v6035_v25  ;;  %v6020_v37 = vmul.f32 %v8633_v22, %v6003_v62  ;;  %vm6025_vm13 = vweird.f32 %v8633_v22 }
 0xc39   :  { %vm6026_vm15 = vmor %vm6024_vm14, %vm6025_vm13 }
 0xc3a   :  { %8634 = vtanh.f32 %v6039_v39  ;;  %v6021_v33 = vsub.f32 1.0, %v6020_v37 }
 0xc3c   :  { %v6022_v26 = vmul.f32 %v8633_v22, %v6021_v33 }
 0xc3e   :  { %v6023_v31 = vadd.f32 %v8633_v22, %v6022_v26 }
 0xc40   :  { %v8635_v43 = vpop.eup %8634  ;;  %v6027_v40 = vsel %vm6026_vm15, %v8633_v22, %v6023_v31 }
 0xc41   :  { %v6032_v6 = vsel %vm6029_vm0, %v6031_v9, %v6027_v40 }
 0xc42   :  { %v6043_v21 = vmul.f32 %v8635_v43, %v6032_v6 }
 0xc44   :  { %v6053_v17 = vpack.c.bf16 %v6043_v21, %v6042_v36 }
 0xc46   :  { %6130 = vmatmul.bf16.vlgmr.msra.gmra.mxu0 %v6053_v17 }
 0xcc3   :  { %v6131_v45 = vpop.f32.mrf.mxu0 }
 0xcc4   :  { %v6132_v1 = vadd.f32 %v8123_v0, %v6131_v45 }
 0xcc6   :  { %v7718_v16 = vmul.f32 -1.442695, %v6132_v1 }
 0xcc8   :  { %8636 = vpow2.f32 %v7718_v16 }
 0xccb   :  { %v6133_v29 = vpop.f32.mrf.mxu0 }
 0xccc   :  { %v6134_v47 = vadd.f32 %v8123_v0, %v6133_v29 }
 0xcce   :  { %v8637_v34 = vpop.eup %8636  ;;  %v7719_v3 = vmul.f32 -1.442695, %v6134_v47 }
 0xccf   :  { %v6142_v5 = vadd.f32 1.0, %v8637_v34 }
 0xcd0   :  { %8638 = vpow2.f32 %v7719_v3 }
 0xcd1   :  { %8640 = vrcp.f32 %v6142_v5  ;;  %v6155_v58 = vand.u32 2147483648, %v6142_v5  ;;  %v6153_v8 = vand.u32 2147483647, %v6142_v5  ;;  %vm6149_vm2 = vweird.f32 %v6142_v5 }
 0xcd3   :  { %v6156_v20 = vor.u32 1.1754944e-38, %v6155_v58  ;;  %vm6154_vm4 = vcmp.eq.f32.partialorder %v6153_v8, 8.507059e+37 }
 0xcd6   :  { %v8639_v46 = vpop.eup %8638 }
 0xcd7   :  { %v8641_v38 = vpop.eup %8640  ;;  %v6143_v57 = vadd.f32 1.0, %v8639_v46 }
 0xcd8   :  { %v6145_v13 = vmul.f32 %v8641_v38, %v6142_v5  ;;  %vm6150_vm1 = vweird.f32 %v8641_v38 }
 0xcd9   :  { %8642 = vrcp.f32 %v6143_v57  ;;  %vm6151_vm3 = vmor %vm6149_vm2, %vm6150_vm1  ;;  %v6170_v4 = vand.u32 2147483648, %v6143_v57  ;;  %v6168_v10 = vand.u32 2147483647, %v6143_v57  ;;  %vm6164_vm6 = vweird.f32 %v6143_v57 }
 0xcda   :  { %v6146_v61 = vsub.f32 1.0, %v6145_v13 }
 0xcdb   :  { %v6171_v19 = vor.u32 1.1754944e-38, %v6170_v4  ;;  %vm6169_vm8 = vcmp.eq.f32.partialorder %v6168_v10, 8.507059e+37 }
 0xcdc   :  { %v6147_v28 = vmul.f32 %v8641_v38, %v6146_v61 }
 0xcde   :  { %v6148_v63 = vadd.f32 %v8641_v38, %v6147_v28 }
 0xcdf   :  { %v8643_v50 = vpop.eup %8642 }
 0xce0   :  { %v6160_v30 = vmul.f32 %v8643_v50, %v6143_v57  ;;  %v6152_v60 = vsel %vm6151_vm3, %v8641_v38, %v6148_v63  ;;  %vm6165_vm5 = vweird.f32 %v8643_v50 }
 0xce1   :  { %v6157_v24 = vsel %vm6154_vm4, %v6156_v20, %v6152_v60  ;;  %vm6166_vm7 = vmor %vm6164_vm6, %vm6165_vm5 }
 0xce2   :  { %v6161_v54 = vsub.f32 1.0, %v6160_v30  ;;  %6174 = vst [vmem:[#allocation17] sm:$0xff] %v6157_v24 }
 0xce4   :  { %v6162_v11 = vmul.f32 %v8643_v50, %v6161_v54 }
 0xce6   :  { %v6163_v14 = vadd.f32 %v8643_v50, %v6162_v11 }
 0xce8   :  { %v6167_v2 = vsel %vm6166_vm7, %v8643_v50, %v6163_v14 }
 0xce9   :  { %v6172_v62 = vsel %vm6169_vm8, %v6171_v19, %v6167_v2 }
 0xcea   :  { %6175 = vst [vmem:[#allocation17 + $0x8] sm:$0xff] %v6172_v62 }
 0xceb   :  { %6188 = dma.vmem_to_hbm [thread:$0]  %s6181_s8, 256, %s6183_s11, [#allocation8], %s8834_s12, %s8834_s12, %s8835_s13  }
 0xcec   :  { %8820 = dma.done.wait [#allocation8], 256  }
 0xced   :  { %8821 = vsyncadd [#allocation8], 4294967040 }
 0xcee   :  { %6193 = vsyncpa [#allocation7], 1 }
 0xcef   :  { %6194 = vsyncpa [#allocation10], 1 }
 0xcf0   :  { %6195 = vsyncpa [#allocation13], 1 }
 0xcf1   :  { %6196 = vsyncpa [#allocation16], 1 }
 0xcf2   :  { %6197 = vsyncpa [#allocation8], 1 }

</bundles_post_ra>
